<compile_context>
chip_gen: v5e
topology: v5e:2x2
jax: 0.10.0
libtpu: 0.0.40
codegen_flags: <defaults>
</compile_context>

<pallas_src>
import jax
import jax.numpy as jnp
from jax.experimental import pallas as pl
from jax.experimental.pallas import tpu as pltpu


H_IN, W_IN = 28, 28
H1, W1 = 26, 26           # conv1 output (valid 3x3)
W1P = 32                  # conv1 output width padded 26 -> 32 (sublane multiple)
H2, W2 = 24, 24           # conv2 output
HP, WP = 12, 12           # pooled output
C1, C2 = 32, 64
FC_H, NCLASS = 128, 10
ACT_DTYPE = jnp.bfloat16  # conv->fc activation / fc1 weight stream dtype


# --------------------------------------------------------------------------- #
# Kernel 1: conv1 + ReLU + conv2 + ReLU + maxpool(2), one grid step per image. #
# --------------------------------------------------------------------------- #

def _conv_pool_kernel(p_ref, w1_ref, b1_ref, w2_ref, b2_ref, o_ref, x1_s, y2_s):
    # conv1: one (H1*W1P, 9) x (9, C1) MXU matmul + bias + ReLU (f32 epilogue).
    a1 = jnp.dot(p_ref[...], w1_ref[...], preferred_element_type=jnp.float32)
    a1 = jnp.maximum(a1 + b1_ref[...], 0.0)                    # (832, 32)
    # (832,32) -> (26,32,32): sublane count regroups on a multiple of 8 (tile-aligned).
    x1_s[...] = a1.reshape(H1, W1P, C1)                        # VMEM-resident NHWC tile

    # conv2: direct convolution — 9 shifted windows of x1_s, each a
    # (576, 32) x (32, 64) MXU matmul, accumulated in f32 (no im2col buffer).
    acc = jnp.zeros((H2 * W2, C2), jnp.float32)
    for t in range(9):
        di, dj = t // 3, t % 3
        win = x1_s[di:di + H2, dj:dj + W2, :]                  # (24, 24, 32)
        w2t = w2_ref[t * C1:(t + 1) * C1, :]                   # (32, 64) static slice
        acc = acc + jnp.dot(win.reshape(H2 * W2, C1), w2t,
                            preferred_element_type=jnp.float32)
    acc = jnp.maximum(acc + b2_ref[...], 0.0)                  # (576, 64)

    # 2x2 / stride-2 max pool.
    # H direction: tile-aligned reshape (576,64)->(12,2,24,64) + elementwise max.
    y = acc.reshape(HP, 2, W2, C2)
    hpool = jnp.maximum(y[:, 0], y[:, 1])                      # (12, 24, 64)
    y2_s[...] = hpool
    # W direction: two single-axis strided ref reads (no int indexers mixed in).
    p0 = y2_s[:, pl.ds(0, WP, stride=2), :]                    # even columns (12,12,64)
    p1 = y2_s[:, pl.ds(1, WP, stride=2), :]                    # odd  columns (12,12,64)
    o_ref[...] = jnp.maximum(p0, p1).astype(o_ref.dtype)       # (12, 12, 64), (h, w, c)


def conv_pool(patches, w1m, b1, w2m, b2):
    n = patches.shape[0]
    return pl.pallas_call(
        _conv_pool_kernel,
        out_shape=jax.ShapeDtypeStruct((n, HP, WP, C2), ACT_DTYPE),
        grid_spec=pltpu.PrefetchScalarGridSpec(
            num_scalar_prefetch=0,
            grid=(n,),
            in_specs=[
                pl.BlockSpec((None, H1 * W1P, 9), lambda b: (b, 0, 0)),
                pl.BlockSpec((9, C1), lambda b: (0, 0)),
                pl.BlockSpec((1, C1), lambda b: (0, 0)),
                pl.BlockSpec((9 * C1, C2), lambda b: (0, 0)),
                pl.BlockSpec((1, C2), lambda b: (0, 0)),
            ],
            out_specs=pl.BlockSpec((None, HP, WP, C2), lambda b: (b, 0, 0, 0)),
            scratch_shapes=[
                pltpu.VMEM((H1, W1P, C1), jnp.float32),        # conv1 activations
                pltpu.VMEM((HP, W2, C2), jnp.float32),         # H-pooled conv2 activations
            ],
        ),
        compiler_params=pltpu.CompilerParams(
            dimension_semantics=("parallel",),                 # v7x: 2 TCs split images
            vmem_limit_bytes=32 * 1024 * 1024,
        ),
    )(patches, w1m, b1, w2m, b2)


# --------------------------------------------------------------------------- #
# Kernel 2: fc1 + ReLU + fc2 + log_softmax, K-tiled fc1 weight streaming.      #
# --------------------------------------------------------------------------- #

def _fc_head_kernel(x_ref, w1_ref, b1_ref, w2_ref, b2_ref, o_ref, acc_ref):
    k = pl.program_id(1)

    @pl.when(k == 0)
    def _():
        acc_ref[...] = jnp.zeros_like(acc_ref)

    # bf16 x bf16 MXU matmul, f32 accumulation.
    acc_ref[...] += jnp.dot(x_ref[...], w1_ref[...],
                            preferred_element_type=jnp.float32)

    @pl.when(k == pl.num_programs(1) - 1)
    def _():
        # f32 epilogue (bias, ReLU, fc2, log_softmax) — safe on v5e (no bf16 VPU/EUP).
        h = jnp.maximum(acc_ref[...] + b1_ref[...], 0.0)
        logits = jnp.dot(h, w2_ref[...], preferred_element_type=jnp.float32)
        logits = logits + b2_ref[...]
        m = jnp.max(logits, axis=-1, keepdims=True)
        s = logits - m
        lse = jnp.log(jnp.sum(jnp.exp(s), axis=-1, keepdims=True))
        o_ref[...] = (s - lse).astype(o_ref.dtype)


def fc_head(x, w1, b1, w2, b2, *, tk=2304):
    m, k = x.shape
    k2, h = w1.shape
    _, nclass = w2.shape
    assert k == k2 and k % tk == 0
    return pl.pallas_call(
        _fc_head_kernel,
        out_shape=jax.ShapeDtypeStruct((m, nclass), jnp.float32),
        grid_spec=pltpu.PrefetchScalarGridSpec(
            num_scalar_prefetch=0,
            grid=(1, k // tk),                                 # (M tiles, K tiles)
            in_specs=[
                pl.BlockSpec((m, tk), lambda i, kk: (i, kk)),
                pl.BlockSpec((tk, h), lambda i, kk: (kk, 0)),
                pl.BlockSpec((1, h), lambda i, kk: (0, 0)),
                pl.BlockSpec((h, nclass), lambda i, kk: (0, 0)),
                pl.BlockSpec((1, nclass), lambda i, kk: (0, 0)),
            ],
            out_specs=pl.BlockSpec((m, nclass), lambda i, kk: (i, 0)),
            scratch_shapes=[pltpu.VMEM((m, h), jnp.float32)],
        ),
        compiler_params=pltpu.CompilerParams(
            dimension_semantics=("parallel", "arbitrary"),
            vmem_limit_bytes=32 * 1024 * 1024,
        ),
    )(x, w1, b1, w2, b2)


# ------------------------------- glue (JAX) -------------------------------- #

def prepare_params(p):
    """One-time weight layout prep (hoisted out of the hot path)."""
    w1m = jnp.transpose(p["conv1_w"], (2, 3, 1, 0)).reshape(9, C1).astype(jnp.float32)
    b1 = p["conv1_b"].reshape(1, C1).astype(jnp.float32)
    # conv2 weights laid out as (tap*Cin, Cout) so the kernel uses static row slices.
    w2m = jnp.transpose(p["conv2_w"], (2, 3, 1, 0)).reshape(9 * C1, C2).astype(jnp.float32)
    b2 = p["conv2_b"].reshape(1, C2).astype(jnp.float32)
    # fc1 rows permuted from torch's (c, h, w) flatten order to the kernel's (h, w, c)
    # pooled layout, so the forward needs no activation transpose; stored bf16.
    w1fc = p["fc1_w"].reshape(FC_H, C2, HP, WP)
    w1fc = jnp.transpose(w1fc, (2, 3, 1, 0)).reshape(HP * WP * C2, FC_H).astype(ACT_DTYPE)
    b1fc = p["fc1_b"].reshape(1, FC_H).astype(jnp.float32)
    w2fc = jnp.transpose(p["fc2_w"], (1, 0)).astype(jnp.float32)   # (128, 10)
    b2fc = p["fc2_b"].reshape(1, NCLASS).astype(jnp.float32)
    return dict(w1m=w1m, b1=b1, w2m=w2m, b2=b2,
                w1fc=w1fc, b1fc=b1fc, w2fc=w2fc, b2fc=b2fc)


def _conv1_patches(x_nchw):
    # 3x3 patch gather for the 1-channel input (~30 KB/image), width-padded 26->32 so
    # in-kernel reshapes stay layout-preserving.  Conv2's im2col is NOT materialized.
    x = x_nchw[:, 0].astype(jnp.float32)                       # (N, 28, 28)
    n = x.shape[0]
    taps = []
    for di in range(3):
        for dj in range(3):
            w = x[:, di:di + H1, dj:dj + W1]                   # (N, 26, 26)
            w = jnp.pad(w, ((0, 0), (0, 0), (0, W1P - W1)))    # (N, 26, 32)
            taps.append(w.reshape(n, H1 * W1P))
    return jnp.stack(taps, axis=-1)                            # (N, 832, 9)


def net_forward(x_nchw, pp):
    n = x_nchw.shape[0]
    patches = _conv1_patches(x_nchw)
    pooled = conv_pool(patches, pp["w1m"], pp["b1"], pp["w2m"], pp["b2"])  # (N,12,12,64)
    # dropout1 / dropout2: identity at inference time.
    flat = pooled.reshape(n, HP * WP * C2)       # (h, w, c) order; free row-major reshape
    return fc_head(flat, pp["w1fc"], pp["b1fc"], pp["w2fc"], pp["b2fc"])   # (N, 10)


# ------------------------------ reference ---------------------------------- #

def reference_forward(x_nchw, p):
    hp = jax.lax.Precision.HIGHEST
    dn = ("NCHW", "OIHW", "NCHW")
    y = jax.lax.conv_general_dilated(x_nchw, p["conv1_w"], (1, 1), "VALID",
                                     dimension_numbers=dn, precision=hp)
    y = jnp.maximum(y + p["conv1_b"][None, :, None, None], 0.0)
    y = jax.lax.conv_general_dilated(y, p["conv2_w"], (1, 1), "VALID",
                                     dimension_numbers=dn, precision=hp)
    y = jnp.maximum(y + p["conv2_b"][None, :, None, None], 0.0)
    n, c, h, w = y.shape
    y = y.reshape(n, c, h // 2, 2, w // 2, 2).max(axis=(3, 5))
    y = y.reshape(n, -1)
    y = jnp.maximum(jnp.dot(y, p["fc1_w"].T, precision=hp) + p["fc1_b"], 0.0)
    y = jnp.dot(y, p["fc2_w"].T, precision=hp) + p["fc2_b"]
    return jax.nn.log_softmax(y, axis=1)


# --------------------------------- main ------------------------------------ #

if __name__ == "__main__":
    key = jax.random.PRNGKey(0)
    ks = jax.random.split(key, 9)
    params = {
        "conv1_w": 0.10 * jax.random.normal(ks[0], (32, 1, 3, 3), jnp.float32),
        "conv1_b": 0.10 * jax.random.normal(ks[1], (32,), jnp.float32),
        "conv2_w": 0.05 * jax.random.normal(ks[2], (64, 32, 3, 3), jnp.float32),
        "conv2_b": 0.05 * jax.random.normal(ks[3], (64,), jnp.float32),
        "fc1_w":   0.02 * jax.random.normal(ks[4], (128, 9216), jnp.float32),
        "fc1_b":   0.02 * jax.random.normal(ks[5], (128,), jnp.float32),
        "fc2_w":   0.05 * jax.random.normal(ks[6], (10, 128), jnp.float32),
        "fc2_b":   0.05 * jax.random.normal(ks[7], (10,), jnp.float32),
    }
    # fc1 expects 9216 = 64 * 12 * 12 features -> MNIST-shaped 28x28 single-channel input.
    x = jax.random.normal(ks[8], (2, 1, 28, 28), jnp.float32)

    prepped = jax.tree_util.tree_map(jax.block_until_ready, prepare_params(params))
    fwd = jax.jit(net_forward)

    out = jax.block_until_ready(fwd(x, prepped))
    assert out.shape == (2, 10)

    # NOTE: kernel uses bf16 fc1 weights / activations and default MXU precision, while
    # the reference is f32 Precision.HIGHEST; the 5e-2 tolerance covers that drift.
    ref = jax.block_until_ready(reference_forward(x, params))
    if not bool(jnp.allclose(out, ref, atol=5e-2, rtol=5e-2)):
        raise AssertionError(
            f"mismatch vs reference: max abs diff {float(jnp.max(jnp.abs(out - ref)))}")

    print("KERNEL_OK")
</pallas_src>

<mosaic_0001>
module attributes {stable_mosaic.version = 11 : i64} {
  func.func @_conv_pool_kernel(%arg0: i32, %arg1: memref<1x832x9xf32, #tpu.memory_space<vmem>>, %arg2: memref<9x32xf32, #tpu.memory_space<vmem>>, %arg3: memref<1x32xf32, #tpu.memory_space<vmem>>, %arg4: memref<288x64xf32, #tpu.memory_space<vmem>>, %arg5: memref<1x64xf32, #tpu.memory_space<vmem>>, %arg6: memref<1x12x12x64xbf16, #tpu.memory_space<vmem>>, %arg7: memref<26x32x32xf32, #tpu.memory_space<vmem>>, %arg8: memref<12x24x64xf32, #tpu.memory_space<vmem>>) attributes {dimension_semantics = [#tpu.dimension_semantics<parallel>], iteration_bounds = array<i64: 2>, scalar_prefetch = 0 : i64, scratch_operands = 2 : i64, tpu.core_type = #tpu.core_type<tc>, window_params = [{transform_indices = @transform_0, window_bounds = array<i64: 1, 832, 9>}, {pipeline_mode = #tpu.pipeline_mode<synchronous>, transform_indices = @transform_1, window_bounds = array<i64: 9, 32>}, {pipeline_mode = #tpu.pipeline_mode<synchronous>, transform_indices = @transform_2, window_bounds = array<i64: 1, 32>}, {pipeline_mode = #tpu.pipeline_mode<synchronous>, transform_indices = @transform_3, window_bounds = array<i64: 288, 64>}, {pipeline_mode = #tpu.pipeline_mode<synchronous>, transform_indices = @transform_4, window_bounds = array<i64: 1, 64>}, {transform_indices = @transform_5, window_bounds = array<i64: 1, 12, 12, 64>}]} {
    %c0 = arith.constant 0 : index
    %c0_0 = arith.constant 0 : index
    %c0_1 = arith.constant 0 : index
    %0 = vector.load %arg1[%c0, %c0_0, %c0_1] : memref<1x832x9xf32, #tpu.memory_space<vmem>>, vector<1x832x9xf32>
    %1 = vector.shape_cast %0 : vector<1x832x9xf32> to vector<832x9xf32>
    %c0_2 = arith.constant 0 : index
    %c0_3 = arith.constant 0 : index
    %2 = vector.load %arg2[%c0_2, %c0_3] : memref<9x32xf32, #tpu.memory_space<vmem>>, vector<9x32xf32>
    %cst = arith.constant dense<0.000000e+00> : vector<832x32xf32>
    %3 = tpu.matmul %1, %2, %cst {dimension_numbers = #tpu.dot_dimension_numbers<[1], [0], [0], [1], [0, 0, 1, 1], [], []>} : vector<832x9xf32>, vector<9x32xf32>, vector<832x32xf32> -> vector<832x32xf32>
    %c0_4 = arith.constant 0 : index
    %c0_5 = arith.constant 0 : index
    %4 = vector.load %arg3[%c0_4, %c0_5] : memref<1x32xf32, #tpu.memory_space<vmem>>, vector<1x32xf32>
    %5 = vector.broadcast %4 : vector<1x32xf32> to vector<832x32xf32>
    %6 = arith.addf %3, %5 : vector<832x32xf32>
    %cst_6 = arith.constant 0.000000e+00 : f32
    %7 = vector.broadcast %cst_6 : f32 to vector<832x32xf32>
    %8 = arith.maximumf %6, %7 : vector<832x32xf32>
    %9 = vector.shape_cast %8 : vector<832x32xf32> to vector<26x32x32xf32>
    %c0_7 = arith.constant 0 : index
    %c0_8 = arith.constant 0 : index
    %c0_9 = arith.constant 0 : index
    %10 = vector.load %arg7[%c0_7, %c0_8, %c0_9] : memref<26x32x32xf32, #tpu.memory_space<vmem>>, vector<26x32x32xf32>
    tpu.vector_store %arg7[%c0_7, %c0_8, %c0_9], %9 {strides = array<i32>} : memref<26x32x32xf32, #tpu.memory_space<vmem>>, vector<26x32x32xf32>,
    %cst_10 = arith.constant 0.000000e+00 : f32
    %11 = vector.broadcast %cst_10 : f32 to vector<576x64xf32>
    %c0_11 = arith.constant 0 : index
    %c0_12 = arith.constant 0 : index
    %c0_13 = arith.constant 0 : index
    %12 = vector.load %arg7[%c0_11, %c0_12, %c0_13] : memref<26x32x32xf32, #tpu.memory_space<vmem>>, vector<24x24x32xf32>
    %c0_14 = arith.constant 0 : index
    %c0_15 = arith.constant 0 : index
    %13 = vector.load %arg4[%c0_14, %c0_15] : memref<288x64xf32, #tpu.memory_space<vmem>>, vector<32x64xf32>
    %14 = vector.shape_cast %12 : vector<24x24x32xf32> to vector<576x32xf32>
    %cst_16 = arith.constant dense<0.000000e+00> : vector<576x64xf32>
    %15 = tpu.matmul %14, %13, %cst_16 {dimension_numbers = #tpu.dot_dimension_numbers<[1], [0], [0], [1], [0, 0, 1, 1], [], []>} : vector<576x32xf32>, vector<32x64xf32>, vector<576x64xf32> -> vector<576x64xf32>
    %16 = arith.addf %11, %15 : vector<576x64xf32>
    %c0_17 = arith.constant 0 : index
    %c1 = arith.constant 1 : index
    %c0_18 = arith.constant 0 : index
    %17 = vector.load %arg7[%c0_17, %c1, %c0_18] : memref<26x32x32xf32, #tpu.memory_space<vmem>>, vector<24x24x32xf32>
    %c32 = arith.constant 32 : index
    %c0_19 = arith.constant 0 : index
    %18 = vector.load %arg4[%c32, %c0_19] : memref<288x64xf32, #tpu.memory_space<vmem>>, vector<32x64xf32>
    %19 = vector.shape_cast %17 : vector<24x24x32xf32> to vector<576x32xf32>
    %cst_20 = arith.constant dense<0.000000e+00> : vector<576x64xf32>
    %20 = tpu.matmul %19, %18, %cst_20 {dimension_numbers = #tpu.dot_dimension_numbers<[1], [0], [0], [1], [0, 0, 1, 1], [], []>} : vector<576x32xf32>, vector<32x64xf32>, vector<576x64xf32> -> vector<576x64xf32>
    %21 = arith.addf %16, %20 : vector<576x64xf32>
    %c0_21 = arith.constant 0 : index
    %c2 = arith.constant 2 : index
    %c0_22 = arith.constant 0 : index
    %22 = vector.load %arg7[%c0_21, %c2, %c0_22] : memref<26x32x32xf32, #tpu.memory_space<vmem>>, vector<24x24x32xf32>
    %c64 = arith.constant 64 : index
    %c0_23 = arith.constant 0 : index
    %23 = vector.load %arg4[%c64, %c0_23] : memref<288x64xf32, #tpu.memory_space<vmem>>, vector<32x64xf32>
    %24 = vector.shape_cast %22 : vector<24x24x32xf32> to vector<576x32xf32>
    %cst_24 = arith.constant dense<0.000000e+00> : vector<576x64xf32>
    %25 = tpu.matmul %24, %23, %cst_24 {dimension_numbers = #tpu.dot_dimension_numbers<[1], [0], [0], [1], [0, 0, 1, 1], [], []>} : vector<576x32xf32>, vector<32x64xf32>, vector<576x64xf32> -> vector<576x64xf32>
    %26 = arith.addf %21, %25 : vector<576x64xf32>
    %c1_25 = arith.constant 1 : index
    %c0_26 = arith.constant 0 : index
    %c0_27 = arith.constant 0 : index
    %27 = vector.load %arg7[%c1_25, %c0_26, %c0_27] : memref<26x32x32xf32, #tpu.memory_space<vmem>>, vector<24x24x32xf32>
    %c96 = arith.constant 96 : index
    %c0_28 = arith.constant 0 : index
    %28 = vector.load %arg4[%c96, %c0_28] : memref<288x64xf32, #tpu.memory_space<vmem>>, vector<32x64xf32>
    %29 = vector.shape_cast %27 : vector<24x24x32xf32> to vector<576x32xf32>
    %cst_29 = arith.constant dense<0.000000e+00> : vector<576x64xf32>
    %30 = tpu.matmul %29, %28, %cst_29 {dimension_numbers = #tpu.dot_dimension_numbers<[1], [0], [0], [1], [0, 0, 1, 1], [], []>} : vector<576x32xf32>, vector<32x64xf32>, vector<576x64xf32> -> vector<576x64xf32>
    %31 = arith.addf %26, %30 : vector<576x64xf32>
    %c1_30 = arith.constant 1 : index
    %c1_31 = arith.constant 1 : index
    %c0_32 = arith.constant 0 : index
    %32 = vector.load %arg7[%c1_30, %c1_31, %c0_32] : memref<26x32x32xf32, #tpu.memory_space<vmem>>, vector<24x24x32xf32>
    %c128 = arith.constant 128 : index
    %c0_33 = arith.constant 0 : index
    %33 = vector.load %arg4[%c128, %c0_33] : memref<288x64xf32, #tpu.memory_space<vmem>>, vector<32x64xf32>
    %34 = vector.shape_cast %32 : vector<24x24x32xf32> to vector<576x32xf32>
    %cst_34 = arith.constant dense<0.000000e+00> : vector<576x64xf32>
    %35 = tpu.matmul %34, %33, %cst_34 {dimension_numbers = #tpu.dot_dimension_numbers<[1], [0], [0], [1], [0, 0, 1, 1], [], []>} : vector<576x32xf32>, vector<32x64xf32>, vector<576x64xf32> -> vector<576x64xf32>
    %36 = arith.addf %31, %35 : vector<576x64xf32>
    %c1_35 = arith.constant 1 : index
    %c2_36 = arith.constant 2 : index
    %c0_37 = arith.constant 0 : index
    %37 = vector.load %arg7[%c1_35, %c2_36, %c0_37] : memref<26x32x32xf32, #tpu.memory_space<vmem>>, vector<24x24x32xf32>
    %c160 = arith.constant 160 : index
    %c0_38 = arith.constant 0 : index
    %38 = vector.load %arg4[%c160, %c0_38] : memref<288x64xf32, #tpu.memory_space<vmem>>, vector<32x64xf32>
    %39 = vector.shape_cast %37 : vector<24x24x32xf32> to vector<576x32xf32>
    %cst_39 = arith.constant dense<0.000000e+00> : vector<576x64xf32>
    %40 = tpu.matmul %39, %38, %cst_39 {dimension_numbers = #tpu.dot_dimension_numbers<[1], [0], [0], [1], [0, 0, 1, 1], [], []>} : vector<576x32xf32>, vector<32x64xf32>, vector<576x64xf32> -> vector<576x64xf32>
    %41 = arith.addf %36, %40 : vector<576x64xf32>
    %c2_40 = arith.constant 2 : index
    %c0_41 = arith.constant 0 : index
    %c0_42 = arith.constant 0 : index
    %42 = vector.load %arg7[%c2_40, %c0_41, %c0_42] : memref<26x32x32xf32, #tpu.memory_space<vmem>>, vector<24x24x32xf32>
    %c192 = arith.constant 192 : index
    %c0_43 = arith.constant 0 : index
    %43 = vector.load %arg4[%c192, %c0_43] : memref<288x64xf32, #tpu.memory_space<vmem>>, vector<32x64xf32>
    %44 = vector.shape_cast %42 : vector<24x24x32xf32> to vector<576x32xf32>
    %cst_44 = arith.constant dense<0.000000e+00> : vector<576x64xf32>
    %45 = tpu.matmul %44, %43, %cst_44 {dimension_numbers = #tpu.dot_dimension_numbers<[1], [0], [0], [1], [0, 0, 1, 1], [], []>} : vector<576x32xf32>, vector<32x64xf32>, vector<576x64xf32> -> vector<576x64xf32>
    %46 = arith.addf %41, %45 : vector<576x64xf32>
    %c2_45 = arith.constant 2 : index
    %c1_46 = arith.constant 1 : index
    %c0_47 = arith.constant 0 : index
    %47 = vector.load %arg7[%c2_45, %c1_46, %c0_47] : memref<26x32x32xf32, #tpu.memory_space<vmem>>, vector<24x24x32xf32>
    %c224 = arith.constant 224 : index
    %c0_48 = arith.constant 0 : index
    %48 = vector.load %arg4[%c224, %c0_48] : memref<288x64xf32, #tpu.memory_space<vmem>>, vector<32x64xf32>
    %49 = vector.shape_cast %47 : vector<24x24x32xf32> to vector<576x32xf32>
    %cst_49 = arith.constant dense<0.000000e+00> : vector<576x64xf32>
    %50 = tpu.matmul %49, %48, %cst_49 {dimension_numbers = #tpu.dot_dimension_numbers<[1], [0], [0], [1], [0, 0, 1, 1], [], []>} : vector<576x32xf32>, vector<32x64xf32>, vector<576x64xf32> -> vector<576x64xf32>
    %51 = arith.addf %46, %50 : vector<576x64xf32>
    %c2_50 = arith.constant 2 : index
    %c2_51 = arith.constant 2 : index
    %c0_52 = arith.constant 0 : index
    %52 = vector.load %arg7[%c2_50, %c2_51, %c0_52] : memref<26x32x32xf32, #tpu.memory_space<vmem>>, vector<24x24x32xf32>
    %c256 = arith.constant 256 : index
    %c0_53 = arith.constant 0 : index
    %53 = vector.load %arg4[%c256, %c0_53] : memref<288x64xf32, #tpu.memory_space<vmem>>, vector<32x64xf32>
    %54 = vector.shape_cast %52 : vector<24x24x32xf32> to vector<576x32xf32>
    %cst_54 = arith.constant dense<0.000000e+00> : vector<576x64xf32>
    %55 = tpu.matmul %54, %53, %cst_54 {dimension_numbers = #tpu.dot_dimension_numbers<[1], [0], [0], [1], [0, 0, 1, 1], [], []>} : vector<576x32xf32>, vector<32x64xf32>, vector<576x64xf32> -> vector<576x64xf32>
    %56 = arith.addf %51, %55 : vector<576x64xf32>
    %c0_55 = arith.constant 0 : index
    %c0_56 = arith.constant 0 : index
    %57 = vector.load %arg5[%c0_55, %c0_56] : memref<1x64xf32, #tpu.memory_space<vmem>>, vector<1x64xf32>
    %58 = vector.broadcast %57 : vector<1x64xf32> to vector<576x64xf32>
    %59 = arith.addf %56, %58 : vector<576x64xf32>
    %cst_57 = arith.constant 0.000000e+00 : f32
    %60 = vector.broadcast %cst_57 : f32 to vector<576x64xf32>
    %61 = arith.maximumf %59, %60 : vector<576x64xf32>
    %62 = vector.shape_cast %61 : vector<576x64xf32> to vector<12x2x24x64xf32>
    %63 = vector.extract_strided_slice %62 {offsets = [0, 0, 0, 0], sizes = [12, 1, 24, 64], strides = [1, 1, 1, 1]} : vector<12x2x24x64xf32> to vector<12x1x24x64xf32>
    %64 = vector.shape_cast %63 : vector<12x1x24x64xf32> to vector<12x24x64xf32>
    %65 = vector.extract_strided_slice %62 {offsets = [0, 1, 0, 0], sizes = [12, 1, 24, 64], strides = [1, 1, 1, 1]} : vector<12x2x24x64xf32> to vector<12x1x24x64xf32>
    %66 = vector.shape_cast %65 : vector<12x1x24x64xf32> to vector<12x24x64xf32>
    %67 = arith.maximumf %64, %66 : vector<12x24x64xf32>
    %c0_58 = arith.constant 0 : index
    %c0_59 = arith.constant 0 : index
    %c0_60 = arith.constant 0 : index
    %68 = vector.load %arg8[%c0_58, %c0_59, %c0_60] : memref<12x24x64xf32, #tpu.memory_space<vmem>>, vector<12x24x64xf32>
    tpu.vector_store %arg8[%c0_58, %c0_59, %c0_60], %67 {strides = array<i32>} : memref<12x24x64xf32, #tpu.memory_space<vmem>>, vector<12x24x64xf32>,
    %c0_61 = arith.constant 0 : index
    %c0_62 = arith.constant 0 : index
    %c0_63 = arith.constant 0 : index
    %69 = tpu.strided_load %arg8[%c0_61, %c0_62, %c0_63] {strides = array<i32: 1, 2, 1>} : memref<12x24x64xf32, #tpu.memory_space<vmem>>, vector<12x12x64xf32>
    %c0_64 = arith.constant 0 : index
    %c1_65 = arith.constant 1 : index
    %c0_66 = arith.constant 0 : index
    %70 = tpu.strided_load %arg8[%c0_64, %c1_65, %c0_66] {strides = array<i32: 1, 2, 1>} : memref<12x24x64xf32, #tpu.memory_space<vmem>>, vector<12x12x64xf32>
    %71 = arith.maximumf %69, %70 : vector<12x12x64xf32>
    %72 = arith.truncf %71 : vector<12x12x64xf32> to vector<12x12x64xbf16>
    %c0_67 = arith.constant 0 : index
    %c0_68 = arith.constant 0 : index
    %c0_69 = arith.constant 0 : index
    %c0_70 = arith.constant 0 : index
    %73 = vector.load %arg6[%c0_67, %c0_68, %c0_69, %c0_70] : memref<1x12x12x64xbf16, #tpu.memory_space<vmem>>, vector<1x12x12x64xbf16>
    %74 = vector.shape_cast %73 : vector<1x12x12x64xbf16> to vector<12x12x64xbf16>
    %75 = vector.shape_cast %72 : vector<12x12x64xbf16> to vector<1x12x12x64xbf16>
    tpu.vector_store %arg6[%c0_67, %c0_68, %c0_69, %c0_70], %75 {strides = array<i32>} : memref<1x12x12x64xbf16, #tpu.memory_space<vmem>>, vector<1x12x12x64xbf16>,
    return
  }
  func.func @transform_0(%arg0: i32) -> (i32, i32, i32) {
    %c0_i32 = arith.constant 0 : i32
    %c0_i32_0 = arith.constant 0 : i32
    %c0_i32_1 = arith.constant 0 : i32
    return %arg0, %c0_i32, %c0_i32_0 : i32, i32, i32
  }
  func.func @transform_1(%arg0: i32) -> (i32, i32) {
    %c0_i32 = arith.constant 0 : i32
    %c0_i32_0 = arith.constant 0 : i32
    %c0_i32_1 = arith.constant 0 : i32
    return %c0_i32, %c0_i32_0 : i32, i32
  }
  func.func @transform_2(%arg0: i32) -> (i32, i32) {
    %c0_i32 = arith.constant 0 : i32
    %c0_i32_0 = arith.constant 0 : i32
    %c0_i32_1 = arith.constant 0 : i32
    return %c0_i32, %c0_i32_0 : i32, i32
  }
  func.func @transform_3(%arg0: i32) -> (i32, i32) {
    %c0_i32 = arith.constant 0 : i32
    %c0_i32_0 = arith.constant 0 : i32
    %c0_i32_1 = arith.constant 0 : i32
    return %c0_i32, %c0_i32_0 : i32, i32
  }
  func.func @transform_4(%arg0: i32) -> (i32, i32) {
    %c0_i32 = arith.constant 0 : i32
    %c0_i32_0 = arith.constant 0 : i32
    %c0_i32_1 = arith.constant 0 : i32
    return %c0_i32, %c0_i32_0 : i32, i32
  }
  func.func @transform_5(%arg0: i32) -> (i32, i32, i32, i32) {
    %c0_i32 = arith.constant 0 : i32
    %c0_i32_0 = arith.constant 0 : i32
    %c0_i32_1 = arith.constant 0 : i32
    %c0_i32_2 = arith.constant 0 : i32
    return %arg0, %c0_i32, %c0_i32_0, %c0_i32_1 : i32, i32, i32, i32
  }
}

module attributes {stable_mosaic.version = 11 : i64} {
  func.func @_fc_head_kernel(%arg0: i32, %arg1: i32, %arg2: memref<2x2304xbf16, #tpu.memory_space<vmem>>, %arg3: memref<2304x128xbf16, #tpu.memory_space<vmem>>, %arg4: memref<1x128xf32, #tpu.memory_space<vmem>>, %arg5: memref<128x10xf32, #tpu.memory_space<vmem>>, %arg6: memref<1x10xf32, #tpu.memory_space<vmem>>, %arg7: memref<2x10xf32, #tpu.memory_space<vmem>>, %arg8: memref<2x128xf32, #tpu.memory_space<vmem>>) attributes {dimension_semantics = [#tpu.dimension_semantics<parallel>, #tpu.dimension_semantics<arbitrary>], iteration_bounds = array<i64: 1, 4>, scalar_prefetch = 0 : i64, scratch_operands = 1 : i64, tpu.core_type = #tpu.core_type<tc>, window_params = [{transform_indices = @transform_0, window_bounds = array<i64: 2, 2304>}, {transform_indices = @transform_1, window_bounds = array<i64: 2304, 128>}, {pipeline_mode = #tpu.pipeline_mode<synchronous>, transform_indices = @transform_2, window_bounds = array<i64: 1, 128>}, {pipeline_mode = #tpu.pipeline_mode<synchronous>, transform_indices = @transform_3, window_bounds = array<i64: 128, 10>}, {pipeline_mode = #tpu.pipeline_mode<synchronous>, transform_indices = @transform_4, window_bounds = array<i64: 1, 10>}, {transform_indices = @transform_5, window_bounds = array<i64: 2, 10>}]} {
    %c0_i32 = arith.constant 0 : i32
    %0 = arith.cmpi eq, %arg1, %c0_i32 : i32
    %1 = arith.extui %0 : i1 to i32
    %c0_i32_0 = arith.constant 0 : i32
    %2 = arith.cmpi ne, %1, %c0_i32_0 : i32
    scf.if %2 {
      %cst_9 = arith.constant 0.000000e+00 : f32
      %12 = vector.broadcast %cst_9 : f32 to vector<2x128xf32>
      %c0_10 = arith.constant 0 : index
      %c0_11 = arith.constant 0 : index
      %13 = vector.load %arg8[%c0_10, %c0_11] : memref<2x128xf32, #tpu.memory_space<vmem>>, vector<2x128xf32>
      tpu.vector_store %arg8[%c0_10, %c0_11], %12 {strides = array<i32>} : memref<2x128xf32, #tpu.memory_space<vmem>>, vector<2x128xf32>,
    } else {
    }
    %c0 = arith.constant 0 : index
    %c0_1 = arith.constant 0 : index
    %3 = vector.load %arg8[%c0, %c0_1] : memref<2x128xf32, #tpu.memory_space<vmem>>, vector<2x128xf32>
    %c0_2 = arith.constant 0 : index
    %c0_3 = arith.constant 0 : index
    %4 = vector.load %arg2[%c0_2, %c0_3] : memref<2x2304xbf16, #tpu.memory_space<vmem>>, vector<2x2304xbf16>
    %c0_4 = arith.constant 0 : index
    %c0_5 = arith.constant 0 : index
    %5 = vector.load %arg3[%c0_4, %c0_5] : memref<2304x128xbf16, #tpu.memory_space<vmem>>, vector<2304x128xbf16>
    %cst = arith.constant dense<0.000000e+00> : vector<2x128xf32>
    %6 = tpu.matmul %4, %5, %cst {dimension_numbers = #tpu.dot_dimension_numbers<[1], [0], [0], [1], [0, 0, 1, 1], [], []>} : vector<2x2304xbf16>, vector<2304x128xbf16>, vector<2x128xf32> -> vector<2x128xf32>
    %7 = arith.addf %3, %6 : vector<2x128xf32>
    %c0_6 = arith.constant 0 : index
    %c0_7 = arith.constant 0 : index
    %8 = vector.load %arg8[%c0_6, %c0_7] : memref<2x128xf32, #tpu.memory_space<vmem>>, vector<2x128xf32>
    tpu.vector_store %arg8[%c0_6, %c0_7], %7 {strides = array<i32>} : memref<2x128xf32, #tpu.memory_space<vmem>>, vector<2x128xf32>,
    %c3_i32 = arith.constant 3 : i32
    %9 = arith.cmpi eq, %arg1, %c3_i32 : i32
    %10 = arith.extui %9 : i1 to i32
    %c0_i32_8 = arith.constant 0 : i32
    %11 = arith.cmpi ne, %10, %c0_i32_8 : i32
    scf.if %11 {
      %c0_9 = arith.constant 0 : index
      %c0_10 = arith.constant 0 : index
      %12 = vector.load %arg8[%c0_9, %c0_10] : memref<2x128xf32, #tpu.memory_space<vmem>>, vector<2x128xf32>
      %c0_11 = arith.constant 0 : index
      %c0_12 = arith.constant 0 : index
      %13 = vector.load %arg4[%c0_11, %c0_12] : memref<1x128xf32, #tpu.memory_space<vmem>>, vector<1x128xf32>
      %14 = vector.broadcast %13 : vector<1x128xf32> to vector<2x128xf32>
      %15 = arith.addf %12, %14 : vector<2x128xf32>
      %cst_13 = arith.constant 0.000000e+00 : f32
      %16 = vector.broadcast %cst_13 : f32 to vector<2x128xf32>
      %17 = arith.maximumf %15, %16 : vector<2x128xf32>
      %c0_14 = arith.constant 0 : index
      %c0_15 = arith.constant 0 : index
      %18 = vector.load %arg5[%c0_14, %c0_15] : memref<128x10xf32, #tpu.memory_space<vmem>>, vector<128x10xf32>
      %cst_16 = arith.constant dense<0.000000e+00> : vector<2x10xf32>
      %19 = tpu.matmul %17, %18, %cst_16 {dimension_numbers = #tpu.dot_dimension_numbers<[1], [0], [0], [1], [0, 0, 1, 1], [], []>} : vector<2x128xf32>, vector<128x10xf32>, vector<2x10xf32> -> vector<2x10xf32>
      %c0_17 = arith.constant 0 : index
      %c0_18 = arith.constant 0 : index
      %20 = vector.load %arg6[%c0_17, %c0_18] : memref<1x10xf32, #tpu.memory_space<vmem>>, vector<1x10xf32>
      %21 = vector.broadcast %20 : vector<1x10xf32> to vector<2x10xf32>
      %22 = arith.addf %19, %21 : vector<2x10xf32>
      %cst_19 = arith.constant dense<0xFF800000> : vector<2xf32>
      %23 = vector.multi_reduction <maximumf>, %22, %cst_19 [1] : vector<2x10xf32> to vector<2xf32>
      %24 = vector.shape_cast %23 : vector<2xf32> to vector<2x1xf32>
      %25 = vector.broadcast %24 : vector<2x1xf32> to vector<2x10xf32>
      %26 = arith.subf %22, %25 : vector<2x10xf32>
      %27 = math.exp %26 : vector<2x10xf32>
      %cst_20 = arith.constant dense<0.000000e+00> : vector<2xf32>
      %28 = vector.multi_reduction <add>, %27, %cst_20 [1] : vector<2x10xf32> to vector<2xf32>
      %29 = vector.shape_cast %28 : vector<2xf32> to vector<2x1xf32>
      %30 = math.log %29 : vector<2x1xf32>
      %31 = vector.broadcast %30 : vector<2x1xf32> to vector<2x10xf32>
      %32 = arith.subf %26, %31 : vector<2x10xf32>
      %c0_21 = arith.constant 0 : index
      %c0_22 = arith.constant 0 : index
      %33 = vector.load %arg7[%c0_21, %c0_22] : memref<2x10xf32, #tpu.memory_space<vmem>>, vector<2x10xf32>
      tpu.vector_store %arg7[%c0_21, %c0_22], %32 {strides = array<i32>} : memref<2x10xf32, #tpu.memory_space<vmem>>, vector<2x10xf32>,
    } else {
    }
    return
  }
  func.func @transform_0(%arg0: i32, %arg1: i32) -> (i32, i32) {
    %c0_i32 = arith.constant 0 : i32
    return %arg0, %arg1 : i32, i32
  }
  func.func @transform_1(%arg0: i32, %arg1: i32) -> (i32, i32) {
    %c0_i32 = arith.constant 0 : i32
    %c0_i32_0 = arith.constant 0 : i32
    return %arg1, %c0_i32 : i32, i32
  }
  func.func @transform_2(%arg0: i32, %arg1: i32) -> (i32, i32) {
    %c0_i32 = arith.constant 0 : i32
    %c0_i32_0 = arith.constant 0 : i32
    %c0_i32_1 = arith.constant 0 : i32
    return %c0_i32, %c0_i32_0 : i32, i32
  }
  func.func @transform_3(%arg0: i32, %arg1: i32) -> (i32, i32) {
    %c0_i32 = arith.constant 0 : i32
    %c0_i32_0 = arith.constant 0 : i32
    %c0_i32_1 = arith.constant 0 : i32
    return %c0_i32, %c0_i32_0 : i32, i32
  }
  func.func @transform_4(%arg0: i32, %arg1: i32) -> (i32, i32) {
    %c0_i32 = arith.constant 0 : i32
    %c0_i32_0 = arith.constant 0 : i32
    %c0_i32_1 = arith.constant 0 : i32
    return %c0_i32, %c0_i32_0 : i32, i32
  }
  func.func @transform_5(%arg0: i32, %arg1: i32) -> (i32, i32) {
    %c0_i32 = arith.constant 0 : i32
    %c0_i32_0 = arith.constant 0 : i32
    return %arg0, %c0_i32 : i32, i32
  }
}

</mosaic_0001>

<bundles_post_ra>
// kernel: net_forward.3
= control target key start
LH: loop header
LB: loop body
LE: loop exit
PB: predicated region body
PF: predicated region fallthrough
CT: control target
= control target key end

     0   :  { %10 = vsyncpa [#allocation4], 0  ;;  %s2700_s18 = smov 0   ;;  %s2702_s19 = smov 0   ;;  %s2965_s0 = inlined_call_operand.vmem [shape: bf16[2,9216], index: 0, kind: input, shape index: {}]   ;;  %s2966_s1 = inlined_call_operand.vmem [shape: bf16[9216,128], index: 1, kind: input, shape index: {}]   ;;  %s2967_s2 = inlined_call_operand.vmem [shape: f32[1,128], index: 2, kind: input, shape index: {}]   ;;  %s2968_s3 = inlined_call_operand.vmem [shape: f32[128,10], index: 3, kind: input, shape index: {}]   ;;  %s2969_s4 = inlined_call_operand.vmem [shape: f32[1,10], index: 4, kind: input, shape index: {}]   ;;  %s2970_s5 = inlined_call_operand.hbm [shape: f32[2,10], index: 5, kind: output, shape index: {}]  }
   0x1   :  { %s2704_s20 = smov 0  }
   0x2 LB: > { %s1843_s21 = sadd.s32 4294967295, %s2666_s20   ;;  %s25_s22 = sadd.s32 1, %s2662_s19  ;;  %s2666_s20 = sphi %s2704_s20, %s16_s20   ;;  %s2662_s19 = sphi %s2702_s19, %s2972_s19   ;;  %s2658_s18 = sphi %s2700_s18, %s2971_s18  }
   0x3   : > { %p26_p0 = scmp.ge.s32.totalorder %s25_s22, 4  ;;  %p1846_p1 = scmp.ge.s32.totalorder %s2666_s20, 1 }
   0x4   : > { %p217_p2 = scmp.lt.s32.totalorder %s2666_s20, 5 }
   0x5   : > { %s2974_s22 = smov (%p26_p0, %s25_s22), 0 }
   0x6   : > { %p218_p3 = pnand %p1846_p1, %p217_p2 }
   0x7   : > { %s248_s23 = smul.u32 (!%p218_p3), 18, %s2658_s18  ;;  %p1848_p6 = scmp.ne.s32.totalorder (!%p218_p3), %s2658_s18, 0 }
   0x8   : > { %221 = sbr.rel (%p218_p3) target bundleno = 740 (0x2e4), region = 40 }
   0x9   : > { %s257_s24 = smul.u32 (!%p218_p3), 288, %s2658_s18  ;;  %p251_p4 = scmp.lt.s32.totalorder (!%p218_p3), %s248_s23, 71 }
   0xb   : > { %p258_p5 = scmp.lt.s32.totalorder (!%p218_p3), %s257_s24, 1151 }
   0xd   : > { %s2976_s23 = smov (!%p251_p4, %s248_s23), 71  ;;  %s2978_s24 = smov (!%p258_p5, %s257_s24), 1151 }
   0xe   : > { %s2726_s27 = scalar_lea.vmem %s2965_s0, %s2976_s23  ;;  %s1847_s28 = sshll.u32 %s2978_s24, 2 }
   0xf   : > { %s2731_s6 = scalar_lea.vmem %s2966_s1, %s1847_s28  ;;  %266 = sbr.rel (%p1848_p6) target bundleno = 22 (0x16), region = 44 }
  0x14   : > { %v2668_v0 = vmov 0.0  }
  0x15   : > { %267 = vst [vmem:[#allocation2] sm:$0x3] %v2668_v0 }
  0x16 PF: > { %v2437_v1 = vld [vmem:[%s2731_s6 + $0x38] sm:$0xff]  ;;  %v2436_v5 = vld [vmem:[%s2731_s6 + $0x30] sm:$0xff]  ;;  %v2435_v9 = vld [vmem:[%s2731_s6 + $0x28] sm:$0xff]  ;;  %p2425_p7 = scmp.ne.s32.totalorder %s2658_s18, 3 }
  0x17   : > { %v2445_v2 = vld [vmem:[%s2731_s6 + $0x78] sm:$0xff]  ;;  %1466 = vmatpush.bf16.msra.mxu0 %v2437_v1  ;;  %v2444_v6 = vld [vmem:[%s2731_s6 + $0x70] sm:$0xff]  ;;  %v2443_v10 = vld [vmem:[%s2731_s6 + $0x68] sm:$0xff] }
  0x18   : > { %v2453_v3 = vld [vmem:[%s2731_s6 + $0xb8] sm:$0xff]  ;;  %1479 = vmatpush.bf16.msra.mxu1 %v2445_v2  ;;  %v2452_v7 = vld [vmem:[%s2731_s6 + $0xb0] sm:$0xff]  ;;  %v2451_v11 = vld [vmem:[%s2731_s6 + $0xa8] sm:$0xff] }
  0x19   : > { %v2461_v4 = vld [vmem:[%s2731_s6 + $0xf8] sm:$0xff]  ;;  %1492 = vmatpush.bf16.msra.mxu2 %v2453_v3  ;;  %v2460_v8 = vld [vmem:[%s2731_s6 + $0xf0] sm:$0xff]  ;;  %v2459_v12 = vld [vmem:[%s2731_s6 + $0xe8] sm:$0xff] }
  0x1a   : > { %1505 = vmatpush.bf16.msra.mxu3 %v2461_v4  ;;  %v2434_v13 = vld [vmem:[%s2731_s6 + $0x20] sm:$0xff]  ;;  %v2433_v17 = vld [vmem:[%s2731_s6 + $0x18] sm:$0xff]  ;;  %v2432_v22 = vld [vmem:[%s2731_s6 + $0x10] sm:$0xff] }
  0x1b   : > { %1467 = vmatpush.bf16.msra.mxu0 %v2436_v5  ;;  %v2442_v14 = vld [vmem:[%s2731_s6 + $0x60] sm:$0xff]  ;;  %v2441_v18 = vld [vmem:[%s2731_s6 + $0x58] sm:$0xff]  ;;  %v2440_v23 = vld [vmem:[%s2731_s6 + $0x50] sm:$0xff] }
  0x1c   : > { %1480 = vmatpush.bf16.msra.mxu1 %v2444_v6  ;;  %v2450_v15 = vld [vmem:[%s2731_s6 + $0xa0] sm:$0xff]  ;;  %v2449_v19 = vld [vmem:[%s2731_s6 + $0x98] sm:$0xff]  ;;  %v2448_v24 = vld [vmem:[%s2731_s6 + $0x90] sm:$0xff] }
  0x1d   : > { %1493 = vmatpush.bf16.msra.mxu2 %v2452_v7  ;;  %v2458_v16 = vld [vmem:[%s2731_s6 + $0xe0] sm:$0xff]  ;;  %v2457_v20 = vld [vmem:[%s2731_s6 + $0xd8] sm:$0xff]  ;;  %v2456_v25 = vld [vmem:[%s2731_s6 + $0xd0] sm:$0xff] }
  0x1e   : > { %1506 = vmatpush.bf16.msra.mxu3 %v2460_v8  ;;  %v269_v21 = vld [vmem:[%s2726_s27] sm:$0xff]  ;;  %v2431_v26 = vld [vmem:[%s2731_s6 + $0x8] sm:$0xff]  ;;  %v2469_v33 = vld [vmem:[%s2731_s6 + $0x138] sm:$0xff] }
  0x1f   : > { %1468 = vmatpush.bf16.msra.mxu0 %v2435_v9  ;;  %561 = vst [vmem:[#allocation1] ss:$9 sm:$0xff] %v269_v21  ;;  %v2439_v27 = vld [vmem:[%s2731_s6 + $0x48] sm:$0xff]  ;;  %v2430_v30 = vld [vmem:[%s2731_s6] sm:$0xff]  ;;  %v2477_v34 = vld [vmem:[%s2731_s6 + $0x178] sm:$0xff] }
  0x20   : > { %1481 = vmatpush.bf16.msra.mxu1 %v2443_v10  ;;  %v2447_v28 = vld [vmem:[%s2731_s6 + $0x88] sm:$0xff]  ;;  %v2438_v31 = vld [vmem:[%s2731_s6 + $0x40] sm:$0xff]  ;;  %v2485_v35 = vld [vmem:[%s2731_s6 + $0x1b8] sm:$0xff] }
  0x21   : > { %1494 = vmatpush.bf16.msra.mxu2 %v2451_v11  ;;  %v2455_v29 = vld [vmem:[%s2731_s6 + $0xc8] sm:$0xff]  ;;  %v2446_v32 = vld [vmem:[%s2731_s6 + $0x80] sm:$0xff]  ;;  %v2493_v37 = vld [vmem:[%s2731_s6 + $0x1f8] sm:$0xff] }
  0x22   : > { %1507 = vmatpush.bf16.msra.mxu3 %v2459_v12  ;;  %v2454_v36 = vld [vmem:[%s2731_s6 + $0xc0] sm:$0xff]  ;;  %v2468_v39 = vld [vmem:[%s2731_s6 + $0x130] sm:$0xff]  ;;  %v2467_v45 = vld [vmem:[%s2731_s6 + $0x128] sm:$0xff] }
  0x23   : > { %1469 = vmatpush.bf16.msra.mxu0 %v2434_v13  ;;  %v2476_v41 = vld [vmem:[%s2731_s6 + $0x170] sm:$0xff]  ;;  %v270_v50 = vld [vmem:[%s2726_s27 + $0x8] sm:$0xff]  ;;  %v2466_v55 = vld [vmem:[%s2731_s6 + $0x120] sm:$0xff] }
  0x24   : > { %1482 = vmatpush.bf16.msra.mxu1 %v2442_v14  ;;  %v2484_v42 = vld [vmem:[%s2731_s6 + $0x1b0] sm:$0xff]  ;;  %v2475_v52 = vld [vmem:[%s2731_s6 + $0x168] sm:$0xff]  ;;  %v2474_v56 = vld [vmem:[%s2731_s6 + $0x160] sm:$0xff] }
  0x25   : > { %1495 = vmatpush.bf16.msra.mxu2 %v2450_v15  ;;  %v2492_v44 = vld [vmem:[%s2731_s6 + $0x1f0] sm:$0xff]  ;;  %v2483_v53 = vld [vmem:[%s2731_s6 + $0x1a8] sm:$0xff]  ;;  %v2482_v57 = vld [vmem:[%s2731_s6 + $0x1a0] sm:$0xff] }
  0x26   : > { %1508 = vmatpush.bf16.msra.mxu3 %v2458_v16  ;;  %v562_v38 = vld [vmem:[#allocation1] sm:$0xff]  ;;  %v564_v40 = vld [vmem:[#allocation1 + $0x12] sm:$0xff]  ;;  %v563_v43 = vld [vmem:[#allocation1 + $0x9] sm:$0xff] }
  0x27   : > { %1470 = vmatpush.bf16.msra.mxu0 %v2433_v17  ;;  %v565_v46 = vld [vmem:[#allocation1 + $0x1b] sm:$0xff]  ;;  %v2778_v48 = vld [vmem:[#allocation1 + $0x24] sm:$0xff]  ;;  %v2783_v51 = vld [vmem:[#allocation1 + $0x2d] sm:$0xff] }
  0x28   : > { %1483 = vmatpush.bf16.msra.mxu1 %v2441_v18  ;;  %v2776_v47 = vld [vmem:[#allocation1 + $0x36] sm:$0xff]  ;;  %v2780_v49 = vld [vmem:[#allocation1 + $0x3f] sm:$0xff]  ;;  %v2491_v54 = vld [vmem:[%s2731_s6 + $0x1e8] sm:$0xff] }
  0x29   : > { %1496 = vmatpush.bf16.msra.mxu2 %v2449_v19  ;;  %571 = vst [vmem:[#allocation1] ss:$9 sm:$0xff] %v270_v50  ;;  %v2490_v58 = vld [vmem:[%s2731_s6 + $0x1e0] sm:$0xff]  ;;  %v2465_v59 = vld [vmem:[%s2731_s6 + $0x118] sm:$0xff]  ;;  %v2464_v63 = vld [vmem:[%s2731_s6 + $0x110] sm:$0xff] }
  0x2a   : > { %1509 = vmatpush.bf16.msra.mxu3 %v2457_v20  ;;  %v2473_v60 = vld [vmem:[%s2731_s6 + $0x158] sm:$0xff]  ;;  %v2472_v0 = vld [vmem:[%s2731_s6 + $0x150] sm:$0xff]  ;;  %v2463_v3 = vld [vmem:[%s2731_s6 + $0x108] sm:$0xff] }
  0x2b   : > { %1471 = vmatpush.bf16.msra.mxu0 %v2432_v22  ;;  %v2481_v61 = vld [vmem:[%s2731_s6 + $0x198] sm:$0xff]  ;;  %v2480_v1 = vld [vmem:[%s2731_s6 + $0x190] sm:$0xff]  ;;  %v2471_v4 = vld [vmem:[%s2731_s6 + $0x148] sm:$0xff] }
  0x2c   : > { %1484 = vmatpush.bf16.msra.mxu1 %v2440_v23  ;;  %v2489_v62 = vld [vmem:[%s2731_s6 + $0x1d8] sm:$0xff]  ;;  %v2488_v2 = vld [vmem:[%s2731_s6 + $0x1d0] sm:$0xff]  ;;  %v2479_v5 = vld [vmem:[%s2731_s6 + $0x188] sm:$0xff] }
  0x2d   : > { %1497 = vmatpush.bf16.msra.mxu2 %v2448_v24  ;;  %v2487_v6 = vld [vmem:[%s2731_s6 + $0x1c8] sm:$0xff]  ;;  %v2462_v7 = vld [vmem:[%s2731_s6 + $0x100] sm:$0xff]  ;;  %v2501_v10 = vld [vmem:[%s2731_s6 + $0x238] sm:$0xff] }
  0x2e   : > { %1510 = vmatpush.bf16.msra.mxu3 %v2456_v25  ;;  %v2470_v8 = vld [vmem:[%s2731_s6 + $0x140] sm:$0xff]  ;;  %v2509_v11 = vld [vmem:[%s2731_s6 + $0x278] sm:$0xff]  ;;  %v2500_v15 = vld [vmem:[%s2731_s6 + $0x230] sm:$0xff] }
  0x2f   : > { %1472 = vmatpush.bf16.msra.mxu0 %v2431_v26  ;;  %v2478_v9 = vld [vmem:[%s2731_s6 + $0x180] sm:$0xff]  ;;  %v2517_v12 = vld [vmem:[%s2731_s6 + $0x2b8] sm:$0xff]  ;;  %v2508_v16 = vld [vmem:[%s2731_s6 + $0x270] sm:$0xff] }
  0x30   : > { %1485 = vmatpush.bf16.msra.mxu1 %v2439_v27  ;;  %v2486_v13 = vld [vmem:[%s2731_s6 + $0x1c0] sm:$0xff]  ;;  %v2525_v14 = vld [vmem:[%s2731_s6 + $0x2f8] sm:$0xff]  ;;  %v2516_v17 = vld [vmem:[%s2731_s6 + $0x2b0] sm:$0xff] }
  0x31   : > { %1498 = vmatpush.bf16.msra.mxu2 %v2447_v28  ;;  %v2524_v18 = vld [vmem:[%s2731_s6 + $0x2f0] sm:$0xff]  ;;  %v2499_v19 = vld [vmem:[%s2731_s6 + $0x228] sm:$0xff]  ;;  %v2498_v23 = vld [vmem:[%s2731_s6 + $0x220] sm:$0xff] }
  0x32   : > { %1511 = vmatpush.bf16.msra.mxu3 %v2455_v29  ;;  %v2507_v20 = vld [vmem:[%s2731_s6 + $0x268] sm:$0xff]  ;;  %v2506_v24 = vld [vmem:[%s2731_s6 + $0x260] sm:$0xff]  ;;  %v2497_v27 = vld [vmem:[%s2731_s6 + $0x218] sm:$0xff] }
  0x33   : > { %1473 = vmatpush.bf16.msra.mxu0 %v2430_v30  ;;  %v2515_v21 = vld [vmem:[%s2731_s6 + $0x2a8] sm:$0xff]  ;;  %v2514_v25 = vld [vmem:[%s2731_s6 + $0x2a0] sm:$0xff]  ;;  %v2505_v28 = vld [vmem:[%s2731_s6 + $0x258] sm:$0xff] }
  0x34   : > { %1486 = vmatpush.bf16.msra.mxu1 %v2438_v31  ;;  %v2523_v22 = vld [vmem:[%s2731_s6 + $0x2e8] sm:$0xff]  ;;  %v2522_v26 = vld [vmem:[%s2731_s6 + $0x2e0] sm:$0xff]  ;;  %v2513_v29 = vld [vmem:[%s2731_s6 + $0x298] sm:$0xff] }
  0x35   : > { %1499 = vmatpush.bf16.msra.mxu2 %v2446_v32  ;;  %v2521_v30 = vld [vmem:[%s2731_s6 + $0x2d8] sm:$0xff]  ;;  %v2496_v31 = vld [vmem:[%s2731_s6 + $0x210] sm:$0xff] }
  0x36   : > { %1512 = vmatpush.bf16.msra.mxu3 %v2454_v36  ;;  %1474 = vmatmul.bf16.vlgmr.msra.gmra.mxu0 %v562_v38  ;;  %v2504_v32 = vld [vmem:[%s2731_s6 + $0x250] sm:$0xff]  ;;  %v2503_v36 = vld [vmem:[%s2731_s6 + $0x248] sm:$0xff] }
  0x37   : > { %1518 = vmatpush.bf16.msrb.mxu0 %v2469_v33  ;;  %1487 = vmatmul.bf16.vlgmr.msra.gmra.mxu1 %v563_v43  ;;  %v2512_v33 = vld [vmem:[%s2731_s6 + $0x290] sm:$0xff]  ;;  %v2519_v38 = vld [vmem:[%s2731_s6 + $0x2c8] sm:$0xff]  ;;  %v2541_v43 = vld [vmem:[%s2731_s6 + $0x378] sm:$0xff] }
  0x38   : > { %1531 = vmatpush.bf16.msrb.mxu1 %v2477_v34  ;;  %1500 = vmatmul.bf16.vlgmr.msra.gmra.mxu2 %v564_v40  ;;  %v2520_v34 = vld [vmem:[%s2731_s6 + $0x2d0] sm:$0xff]  ;;  %v2502_v40 = vld [vmem:[%s2731_s6 + $0x240] sm:$0xff] }
  0x39   : > { %1544 = vmatpush.bf16.msrb.mxu2 %v2485_v35  ;;  %1513 = vmatmul.bf16.vlgmr.msra.gmra.mxu3 %v565_v46  ;;  %v2495_v35 = vld [vmem:[%s2731_s6 + $0x208] sm:$0xff]  ;;  %v572_v46 = vld [vmem:[#allocation1] sm:$0xff] }
  0x3a   : > { %1557 = vmatpush.bf16.msrb.mxu3 %v2493_v37  ;;  %v2511_v37 = vld [vmem:[%s2731_s6 + $0x288] sm:$0xff] }
  0x3b   : > { %1519 = vmatpush.bf16.msrb.mxu0 %v2468_v39  ;;  %v2494_v39 = vld [vmem:[%s2731_s6 + $0x200] sm:$0xff]  ;;  %v573_v50 = vld [vmem:[#allocation1 + $0x9] sm:$0xff] }
  0x3c   : > { %1532 = vmatpush.bf16.msrb.mxu1 %v2476_v41  ;;  %v2510_v41 = vld [vmem:[%s2731_s6 + $0x280] sm:$0xff] }
  0x3d   : > { %1545 = vmatpush.bf16.msrb.mxu2 %v2484_v42  ;;  %v2533_v42 = vld [vmem:[%s2731_s6 + $0x338] sm:$0xff] }
  0x3e   : > { %1558 = vmatpush.bf16.msrb.mxu3 %v2492_v44  ;;  %v2549_v44 = vld [vmem:[%s2731_s6 + $0x3b8] sm:$0xff] }
  0x3f   : > { %1520 = vmatpush.bf16.msrb.mxu0 %v2467_v45  ;;  %v2518_v45 = vld [vmem:[%s2731_s6 + $0x2c0] sm:$0xff] }
  0x40   : > { %1533 = vmatpush.bf16.msrb.mxu1 %v2475_v52  ;;  %v575_v52 = vld [vmem:[#allocation1 + $0x1b] sm:$0xff] }
  0x41   : > { %1546 = vmatpush.bf16.msrb.mxu2 %v2483_v53  ;;  %v2548_v53 = vld [vmem:[%s2731_s6 + $0x3b0] sm:$0xff] }
  0x42   : > { %1559 = vmatpush.bf16.msrb.mxu3 %v2491_v54  ;;  %v2556_v54 = vld [vmem:[%s2731_s6 + $0x3f0] sm:$0xff] }
  0x43   : > { %1521 = vmatpush.bf16.msrb.mxu0 %v2466_v55  ;;  %v2531_v55 = vld [vmem:[%s2731_s6 + $0x328] sm:$0xff] }
  0x44   : > { %1534 = vmatpush.bf16.msrb.mxu1 %v2474_v56  ;;  %v2539_v56 = vld [vmem:[%s2731_s6 + $0x368] sm:$0xff] }
  0x45   : > { %1547 = vmatpush.bf16.msrb.mxu2 %v2482_v57  ;;  %v2547_v57 = vld [vmem:[%s2731_s6 + $0x3a8] sm:$0xff] }
  0x46   : > { %1560 = vmatpush.bf16.msrb.mxu3 %v2490_v58  ;;  %v2555_v58 = vld [vmem:[%s2731_s6 + $0x3e8] sm:$0xff] }
  0x47   : > { %1522 = vmatpush.bf16.msrb.mxu0 %v2465_v59  ;;  %v2530_v59 = vld [vmem:[%s2731_s6 + $0x320] sm:$0xff] }
  0x48   : > { %1535 = vmatpush.bf16.msrb.mxu1 %v2473_v60  ;;  %v2538_v60 = vld [vmem:[%s2731_s6 + $0x360] sm:$0xff] }
  0x49   : > { %1548 = vmatpush.bf16.msrb.mxu2 %v2481_v61  ;;  %v2546_v61 = vld [vmem:[%s2731_s6 + $0x3a0] sm:$0xff] }
  0x4a   : > { %1561 = vmatpush.bf16.msrb.mxu3 %v2489_v62  ;;  %v2554_v62 = vld [vmem:[%s2731_s6 + $0x3e0] sm:$0xff] }
  0x4b   : > { %1523 = vmatpush.bf16.msrb.mxu0 %v2464_v63  ;;  %v2529_v63 = vld [vmem:[%s2731_s6 + $0x318] sm:$0xff] }
  0x4c   : > { %1536 = vmatpush.bf16.msrb.mxu1 %v2472_v0  ;;  %v2537_v0 = vld [vmem:[%s2731_s6 + $0x358] sm:$0xff] }
  0x4d   : > { %1549 = vmatpush.bf16.msrb.mxu2 %v2480_v1  ;;  %v2545_v1 = vld [vmem:[%s2731_s6 + $0x398] sm:$0xff] }
  0x4e   : > { %1562 = vmatpush.bf16.msrb.mxu3 %v2488_v2  ;;  %v2553_v2 = vld [vmem:[%s2731_s6 + $0x3d8] sm:$0xff] }
  0x4f   : > { %1524 = vmatpush.bf16.msrb.mxu0 %v2463_v3  ;;  %v2528_v3 = vld [vmem:[%s2731_s6 + $0x310] sm:$0xff] }
  0x50   : > { %1537 = vmatpush.bf16.msrb.mxu1 %v2471_v4  ;;  %v2536_v4 = vld [vmem:[%s2731_s6 + $0x350] sm:$0xff] }
  0x51   : > { %1550 = vmatpush.bf16.msrb.mxu2 %v2479_v5  ;;  %v2544_v5 = vld [vmem:[%s2731_s6 + $0x390] sm:$0xff] }
  0x52   : > { %1563 = vmatpush.bf16.msrb.mxu3 %v2487_v6  ;;  %v2552_v6 = vld [vmem:[%s2731_s6 + $0x3d0] sm:$0xff] }
  0x53   : > { %1525 = vmatpush.bf16.msrb.mxu0 %v2462_v7  ;;  %v2527_v7 = vld [vmem:[%s2731_s6 + $0x308] sm:$0xff] }
  0x54   : > { %1538 = vmatpush.bf16.msrb.mxu1 %v2470_v8  ;;  %v2535_v8 = vld [vmem:[%s2731_s6 + $0x348] sm:$0xff] }
  0x55   : > { %1551 = vmatpush.bf16.msrb.mxu2 %v2478_v9  ;;  %v576_v9 = vld [vmem:[#allocation1 + $0x24] sm:$0xff] }
  0x56   : > { %1564 = vmatpush.bf16.msrb.mxu3 %v2486_v13  ;;  %1526 = vmatmul.bf16.vlgmr.msrb.gmra.mxu0 %v2778_v48  ;;  %v574_v48 = vld [vmem:[#allocation1 + $0x12] sm:$0xff]  ;;  %v271_v13 = vld [vmem:[%s2726_s27 + $0x10] sm:$0x3] }
  0x57   : > { %1570 = vmatpush.bf16.msra.mxu0 %v2501_v10  ;;  %1539 = vmatmul.bf16.vlgmr.msrb.gmra.mxu1 %v2783_v51  ;;  %v2540_v51 = vld [vmem:[%s2731_s6 + $0x370] sm:$0xff] }
  0x58   : > { %1583 = vmatpush.bf16.msra.mxu1 %v2509_v11  ;;  %1552 = vmatmul.bf16.vlgmr.msrb.gmra.mxu2 %v2776_v47  ;;  %v2557_v47 = vld [vmem:[%s2731_s6 + $0x3f8] sm:$0xff]  ;;  %v577_v11 = vld [vmem:[#allocation1 + $0x2d] sm:$0xff] }
  0x59   : > { %1596 = vmatpush.bf16.msra.mxu2 %v2517_v12  ;;  %1565 = vmatmul.bf16.vlgmr.msrb.gmra.mxu3 %v2780_v49  ;;  %v2532_v49 = vld [vmem:[%s2731_s6 + $0x330] sm:$0xff]  ;;  %v579_v12 = vld [vmem:[#allocation1 + $0x3f] sm:$0xff] }
  0x5a   : > { %1609 = vmatpush.bf16.msra.mxu3 %v2525_v14  ;;  %v578_v10 = vld [vmem:[#allocation1 + $0x36] sm:$0xff]  ;;  %v2543_v14 = vld [vmem:[%s2731_s6 + $0x388] sm:$0xff] }
  0x5b   : > { %1571 = vmatpush.bf16.msra.mxu0 %v2500_v15  ;;  %581 = vst [vmem:[#allocation1] ss:$9 sm:$0xff] %v271_v13  ;;  %v2551_v15 = vld [vmem:[%s2731_s6 + $0x3c8] sm:$0xff] }
  0x5c   : > { %1584 = vmatpush.bf16.msra.mxu1 %v2508_v16  ;;  %v2526_v16 = vld [vmem:[%s2731_s6 + $0x300] sm:$0xff] }
  0x5d   : > { %1597 = vmatpush.bf16.msra.mxu2 %v2516_v17  ;;  %v2534_v17 = vld [vmem:[%s2731_s6 + $0x340] sm:$0xff] }
  0x5e   : > { %1610 = vmatpush.bf16.msra.mxu3 %v2524_v18  ;;  %v2565_v18 = vld [vmem:[%s2731_s6 + $0x438] sm:$0xff] }
  0x5f   : > { %1572 = vmatpush.bf16.msra.mxu0 %v2499_v19  ;;  %v2542_v19 = vld [vmem:[%s2731_s6 + $0x380] sm:$0xff] }
  0x60   : > { %1585 = vmatpush.bf16.msra.mxu1 %v2507_v20  ;;  %v2573_v20 = vld [vmem:[%s2731_s6 + $0x478] sm:$0xff] }
  0x61   : > { %1598 = vmatpush.bf16.msra.mxu2 %v2515_v21  ;;  %v2550_v21 = vld [vmem:[%s2731_s6 + $0x3c0] sm:$0xff] }
  0x62   : > { %1611 = vmatpush.bf16.msra.mxu3 %v2523_v22  ;;  %v2564_v22 = vld [vmem:[%s2731_s6 + $0x430] sm:$0xff] }
  0x63   : > { %1573 = vmatpush.bf16.msra.mxu0 %v2498_v23  ;;  %v2572_v23 = vld [vmem:[%s2731_s6 + $0x470] sm:$0xff] }
  0x64   : > { %1586 = vmatpush.bf16.msra.mxu1 %v2506_v24  ;;  %v2563_v24 = vld [vmem:[%s2731_s6 + $0x428] sm:$0xff] }
  0x65   : > { %1599 = vmatpush.bf16.msra.mxu2 %v2514_v25  ;;  %v2571_v25 = vld [vmem:[%s2731_s6 + $0x468] sm:$0xff] }
  0x66   : > { %1612 = vmatpush.bf16.msra.mxu3 %v2522_v26  ;;  %v2562_v26 = vld [vmem:[%s2731_s6 + $0x420] sm:$0xff] }
  0x67   : > { %1574 = vmatpush.bf16.msra.mxu0 %v2497_v27  ;;  %v2570_v27 = vld [vmem:[%s2731_s6 + $0x460] sm:$0xff] }
  0x68   : > { %1587 = vmatpush.bf16.msra.mxu1 %v2505_v28  ;;  %v2561_v28 = vld [vmem:[%s2731_s6 + $0x418] sm:$0xff] }
  0x69   : > { %1600 = vmatpush.bf16.msra.mxu2 %v2513_v29  ;;  %v2569_v29 = vld [vmem:[%s2731_s6 + $0x458] sm:$0xff] }
  0x6a   : > { %1613 = vmatpush.bf16.msra.mxu3 %v2521_v30  ;;  %v2560_v30 = vld [vmem:[%s2731_s6 + $0x410] sm:$0xff] }
  0x6b   : > { %1575 = vmatpush.bf16.msra.mxu0 %v2496_v31  ;;  %v2568_v31 = vld [vmem:[%s2731_s6 + $0x450] sm:$0xff] }
  0x6c   : > { %1588 = vmatpush.bf16.msra.mxu1 %v2504_v32  ;;  %v2559_v32 = vld [vmem:[%s2731_s6 + $0x408] sm:$0xff] }
  0x6d   : > { %1601 = vmatpush.bf16.msra.mxu2 %v2512_v33  ;;  %v2567_v33 = vld [vmem:[%s2731_s6 + $0x448] sm:$0xff] }
  0x6e   : > { %1614 = vmatpush.bf16.msra.mxu3 %v2520_v34  ;;  %v2558_v34 = vld [vmem:[%s2731_s6 + $0x400] sm:$0xff] }
  0x6f   : > { %1576 = vmatpush.bf16.msra.mxu0 %v2495_v35  ;;  %v2566_v35 = vld [vmem:[%s2731_s6 + $0x440] sm:$0xff] }
  0x70   : > { %1589 = vmatpush.bf16.msra.mxu1 %v2503_v36  ;;  %v582_v36 = vld [vmem:[#allocation1] sm:$0xff] }
  0x71   : > { %1602 = vmatpush.bf16.msra.mxu2 %v2511_v37  ;;  %v583_v37 = vld [vmem:[#allocation1 + $0x9] sm:$0xff] }
  0x72   : > { %1615 = vmatpush.bf16.msra.mxu3 %v2519_v38 }
  0x73   : > { %1577 = vmatpush.bf16.msra.mxu0 %v2494_v39 }
  0x74   : > { %1590 = vmatpush.bf16.msra.mxu1 %v2502_v40 }
  0x75   : > { %1603 = vmatpush.bf16.msra.mxu2 %v2510_v41 }
  0x76   : > { %1616 = vmatpush.bf16.msra.mxu3 %v2518_v45  ;;  %1578 = vmatmul.bf16.vlgmr.msra.gmra.mxu0 %v572_v46 }
  0x77   : > { %1622 = vmatpush.bf16.msrb.mxu0 %v2533_v42  ;;  %1591 = vmatmul.bf16.vlgmr.msra.gmra.mxu1 %v573_v50 }
  0x78   : > { %1635 = vmatpush.bf16.msrb.mxu1 %v2541_v43  ;;  %1604 = vmatmul.bf16.vlgmr.msra.gmra.mxu2 %v574_v48 }
  0x79   : > { %1648 = vmatpush.bf16.msrb.mxu2 %v2549_v44  ;;  %1617 = vmatmul.bf16.vlgmr.msra.gmra.mxu3 %v575_v52 }
  0x7a   : > { %1661 = vmatpush.bf16.msrb.mxu3 %v2557_v47 }
  0x7b   : > { %1623 = vmatpush.bf16.msrb.mxu0 %v2532_v49 }
  0x7c   : > { %1636 = vmatpush.bf16.msrb.mxu1 %v2540_v51 }
  0x7d   : > { %1649 = vmatpush.bf16.msrb.mxu2 %v2548_v53 }
  0x7e   : > { %1662 = vmatpush.bf16.msrb.mxu3 %v2556_v54 }
  0x7f   : > { %1624 = vmatpush.bf16.msrb.mxu0 %v2531_v55 }
  0x80   : > { %1637 = vmatpush.bf16.msrb.mxu1 %v2539_v56 }
  0x81   : > { %1650 = vmatpush.bf16.msrb.mxu2 %v2547_v57 }
  0x82   : > { %1663 = vmatpush.bf16.msrb.mxu3 %v2555_v58 }
  0x83   : > { %1625 = vmatpush.bf16.msrb.mxu0 %v2530_v59 }
  0x84   : > { %1638 = vmatpush.bf16.msrb.mxu1 %v2538_v60 }
  0x85   : > { %1651 = vmatpush.bf16.msrb.mxu2 %v2546_v61 }
  0x86   : > { %1664 = vmatpush.bf16.msrb.mxu3 %v2554_v62 }
  0x87   : > { %1626 = vmatpush.bf16.msrb.mxu0 %v2529_v63 }
  0x88   : > { %1639 = vmatpush.bf16.msrb.mxu1 %v2537_v0 }
  0x89   : > { %1652 = vmatpush.bf16.msrb.mxu2 %v2545_v1 }
  0x8a   : > { %1665 = vmatpush.bf16.msrb.mxu3 %v2553_v2 }
  0x8b   : > { %1627 = vmatpush.bf16.msrb.mxu0 %v2528_v3 }
  0x8c   : > { %1640 = vmatpush.bf16.msrb.mxu1 %v2536_v4 }
  0x8d   : > { %1653 = vmatpush.bf16.msrb.mxu2 %v2544_v5 }
  0x8e   : > { %1666 = vmatpush.bf16.msrb.mxu3 %v2552_v6 }
  0x8f   : > { %1628 = vmatpush.bf16.msrb.mxu0 %v2527_v7 }
  0x90   : > { %1641 = vmatpush.bf16.msrb.mxu1 %v2535_v8 }
  0x91   : > { %1654 = vmatpush.bf16.msrb.mxu2 %v2543_v14 }
  0x92   : > { %1667 = vmatpush.bf16.msrb.mxu3 %v2551_v15 }
  0x93   : > { %1629 = vmatpush.bf16.msrb.mxu0 %v2526_v16 }
  0x94   : > { %1642 = vmatpush.bf16.msrb.mxu1 %v2534_v17 }
  0x95   : > { %1655 = vmatpush.bf16.msrb.mxu2 %v2542_v19 }
  0x96   : > { %1668 = vmatpush.bf16.msrb.mxu3 %v2550_v21  ;;  %1630 = vmatmul.bf16.vlgmr.msrb.gmra.mxu0 %v576_v9 }
  0x97   : > { %1674 = vmatpush.bf16.msra.mxu0 %v2565_v18  ;;  %1643 = vmatmul.bf16.vlgmr.msrb.gmra.mxu1 %v577_v11 }
  0x98   : > { %1687 = vmatpush.bf16.msra.mxu1 %v2573_v20  ;;  %1656 = vmatmul.bf16.vlgmr.msrb.gmra.mxu2 %v578_v10 }
  0x99   : > { %1669 = vmatmul.bf16.vlgmr.msrb.gmra.mxu3 %v579_v12 }
  0x9b   : > { %1675 = vmatpush.bf16.msra.mxu0 %v2564_v22 }
  0x9c   : > { %1688 = vmatpush.bf16.msra.mxu1 %v2572_v23 }
  0x9f   : > { %1676 = vmatpush.bf16.msra.mxu0 %v2563_v24  ;;  %v268_v24 = vld [vmem:[#allocation2] sm:$0x3] }
  0xa0   : > { %1689 = vmatpush.bf16.msra.mxu1 %v2571_v25 }
  0xa3   : > { %1677 = vmatpush.bf16.msra.mxu0 %v2562_v26 }
  0xa4   : > { %1690 = vmatpush.bf16.msra.mxu1 %v2570_v27 }
  0xa7   : > { %1678 = vmatpush.bf16.msra.mxu0 %v2561_v28 }
  0xa8   : > { %1691 = vmatpush.bf16.msra.mxu1 %v2569_v29 }
  0xab   : > { %1679 = vmatpush.bf16.msra.mxu0 %v2560_v30 }
  0xac   : > { %1692 = vmatpush.bf16.msra.mxu1 %v2568_v31 }
  0xaf   : > { %1680 = vmatpush.bf16.msra.mxu0 %v2559_v32 }
  0xb0   : > { %1693 = vmatpush.bf16.msra.mxu1 %v2567_v33 }
  0xb3   : > { %1681 = vmatpush.bf16.msra.mxu0 %v2558_v34  ;;  %v1475_v38 = vpop.f32.mrf.mxu0 }
  0xb4   : > { %1694 = vmatpush.bf16.msra.mxu1 %v2566_v35  ;;  %v1488_v39 = vpop.f32.mrf.mxu1 }
  0xb5   : > { %v1489_v40 = vadd.f32 %v1488_v39, %v1475_v38 }
  0xb6   : > { %1682 = vmatmul.bf16.vlgmr.msra.gmra.mxu0 %v582_v36 }
  0xb7   : > { %1695 = vmatmul.bf16.vlgmr.msra.gmra.mxu1 %v583_v37 }
  0xbb   : > { %v1501_v41 = vpop.f32.mrf.mxu2  ;;  %v1477_v43 = vpop.f32.mrf.mxu0 }
  0xbc   : > { %v1502_v42 = vadd.f32 %v1501_v41, %v1489_v40  ;;  %v1514_v44 = vpop.f32.mrf.mxu3  ;;  %v1490_v45 = vpop.f32.mrf.mxu1 }
  0xbe   : > { %v1515_v46 = vadd.f32 %v1514_v44, %v1502_v42 }
  0xc3   : > { %v1503_v47 = vpop.f32.mrf.mxu2 }
  0xc4   : > { %v1516_v48 = vpop.f32.mrf.mxu3 }
  0xd3   : > { %v1527_v49 = vpop.f32.mrf.mxu0 }
  0xd4   : > { %v1540_v50 = vpop.f32.mrf.mxu1  ;;  %v1528_v1 = vadd.f32 %v1527_v49, %v1515_v46 }
  0xd6   : > { %v1541_v2 = vadd.f32 %v1540_v50, %v1528_v1 }
  0xdb   : > { %v1553_v51 = vpop.f32.mrf.mxu2  ;;  %v1529_v53 = vpop.f32.mrf.mxu0 }
  0xdc   : > { %v1566_v52 = vpop.f32.mrf.mxu3  ;;  %v1542_v54 = vpop.f32.mrf.mxu1  ;;  %v1554_v3 = vadd.f32 %v1553_v51, %v1541_v2 }
  0xde   : > { %v1567_v6 = vadd.f32 %v1566_v52, %v1554_v3 }
  0xe3   : > { %v1555_v55 = vpop.f32.mrf.mxu2 }
  0xe4   : > { %v1568_v56 = vpop.f32.mrf.mxu3 }
  0xf3   : > { %v1579_v57 = vpop.f32.mrf.mxu0 }
  0xf4   : > { %v1592_v58 = vpop.f32.mrf.mxu1  ;;  %v1580_v7 = vadd.f32 %v1579_v57, %v1567_v6 }
  0xf6   : > { %v1593_v12 = vadd.f32 %v1592_v58, %v1580_v7 }
  0xfb   : > { %v1605_v59 = vpop.f32.mrf.mxu2  ;;  %v1581_v60 = vpop.f32.mrf.mxu0 }
  0xfc   : > { %v1618_v61 = vpop.f32.mrf.mxu3  ;;  %v1594_v62 = vpop.f32.mrf.mxu1  ;;  %v1606_v13 = vadd.f32 %v1605_v59, %v1593_v12 }
  0xfe   : > { %v1619_v14 = vadd.f32 %v1618_v61, %v1606_v13 }
 0x103   : > { %v1607_v63 = vpop.f32.mrf.mxu2 }
 0x104   : > { %v1620_v0 = vpop.f32.mrf.mxu3 }
 0x113   : > { %v1631_v4 = vpop.f32.mrf.mxu0 }
 0x114   : > { %v1644_v5 = vpop.f32.mrf.mxu1  ;;  %v1632_v17 = vadd.f32 %v1631_v4, %v1619_v14 }
 0x116   : > { %v1645_v18 = vadd.f32 %v1644_v5, %v1632_v17 }
 0x11b   : > { %v1657_v8 = vpop.f32.mrf.mxu2  ;;  %v1633_v9 = vpop.f32.mrf.mxu0 }
 0x11c   : > { %v1670_v10 = vpop.f32.mrf.mxu3  ;;  %v1646_v11 = vpop.f32.mrf.mxu1  ;;  %v1658_v19 = vadd.f32 %v1657_v8, %v1645_v18 }
 0x11e   : > { %v1671_v20 = vadd.f32 %v1670_v10, %v1658_v19 }
 0x123   : > { %v1659_v15 = vpop.f32.mrf.mxu2 }
 0x124   : > { %v1672_v16 = vpop.f32.mrf.mxu3 }
 0x133   : > { %v1683_v21 = vpop.f32.mrf.mxu0 }
 0x134   : > { %v1684_v22 = vadd.f32 %v1683_v21, %v1671_v20  ;;  %v1696_v23 = vpop.f32.mrf.mxu1 }
 0x136   : > { %v1697_v25 = vadd.f32 %v1696_v23, %v1684_v22 }
 0x138   : > { %v1700_v26 = vadd.f32 %v1697_v25, %v268_v24  ;;  %1705 = sbr.rel (%p2425_p7) target bundleno = 734 (0x2de), region = 48 }
 0x13a   : > { %1701 = vst [vmem:[#allocation2] sm:$0x3] %v1700_v26 }
 0x13b   : > { %v1685_v27 = vpop.f32.mrf.mxu0 }
 0x13c   : > { %v1698_v28 = vpop.f32.mrf.mxu1 }
 0x13d   : > { %v1728_v29 = vld [vmem:[%s2968_s3 + $0x78] sm:$0xff]  ;;  %v1727_v30 = vld [vmem:[%s2968_s3 + $0x70] sm:$0xff]  ;;  %v1726_v31 = vld [vmem:[%s2968_s3 + $0x68] sm:$0xff]  ;;  %vm1753_vm0 = vcmask 74752  }
 0x13e   : > { %1733 = vmatpush.msra.mxu0 %v1728_v29  ;;  %v1725_v32 = vld [vmem:[%s2968_s3 + $0x60] sm:$0xff]  ;;  %v1724_v33 = vld [vmem:[%s2968_s3 + $0x58] sm:$0xff]  ;;  %v1723_v34 = vld [vmem:[%s2968_s3 + $0x50] sm:$0xff] }
 0x13f   : > { %v1722_v35 = vld [vmem:[%s2968_s3 + $0x48] sm:$0xff]  ;;  %v1721_v36 = vld [vmem:[%s2968_s3 + $0x40] sm:$0xff]  ;;  %v1720_v37 = vld [vmem:[%s2968_s3 + $0x38] sm:$0xff] }
 0x140   : > { %1734 = vmatpush.msra.mxu0 %v1727_v30  ;;  %v1719_v38 = vld [vmem:[%s2968_s3 + $0x30] sm:$0xff]  ;;  %v1718_v39 = vld [vmem:[%s2968_s3 + $0x28] sm:$0xff]  ;;  %v1717_v40 = vld [vmem:[%s2968_s3 + $0x20] sm:$0xff] }
 0x141   : > { %v2606_v41 = vld [vmem:[%s2967_s2] ss:$0 sm:$0xff]  ;;  %v1706_v42 = vld [vmem:[#allocation2] sm:$0x3]  ;;  %v1716_v43 = vld [vmem:[%s2968_s3 + $0x18] sm:$0xff] }
 0x142   : > { %1735 = vmatpush.msra.mxu0 %v1726_v31  ;;  %v1715_v44 = vld [vmem:[%s2968_s3 + $0x10] sm:$0xff]  ;;  %v1711_v45 = vadd.f32 %v2606_v41, %v1706_v42  ;;  %v1714_v46 = vld [vmem:[%s2968_s3 + $0x8] sm:$0xff]  ;;  %v1713_v47 = vld [vmem:[%s2968_s3] sm:$0xff] }
 0x143   : > { %v2607_v49 = vld [vmem:[%s2969_s4] ss:$0 sm:$0xff] }
 0x144   : > { %1736 = vmatpush.msra.mxu0 %v1725_v32  ;;  %v1712_v48 = vmax.f32 %v1711_v45, 0.0 }
 0x146   : > { %1737 = vmatpush.msra.mxu0 %v1724_v33 }
 0x148   : > { %1738 = vmatpush.msra.mxu0 %v1723_v34 }
 0x14a   : > { %1739 = vmatpush.msra.mxu0 %v1722_v35 }
 0x14c   : > { %1740 = vmatpush.msra.mxu0 %v1721_v36 }
 0x14e   : > { %1741 = vmatpush.msra.mxu0 %v1720_v37 }
 0x150   : > { %1742 = vmatpush.msra.mxu0 %v1719_v38 }
 0x152   : > { %1743 = vmatpush.msra.mxu0 %v1718_v39 }
 0x154   : > { %1744 = vmatpush.msra.mxu0 %v1717_v40 }
 0x156   : > { %1745 = vmatpush.msra.mxu0 %v1716_v43 }
 0x158   : > { %1746 = vmatpush.msra.mxu0 %v1715_v44 }
 0x15a   : > { %1747 = vmatpush.msra.mxu0 %v1714_v46 }
 0x15c   : > { %1748 = vmatpush.msra.mxu0 %v1713_v47 }
 0x15d   : > { %1749 = vmatmul.f32.vlgmr.msra.gmra.mxu0 %v1712_v48 }
 0x1da   : > { %v1750_v50 = vpop.f32.mrf.mxu0 }
 0x1db   : > { %v1751_v51 = vadd.f32 %v2607_v49, %v1750_v50 }
 0x1dd   : > { %v1754_v52 = vsel %vm1753_vm0, %v1751_v51, -inf }
 0x1de   : > { %1755 = vmax.xlane.f32.xlu0 %v1754_v52 }
 0x251   : > { %v1756_v53 = vpop.xlane.xlu0 %1755 }
 0x252   : > { %v1757_v54 = vsub.f32 %v1751_v51, %v1756_v53 }
 0x254   : > { %v1758_v55 = vmul.f32 1.442695, %v1757_v54 }
 0x256   : > { %2608 = vpow2.f32 %v1758_v55 }
 0x25c   : > { %v2609_v56 = vpop.eup %2608 }
 0x25d   : > { %v1760_v57 = vsel %vm1753_vm0, %v2609_v56, 0.0 }
 0x25e   : > { %1761 = vadd.xlane.f32.xlu0 %v1760_v57 }
 0x2d1   : > { %v1762_v58 = vpop.xlane.xlu0 %1761 }
 0x2d2   : > { %2610 = vlog2.f32 %v1762_v58 }
 0x2d8   : > { %v2611_v59 = vpop.eup %2610 }
 0x2d9   : > { %v1764_v60 = vmul.f32 0.6931472, %v2611_v59 }
 0x2db   : > { %v1765_v61 = vsub.f32 %v1757_v54, %v1764_v60 }
 0x2dd   : > { %1766 = vst.msk [vmem:[#allocation3] sm:$0x3] %vm1753_vm0, %v1765_v61 }
 0x2de PF: > { %p2578_p8 = scmp.eq.s32.totalorder %s1843_s21, 3  ;;  %s1777_s28 = sshll.u32 %s2970_s5, 4  ;;  %s1778_s28 = int_to_ptr.hbm [resolvable:$true] %s1777_s28 }
 0x2df   : > { %s2669_s29 = smov [#allocation3]  }
 0x2e0   : > { %s1775_s30 = sshll.u32 %s2669_s29, 4  ;;  %s1776_s30 = int_to_ptr.vmem [resolvable:$true] %s1775_s30 }
 0x2e1   : > { %2575 = dma.vmem_to_hbm [thread:$0]  (%p2578_p8), %s1776_s30, 32, %s1778_s28, [#allocation4]  }
 0x2e2   : > { %2653 = dma.done.wait (%p2578_p8), [#allocation4], 32  }
 0x2e3   : > { %2655 = vsyncadd (%p2578_p8), [#allocation4], 4294967264 }
 0x2e4 PF: > { %s16_s20 = sadd.s32 1, %s2666_s20   ;;  %s2971_s18 = smov %s2662_s19 }
 0x2e5   : > { %p13_p9 = scmp.ge.s32.totalorder %s16_s20, 6   ;;  %s2972_s19 = smov %s2974_s22 }
 0x2e7   :  { %15 = sbr.rel (!%p13_p9) target bundleno = 2 (0x2), region = 79 }
 0x2ec   :  { %1791 = vsyncpa [#allocation4], 1 }
 0x2ed   :  { %1793 = vsyncpa [#allocation4 + $0x1], 1 }

// kernel: net_forward.2
= control target key start
LH: loop header
LB: loop body
LE: loop exit
PB: predicated region body
PF: predicated region fallthrough
CT: control target
= control target key end

     0   :  { %s7694_s18 = smov 0   ;;  %s11062_s0 = inlined_call_operand.vmem [shape: f32[2,832,9], index: 0, kind: input, shape index: {}]   ;;  %s11063_s1 = inlined_call_operand.vmem [shape: f32[9,32], index: 1, kind: input, shape index: {}]   ;;  %s11064_s2 = inlined_call_operand.vmem [shape: f32[1,32], index: 2, kind: input, shape index: {}]   ;;  %s11065_s3 = inlined_call_operand.vmem [shape: f32[288,64], index: 3, kind: input, shape index: {}]   ;;  %s11066_s4 = inlined_call_operand.vmem [shape: f32[1,64], index: 4, kind: input, shape index: {}]   ;;  %s11067_s5 = inlined_call_operand.vmem [shape: bf16[2,12,12,64], index: 5, kind: output, shape index: {}]  }
   0x1 LB: > { %s6866_s19 = sadd.s32 4294967295, %s7662_s18   ;;  %p6870_p0 = scmp.ge.s32.totalorder %s7662_s18, 1  ;;  %s7662_s18 = sphi %s7694_s18, %s15_s18  }
   0x2   : > { %p187_p1 = scmp.lt.s32.totalorder %s7662_s18, 3 }
   0x4   : > { %p188_p2 = pnand %p6870_p0, %p187_p1 }
   0x6   : > { %191 = sbr.rel (%p188_p2) target bundleno = 2451 (0x993), region = 40 }
   0xb   : > { %v330_v0 = vld [vmem:[%s11063_s1 + $0x8] sm:$0x1]  ;;  %vm648_vm0 = vcmask 1040384   ;;  %v329_v1 = vld [vmem:[%s11063_s1] sm:$0xff]  ;;  %p215_p3 = scmp.lt.s32.totalorder %s6866_s19, 1  ;;  %vm335_vm1 = vcmask 72704  }
   0xc   : > { %6873 = vmatpush.msk.msra.mxu0 %vm648_vm0, %v330_v0  ;;  %v7745_v15 = vld [vmem:[%s11065_s3 + $0x18] sm:$0xff]  ;;  %v7751_v16 = vld [vmem:[%s11065_s3 + $0x10] sm:$0xff]  ;;  %v7758_v18 = vld [vmem:[%s11065_s3 + $0x8] sm:$0xff]  ;;  %vm1085_vm2 = vcmask 261120   ;;  %vm6605_vm3 = vcmask 523264   ;;  %vm6785_vm4 = vcmask 519168  }
   0xd   : > { %s11921_s19 = smov (!%p215_p3, %s6866_s19), 1  ;;  %2019 = vmatpush.msra.mxu2 %v7745_v15  ;;  %v7765_v19 = vld [vmem:[%s11065_s3] sm:$0xff]  ;;  %vm6787_vm5 = vcmask 517120  }
   0xe   : > { %667 = vmatpush.msra.mxu0 %v329_v1  ;;  %s7640_s24 = smul.u32 832, %s11921_s19  ;;  %v7775_v22 = vld [vmem:[%s11064_s2] ss:$0 sm:$0xff] }
   0xf   : > { %2020 = vmatpush.msra.mxu2 %v7751_v16  ;;  %s7641_s15 = smul.u32 96, %s11921_s19 }
  0x10   : > { %s7714_s27 = scalar_lea.vmem %s11062_s0, %s7640_s24 }
  0x11   : > { %v225_v2 = vld [vmem:[%s7714_s27] sm:$0xff]  ;;  %v226_v3 = vld [vmem:[%s7714_s27 + $0x8] sm:$0xff]  ;;  %v227_v4 = vld [vmem:[%s7714_s27 + $0x10] sm:$0xff]  ;;  %2021 = vmatpush.msra.mxu2 %v7758_v18  ;;  %s10369_s17 = scalar_lea.vmem %s11067_s5, %s7641_s15 }
  0x12   : > { %6874 = vmatmul.msk.f32.vlgmr.msra.gmra.mxu0 %vm335_vm1, %v225_v2  ;;  %v228_v5 = vld [vmem:[%s7714_s27 + $0x18] sm:$0xff]  ;;  %v229_v6 = vld [vmem:[%s7714_s27 + $0x20] sm:$0xff]  ;;  %v230_v7 = vld [vmem:[%s7714_s27 + $0x28] sm:$0xff] }
  0x13   : > { %v231_v8 = vld [vmem:[%s7714_s27 + $0x30] sm:$0xff]  ;;  %v232_v9 = vld [vmem:[%s7714_s27 + $0x38] sm:$0xff]  ;;  %v233_v10 = vld [vmem:[%s7714_s27 + $0x40] sm:$0xff]  ;;  %2022 = vmatpush.msra.mxu2 %v7765_v19 }
  0x14   : > { %v234_v11 = vld [vmem:[%s7714_s27 + $0x48] sm:$0xff]  ;;  %v235_v12 = vld [vmem:[%s7714_s27 + $0x50] sm:$0xff]  ;;  %v236_v13 = vld [vmem:[%s7714_s27 + $0x58] sm:$0xff] }
  0x15   : > { %v237_v14 = vld [vmem:[%s7714_s27 + $0x60] sm:$0xff]  ;;  %v238_v17 = vld [vmem:[%s7714_s27 + $0x68] sm:$0xff]  ;;  %v239_v20 = vld [vmem:[%s7714_s27 + $0x70] sm:$0xff] }
  0x16   : > { %v240_v21 = vld [vmem:[%s7714_s27 + $0x78] sm:$0xff]  ;;  %v241_v24 = vld [vmem:[%s7714_s27 + $0x80] sm:$0xff]  ;;  %v242_v28 = vld [vmem:[%s7714_s27 + $0x88] sm:$0xff] }
  0x17   : > { %v243_v33 = vld [vmem:[%s7714_s27 + $0x90] sm:$0xff]  ;;  %v244_v38 = vld [vmem:[%s7714_s27 + $0x98] sm:$0xff]  ;;  %v245_v43 = vld [vmem:[%s7714_s27 + $0xa0] sm:$0xff] }
  0x18   : > { %v246_v47 = vld [vmem:[%s7714_s27 + $0xa8] sm:$0xff]  ;;  %v247_v52 = vld [vmem:[%s7714_s27 + $0xb0] sm:$0xff]  ;;  %v248_v57 = vld [vmem:[%s7714_s27 + $0xb8] sm:$0xff] }
  0x19   : > { %v249_v62 = vld [vmem:[%s7714_s27 + $0xc0] sm:$0xff]  ;;  %v250_v2 = vld [vmem:[%s7714_s27 + $0xc8] sm:$0xff] }
  0x1a   : > { %6875 = vmatmul.msk.f32.gmra.mxu0 %vm335_vm1, %v226_v3 }
  0x22   : > { %6876 = vmatmul.msk.f32.gmra.mxu0 %vm335_vm1, %v227_v4 }
  0x2a   : > { %6877 = vmatmul.msk.f32.gmra.mxu0 %vm335_vm1, %v228_v5 }
  0x32   : > { %6878 = vmatmul.msk.f32.gmra.mxu0 %vm335_vm1, %v229_v6 }
  0x3a   : > { %6879 = vmatmul.msk.f32.gmra.mxu0 %vm335_vm1, %v230_v7  ;;  %v251_v7 = vld [vmem:[%s7714_s27 + $0xd0] sm:$0xff] }
  0x42   : > { %6880 = vmatmul.msk.f32.gmra.mxu0 %vm335_vm1, %v231_v8 }
  0x4a   : > { %6881 = vmatmul.msk.f32.gmra.mxu0 %vm335_vm1, %v232_v9 }
  0x52   : > { %6882 = vmatmul.msk.f32.gmra.mxu0 %vm335_vm1, %v233_v10 }
  0x5a   : > { %6883 = vmatmul.msk.f32.gmra.mxu0 %vm335_vm1, %v234_v11 }
  0x62   : > { %6884 = vmatmul.msk.f32.gmra.mxu0 %vm335_vm1, %v235_v12  ;;  %v252_v12 = vld [vmem:[%s7714_s27 + $0xd8] sm:$0xff] }
  0x6a   : > { %6885 = vmatmul.msk.f32.gmra.mxu0 %vm335_vm1, %v236_v13 }
  0x72   : > { %6886 = vmatmul.msk.f32.gmra.mxu0 %vm335_vm1, %v237_v14 }
  0x7a   : > { %6887 = vmatmul.msk.f32.gmra.mxu0 %vm335_vm1, %v238_v17 }
  0x82   : > { %6888 = vmatmul.msk.f32.gmra.mxu0 %vm335_vm1, %v239_v20 }
  0x8a   : > { %6889 = vmatmul.msk.f32.gmra.mxu0 %vm335_vm1, %v240_v21  ;;  %v253_v21 = vld [vmem:[%s7714_s27 + $0xe0] sm:$0xff] }
  0x8f   : > { %v669_v23 = vpop.f32.mrf.mxu0 }
  0x90   : > { %v670_v25 = vadd.f32 %v7775_v22, %v669_v23 }
  0x92   : > { %v981_v26 = vmax.f32 %v670_v25, 0.0  ;;  %6890 = vmatmul.msk.f32.gmra.mxu0 %vm335_vm1, %v241_v24 }
  0x94   : > { %1086 = vst.msk [vmem:[#allocation2] sm:$0xff] %vm1085_vm2, %v981_v26  ;;  %v254_v26 = vld [vmem:[%s7714_s27 + $0xe8] sm:$0xff] }
  0x97   : > { %v672_v27 = vpop.f32.mrf.mxu0 }
  0x98   : > { %v673_v29 = vadd.f32 %v7775_v22, %v672_v27 }
  0x9a   : > { %v982_v30 = vmax.f32 %v673_v29, 0.0  ;;  %6891 = vmatmul.msk.f32.gmra.mxu0 %vm335_vm1, %v242_v28 }
  0x9b   : > { %v1190_v31 = vld [vmem:[#allocation2] sm:$0xff] }
  0x9c   : > { %1087 = vst.msk [vmem:[#allocation2 + $0x8] sm:$0xff] %vm1085_vm2, %v982_v30  ;;  %7050 = vmatmul.msk.f32.vlgmr.msra.gmra.mxu2 %vm1085_vm2, %v1190_v31  ;;  %v1341_v30 = vld [vmem:[%s11065_s3 + $0x38] sm:$0xff]  ;;  %v1340_v31 = vld [vmem:[%s11065_s3 + $0x30] sm:$0xff] }
  0x9d   : > { %7628 = vmatpush.msra.mxu1 %v1341_v30  ;;  %7629 = vmatpush.msra.mxu3 %v1341_v30 }
  0x9e   : > { %1570 = vmatpush.msrb.mxu0 %v1341_v30 }
  0x9f   : > { %v675_v32 = vpop.f32.mrf.mxu0  ;;  %7630 = vmatpush.msra.mxu1 %v1340_v31  ;;  %7631 = vmatpush.msra.mxu3 %v1340_v31 }
  0xa0   : > { %v676_v34 = vadd.f32 %v7775_v22, %v675_v32  ;;  %1571 = vmatpush.msrb.mxu0 %v1340_v31  ;;  %v266_v31 = vld [vmem:[%s7714_s27 + $0x148] sm:$0xff] }
  0xa2   : > { %v983_v35 = vmax.f32 %v676_v34, 0.0  ;;  %6892 = vmatmul.msk.f32.gmra.mxu0 %vm335_vm1, %v243_v33  ;;  %v255_v33 = vld [vmem:[%s7714_s27 + $0xf0] sm:$0xff] }
  0xa3   : > { %v1191_v36 = vld [vmem:[#allocation2 + $0x8] sm:$0xff] }
  0xa4   : > { %1088 = vst.msk [vmem:[#allocation2 + $0x10] sm:$0xff] %vm1085_vm2, %v983_v35  ;;  %7051 = vmatmul.msk.f32.gmra.mxu2 %vm1085_vm2, %v1191_v36  ;;  %v1339_v35 = vld [vmem:[%s11065_s3 + $0x28] sm:$0xff] }
  0xa5   : > { %7632 = vmatpush.msra.mxu1 %v1339_v35  ;;  %7633 = vmatpush.msra.mxu3 %v1339_v35 }
  0xa6   : > { %1572 = vmatpush.msrb.mxu0 %v1339_v35 }
  0xa7   : > { %v678_v37 = vpop.f32.mrf.mxu0 }
  0xa8   : > { %v679_v39 = vadd.f32 %v7775_v22, %v678_v37  ;;  %v1338_v37 = vld [vmem:[%s11065_s3 + $0x20] sm:$0xff] }
  0xa9   : > { %7634 = vmatpush.msra.mxu1 %v1338_v37  ;;  %7635 = vmatpush.msra.mxu3 %v1338_v37 }
  0xaa   : > { %v984_v40 = vmax.f32 %v679_v39, 0.0  ;;  %6893 = vmatmul.msk.f32.gmra.mxu0 %vm335_vm1, %v244_v38 }
  0xab   : > { %v1192_v41 = vld [vmem:[#allocation2 + $0x10] sm:$0xff]  ;;  %7636 = vmatpush.msrb.mxu3 %v7745_v15  ;;  %1573 = vmatpush.msrb.mxu0 %v1338_v37 }
  0xac   : > { %1089 = vst.msk [vmem:[#allocation2 + $0x18] sm:$0xff] %vm1085_vm2, %v984_v40  ;;  %7052 = vmatmul.msk.f32.gmra.mxu2 %vm1085_vm2, %v1192_v41  ;;  %v256_v40 = vld [vmem:[%s7714_s27 + $0xf8] sm:$0xff] }
  0xad   : > { %7637 = vmatpush.msrb.mxu3 %v7751_v16  ;;  %v257_v16 = vld [vmem:[%s7714_s27 + $0x100] sm:$0xff] }
  0xaf   : > { %v681_v42 = vpop.f32.mrf.mxu0  ;;  %7638 = vmatpush.msrb.mxu3 %v7758_v18 }
  0xb0   : > { %v682_v44 = vadd.f32 %v7775_v22, %v681_v42 }
  0xb1   : > { %7639 = vmatpush.msrb.mxu3 %v7765_v19 }
  0xb2   : > { %v985_v45 = vmax.f32 %v682_v44, 0.0  ;;  %6894 = vmatmul.msk.f32.gmra.mxu0 %vm335_vm1, %v245_v43 }
  0xb4   : > { %1090 = vst.msk [vmem:[#allocation2 + $0x20] sm:$0xff] %vm1085_vm2, %v985_v45 }
  0xb7   : > { %v684_v46 = vpop.f32.mrf.mxu0 }
  0xb8   : > { %v685_v48 = vadd.f32 %v7775_v22, %v684_v46  ;;  %v258_v46 = vld [vmem:[%s7714_s27 + $0x108] sm:$0xff] }
  0xba   : > { %v986_v49 = vmax.f32 %v685_v48, 0.0  ;;  %6895 = vmatmul.msk.f32.gmra.mxu0 %vm335_vm1, %v246_v47 }
  0xbb   : > { %v1193_v50 = vld [vmem:[#allocation2 + $0x20] sm:$0xff] }
  0xbc   : > { %1091 = vst.msk [vmem:[#allocation2 + $0x28] sm:$0xff] %vm1085_vm2, %v986_v49  ;;  %7053 = vmatmul.msk.f32.gmra.mxu2 %vm1085_vm2, %v1193_v50  ;;  %v259_v50 = vld [vmem:[%s7714_s27 + $0x110] sm:$0xff] }
  0xbf   : > { %v687_v51 = vpop.f32.mrf.mxu0 }
  0xc0   : > { %v688_v53 = vadd.f32 %v7775_v22, %v687_v51 }
  0xc2   : > { %v987_v54 = vmax.f32 %v688_v53, 0.0  ;;  %6896 = vmatmul.msk.f32.gmra.mxu0 %vm335_vm1, %v247_v52 }
  0xc3   : > { %v1194_v55 = vld [vmem:[#allocation2 + $0x28] sm:$0xff] }
  0xc4   : > { %1092 = vst.msk [vmem:[#allocation2 + $0x30] sm:$0xff] %vm1085_vm2, %v987_v54  ;;  %7054 = vmatmul.msk.f32.gmra.mxu2 %vm1085_vm2, %v1194_v55 }
  0xc7   : > { %v690_v56 = vpop.f32.mrf.mxu0 }
  0xc8   : > { %v691_v58 = vadd.f32 %v7775_v22, %v690_v56  ;;  %v260_v56 = vld [vmem:[%s7714_s27 + $0x118] sm:$0xff] }
  0xca   : > { %v988_v59 = vmax.f32 %v691_v58, 0.0  ;;  %6897 = vmatmul.msk.f32.gmra.mxu0 %vm335_vm1, %v248_v57 }
  0xcb   : > { %v1195_v60 = vld [vmem:[#allocation2 + $0x30] sm:$0xff] }
  0xcc   : > { %1093 = vst.msk [vmem:[#allocation2 + $0x38] sm:$0xff] %vm1085_vm2, %v988_v59  ;;  %7055 = vmatmul.msk.f32.gmra.mxu2 %vm1085_vm2, %v1195_v60 }
  0xcf   : > { %v693_v61 = vpop.f32.mrf.mxu0 }
  0xd0   : > { %v694_v63 = vadd.f32 %v7775_v22, %v693_v61 }
  0xd2   : > { %v989_v0 = vmax.f32 %v694_v63, 0.0  ;;  %6898 = vmatmul.msk.f32.gmra.mxu0 %vm335_vm1, %v249_v62  ;;  %v261_v62 = vld [vmem:[%s7714_s27 + $0x120] sm:$0xff] }
  0xd4   : > { %1094 = vst.msk [vmem:[#allocation2 + $0x40] sm:$0xff] %vm1085_vm2, %v989_v0 }
  0xd7   : > { %v696_v1 = vpop.f32.mrf.mxu0 }
  0xd8   : > { %v697_v3 = vadd.f32 %v7775_v22, %v696_v1 }
  0xda   : > { %v990_v4 = vmax.f32 %v697_v3, 0.0  ;;  %6899 = vmatmul.msk.f32.gmra.mxu0 %vm335_vm1, %v250_v2  ;;  %v262_v3 = vld [vmem:[%s7714_s27 + $0x128] sm:$0xff] }
  0xdb   : > { %v1196_v5 = vld [vmem:[#allocation2 + $0x40] sm:$0xff] }
  0xdc   : > { %1095 = vst.msk [vmem:[#allocation2 + $0x48] sm:$0xff] %vm1085_vm2, %v990_v4  ;;  %7056 = vmatmul.msk.f32.gmra.mxu2 %vm1085_vm2, %v1196_v5 }
  0xdf   : > { %v699_v6 = vpop.f32.mrf.mxu0 }
  0xe0   : > { %v700_v8 = vadd.f32 %v7775_v22, %v699_v6 }
  0xe2   : > { %v991_v9 = vmax.f32 %v700_v8, 0.0  ;;  %6900 = vmatmul.msk.f32.gmra.mxu0 %vm335_vm1, %v251_v7  ;;  %v263_v8 = vld [vmem:[%s7714_s27 + $0x130] sm:$0xff] }
  0xe3   : > { %v1197_v10 = vld [vmem:[#allocation2 + $0x48] sm:$0xff] }
  0xe4   : > { %1096 = vst.msk [vmem:[#allocation2 + $0x50] sm:$0xff] %vm1085_vm2, %v991_v9  ;;  %7057 = vmatmul.msk.f32.gmra.mxu2 %vm1085_vm2, %v1197_v10 }
  0xe7   : > { %v702_v11 = vpop.f32.mrf.mxu0 }
  0xe8   : > { %v703_v13 = vadd.f32 %v7775_v22, %v702_v11 }
  0xea   : > { %v992_v14 = vmax.f32 %v703_v13, 0.0  ;;  %6901 = vmatmul.msk.f32.gmra.mxu0 %vm335_vm1, %v252_v12 }
  0xeb   : > { %v1198_v17 = vld [vmem:[#allocation2 + $0x50] sm:$0xff] }
  0xec   : > { %1097 = vst.msk [vmem:[#allocation2 + $0x58] sm:$0xff] %vm1085_vm2, %v992_v14  ;;  %7058 = vmatmul.msk.f32.gmra.mxu2 %vm1085_vm2, %v1198_v17  ;;  %v264_v14 = vld [vmem:[%s7714_s27 + $0x138] sm:$0xff] }
  0xef   : > { %v705_v20 = vpop.f32.mrf.mxu0 }
  0xf0   : > { %v706_v23 = vadd.f32 %v7775_v22, %v705_v20 }
  0xf2   : > { %v993_v24 = vmax.f32 %v706_v23, 0.0  ;;  %6902 = vmatmul.msk.f32.gmra.mxu0 %vm335_vm1, %v253_v21 }
  0xf4   : > { %1098 = vst.msk [vmem:[#allocation2 + $0x60] sm:$0xff] %vm1085_vm2, %v993_v24 }
  0xf7   : > { %v708_v25 = vpop.f32.mrf.mxu0 }
  0xf8   : > { %v709_v27 = vadd.f32 %v7775_v22, %v708_v25  ;;  %v265_v25 = vld [vmem:[%s7714_s27 + $0x140] sm:$0xff] }
  0xfa   : > { %v994_v28 = vmax.f32 %v709_v27, 0.0  ;;  %6903 = vmatmul.msk.f32.gmra.mxu0 %vm335_vm1, %v254_v26 }
  0xfb   : > { %v1199_v29 = vld [vmem:[#allocation2 + $0x60] sm:$0xff] }
  0xfc   : > { %1099 = vst.msk [vmem:[#allocation2 + $0x68] sm:$0xff] %vm1085_vm2, %v994_v28  ;;  %7059 = vmatmul.msk.f32.gmra.mxu2 %vm1085_vm2, %v1199_v29 }
  0xff   : > { %v711_v32 = vpop.f32.mrf.mxu0 }
 0x100   : > { %v712_v34 = vadd.f32 %v7775_v22, %v711_v32 }
 0x102   : > { %v995_v36 = vmax.f32 %v712_v34, 0.0  ;;  %6904 = vmatmul.msk.f32.gmra.mxu0 %vm335_vm1, %v255_v33 }
 0x103   : > { %v1200_v38 = vld [vmem:[#allocation2 + $0x68] sm:$0xff] }
 0x104   : > { %1100 = vst.msk [vmem:[#allocation2 + $0x70] sm:$0xff] %vm1085_vm2, %v995_v36  ;;  %7060 = vmatmul.msk.f32.gmra.mxu2 %vm1085_vm2, %v1200_v38  ;;  %v267_v36 = vld [vmem:[%s7714_s27 + $0x150] sm:$0xff] }
 0x107   : > { %v714_v39 = vpop.f32.mrf.mxu0 }
 0x108   : > { %v715_v41 = vadd.f32 %v7775_v22, %v714_v39 }
 0x10a   : > { %v996_v42 = vmax.f32 %v715_v41, 0.0  ;;  %6905 = vmatmul.msk.f32.gmra.mxu0 %vm335_vm1, %v256_v40 }
 0x10b   : > { %v1201_v43 = vld [vmem:[#allocation2 + $0x70] sm:$0xff] }
 0x10c   : > { %1101 = vst.msk [vmem:[#allocation2 + $0x78] sm:$0xff] %vm1085_vm2, %v996_v42  ;;  %7061 = vmatmul.msk.f32.gmra.mxu2 %vm1085_vm2, %v1201_v43  ;;  %v268_v43 = vld [vmem:[%s7714_s27 + $0x158] sm:$0xff] }
 0x10f   : > { %v717_v15 = vpop.f32.mrf.mxu0 }
 0x110   : > { %v718_v44 = vadd.f32 %v7775_v22, %v717_v15 }
 0x112   : > { %v997_v45 = vmax.f32 %v718_v44, 0.0  ;;  %6906 = vmatmul.msk.f32.gmra.mxu0 %vm335_vm1, %v257_v16 }
 0x114   : > { %1102 = vst.msk [vmem:[#allocation2 + $0x80] sm:$0xff] %vm1085_vm2, %v997_v45 }
 0x117   : > { %v720_v18 = vpop.f32.mrf.mxu0 }
 0x118   : > { %v721_v47 = vadd.f32 %v7775_v22, %v720_v18 }
 0x11a   : > { %v998_v19 = vmax.f32 %v721_v47, 0.0  ;;  %6907 = vmatmul.msk.f32.gmra.mxu0 %vm335_vm1, %v258_v46  ;;  %v269_v47 = vld [vmem:[%s7714_s27 + $0x160] sm:$0xff] }
 0x11b   : > { %v1202_v48 = vld [vmem:[#allocation2 + $0x80] sm:$0xff] }
 0x11c   : > { %1103 = vst.msk [vmem:[#allocation2 + $0x88] sm:$0xff] %vm1085_vm2, %v998_v19  ;;  %7062 = vmatmul.msk.f32.gmra.mxu2 %vm1085_vm2, %v1202_v48 }
 0x11f   : > { %v723_v49 = vpop.f32.mrf.mxu0  ;;  %v7917_v29 = vpop.f32.mrf.mxu2 }
 0x120   : > { %v724_v51 = vadd.f32 %v7775_v22, %v723_v49  ;;  %11068 = vst [vmem:[#allocation4_spill] sm:$0xff] %v7917_v29 }
 0x122   : > { %v999_v52 = vmax.f32 %v724_v51, 0.0  ;;  %6908 = vmatmul.msk.f32.gmra.mxu0 %vm335_vm1, %v259_v50 }
 0x123   : > { %v1278_v53 = vld [vmem:[#allocation2 + $0x81] sm:$0xff] }
 0x124   : > { %v1203_v54 = vld [vmem:[#allocation2 + $0x88] sm:$0xff]  ;;  %1104 = vst.msk [vmem:[#allocation2 + $0x90] sm:$0xff] %vm1085_vm2, %v999_v52  ;;  %6990 = vmatmul.msk.f32.vlgmr.msra.gmra.mxu1 %vm1085_vm2, %v1278_v53 }
 0x125   : > { %7063 = vmatmul.msk.f32.gmra.mxu2 %vm1085_vm2, %v1203_v54  ;;  %v270_v52 = vld [vmem:[%s7714_s27 + $0x168] sm:$0xff] }
 0x127   : > { %v726_v55 = vpop.f32.mrf.mxu0  ;;  %v7926_v38 = vpop.f32.mrf.mxu2 }
 0x128   : > { %v727_v57 = vadd.f32 %v7775_v22, %v726_v55  ;;  %11069 = vst [vmem:[#allocation5_spill] sm:$0xff] %v7926_v38 }
 0x12a   : > { %v1000_v58 = vmax.f32 %v727_v57, 0.0  ;;  %6909 = vmatmul.msk.f32.gmra.mxu0 %vm335_vm1, %v260_v56 }
 0x12b   : > { %v1279_v59 = vld [vmem:[#allocation2 + $0x89] sm:$0xff] }
 0x12c   : > { %v1204_v60 = vld [vmem:[#allocation2 + $0x90] sm:$0xff]  ;;  %1105 = vst.msk [vmem:[#allocation2 + $0x98] sm:$0xff] %vm1085_vm2, %v1000_v58  ;;  %6991 = vmatmul.msk.f32.gmra.mxu1 %vm1085_vm2, %v1279_v59 }
 0x12d   : > { %7064 = vmatmul.msk.f32.gmra.mxu2 %vm1085_vm2, %v1204_v60  ;;  %v271_v58 = vld [vmem:[%s7714_s27 + $0x170] sm:$0xff] }
 0x12f   : > { %v729_v61 = vpop.f32.mrf.mxu0  ;;  %v7935_v44 = vpop.f32.mrf.mxu2 }
 0x130   : > { %v730_v63 = vadd.f32 %v7775_v22, %v729_v61  ;;  %11070 = vst [vmem:[#allocation6_spill] sm:$0xff] %v7935_v44 }
 0x132   : > { %v1001_v0 = vmax.f32 %v730_v63, 0.0  ;;  %6910 = vmatmul.msk.f32.gmra.mxu0 %vm335_vm1, %v261_v62 }
 0x133   : > { %v1280_v1 = vld [vmem:[#allocation2 + $0x91] sm:$0xff] }
 0x134   : > { %1106 = vst.msk [vmem:[#allocation2 + $0xa0] sm:$0xff] %vm1085_vm2, %v1001_v0  ;;  %6992 = vmatmul.msk.f32.gmra.mxu1 %vm1085_vm2, %v1280_v1  ;;  %v272_v1 = vld [vmem:[%s7714_s27 + $0x178] sm:$0xff] }
 0x137   : > { %v732_v2 = vpop.f32.mrf.mxu0 }
 0x138   : > { %v733_v4 = vadd.f32 %v7775_v22, %v732_v2 }
 0x13a   : > { %v1002_v5 = vmax.f32 %v733_v4, 0.0  ;;  %6911 = vmatmul.msk.f32.gmra.mxu0 %vm335_vm1, %v262_v3 }
 0x13b   : > { %v1205_v6 = vld [vmem:[#allocation2 + $0xa0] sm:$0xff] }
 0x13c   : > { %1107 = vst.msk [vmem:[#allocation2 + $0xa8] sm:$0xff] %vm1085_vm2, %v1002_v5  ;;  %7065 = vmatmul.msk.f32.gmra.mxu2 %vm1085_vm2, %v1205_v6 }
 0x13f   : > { %v735_v7 = vpop.f32.mrf.mxu0  ;;  %v7943_v49 = vpop.f32.mrf.mxu2 }
 0x140   : > { %v736_v9 = vadd.f32 %v7775_v22, %v735_v7  ;;  %11071 = vst [vmem:[#allocation7_spill] sm:$0xff] %v7943_v49 }
 0x142   : > { %v1003_v10 = vmax.f32 %v736_v9, 0.0  ;;  %6912 = vmatmul.msk.f32.gmra.mxu0 %vm335_vm1, %v263_v8  ;;  %v273_v8 = vld [vmem:[%s7714_s27 + $0x180] sm:$0xff] }
 0x143   : > { %v1281_v11 = vld [vmem:[#allocation2 + $0xa1] sm:$0xff] }
 0x144   : > { %v1206_v12 = vld [vmem:[#allocation2 + $0xa8] sm:$0xff]  ;;  %1108 = vst.msk [vmem:[#allocation2 + $0xb0] sm:$0xff] %vm1085_vm2, %v1003_v10  ;;  %6993 = vmatmul.msk.f32.gmra.mxu1 %vm1085_vm2, %v1281_v11 }
 0x145   : > { %7066 = vmatmul.msk.f32.gmra.mxu2 %vm1085_vm2, %v1206_v12 }
 0x147   : > { %v738_v13 = vpop.f32.mrf.mxu0  ;;  %v7952_v56 = vpop.f32.mrf.mxu2 }
 0x148   : > { %v739_v17 = vadd.f32 %v7775_v22, %v738_v13  ;;  %11072 = vst [vmem:[#allocation8_spill] sm:$0xff] %v7952_v56  ;;  %v274_v13 = vld [vmem:[%s7714_s27 + $0x188] sm:$0xff] }
 0x14a   : > { %v1004_v20 = vmax.f32 %v739_v17, 0.0  ;;  %6913 = vmatmul.msk.f32.gmra.mxu0 %vm335_vm1, %v264_v14 }
 0x14b   : > { %v1282_v21 = vld [vmem:[#allocation2 + $0xa9] sm:$0xff] }
 0x14c   : > { %v1207_v23 = vld [vmem:[#allocation2 + $0xb0] sm:$0xff]  ;;  %1109 = vst.msk [vmem:[#allocation2 + $0xb8] sm:$0xff] %vm1085_vm2, %v1004_v20  ;;  %6994 = vmatmul.msk.f32.gmra.mxu1 %vm1085_vm2, %v1282_v21 }
 0x14d   : > { %7067 = vmatmul.msk.f32.gmra.mxu2 %vm1085_vm2, %v1207_v23 }
 0x14f   : > { %v741_v24 = vpop.f32.mrf.mxu0  ;;  %v7960_v63 = vpop.f32.mrf.mxu2 }
 0x150   : > { %v742_v26 = vadd.f32 %v7775_v22, %v741_v24  ;;  %11073 = vst [vmem:[#allocation9_spill] sm:$0xff] %v7960_v63  ;;  %v275_v24 = vld [vmem:[%s7714_s27 + $0x190] sm:$0xff] }
 0x152   : > { %v1005_v27 = vmax.f32 %v742_v26, 0.0  ;;  %6914 = vmatmul.msk.f32.gmra.mxu0 %vm335_vm1, %v265_v25 }
 0x153   : > { %v1283_v28 = vld [vmem:[#allocation2 + $0xb1] sm:$0xff] }
 0x154   : > { %1110 = vst.msk [vmem:[#allocation2 + $0xc0] sm:$0xff] %vm1085_vm2, %v1005_v27  ;;  %6995 = vmatmul.msk.f32.gmra.mxu1 %vm1085_vm2, %v1283_v28 }
 0x157   : > { %v744_v30 = vpop.f32.mrf.mxu0 }
 0x158   : > { %v745_v32 = vadd.f32 %v7775_v22, %v744_v30 }
 0x15a   : > { %v1006_v33 = vmax.f32 %v745_v32, 0.0  ;;  %6915 = vmatmul.msk.f32.gmra.mxu0 %vm335_vm1, %v266_v31  ;;  %v276_v32 = vld [vmem:[%s7714_s27 + $0x198] sm:$0xff] }
 0x15b   : > { %v1208_v34 = vld [vmem:[#allocation2 + $0xc0] sm:$0xff] }
 0x15c   : > { %1111 = vst.msk [vmem:[#allocation2 + $0xc8] sm:$0xff] %vm1085_vm2, %v1006_v33  ;;  %7068 = vmatmul.msk.f32.gmra.mxu2 %vm1085_vm2, %v1208_v34 }
 0x15f   : > { %v747_v35 = vpop.f32.mrf.mxu0  ;;  %v7968_v6 = vpop.f32.mrf.mxu2 }
 0x160   : > { %v748_v37 = vadd.f32 %v7775_v22, %v747_v35  ;;  %11074 = vst [vmem:[#allocation10_spill] sm:$0xff] %v7968_v6 }
 0x162   : > { %v1007_v39 = vmax.f32 %v748_v37, 0.0  ;;  %6916 = vmatmul.msk.f32.gmra.mxu0 %vm335_vm1, %v267_v36 }
 0x163   : > { %v1284_v40 = vld [vmem:[#allocation2 + $0xc1] sm:$0xff] }
 0x164   : > { %v1209_v41 = vld [vmem:[#allocation2 + $0xc8] sm:$0xff]  ;;  %1112 = vst.msk [vmem:[#allocation2 + $0xd0] sm:$0xff] %vm1085_vm2, %v1007_v39  ;;  %6996 = vmatmul.msk.f32.gmra.mxu1 %vm1085_vm2, %v1284_v40  ;;  %v277_v40 = vld [vmem:[%s7714_s27 + $0x1a0] sm:$0xff] }
 0x165   : > { %7069 = vmatmul.msk.f32.gmra.mxu2 %vm1085_vm2, %v1209_v41 }
 0x167   : > { %v750_v42 = vpop.f32.mrf.mxu0  ;;  %v7977_v17 = vpop.f32.mrf.mxu2 }
 0x168   : > { %v751_v15 = vadd.f32 %v7775_v22, %v750_v42  ;;  %11075 = vst [vmem:[#allocation11_spill] sm:$0xff] %v7977_v17 }
 0x16a   : > { %v1008_v16 = vmax.f32 %v751_v15, 0.0  ;;  %6917 = vmatmul.msk.f32.gmra.mxu0 %vm335_vm1, %v268_v43 }
 0x16b   : > { %v1285_v45 = vld [vmem:[#allocation2 + $0xc9] sm:$0xff] }
 0x16c   : > { %v1210_v18 = vld [vmem:[#allocation2 + $0xd0] sm:$0xff]  ;;  %1113 = vst.msk [vmem:[#allocation2 + $0xd8] sm:$0xff] %vm1085_vm2, %v1008_v16  ;;  %6997 = vmatmul.msk.f32.gmra.mxu1 %vm1085_vm2, %v1285_v45  ;;  %v278_v45 = vld [vmem:[%s7714_s27 + $0x1a8] sm:$0xff] }
 0x16d   : > { %7070 = vmatmul.msk.f32.gmra.mxu2 %vm1085_vm2, %v1210_v18 }
 0x16f   : > { %v753_v46 = vpop.f32.mrf.mxu0  ;;  %v7985_v27 = vpop.f32.mrf.mxu2 }
 0x170   : > { %v754_v19 = vadd.f32 %v7775_v22, %v753_v46  ;;  %11076 = vst [vmem:[#allocation12_spill] sm:$0xff] %v7985_v27  ;;  %v8590_v27 = vld [vmem:[#allocation2 + $0xa0] sm:$0xff] }
 0x172   : > { %v1009_v48 = vmax.f32 %v754_v19, 0.0  ;;  %6918 = vmatmul.msk.f32.gmra.mxu0 %vm335_vm1, %v269_v47 }
 0x173   : > { %v1286_v50 = vld [vmem:[#allocation2 + $0xd1] sm:$0xff] }
 0x174   : > { %1114 = vst.msk [vmem:[#allocation2 + $0xe0] sm:$0xff] %vm1085_vm2, %v1009_v48  ;;  %6998 = vmatmul.msk.f32.gmra.mxu1 %vm1085_vm2, %v1286_v50  ;;  %v279_v50 = vld [vmem:[%s7714_s27 + $0x1b0] sm:$0xff] }
 0x177   : > { %v756_v51 = vpop.f32.mrf.mxu0 }
 0x178   : > { %v757_v53 = vadd.f32 %v7775_v22, %v756_v51 }
 0x17a   : > { %v1010_v54 = vmax.f32 %v757_v53, 0.0  ;;  %6919 = vmatmul.msk.f32.gmra.mxu0 %vm335_vm1, %v270_v52 }
 0x17b   : > { %v1211_v55 = vld [vmem:[#allocation2 + $0xe0] sm:$0xff] }
 0x17c   : > { %1115 = vst.msk [vmem:[#allocation2 + $0xe8] sm:$0xff] %vm1085_vm2, %v1010_v54  ;;  %7071 = vmatmul.msk.f32.gmra.mxu2 %vm1085_vm2, %v1211_v55 }
 0x17f   : > { %v759_v57 = vpop.f32.mrf.mxu0  ;;  %v7993_v35 = vpop.f32.mrf.mxu2 }
 0x180   : > { %v760_v59 = vadd.f32 %v7775_v22, %v759_v57  ;;  %11077 = vst [vmem:[#allocation13_spill] sm:$0xff] %v7993_v35  ;;  %v1267_v35 = vld [vmem:[#allocation2 + $0x9] sm:$0xff] }
 0x182   : > { %v1011_v60 = vmax.f32 %v760_v59, 0.0  ;;  %6920 = vmatmul.msk.f32.gmra.mxu0 %vm335_vm1, %v271_v58  ;;  %v280_v58 = vld [vmem:[%s7714_s27 + $0x1b8] sm:$0xff] }
 0x183   : > { %v1287_v61 = vld [vmem:[#allocation2 + $0xe1] sm:$0xff] }
 0x184   : > { %v1212_v62 = vld [vmem:[#allocation2 + $0xe8] sm:$0xff]  ;;  %1116 = vst.msk [vmem:[#allocation2 + $0xf0] sm:$0xff] %vm1085_vm2, %v1011_v60  ;;  %6999 = vmatmul.msk.f32.gmra.mxu1 %vm1085_vm2, %v1287_v61 }
 0x185   : > { %7072 = vmatmul.msk.f32.gmra.mxu2 %vm1085_vm2, %v1212_v62 }
 0x187   : > { %v762_v0 = vpop.f32.mrf.mxu0  ;;  %v8003_v15 = vpop.f32.mrf.mxu2 }
 0x188   : > { %v763_v2 = vadd.f32 %v7775_v22, %v762_v0  ;;  %11078 = vst [vmem:[#allocation14_spill] sm:$0xff] %v8003_v15 }
 0x18a   : > { %v1012_v3 = vmax.f32 %v763_v2, 0.0  ;;  %6921 = vmatmul.msk.f32.gmra.mxu0 %vm335_vm1, %v272_v1  ;;  %v281_v1 = vld [vmem:[%s7714_s27 + $0x1c0] sm:$0xff] }
 0x18b   : > { %v1288_v4 = vld [vmem:[#allocation2 + $0xe9] sm:$0xff] }
 0x18c   : > { %v1213_v5 = vld [vmem:[#allocation2 + $0xf0] sm:$0xff]  ;;  %1117 = vst.msk [vmem:[#allocation2 + $0xf8] sm:$0xff] %vm1085_vm2, %v1012_v3  ;;  %7000 = vmatmul.msk.f32.gmra.mxu1 %vm1085_vm2, %v1288_v4 }
 0x18d   : > { %7073 = vmatmul.msk.f32.gmra.mxu2 %vm1085_vm2, %v1213_v5  ;;  %v8738_v38 = vld [vmem:[#allocation2 + $0xf0] sm:$0xff] }
 0x18f   : > { %v765_v7 = vpop.f32.mrf.mxu0  ;;  %v8010_v19 = vpop.f32.mrf.mxu2 }
 0x190   : > { %v766_v9 = vadd.f32 %v7775_v22, %v765_v7  ;;  %11079 = vst [vmem:[#allocation15_spill] sm:$0xff] %v8010_v19 }
 0x192   : > { %v1013_v10 = vmax.f32 %v766_v9, 0.0  ;;  %6922 = vmatmul.msk.f32.gmra.mxu0 %vm335_vm1, %v273_v8  ;;  %v282_v8 = vld [vmem:[%s7714_s27 + $0x1c8] sm:$0xff] }
 0x193   : > { %v1289_v11 = vld [vmem:[#allocation2 + $0xf1] sm:$0xff] }
 0x194   : > { %1118 = vst.msk [vmem:[#allocation2 + $0x100] sm:$0xff] %vm1085_vm2, %v1013_v10  ;;  %7001 = vmatmul.msk.f32.gmra.mxu1 %vm1085_vm2, %v1289_v11 }
 0x197   : > { %v768_v12 = vpop.f32.mrf.mxu0 }
 0x198   : > { %v769_v14 = vadd.f32 %v7775_v22, %v768_v12 }
 0x19a   : > { %v1014_v20 = vmax.f32 %v769_v14, 0.0  ;;  %6923 = vmatmul.msk.f32.gmra.mxu0 %vm335_vm1, %v274_v13 }
 0x19b   : > { %v1214_v21 = vld [vmem:[#allocation2 + $0x100] sm:$0xff] }
 0x19c   : > { %1119 = vst.msk [vmem:[#allocation2 + $0x108] sm:$0xff] %vm1085_vm2, %v1014_v20  ;;  %7074 = vmatmul.msk.f32.gmra.mxu2 %vm1085_vm2, %v1214_v21  ;;  %v283_v20 = vld [vmem:[%s7714_s27 + $0x1d0] sm:$0xff] }
 0x19f   : > { %v771_v23 = vpop.f32.mrf.mxu0  ;;  %v8018_v55 = vpop.f32.mrf.mxu2 }
 0x1a0   : > { %v772_v25 = vadd.f32 %v7775_v22, %v771_v23  ;;  %11080 = vst [vmem:[#allocation16_spill] sm:$0xff] %v8018_v55 }
 0x1a1   : > { %v8034_v9 = vpop.f32.mrf.mxu1 }
 0x1a2   : > { %v1015_v26 = vmax.f32 %v772_v25, 0.0  ;;  %6924 = vmatmul.msk.f32.gmra.mxu0 %vm335_vm1, %v275_v24  ;;  %11082 = vst [vmem:[#allocation18_spill] sm:$0xff] %v8034_v9 }
 0x1a3   : > { %v1290_v28 = vld [vmem:[#allocation2 + $0x101] sm:$0xff] }
 0x1a4   : > { %v1215_v30 = vld [vmem:[#allocation2 + $0x108] sm:$0xff]  ;;  %1120 = vst.msk [vmem:[#allocation2 + $0x110] sm:$0xff] %vm1085_vm2, %v1015_v26  ;;  %7002 = vmatmul.msk.f32.gmra.mxu1 %vm1085_vm2, %v1290_v28 }
 0x1a5   : > { %7075 = vmatmul.msk.f32.gmra.mxu2 %vm1085_vm2, %v1215_v30 }
 0x1a7   : > { %v774_v31 = vpop.f32.mrf.mxu0 }
 0x1a8   : > { %v775_v33 = vadd.f32 %v7775_v22, %v774_v31  ;;  %v8028_v3 = vpop.f32.mrf.mxu2  ;;  %v284_v31 = vld [vmem:[%s7714_s27 + $0x1d8] sm:$0xff] }
 0x1a9   : > { %11081 = vst [vmem:[#allocation17_spill] sm:$0xff] %v8028_v3  ;;  %v8044_v23 = vpop.f32.mrf.mxu1 }
 0x1aa   : > { %v1016_v34 = vmax.f32 %v775_v33, 0.0  ;;  %6925 = vmatmul.msk.f32.gmra.mxu0 %vm335_vm1, %v276_v32  ;;  %11084 = vst [vmem:[#allocation20_spill] sm:$0xff] %v8044_v23 }
 0x1ab   : > { %v1291_v36 = vld [vmem:[#allocation2 + $0x109] sm:$0xff] }
 0x1ac   : > { %v1216_v37 = vld [vmem:[#allocation2 + $0x110] sm:$0xff]  ;;  %1121 = vst.msk [vmem:[#allocation2 + $0x118] sm:$0xff] %vm1085_vm2, %v1016_v34  ;;  %7003 = vmatmul.msk.f32.gmra.mxu1 %vm1085_vm2, %v1291_v36 }
 0x1ad   : > { %7076 = vmatmul.msk.f32.gmra.mxu2 %vm1085_vm2, %v1216_v37 }
 0x1af   : > { %v777_v39 = vpop.f32.mrf.mxu0 }
 0x1b0   : > { %v778_v41 = vadd.f32 %v7775_v22, %v777_v39  ;;  %v8038_v12 = vpop.f32.mrf.mxu2 }
 0x1b1   : > { %11083 = vst [vmem:[#allocation19_spill] sm:$0xff] %v8038_v12  ;;  %v8055_v37 = vpop.f32.mrf.mxu1 }
 0x1b2   : > { %v1017_v42 = vmax.f32 %v778_v41, 0.0  ;;  %6926 = vmatmul.msk.f32.gmra.mxu0 %vm335_vm1, %v277_v40  ;;  %11086 = vst [vmem:[#allocation22_spill] sm:$0xff] %v8055_v37  ;;  %v285_v41 = vld [vmem:[%s7714_s27 + $0x1e0] sm:$0xff]  ;;  %v8529_v37 = vld [vmem:[#allocation2 + $0x70] sm:$0xff] }
 0x1b3   : > { %v1292_v43 = vld [vmem:[#allocation2 + $0x111] sm:$0xff] }
 0x1b4   : > { %1122 = vst.msk [vmem:[#allocation2 + $0x120] sm:$0xff] %vm1085_vm2, %v1017_v42  ;;  %7004 = vmatmul.msk.f32.gmra.mxu1 %vm1085_vm2, %v1292_v43 }
 0x1b7   : > { %v780_v16 = vpop.f32.mrf.mxu0 }
 0x1b8   : > { %v781_v18 = vadd.f32 %v7775_v22, %v780_v16 }
 0x1ba   : > { %v1018_v46 = vmax.f32 %v781_v18, 0.0  ;;  %6927 = vmatmul.msk.f32.gmra.mxu0 %vm335_vm1, %v278_v45 }
 0x1bb   : > { %v1217_v47 = vld [vmem:[#allocation2 + $0x120] sm:$0xff] }
 0x1bc   : > { %1123 = vst.msk [vmem:[#allocation2 + $0x128] sm:$0xff] %vm1085_vm2, %v1018_v46  ;;  %7077 = vmatmul.msk.f32.gmra.mxu2 %vm1085_vm2, %v1217_v47  ;;  %v286_v47 = vld [vmem:[%s7714_s27 + $0x1e8] sm:$0xff] }
 0x1bf   : > { %v783_v48 = vpop.f32.mrf.mxu0  ;;  %v8047_v25 = vpop.f32.mrf.mxu2 }
 0x1c0   : > { %v784_v51 = vadd.f32 %v7775_v22, %v783_v48  ;;  %11085 = vst [vmem:[#allocation21_spill] sm:$0xff] %v8047_v25 }
 0x1c1   : > { %v8065_v45 = vpop.f32.mrf.mxu1 }
 0x1c2   : > { %v1019_v52 = vmax.f32 %v784_v51, 0.0  ;;  %6928 = vmatmul.msk.f32.gmra.mxu0 %vm335_vm1, %v279_v50  ;;  %11088 = vst [vmem:[#allocation24_spill] sm:$0xff] %v8065_v45 }
 0x1c3   : > { %v1293_v53 = vld [vmem:[#allocation2 + $0x121] sm:$0xff] }
 0x1c4   : > { %v1218_v54 = vld [vmem:[#allocation2 + $0x128] sm:$0xff]  ;;  %1124 = vst.msk [vmem:[#allocation2 + $0x130] sm:$0xff] %vm1085_vm2, %v1019_v52  ;;  %7005 = vmatmul.msk.f32.gmra.mxu1 %vm1085_vm2, %v1293_v53 }
 0x1c5   : > { %7078 = vmatmul.msk.f32.gmra.mxu2 %vm1085_vm2, %v1218_v54 }
 0x1c7   : > { %v786_v57 = vpop.f32.mrf.mxu0 }
 0x1c8   : > { %v787_v59 = vadd.f32 %v7775_v22, %v786_v57  ;;  %v8060_v39 = vpop.f32.mrf.mxu2  ;;  %v287_v57 = vld [vmem:[%s7714_s27 + $0x1f0] sm:$0xff] }
 0x1c9   : > { %11087 = vst [vmem:[#allocation23_spill] sm:$0xff] %v8060_v39  ;;  %v8076_v52 = vpop.f32.mrf.mxu1 }
 0x1ca   : > { %v1020_v60 = vmax.f32 %v787_v59, 0.0  ;;  %6929 = vmatmul.msk.f32.gmra.mxu0 %vm335_vm1, %v280_v58  ;;  %11090 = vst [vmem:[#allocation26_spill] sm:$0xff] %v8076_v52 }
 0x1cb   : > { %v1294_v61 = vld [vmem:[#allocation2 + $0x129] sm:$0xff] }
 0x1cc   : > { %v1219_v62 = vld [vmem:[#allocation2 + $0x130] sm:$0xff]  ;;  %1125 = vst.msk [vmem:[#allocation2 + $0x138] sm:$0xff] %vm1085_vm2, %v1020_v60  ;;  %7006 = vmatmul.msk.f32.gmra.mxu1 %vm1085_vm2, %v1294_v61 }
 0x1cd   : > { %7079 = vmatmul.msk.f32.gmra.mxu2 %vm1085_vm2, %v1219_v62 }
 0x1cf   : > { %v789_v0 = vpop.f32.mrf.mxu0 }
 0x1d0   : > { %v790_v2 = vadd.f32 %v7775_v22, %v789_v0  ;;  %v8069_v18 = vpop.f32.mrf.mxu2  ;;  %v288_v0 = vld [vmem:[%s7714_s27 + $0x1f8] sm:$0xff] }
 0x1d1   : > { %11089 = vst [vmem:[#allocation25_spill] sm:$0xff] %v8069_v18 }
 0x1d2   : > { %v1021_v4 = vmax.f32 %v790_v2, 0.0  ;;  %6930 = vmatmul.msk.f32.gmra.mxu0 %vm335_vm1, %v281_v1  ;;  %v8087_v1 = vpop.f32.mrf.mxu1 }
 0x1d3   : > { %v1295_v5 = vld [vmem:[#allocation2 + $0x131] sm:$0xff]  ;;  %11092 = vst [vmem:[#allocation28_spill] sm:$0xff] %v8087_v1  ;;  %v8512_v1 = vld [vmem:[#allocation2 + $0x68] sm:$0xff] }
 0x1d4   : > { %1126 = vst.msk [vmem:[#allocation2 + $0x140] sm:$0xff] %vm1085_vm2, %v1021_v4  ;;  %7007 = vmatmul.msk.f32.gmra.mxu1 %vm1085_vm2, %v1295_v5  ;;  %v3461_v23 = vld [vmem:[#allocation2 + $0x131] sm:$0xff] }
 0x1d7   : > { %v792_v7 = vpop.f32.mrf.mxu0 }
 0x1d8   : > { %v793_v10 = vadd.f32 %v7775_v22, %v792_v7 }
 0x1da   : > { %v1022_v11 = vmax.f32 %v793_v10, 0.0  ;;  %6931 = vmatmul.msk.f32.gmra.mxu0 %vm335_vm1, %v282_v8 }
 0x1db   : > { %v1220_v13 = vld [vmem:[#allocation2 + $0x140] sm:$0xff] }
 0x1dc   : > { %1127 = vst.msk [vmem:[#allocation2 + $0x148] sm:$0xff] %vm1085_vm2, %v1022_v11  ;;  %7080 = vmatmul.msk.f32.gmra.mxu2 %vm1085_vm2, %v1220_v13  ;;  %v289_v11 = vld [vmem:[%s7714_s27 + $0x200] sm:$0xff] }
 0x1df   : > { %v795_v14 = vpop.f32.mrf.mxu0  ;;  %v8078_v53 = vpop.f32.mrf.mxu2 }
 0x1e0   : > { %v796_v21 = vadd.f32 %v7775_v22, %v795_v14  ;;  %11091 = vst [vmem:[#allocation27_spill] sm:$0xff] %v8078_v53 }
 0x1e1   : > { %v8097_v13 = vpop.f32.mrf.mxu1 }
 0x1e2   : > { %v1023_v24 = vmax.f32 %v796_v21, 0.0  ;;  %6932 = vmatmul.msk.f32.gmra.mxu0 %vm335_vm1, %v283_v20  ;;  %11094 = vst [vmem:[#allocation30_spill] sm:$0xff] %v8097_v13 }
 0x1e3   : > { %v1296_v26 = vld [vmem:[#allocation2 + $0x141] sm:$0xff] }
 0x1e4   : > { %v1221_v28 = vld [vmem:[#allocation2 + $0x148] sm:$0xff]  ;;  %1128 = vst.msk [vmem:[#allocation2 + $0x150] sm:$0xff] %vm1085_vm2, %v1023_v24  ;;  %7008 = vmatmul.msk.f32.gmra.mxu1 %vm1085_vm2, %v1296_v26 }
 0x1e5   : > { %7081 = vmatmul.msk.f32.gmra.mxu2 %vm1085_vm2, %v1221_v28  ;;  %v290_v28 = vld [vmem:[%s7714_s27 + $0x208] sm:$0xff] }
 0x1e7   : > { %v798_v30 = vpop.f32.mrf.mxu0 }
 0x1e8   : > { %v799_v32 = vadd.f32 %v7775_v22, %v798_v30  ;;  %v8090_v4 = vpop.f32.mrf.mxu2 }
 0x1e9   : > { %11093 = vst [vmem:[#allocation29_spill] sm:$0xff] %v8090_v4  ;;  %v323_v4 = vld [vmem:[%s7714_s27 + $0x310] sm:$0xff] }
 0x1ea   : > { %v1024_v33 = vmax.f32 %v799_v32, 0.0  ;;  %6933 = vmatmul.msk.f32.gmra.mxu0 %vm335_vm1, %v284_v31  ;;  %v8107_v31 = vpop.f32.mrf.mxu1 }
 0x1eb   : > { %v1297_v34 = vld [vmem:[#allocation2 + $0x149] sm:$0xff]  ;;  %11096 = vst [vmem:[#allocation32_spill] sm:$0xff] %v8107_v31 }
 0x1ec   : > { %v1222_v36 = vld [vmem:[#allocation2 + $0x150] sm:$0xff]  ;;  %1129 = vst.msk [vmem:[#allocation2 + $0x158] sm:$0xff] %vm1085_vm2, %v1024_v33  ;;  %7009 = vmatmul.msk.f32.gmra.mxu1 %vm1085_vm2, %v1297_v34 }
 0x1ed   : > { %7082 = vmatmul.msk.f32.gmra.mxu2 %vm1085_vm2, %v1222_v36 }
 0x1ef   : > { %v801_v40 = vpop.f32.mrf.mxu0 }
 0x1f0   : > { %v802_v42 = vadd.f32 %v7775_v22, %v801_v40  ;;  %v8101_v21 = vpop.f32.mrf.mxu2  ;;  %v291_v40 = vld [vmem:[%s7714_s27 + $0x210] sm:$0xff] }
 0x1f1   : > { %11095 = vst [vmem:[#allocation31_spill] sm:$0xff] %v8101_v21 }
 0x1f2   : > { %v1025_v43 = vmax.f32 %v802_v42, 0.0  ;;  %6934 = vmatmul.msk.f32.gmra.mxu0 %vm335_vm1, %v285_v41 }
 0x1f3   : > { %v1298_v16 = vld [vmem:[#allocation2 + $0x151] sm:$0xff] }
 0x1f4   : > { %1130 = vst.msk [vmem:[#allocation2 + $0x160] sm:$0xff] %vm1085_vm2, %v1025_v43  ;;  %7010 = vmatmul.msk.f32.gmra.mxu1 %vm1085_vm2, %v1298_v16 }
 0x1f7   : > { %v804_v46 = vpop.f32.mrf.mxu0 }
 0x1f8   : > { %v805_v48 = vadd.f32 %v7775_v22, %v804_v46  ;;  %v8117_v46 = vpop.f32.mrf.mxu1 }
 0x1f9   : > { %11098 = vst [vmem:[#allocation34_spill] sm:$0xff] %v8117_v46 }
 0x1fa   : > { %v1026_v50 = vmax.f32 %v805_v48, 0.0  ;;  %6935 = vmatmul.msk.f32.gmra.mxu0 %vm335_vm1, %v286_v47 }
 0x1fb   : > { %v1223_v51 = vld [vmem:[#allocation2 + $0x160] sm:$0xff] }
 0x1fc   : > { %1131 = vst.msk [vmem:[#allocation2 + $0x168] sm:$0xff] %vm1085_vm2, %v1026_v50  ;;  %7083 = vmatmul.msk.f32.gmra.mxu2 %vm1085_vm2, %v1223_v51  ;;  %v292_v50 = vld [vmem:[%s7714_s27 + $0x218] sm:$0xff] }
 0x1ff   : > { %v807_v54 = vpop.f32.mrf.mxu0  ;;  %v8110_v33 = vpop.f32.mrf.mxu2 }
 0x200   : > { %v808_v58 = vadd.f32 %v7775_v22, %v807_v54  ;;  %11097 = vst [vmem:[#allocation33_spill] sm:$0xff] %v8110_v33  ;;  %v3457_v33 = vld [vmem:[#allocation2 + $0x109] sm:$0xff] }
 0x202   : > { %v1027_v59 = vmax.f32 %v808_v58, 0.0  ;;  %6936 = vmatmul.msk.f32.gmra.mxu0 %vm335_vm1, %v287_v57 }
 0x203   : > { %v1299_v60 = vld [vmem:[#allocation2 + $0x161] sm:$0xff] }
 0x204   : > { %v1224_v61 = vld [vmem:[#allocation2 + $0x168] sm:$0xff]  ;;  %1132 = vst.msk [vmem:[#allocation2 + $0x170] sm:$0xff] %vm1085_vm2, %v1027_v59  ;;  %7011 = vmatmul.msk.f32.gmra.mxu1 %vm1085_vm2, %v1299_v60  ;;  %v8127_v59 = vpop.f32.mrf.mxu1 }
 0x205   : > { %7084 = vmatmul.msk.f32.gmra.mxu2 %vm1085_vm2, %v1224_v61  ;;  %11100 = vst [vmem:[#allocation36_spill] sm:$0xff] %v8127_v59  ;;  %v3465_v17 = vld [vmem:[#allocation2 + $0x161] sm:$0xff] }
 0x207   : > { %v810_v62 = vpop.f32.mrf.mxu0 }
 0x208   : > { %v811_v2 = vadd.f32 %v7775_v22, %v810_v62  ;;  %v8122_v47 = vpop.f32.mrf.mxu2  ;;  %v293_v62 = vld [vmem:[%s7714_s27 + $0x220] sm:$0xff] }
 0x209   : > { %11099 = vst [vmem:[#allocation35_spill] sm:$0xff] %v8122_v47  ;;  %v8465_v47 = vld [vmem:[#allocation2 + $0x48] sm:$0xff] }
 0x20a   : > { %v1028_v5 = vmax.f32 %v811_v2, 0.0  ;;  %6937 = vmatmul.msk.f32.gmra.mxu0 %vm335_vm1, %v288_v0 }
 0x20b   : > { %v1300_v7 = vld [vmem:[#allocation2 + $0x169] sm:$0xff] }
 0x20c   : > { %v1225_v8 = vld [vmem:[#allocation2 + $0x170] sm:$0xff]  ;;  %1133 = vst.msk [vmem:[#allocation2 + $0x178] sm:$0xff] %vm1085_vm2, %v1028_v5  ;;  %7012 = vmatmul.msk.f32.gmra.mxu1 %vm1085_vm2, %v1300_v7  ;;  %v8139_v7 = vpop.f32.mrf.mxu1 }
 0x20d   : > { %7085 = vmatmul.msk.f32.gmra.mxu2 %vm1085_vm2, %v1225_v8  ;;  %11102 = vst [vmem:[#allocation38_spill] sm:$0xff] %v8139_v7  ;;  %v322_v7 = vld [vmem:[%s7714_s27 + $0x308] sm:$0xff] }
 0x20f   : > { %v813_v10 = vpop.f32.mrf.mxu0 }
 0x210   : > { %v814_v14 = vadd.f32 %v7775_v22, %v813_v10  ;;  %v8132_v60 = vpop.f32.mrf.mxu2 }
 0x211   : > { %11101 = vst [vmem:[#allocation37_spill] sm:$0xff] %v8132_v60 }
 0x212   : > { %v1029_v20 = vmax.f32 %v814_v14, 0.0  ;;  %6938 = vmatmul.msk.f32.gmra.mxu0 %vm335_vm1, %v289_v11  ;;  %v294_v11 = vld [vmem:[%s7714_s27 + $0x228] sm:$0xff] }
 0x213   : > { %v1301_v24 = vld [vmem:[#allocation2 + $0x171] sm:$0xff] }
 0x214   : > { %1134 = vst.msk [vmem:[#allocation2 + $0x180] sm:$0xff] %vm1085_vm2, %v1029_v20  ;;  %7013 = vmatmul.msk.f32.gmra.mxu1 %vm1085_vm2, %v1301_v24 }
 0x217   : > { %v816_v26 = vpop.f32.mrf.mxu0 }
 0x218   : > { %v817_v30 = vadd.f32 %v7775_v22, %v816_v26 }
 0x21a   : > { %v1030_v32 = vmax.f32 %v817_v30, 0.0  ;;  %6939 = vmatmul.msk.f32.gmra.mxu0 %vm335_vm1, %v290_v28  ;;  %v295_v28 = vld [vmem:[%s7714_s27 + $0x230] sm:$0xff]  ;;  %v8149_v30 = vpop.f32.mrf.mxu1 }
 0x21b   : > { %v1226_v34 = vld [vmem:[#allocation2 + $0x180] sm:$0xff]  ;;  %11104 = vst [vmem:[#allocation40_spill] sm:$0xff] %v8149_v30 }
 0x21c   : > { %1135 = vst.msk [vmem:[#allocation2 + $0x188] sm:$0xff] %vm1085_vm2, %v1030_v32  ;;  %7086 = vmatmul.msk.f32.gmra.mxu2 %vm1085_vm2, %v1226_v34  ;;  %v8154_v32 = vld [vmem:[%s11064_s2] ss:$0 sm:$0xff] }
 0x21f   : > { %v819_v36 = vpop.f32.mrf.mxu0  ;;  %v8141_v8 = vpop.f32.mrf.mxu2 }
 0x220   : > { %v820_v41 = vadd.f32 %v7775_v22, %v819_v36  ;;  %11103 = vst [vmem:[#allocation39_spill] sm:$0xff] %v8141_v8 }
 0x222   : > { %v1031_v42 = vmax.f32 %v820_v41, 0.0  ;;  %6940 = vmatmul.msk.f32.gmra.mxu0 %vm335_vm1, %v291_v40 }
 0x223   : > { %v1302_v43 = vld [vmem:[#allocation2 + $0x181] sm:$0xff] }
 0x224   : > { %v1227_v16 = vld [vmem:[#allocation2 + $0x188] sm:$0xff]  ;;  %1136 = vst.msk [vmem:[#allocation2 + $0x190] sm:$0xff] %vm1085_vm2, %v1031_v42  ;;  %7014 = vmatmul.msk.f32.gmra.mxu1 %vm1085_vm2, %v1302_v43  ;;  %v3510_v42 = vld [vmem:[%s11065_s3 + $0x98] sm:$0xff]  ;;  %v3509_v43 = vld [vmem:[%s11065_s3 + $0x90] sm:$0xff] }
 0x225   : > { %7087 = vmatmul.msk.f32.gmra.mxu2 %vm1085_vm2, %v1227_v16 }
 0x226   : > { %3739 = vmatpush.msrb.mxu2 %v3510_v42 }
 0x227   : > { %v822_v48 = vpop.f32.mrf.mxu0 }
 0x228   : > { %v823_v51 = vadd.f32 %v7775_v22, %v822_v48  ;;  %v8157_v34 = vpop.f32.mrf.mxu2  ;;  %v296_v48 = vld [vmem:[%s7714_s27 + $0x238] sm:$0xff]  ;;  %3740 = vmatpush.msrb.mxu2 %v3509_v43 }
 0x229   : > { %11105 = vst [vmem:[#allocation41_spill] sm:$0xff] %v8157_v34  ;;  %v319_v34 = vld [vmem:[%s7714_s27 + $0x2f0] sm:$0xff] }
 0x22a   : > { %v1032_v54 = vmax.f32 %v823_v51, 0.0  ;;  %6941 = vmatmul.msk.f32.gmra.mxu0 %vm335_vm1, %v292_v50  ;;  %v8170_v50 = vpop.f32.mrf.mxu1 }
 0x22b   : > { %v1303_v57 = vld [vmem:[#allocation2 + $0x189] sm:$0xff]  ;;  %11106 = vst [vmem:[#allocation42_spill] sm:$0xff] %v8170_v50 }
 0x22c   : > { %v1228_v58 = vld [vmem:[#allocation2 + $0x190] sm:$0xff]  ;;  %1137 = vst.msk [vmem:[#allocation2 + $0x198] sm:$0xff] %vm1085_vm2, %v1032_v54  ;;  %7015 = vmatmul.msk.f32.gmra.mxu1 %vm1085_vm2, %v1303_v57  ;;  %v3508_v54 = vld [vmem:[%s11065_s3 + $0x88] sm:$0xff] }
 0x22d   : > { %7088 = vmatmul.msk.f32.gmra.mxu2 %vm1085_vm2, %v1228_v58  ;;  %v3507_v58 = vld [vmem:[%s11065_s3 + $0x80] sm:$0xff]  ;;  %v3469_v56 = vld [vmem:[#allocation2 + $0x189] sm:$0xff] }
 0x22e   : > { %3741 = vmatpush.msrb.mxu2 %v3508_v54 }
 0x22f   : > { %v825_v61 = vpop.f32.mrf.mxu0 }
 0x230   : > { %v826_v0 = vadd.f32 %v7775_v22, %v825_v61  ;;  %v8180_v61 = vpop.f32.mrf.mxu2  ;;  %3742 = vmatpush.msrb.mxu2 %v3507_v58 }
 0x231   : > { %11107 = vst [vmem:[#allocation43_spill] sm:$0xff] %v8180_v61 }
 0x232   : > { %v1033_v2 = vmax.f32 %v826_v0, 0.0  ;;  %6942 = vmatmul.msk.f32.gmra.mxu0 %vm335_vm1, %v293_v62 }
 0x233   : > { %v1304_v5 = vld [vmem:[#allocation2 + $0x191] sm:$0xff] }
 0x234   : > { %1138 = vst.msk [vmem:[#allocation2 + $0x1a0] sm:$0xff] %vm1085_vm2, %v1033_v2  ;;  %7016 = vmatmul.msk.f32.gmra.mxu1 %vm1085_vm2, %v1304_v5  ;;  %v297_v5 = vld [vmem:[%s7714_s27 + $0x240] sm:$0xff] }
 0x237   : > { %v828_v10 = vpop.f32.mrf.mxu0 }
 0x238   : > { %v829_v14 = vadd.f32 %v7775_v22, %v828_v10 }
 0x23a   : > { %v1034_v20 = vmax.f32 %v829_v14, 0.0  ;;  %6943 = vmatmul.msk.f32.gmra.mxu0 %vm335_vm1, %v294_v11  ;;  %v8187_v11 = vpop.f32.mrf.mxu1 }
 0x23b   : > { %v1229_v24 = vld [vmem:[#allocation2 + $0x1a0] sm:$0xff]  ;;  %11108 = vst [vmem:[#allocation44_spill] sm:$0xff] %v8187_v11 }
 0x23c   : > { %1139 = vst.msk [vmem:[#allocation2 + $0x1a8] sm:$0xff] %vm1085_vm2, %v1034_v20  ;;  %7089 = vmatmul.msk.f32.gmra.mxu2 %vm1085_vm2, %v1229_v24 }
 0x23f   : > { %v831_v26 = vpop.f32.mrf.mxu0  ;;  %v8190_v20 = vpop.f32.mrf.mxu2 }
 0x240   : > { %v832_v22 = vadd.f32 %v8154_v32, %v831_v26  ;;  %11109 = vst [vmem:[#allocation45_spill] sm:$0xff] %v8190_v20 }
 0x242   : > { %v1035_v36 = vmax.f32 %v832_v22, 0.0  ;;  %6944 = vmatmul.msk.f32.gmra.mxu0 %vm335_vm1, %v295_v28  ;;  %v298_v28 = vld [vmem:[%s7714_s27 + $0x248] sm:$0xff] }
 0x243   : > { %v1305_v40 = vld [vmem:[#allocation2 + $0x1a1] sm:$0xff] }
 0x244   : > { %v1230_v41 = vld [vmem:[#allocation2 + $0x1a8] sm:$0xff]  ;;  %1140 = vst.msk [vmem:[#allocation2 + $0x1b0] sm:$0xff] %vm1085_vm2, %v1035_v36  ;;  %7017 = vmatmul.msk.f32.gmra.mxu1 %vm1085_vm2, %v1305_v40 }
 0x245   : > { %7090 = vmatmul.msk.f32.gmra.mxu2 %vm1085_vm2, %v1230_v41  ;;  %v8197_v41 = vpop.f32.mrf.mxu1 }
 0x246   : > { %11110 = vst [vmem:[#allocation46_spill] sm:$0xff] %v8197_v41  ;;  %v3451_v41 = vld [vmem:[#allocation2 + $0xc9] sm:$0xff] }
 0x247   : > { %v834_v16 = vpop.f32.mrf.mxu0 }
 0x248   : > { %v835_v51 = vadd.f32 %v8154_v32, %v834_v16  ;;  %v8201_v42 = vpop.f32.mrf.mxu2  ;;  %v299_v16 = vld [vmem:[%s7714_s27 + $0x250] sm:$0xff] }
 0x249   : > { %11111 = vst [vmem:[#allocation47_spill] sm:$0xff] %v8201_v42  ;;  %v8314_v42 = vld [vmem:[#allocation2 + $0x71] sm:$0xff] }
 0x24a   : > { %v1036_v57 = vmax.f32 %v835_v51, 0.0  ;;  %6945 = vmatmul.msk.f32.gmra.mxu0 %vm335_vm1, %v296_v48 }
 0x24b   : > { %v1306_v62 = vld [vmem:[#allocation2 + $0x1a9] sm:$0xff] }
 0x24c   : > { %v1231_v0 = vld [vmem:[#allocation2 + $0x1b0] sm:$0xff]  ;;  %1141 = vst.msk [vmem:[#allocation2 + $0x1b8] sm:$0xff] %vm1085_vm2, %v1036_v57  ;;  %7018 = vmatmul.msk.f32.gmra.mxu1 %vm1085_vm2, %v1306_v62 }
 0x24d   : > { %7091 = vmatmul.msk.f32.gmra.mxu2 %vm1085_vm2, %v1231_v0  ;;  %v8206_v58 = vpop.f32.mrf.mxu1 }
 0x24e   : > { %11112 = vst [vmem:[#allocation48_spill] sm:$0xff] %v8206_v58  ;;  %v318_v58 = vld [vmem:[%s7714_s27 + $0x2e8] sm:$0xff] }
 0x24f   : > { %v837_v2 = vpop.f32.mrf.mxu0 }
 0x250   : > { %v838_v10 = vadd.f32 %v8154_v32, %v837_v2  ;;  %v8211_v62 = vpop.f32.mrf.mxu2  ;;  %v300_v2 = vld [vmem:[%s7714_s27 + $0x258] sm:$0xff] }
 0x251   : > { %11113 = vst [vmem:[#allocation49_spill] sm:$0xff] %v8211_v62 }
 0x252   : > { %v1037_v14 = vmax.f32 %v838_v10, 0.0  ;;  %6946 = vmatmul.msk.f32.gmra.mxu0 %vm335_vm1, %v297_v5 }
 0x253   : > { %v1307_v24 = vld [vmem:[#allocation2 + $0x1b1] sm:$0xff] }
 0x254   : > { %1142 = vst.msk [vmem:[#allocation2 + $0x1c0] sm:$0xff] %vm1085_vm2, %v1037_v14  ;;  %7019 = vmatmul.msk.f32.gmra.mxu1 %vm1085_vm2, %v1307_v24  ;;  %v8216_v24 = vld [vmem:[#allocation2 + $0x21] sm:$0xff] }
 0x257   : > { %v840_v26 = vpop.f32.mrf.mxu0 }
 0x258   : > { %v841_v22 = vadd.f32 %v8154_v32, %v840_v26  ;;  %v8222_v26 = vpop.f32.mrf.mxu1 }
 0x259   : > { %11114 = vst [vmem:[#allocation50_spill] sm:$0xff] %v8222_v26  ;;  %v310_v26 = vld [vmem:[%s7714_s27 + $0x2a8] sm:$0xff] }
 0x25a   : > { %v1038_v36 = vmax.f32 %v841_v22, 0.0  ;;  %6947 = vmatmul.msk.f32.gmra.mxu0 %vm335_vm1, %v298_v28 }
 0x25b   : > { %v1232_v40 = vld [vmem:[#allocation2 + $0x1c0] sm:$0xff] }
 0x25c   : > { %1143 = vst.msk [vmem:[#allocation2 + $0x1c8] sm:$0xff] %vm1085_vm2, %v1038_v36  ;;  %7092 = vmatmul.msk.f32.gmra.mxu2 %vm1085_vm2, %v1232_v40  ;;  %v301_v36 = vld [vmem:[%s7714_s27 + $0x260] sm:$0xff] }
 0x25f   : > { %v843_v43 = vpop.f32.mrf.mxu0  ;;  %v8224_v28 = vpop.f32.mrf.mxu2 }
 0x260   : > { %v844_v48 = vadd.f32 %v8154_v32, %v843_v43  ;;  %11115 = vst [vmem:[#allocation51_spill] sm:$0xff] %v8224_v28  ;;  %v8267_v28 = vld [vmem:[#allocation2 + $0x49] sm:$0xff] }
 0x262   : > { %v1039_v51 = vmax.f32 %v844_v48, 0.0  ;;  %6948 = vmatmul.msk.f32.gmra.mxu0 %vm335_vm1, %v299_v16  ;;  %v8229_v48 = vld [vmem:[#allocation2 + $0x29] sm:$0xff] }
 0x263   : > { %v1308_v54 = vld [vmem:[#allocation2 + $0x1c1] sm:$0xff] }
 0x264   : > { %v1233_v57 = vld [vmem:[#allocation2 + $0x1c8] sm:$0xff]  ;;  %1144 = vst.msk [vmem:[#allocation2 + $0x1d0] sm:$0xff] %vm1085_vm2, %v1039_v51  ;;  %7020 = vmatmul.msk.f32.gmra.mxu1 %vm1085_vm2, %v1308_v54 }
 0x265   : > { %7093 = vmatmul.msk.f32.gmra.mxu2 %vm1085_vm2, %v1233_v57  ;;  %v302_v54 = vld [vmem:[%s7714_s27 + $0x268] sm:$0xff]  ;;  %v8236_v57 = vpop.f32.mrf.mxu1 }
 0x266   : > { %11116 = vst [vmem:[#allocation52_spill] sm:$0xff] %v8236_v57 }
 0x267   : > { %v846_v0 = vpop.f32.mrf.mxu0 }
 0x268   : > { %v847_v5 = vadd.f32 %v8154_v32, %v846_v0 }
 0x26a   : > { %v1040_v10 = vmax.f32 %v847_v5, 0.0  ;;  %6949 = vmatmul.msk.f32.gmra.mxu0 %vm335_vm1, %v300_v2  ;;  %v8239_v2 = vpop.f32.mrf.mxu2 }
 0x26b   : > { %v1309_v14 = vld [vmem:[#allocation2 + $0x1c9] sm:$0xff]  ;;  %11117 = vst [vmem:[#allocation53_spill] sm:$0xff] %v8239_v2 }
 0x26c   : > { %1145 = vst.msk [vmem:[#allocation2 + $0x1d8] sm:$0xff] %vm1085_vm2, %v1040_v10  ;;  %7021 = vmatmul.msk.f32.gmra.mxu1 %vm1085_vm2, %v1309_v14  ;;  %v8242_v10 = vld [vmem:[#allocation2 + $0x31] sm:$0xff] }
 0x26d   : > { %7266 = vmatmul.msk.f32.vlgmr.msrb.gmra.mxu2 %vm1085_vm2, %v8216_v24 }
 0x26f   : > { %v849_v22 = vpop.f32.mrf.mxu0 }
 0x270   : > { %v850_v40 = vadd.f32 %v8154_v32, %v849_v22  ;;  %v303_v22 = vld [vmem:[%s7714_s27 + $0x270] sm:$0xff] }
 0x272   : > { %v1041_v43 = vmax.f32 %v850_v40, 0.0  ;;  %6950 = vmatmul.msk.f32.gmra.mxu0 %vm335_vm1, %v301_v36  ;;  %v8248_v36 = vpop.f32.mrf.mxu1 }
 0x273   : > { %v1310_v16 = vld [vmem:[#allocation2 + $0x1d1] sm:$0xff]  ;;  %11118 = vst [vmem:[#allocation54_spill] sm:$0xff] %v8248_v36  ;;  %v8289_v36 = vld [vmem:[#allocation2 + $0x61] sm:$0xff] }
 0x274   : > { %1146 = vst.msk [vmem:[#allocation2 + $0x1e0] sm:$0xff] %vm1085_vm2, %v1041_v43  ;;  %7022 = vmatmul.msk.f32.gmra.mxu1 %vm1085_vm2, %v1310_v16  ;;  %v8252_v16 = vpop.f32.mrf.mxu2 }
 0x275   : > { %7267 = vmatmul.msk.f32.gmra.mxu2 %vm1085_vm2, %v8229_v48  ;;  %11119 = vst [vmem:[#allocation55_spill] sm:$0xff] %v8252_v16 }
 0x277   : > { %v852_v51 = vpop.f32.mrf.mxu0 }
 0x278   : > { %v853_v0 = vadd.f32 %v8154_v32, %v852_v51 }
 0x27a   : > { %v1042_v5 = vmax.f32 %v853_v0, 0.0  ;;  %6951 = vmatmul.msk.f32.gmra.mxu0 %vm335_vm1, %v302_v54  ;;  %v8254_v54 = vld [vmem:[#allocation2 + $0x41] sm:$0xff] }
 0x27c   : > { %1147 = vst.msk [vmem:[#allocation2 + $0x1e8] sm:$0xff] %vm1085_vm2, %v1042_v5  ;;  %v304_v5 = vld [vmem:[%s7714_s27 + $0x278] sm:$0xff] }
 0x27d   : > { %7268 = vmatmul.msk.f32.gmra.mxu2 %vm1085_vm2, %v8242_v10 }
 0x27f   : > { %v855_v14 = vpop.f32.mrf.mxu0  ;;  %v8265_v16 = vpop.f32.mrf.mxu2 }
 0x280   : > { %v856_v40 = vadd.f32 %v8154_v32, %v855_v14  ;;  %11121 = vst [vmem:[#allocation57_spill] sm:$0xff] %v8265_v16  ;;  %v8276_v16 = vld [vmem:[#allocation2 + $0x51] sm:$0xff] }
 0x282   : > { %v1043_v43 = vmax.f32 %v856_v40, 0.0  ;;  %6952 = vmatmul.msk.f32.gmra.mxu0 %vm335_vm1, %v303_v22  ;;  %v8262_v40 = vpop.f32.mrf.mxu1 }
 0x283   : > { %v1311_v51 = vld [vmem:[#allocation2 + $0x1e1] sm:$0xff]  ;;  %11120 = vst [vmem:[#allocation56_spill] sm:$0xff] %v8262_v40 }
 0x284   : > { %1148 = vst.msk [vmem:[#allocation2 + $0x1f0] sm:$0xff] %vm1085_vm2, %v1043_v43  ;;  %7023 = vmatmul.msk.f32.gmra.mxu1 %vm1085_vm2, %v1311_v51  ;;  %v305_v51 = vld [vmem:[%s7714_s27 + $0x280] sm:$0xff] }
 0x285   : > { %7269 = vmatmul.msk.f32.gmra.mxu2 %vm1085_vm2, %v8254_v54 }
 0x287   : > { %v858_v0 = vpop.f32.mrf.mxu0 }
 0x288   : > { %v859_v14 = vadd.f32 %v8154_v32, %v858_v0 }
 0x28a   : > { %v1044_v22 = vmax.f32 %v859_v14, 0.0  ;;  %6953 = vmatmul.msk.f32.gmra.mxu0 %vm335_vm1, %v304_v5  ;;  %v8278_v40 = vpop.f32.mrf.mxu1 }
 0x28b   : > { %v1312_v2 = vld [vmem:[#allocation2 + $0x1e9] sm:$0xff]  ;;  %11122 = vst [vmem:[#allocation58_spill] sm:$0xff] %v8278_v40 }
 0x28c   : > { %1149 = vst.msk [vmem:[#allocation2 + $0x1f8] sm:$0xff] %vm1085_vm2, %v1044_v22  ;;  %7024 = vmatmul.msk.f32.gmra.mxu1 %vm1085_vm2, %v1312_v2  ;;  %v8284_v2 = vpop.f32.mrf.mxu2 }
 0x28d   : > { %7270 = vmatmul.msk.f32.gmra.mxu2 %vm1085_vm2, %v8267_v28  ;;  %11123 = vst [vmem:[#allocation59_spill] sm:$0xff] %v8284_v2  ;;  %v307_v2 = vld [vmem:[%s7714_s27 + $0x290] sm:$0xff] }
 0x28f   : > { %v861_v43 = vpop.f32.mrf.mxu0 }
 0x290   : > { %v862_v0 = vadd.f32 %v8154_v32, %v861_v43  ;;  %v306_v43 = vld [vmem:[%s7714_s27 + $0x288] sm:$0xff] }
 0x292   : > { %v1045_v14 = vmax.f32 %v862_v0, 0.0  ;;  %6954 = vmatmul.msk.f32.gmra.mxu0 %vm335_vm1, %v305_v51  ;;  %v8291_v40 = vpop.f32.mrf.mxu1 }
 0x293   : > { %v1313_v5 = vld [vmem:[#allocation2 + $0x1f1] sm:$0xff]  ;;  %11124 = vst [vmem:[#allocation60_spill] sm:$0xff] %v8291_v40 }
 0x294   : > { %1150 = vst.msk [vmem:[#allocation2 + $0x200] sm:$0xff] %vm1085_vm2, %v1045_v14  ;;  %7025 = vmatmul.msk.f32.gmra.mxu1 %vm1085_vm2, %v1313_v5  ;;  %v8296_v14 = vpop.f32.mrf.mxu2 }
 0x295   : > { %7271 = vmatmul.msk.f32.gmra.mxu2 %vm1085_vm2, %v8276_v16  ;;  %11125 = vst [vmem:[#allocation61_spill] sm:$0xff] %v8296_v14 }
 0x297   : > { %v864_v22 = vpop.f32.mrf.mxu0 }
 0x298   : > { %v865_v0 = vadd.f32 %v8154_v32, %v864_v22 }
 0x29a   : > { %v1046_v51 = vmax.f32 %v865_v0, 0.0  ;;  %6955 = vmatmul.msk.f32.gmra.mxu0 %vm335_vm1, %v306_v43  ;;  %v8301_v0 = vld [vmem:[#allocation2 + $0x69] sm:$0xff] }
 0x29c   : > { %1151 = vst.msk [vmem:[#allocation2 + $0x208] sm:$0xff] %vm1085_vm2, %v1046_v51  ;;  %v8307_v51 = vpop.f32.mrf.mxu1 }
 0x29d   : > { %7272 = vmatmul.msk.f32.gmra.mxu2 %vm1085_vm2, %v8289_v36  ;;  %11126 = vst [vmem:[#allocation62_spill] sm:$0xff] %v8307_v51 }
 0x29f   : > { %v867_v5 = vpop.f32.mrf.mxu0  ;;  %v8309_v14 = vpop.f32.mrf.mxu2 }
 0x2a0   : > { %v868_v62 = vadd.f32 %v8154_v32, %v867_v5  ;;  %11127 = vst [vmem:[#allocation63_spill] sm:$0xff] %v8309_v14  ;;  %v308_v5 = vld [vmem:[%s7714_s27 + $0x298] sm:$0xff] }
 0x2a2   : > { %v1047_v22 = vmax.f32 %v868_v62, 0.0  ;;  %6956 = vmatmul.msk.f32.gmra.mxu0 %vm335_vm1, %v307_v2 }
 0x2a3   : > { %v1314_v43 = vld [vmem:[#allocation2 + $0x201] sm:$0xff] }
 0x2a4   : > { %1152 = vst.msk [vmem:[#allocation2 + $0x210] sm:$0xff] %vm1085_vm2, %v1047_v22  ;;  %7026 = vmatmul.msk.f32.gmra.mxu1 %vm1085_vm2, %v1314_v43  ;;  %v309_v43 = vld [vmem:[%s7714_s27 + $0x2a0] sm:$0xff]  ;;  %v8321_v14 = vpop.f32.mrf.mxu1 }
 0x2a5   : > { %7273 = vmatmul.msk.f32.gmra.mxu2 %vm1085_vm2, %v8301_v0  ;;  %11128 = vst [vmem:[#allocation64_spill] sm:$0xff] %v8321_v14 }
 0x2a7   : > { %v870_v40 = vpop.f32.mrf.mxu0 }
 0x2a8   : > { %v871_v62 = vadd.f32 %v8154_v32, %v870_v40 }
 0x2aa   : > { %v1048_v2 = vmax.f32 %v871_v62, 0.0  ;;  %6957 = vmatmul.msk.f32.gmra.mxu0 %vm335_vm1, %v308_v5  ;;  %v8324_v62 = vpop.f32.mrf.mxu2 }
 0x2ab   : > { %v1315_v57 = vld [vmem:[#allocation2 + $0x209] sm:$0xff]  ;;  %11129 = vst [vmem:[#allocation65_spill] sm:$0xff] %v8324_v62 }
 0x2ac   : > { %1153 = vst.msk [vmem:[#allocation2 + $0x218] sm:$0xff] %vm1085_vm2, %v1048_v2  ;;  %7027 = vmatmul.msk.f32.gmra.mxu1 %vm1085_vm2, %v1315_v57  ;;  %v3444_v2 = vld [vmem:[#allocation2 + $0x81] sm:$0xff]  ;;  %v8331_v61 = vpop.f32.mrf.mxu1 }
 0x2ad   : > { %7274 = vmatmul.msk.f32.gmra.mxu2 %vm1085_vm2, %v8314_v42  ;;  %11130 = vst [vmem:[#allocation66_spill] sm:$0xff] %v8331_v61 }
 0x2af   : > { %v873_v22 = vpop.f32.mrf.mxu0 }
 0x2b0   : > { %v874_v40 = vadd.f32 %v8154_v32, %v873_v22 }
 0x2b2   : > { %v1049_v5 = vmax.f32 %v874_v40, 0.0  ;;  %6958 = vmatmul.msk.f32.gmra.mxu0 %vm335_vm1, %v309_v43  ;;  %v8335_v40 = vpop.f32.mrf.mxu2  ;;  %v3445_v43 = vld [vmem:[#allocation2 + $0x89] sm:$0xff] }
 0x2b3   : > { %v1316_v51 = vld [vmem:[#allocation2 + $0x211] sm:$0xff]  ;;  %11131 = vst [vmem:[#allocation67_spill] sm:$0xff] %v8335_v40 }
 0x2b4   : > { %1154 = vst.msk [vmem:[#allocation2 + $0x220] sm:$0xff] %vm1085_vm2, %v1049_v5  ;;  %7028 = vmatmul.msk.f32.gmra.mxu1 %vm1085_vm2, %v1316_v51  ;;  %v311_v5 = vld [vmem:[%s7714_s27 + $0x2b0] sm:$0xff]  ;;  %v8341_v62 = vpop.f32.mrf.mxu1 }
 0x2b5   : > { %7275 = vmatmul.msk.f32.gmra.mxu2 %vm1085_vm2, %v3444_v2  ;;  %11132 = vst [vmem:[#allocation68_spill] sm:$0xff] %v8341_v62 }
 0x2b7   : > { %v876_v57 = vpop.f32.mrf.mxu0 }
 0x2b8   : > { %v877_v22 = vadd.f32 %v8154_v32, %v876_v57 }
 0x2ba   : > { %v1050_v14 = vmax.f32 %v877_v22, 0.0  ;;  %6959 = vmatmul.msk.f32.gmra.mxu0 %vm335_vm1, %v310_v26  ;;  %v3446_v22 = vld [vmem:[#allocation2 + $0x91] sm:$0xff] }
 0x2bc   : > { %1155 = vst.msk [vmem:[#allocation2 + $0x228] sm:$0xff] %vm1085_vm2, %v1050_v14  ;;  %v8352_v62 = vpop.f32.mrf.mxu1 }
 0x2bd   : > { %7276 = vmatmul.msk.f32.gmra.mxu2 %vm1085_vm2, %v3445_v43  ;;  %v312_v43 = vld [vmem:[%s7714_s27 + $0x2b8] sm:$0xff]  ;;  %11134 = vst [vmem:[#allocation70_spill] sm:$0xff] %v8352_v62 }
 0x2bf   : > { %v879_v51 = vpop.f32.mrf.mxu0  ;;  %v8344_v57 = vpop.f32.mrf.mxu2 }
 0x2c0   : > { %v880_v2 = vadd.f32 %v8154_v32, %v879_v51  ;;  %11133 = vst [vmem:[#allocation69_spill] sm:$0xff] %v8344_v57  ;;  %v3449_v57 = vld [vmem:[#allocation2 + $0xb1] sm:$0xff] }
 0x2c2   : > { %v1051_v61 = vmax.f32 %v880_v2, 0.0  ;;  %6960 = vmatmul.msk.f32.gmra.mxu0 %vm335_vm1, %v311_v5  ;;  %v3447_v5 = vld [vmem:[#allocation2 + $0xa1] sm:$0xff] }
 0x2c3   : > { %v1317_v26 = vld [vmem:[#allocation2 + $0x221] sm:$0xff] }
 0x2c4   : > { %1156 = vst.msk [vmem:[#allocation2 + $0x230] sm:$0xff] %vm1085_vm2, %v1051_v61  ;;  %7029 = vmatmul.msk.f32.gmra.mxu1 %vm1085_vm2, %v1317_v26  ;;  %v2913_v61 = vld [vmem:[%s11065_s3 + $0x78] sm:$0xff]  ;;  %v8374_v62 = vpop.f32.mrf.mxu1 }
 0x2c5   : > { %7277 = vmatmul.msk.f32.gmra.mxu2 %vm1085_vm2, %v3446_v22  ;;  %3142 = vmatpush.msrb.mxu1 %v2913_v61  ;;  %v2912_v22 = vld [vmem:[%s11065_s3 + $0x70] sm:$0xff]  ;;  %11136 = vst [vmem:[#allocation72_spill] sm:$0xff] %v8374_v62 }
 0x2c7   : > { %v882_v14 = vpop.f32.mrf.mxu0  ;;  %3143 = vmatpush.msrb.mxu1 %v2912_v22 }
 0x2c8   : > { %v883_v51 = vadd.f32 %v8154_v32, %v882_v14  ;;  %v8360_v26 = vpop.f32.mrf.mxu2 }
 0x2c9   : > { %11135 = vst [vmem:[#allocation71_spill] sm:$0xff] %v8360_v26  ;;  %v3448_v26 = vld [vmem:[#allocation2 + $0xa9] sm:$0xff] }
 0x2ca   : > { %v1052_v40 = vmax.f32 %v883_v51, 0.0  ;;  %6961 = vmatmul.msk.f32.gmra.mxu0 %vm335_vm1, %v312_v43  ;;  %v313_v43 = vld [vmem:[%s7714_s27 + $0x2c0] sm:$0xff]  ;;  %v2911_v51 = vld [vmem:[%s11065_s3 + $0x68] sm:$0xff] }
 0x2cb   : > { %v1318_v2 = vld [vmem:[#allocation2 + $0x229] sm:$0xff]  ;;  %3144 = vmatpush.msrb.mxu1 %v2911_v51 }
 0x2cc   : > { %1157 = vst.msk [vmem:[#allocation2 + $0x238] sm:$0xff] %vm1085_vm2, %v1052_v40  ;;  %7030 = vmatmul.msk.f32.gmra.mxu1 %vm1085_vm2, %v1318_v2 }
 0x2cd   : > { %7278 = vmatmul.msk.f32.gmra.mxu2 %vm1085_vm2, %v3447_v5  ;;  %v2910_v5 = vld [vmem:[%s11065_s3 + $0x60] sm:$0xff] }
 0x2ce   : > { %3145 = vmatpush.msrb.mxu1 %v2910_v5 }
 0x2cf   : > { %v885_v14 = vpop.f32.mrf.mxu0 }
 0x2d0   : > { %v886_v40 = vadd.f32 %v8154_v32, %v885_v14  ;;  %v8379_v22 = vpop.f32.mrf.mxu2 }
 0x2d1   : > { %11137 = vst [vmem:[#allocation73_spill] sm:$0xff] %v8379_v22 }
 0x2d2   : > { %v1053_v2 = vmax.f32 %v886_v40, 0.0  ;;  %6962 = vmatmul.msk.f32.gmra.mxu0 %vm335_vm1, %v313_v43  ;;  %v314_v43 = vld [vmem:[%s7714_s27 + $0x2c8] sm:$0xff] }
 0x2d3   : > { %v1319_v61 = vld [vmem:[#allocation2 + $0x231] sm:$0xff] }
 0x2d4   : > { %1158 = vst.msk [vmem:[#allocation2 + $0x240] sm:$0xff] %vm1085_vm2, %v1053_v2  ;;  %7031 = vmatmul.msk.f32.gmra.mxu1 %vm1085_vm2, %v1319_v61  ;;  %v8386_v2 = vpop.f32.mrf.mxu1 }
 0x2d5   : > { %7279 = vmatmul.msk.f32.gmra.mxu2 %vm1085_vm2, %v3448_v26  ;;  %11138 = vst [vmem:[#allocation74_spill] sm:$0xff] %v8386_v2  ;;  %v315_v26 = vld [vmem:[%s7714_s27 + $0x2d0] sm:$0xff] }
 0x2d7   : > { %v888_v14 = vpop.f32.mrf.mxu0 }
 0x2d8   : > { %v889_v40 = vadd.f32 %v8154_v32, %v888_v14 }
 0x2da   : > { %v1054_v51 = vmax.f32 %v889_v40, 0.0  ;;  %6963 = vmatmul.msk.f32.gmra.mxu0 %vm335_vm1, %v314_v43  ;;  %v3450_v40 = vld [vmem:[#allocation2 + $0xc1] sm:$0xff] }
 0x2dc   : > { %1159 = vst.msk [vmem:[#allocation2 + $0x248] sm:$0xff] %vm1085_vm2, %v1054_v51  ;;  %v316_v51 = vld [vmem:[%s7714_s27 + $0x2d8] sm:$0xff]  ;;  %v8399_v2 = vpop.f32.mrf.mxu1 }
 0x2dd   : > { %7280 = vmatmul.msk.f32.gmra.mxu2 %vm1085_vm2, %v3449_v57  ;;  %11139 = vst [vmem:[#allocation75_spill] sm:$0xff] %v8399_v2  ;;  %v2838_v2 = vld [vmem:[#allocation2 + $0x20] sm:$0xff] }
 0x2df   : > { %v891_v5 = vpop.f32.mrf.mxu0  ;;  %v8388_v61 = vpop.f32.mrf.mxu2 }
 0x2e0   : > { %v892_v22 = vadd.f32 %v8154_v32, %v891_v5 }
 0x2e2   : > { %v1055_v62 = vmax.f32 %v892_v22, 0.0  ;;  %6964 = vmatmul.msk.f32.gmra.mxu0 %vm335_vm1, %v315_v26 }
 0x2e3   : > { %v1320_v14 = vld [vmem:[#allocation2 + $0x241] sm:$0xff] }
 0x2e4   : > { %1160 = vst.msk [vmem:[#allocation2 + $0x250] sm:$0xff] %vm1085_vm2, %v1055_v62  ;;  %7032 = vmatmul.msk.f32.gmra.mxu1 %vm1085_vm2, %v1320_v14  ;;  %v8409_v20 = vpop.f32.mrf.mxu1 }
 0x2e5   : > { %7281 = vmatmul.msk.f32.gmra.mxu2 %vm1085_vm2, %v3450_v40  ;;  %v317_v40 = vld [vmem:[%s7714_s27 + $0x2e0] sm:$0xff] }
 0x2e7   : > { %v894_v57 = vpop.f32.mrf.mxu0 }
 0x2e8   : > { %v8396_v43 = vpop.f32.mrf.mxu2  ;;  %v895_v5 = vadd.f32 %v8154_v32, %v894_v57 }
 0x2ea   : > { %v1056_v22 = vmax.f32 %v895_v5, 0.0  ;;  %6965 = vmatmul.msk.f32.gmra.mxu0 %vm335_vm1, %v316_v51 }
 0x2eb   : > { %v1321_v26 = vld [vmem:[#allocation2 + $0x249] sm:$0xff] }
 0x2ec   : > { %1161 = vst.msk [vmem:[#allocation2 + $0x258] sm:$0xff] %vm1085_vm2, %v1056_v22  ;;  %7033 = vmatmul.msk.f32.gmra.mxu1 %vm1085_vm2, %v1321_v26 }
 0x2ed   : > { %7282 = vmatmul.msk.f32.gmra.mxu2 %vm1085_vm2, %v3451_v41  ;;  %v3452_v41 = vld [vmem:[#allocation2 + $0xd1] sm:$0xff] }
 0x2ef   : > { %v897_v62 = vpop.f32.mrf.mxu0 }
 0x2f0   : > { %v8406_v14 = vpop.f32.mrf.mxu2  ;;  %v898_v57 = vadd.f32 %v8154_v32, %v897_v62 }
 0x2f1   : > { %11140 = vst [vmem:[#allocation76_spill] sm:$0xff] %v8406_v14 }
 0x2f2   : > { %v1057_v5 = vmax.f32 %v898_v57, 0.0  ;;  %6966 = vmatmul.msk.f32.gmra.mxu0 %vm335_vm1, %v317_v40  ;;  %v8421_v57 = vpop.f32.mrf.mxu1 }
 0x2f3   : > { %v1322_v51 = vld [vmem:[#allocation2 + $0x251] sm:$0xff] }
 0x2f4   : > { %1162 = vst.msk [vmem:[#allocation2 + $0x260] sm:$0xff] %vm1085_vm2, %v1057_v5  ;;  %7034 = vmatmul.msk.f32.vlgmr.msra.gmra.mxu3 %vm1085_vm2, %v1322_v51  ;;  %7194 = vmatmul.msk.f32.vlgmr.msrb.gmra.mxu1 %vm1085_vm2, %v2838_v2  ;;  %v2839_v5 = vld [vmem:[#allocation2 + $0x28] sm:$0xff] }
 0x2f5   : > { %7283 = vmatmul.msk.f32.gmra.mxu2 %vm1085_vm2, %v3452_v41  ;;  %v3453_v2 = vld [vmem:[#allocation2 + $0xe1] sm:$0xff] }
 0x2f7   : > { %v900_v22 = vpop.f32.mrf.mxu0 }
 0x2f8   : > { %v8417_v26 = vpop.f32.mrf.mxu2  ;;  %v901_v62 = vadd.f32 %v8154_v32, %v900_v22 }
 0x2f9   : > { %11141 = vst [vmem:[#allocation77_spill] sm:$0xff] %v8417_v26 }
 0x2fa   : > { %v1058_v40 = vmax.f32 %v901_v62, 0.0  ;;  %6967 = vmatmul.msk.f32.gmra.mxu0 %vm335_vm1, %v318_v58  ;;  %v2840_v58 = vld [vmem:[#allocation2 + $0x30] sm:$0xff]  ;;  %v8434_v8 = vpop.f32.mrf.mxu1 }
 0x2fb   : > { %11143 = vst [vmem:[#allocation79_spill] sm:$0xff] %v8434_v8  ;;  %v9107_v8 = vld [vmem:[#allocation2 + $0x1c0] sm:$0xff] }
 0x2fc   : > { %1163 = vst.msk [vmem:[#allocation2 + $0x268] sm:$0xff] %vm1085_vm2, %v1058_v40  ;;  %7195 = vmatmul.msk.f32.gmra.mxu1 %vm1085_vm2, %v2839_v5  ;;  %v3454_v40 = vld [vmem:[#allocation2 + $0xe9] sm:$0xff] }
 0x2fd   : > { %7284 = vmatmul.msk.f32.gmra.mxu2 %vm1085_vm2, %v3453_v2 }
 0x2ff   : > { %v903_v51 = vpop.f32.mrf.mxu0 }
 0x300   : > { %v8427_v41 = vpop.f32.mrf.mxu2  ;;  %v904_v22 = vadd.f32 %v8154_v32, %v903_v51 }
 0x301   : > { %11142 = vst [vmem:[#allocation78_spill] sm:$0xff] %v8427_v41  ;;  %v8635_v41 = vld [vmem:[#allocation2 + $0xc0] sm:$0xff] }
 0x302   : > { %v1059_v11 = vmax.f32 %v904_v22, 0.0  ;;  %6968 = vmatmul.msk.f32.gmra.mxu0 %vm335_vm1, %v319_v34  ;;  %v320_v34 = vld [vmem:[%s7714_s27 + $0x2f8] sm:$0xff]  ;;  %v8450_v60 = vpop.f32.mrf.mxu1 }
 0x303   : > { %v8432_v62 = vld [vmem:[#allocation2 + $0x261] sm:$0xff]  ;;  %11145 = vst [vmem:[#allocation81_spill] sm:$0xff] %v8450_v60 }
 0x304   : > { %1164 = vst.msk [vmem:[#allocation2 + $0x270] sm:$0xff] %vm1085_vm2, %v1059_v11  ;;  %7035 = vmatmul.msk.f32.gmra.mxu3 %vm1085_vm2, %v8432_v62  ;;  %7196 = vmatmul.msk.f32.gmra.mxu1 %vm1085_vm2, %v2840_v58  ;;  %v8448_v11 = vld [vmem:[#allocation2 + $0x40] sm:$0xff]  ;;  %v3455_v58 = vld [vmem:[#allocation2 + $0xf1] sm:$0xff]  ;;  %v9064_v60 = vld [vmem:[#allocation2 + $0x1a8] sm:$0xff] }
 0x305   : > { %7285 = vmatmul.msk.f32.gmra.mxu2 %vm1085_vm2, %v3454_v40 }
 0x307   : > { %v906_v5 = vpop.f32.mrf.mxu0 }
 0x308   : > { %v8441_v2 = vpop.f32.mrf.mxu2  ;;  %v907_v51 = vadd.f32 %v8154_v32, %v906_v5 }
 0x309   : > { %11144 = vst [vmem:[#allocation80_spill] sm:$0xff] %v8441_v2  ;;  %v8652_v2 = vld [vmem:[#allocation2 + $0xc8] sm:$0xff] }
 0x30a   : > { %v1060_v22 = vmax.f32 %v907_v51, 0.0  ;;  %6969 = vmatmul.msk.f32.gmra.mxu0 %vm335_vm1, %v320_v34  ;;  %v321_v34 = vld [vmem:[%s7714_s27 + $0x300] sm:$0xff] }
 0x30b   : > { %v8446_v50 = vld [vmem:[#allocation2 + $0x269] sm:$0xff] }
 0x30c   : > { %1165 = vst.msk [vmem:[#allocation2 + $0x278] sm:$0xff] %vm1085_vm2, %v1060_v22  ;;  %7036 = vmatmul.msk.f32.gmra.mxu3 %vm1085_vm2, %v8446_v50  ;;  %7197 = vmatmul.msk.f32.gmra.mxu1 %vm1085_vm2, %v8448_v11 }
 0x30d   : > { %7286 = vmatmul.msk.f32.gmra.mxu2 %vm1085_vm2, %v3455_v58  ;;  %v3456_v58 = vld [vmem:[#allocation2 + $0x101] sm:$0xff] }
 0x30f   : > { %v909_v40 = vpop.f32.mrf.mxu0 }
 0x310   : > { %v8458_v5 = vpop.f32.mrf.mxu2  ;;  %v910_v51 = vadd.f32 %v8154_v32, %v909_v40  ;;  %v8473_v40 = vpop.f32.mrf.mxu1 }
 0x311   : > { %11146 = vst [vmem:[#allocation82_spill] sm:$0xff] %v8458_v5 }
 0x312   : > { %v1061_v30 = vmax.f32 %v910_v51, 0.0  ;;  %6970 = vmatmul.msk.f32.gmra.mxu0 %vm335_vm1, %v321_v34  ;;  %11147 = vst [vmem:[#allocation83_spill] sm:$0xff] %v8473_v40  ;;  %v9045_v40 = vld [vmem:[#allocation2 + $0x1a0] sm:$0xff] }
 0x313   : > { %v8463_v22 = vld [vmem:[#allocation2 + $0x271] sm:$0xff] }
 0x314   : > { %1166 = vst.msk [vmem:[#allocation2 + $0x280] sm:$0xff] %vm1085_vm2, %v1061_v30  ;;  %7037 = vmatmul.msk.f32.gmra.mxu3 %vm1085_vm2, %v8463_v22  ;;  %7198 = vmatmul.msk.f32.gmra.mxu1 %vm1085_vm2, %v8465_v47  ;;  %v8480_v30 = vld [vmem:[#allocation2 + $0x50] sm:$0xff] }
 0x315   : > { %7287 = vmatmul.msk.f32.gmra.mxu2 %vm1085_vm2, %v3456_v58 }
 0x317   : > { %v912_v51 = vpop.f32.mrf.mxu0 }
 0x318   : > { %v8475_v34 = vpop.f32.mrf.mxu2  ;;  %v913_v21 = vadd.f32 %v8154_v32, %v912_v51  ;;  %v8489_v31 = vpop.f32.mrf.mxu1 }
 0x319   : > { %11148 = vst [vmem:[#allocation84_spill] sm:$0xff] %v8475_v34 }
 0x31a   : > { %v1062_v46 = vmax.f32 %v913_v21, 0.0  ;;  %6971 = vmatmul.msk.f32.gmra.mxu0 %vm335_vm1, %v322_v7  ;;  %11150 = vst [vmem:[#allocation86_spill] sm:$0xff] %v8489_v31  ;;  %v9026_v31 = vld [vmem:[#allocation2 + $0x190] sm:$0xff] }
 0x31c   : > { %1167 = vst.msk [vmem:[#allocation2 + $0x288] sm:$0xff] %vm1085_vm2, %v1062_v46  ;;  %7199 = vmatmul.msk.f32.gmra.mxu1 %vm1085_vm2, %v8480_v30  ;;  %v8495_v46 = vld [vmem:[#allocation2 + $0x60] sm:$0xff] }
 0x31d   : > { %7288 = vmatmul.msk.f32.gmra.mxu2 %vm1085_vm2, %v3457_v33  ;;  %v3458_v33 = vld [vmem:[#allocation2 + $0x111] sm:$0xff] }
 0x31f   : > { %v915_v58 = vpop.f32.mrf.mxu0 }
 0x320   : > { %v8486_v59 = vpop.f32.mrf.mxu2  ;;  %v916_v21 = vadd.f32 %v8154_v32, %v915_v58 }
 0x321   : > { %11149 = vst [vmem:[#allocation85_spill] sm:$0xff] %v8486_v59 }
 0x322   : > { %v1063_v7 = vmax.f32 %v916_v21, 0.0  ;;  %6972 = vmatmul.msk.f32.gmra.mxu0 %vm335_vm1, %v323_v4  ;;  %v324_v4 = vld [vmem:[%s7714_s27 + $0x318] sm:$0xff]  ;;  %v8506_v21 = vpop.f32.mrf.mxu1 }
 0x323   : > { %v8493_v51 = vld [vmem:[#allocation2 + $0x281] sm:$0xff]  ;;  %11152 = vst [vmem:[#allocation88_spill] sm:$0xff] %v8506_v21 }
 0x324   : > { %1168 = vst.msk [vmem:[#allocation2 + $0x290] sm:$0xff] %vm1085_vm2, %v1063_v7  ;;  %7038 = vmatmul.msk.f32.gmra.mxu3 %vm1085_vm2, %v8493_v51  ;;  %7200 = vmatmul.msk.f32.gmra.mxu1 %vm1085_vm2, %v8495_v46  ;;  %v9007_v21 = vld [vmem:[#allocation2 + $0x188] sm:$0xff] }
 0x325   : > { %7289 = vmatmul.msk.f32.gmra.mxu2 %vm1085_vm2, %v3458_v33  ;;  %v3459_v33 = vld [vmem:[#allocation2 + $0x121] sm:$0xff] }
 0x327   : > { %v918_v53 = vpop.f32.mrf.mxu0 }
 0x328   : > { %v8503_v58 = vpop.f32.mrf.mxu2  ;;  %v919_v13 = vadd.f32 %v8154_v32, %v918_v53 }
 0x329   : > { %11151 = vst [vmem:[#allocation87_spill] sm:$0xff] %v8503_v58  ;;  %v1266_v58 = vld [vmem:[#allocation2 + $0x1] sm:$0xff] }
 0x32a   : > { %v1064_v18 = vmax.f32 %v919_v13, 0.0  ;;  %6973 = vmatmul.msk.f32.gmra.mxu0 %vm335_vm1, %v324_v4  ;;  %v325_v13 = vld [vmem:[%s7714_s27 + $0x320] sm:$0xff]  ;;  %v8524_v52 = vpop.f32.mrf.mxu1 }
 0x32b   : > { %v8510_v7 = vld [vmem:[#allocation2 + $0x289] sm:$0xff]  ;;  %11154 = vst [vmem:[#allocation90_spill] sm:$0xff] %v8524_v52  ;;  %v8988_v52 = vld [vmem:[#allocation2 + $0x180] sm:$0xff] }
 0x32c   : > { %1169 = vst.msk [vmem:[#allocation2 + $0x298] sm:$0xff] %vm1085_vm2, %v1064_v18  ;;  %7039 = vmatmul.msk.f32.gmra.mxu3 %vm1085_vm2, %v8510_v7  ;;  %7201 = vmatmul.msk.f32.gmra.mxu1 %vm1085_vm2, %v8512_v1 }
 0x32d   : > { %7290 = vmatmul.msk.f32.gmra.mxu2 %vm1085_vm2, %v3459_v33  ;;  %v3460_v33 = vld [vmem:[#allocation2 + $0x129] sm:$0xff] }
 0x32f   : > { %v921_v39 = vpop.f32.mrf.mxu0 }
 0x330   : > { %v8520_v53 = vpop.f32.mrf.mxu2  ;;  %v922_v4 = vadd.f32 %v8154_v32, %v921_v39 }
 0x331   : > { %11153 = vst [vmem:[#allocation89_spill] sm:$0xff] %v8520_v53  ;;  %v8557_v53 = vld [vmem:[#allocation2 + $0x88] sm:$0xff] }
 0x332   : > { %v1065_v12 = vmax.f32 %v922_v4, 0.0  ;;  %6974 = vmatmul.msk.f32.gmra.mxu0 %vm335_vm1, %v325_v13  ;;  %v326_v13 = vld [vmem:[%s7714_s27 + $0x328] sm:$0xff]  ;;  %v8544_v3 = vpop.f32.mrf.mxu1 }
 0x333   : > { %v8527_v18 = vld [vmem:[#allocation2 + $0x291] sm:$0xff]  ;;  %11156 = vst [vmem:[#allocation92_spill] sm:$0xff] %v8544_v3 }
 0x334   : > { %1170 = vst.msk [vmem:[#allocation2 + $0x2a0] sm:$0xff] %vm1085_vm2, %v1065_v12  ;;  %7040 = vmatmul.msk.f32.gmra.mxu3 %vm1085_vm2, %v8527_v18  ;;  %7202 = vmatmul.msk.f32.gmra.mxu1 %vm1085_vm2, %v8529_v37  ;;  %v8542_v12 = vld [vmem:[#allocation2 + $0x80] sm:$0xff]  ;;  %v8969_v3 = vld [vmem:[#allocation2 + $0x170] sm:$0xff] }
 0x335   : > { %7291 = vmatmul.msk.f32.gmra.mxu2 %vm1085_vm2, %v3460_v33 }
 0x337   : > { %v924_v39 = vpop.f32.mrf.mxu0 }
 0x338   : > { %v8537_v4 = vpop.f32.mrf.mxu2  ;;  %v925_v25 = vadd.f32 %v8154_v32, %v924_v39  ;;  %v327_v39 = vld [vmem:[%s7714_s27 + $0x330] sm:$0xff] }
 0x339   : > { %11155 = vst [vmem:[#allocation91_spill] sm:$0xff] %v8537_v4  ;;  %v8574_v4 = vld [vmem:[#allocation2 + $0x90] sm:$0xff] }
 0x33a   : > { %v1066_v45 = vmax.f32 %v925_v25, 0.0  ;;  %6975 = vmatmul.msk.f32.gmra.mxu0 %vm335_vm1, %v326_v13 }
 0x33c   : > { %1171 = vst.msk [vmem:[#allocation2 + $0x2a8] sm:$0xff] %vm1085_vm2, %v1066_v45  ;;  %7203 = vmatmul.msk.f32.gmra.mxu1 %vm1085_vm2, %v8542_v12 }
 0x33d   : > { %7292 = vmatmul.msk.f32.gmra.mxu2 %vm1085_vm2, %v3461_v23  ;;  %v3462_v23 = vld [vmem:[#allocation2 + $0x141] sm:$0xff] }
 0x33f   : > { %v927_v33 = vpop.f32.mrf.mxu0 }
 0x340   : > { %v8550_v55 = vpop.f32.mrf.mxu2  ;;  %v928_v25 = vadd.f32 %v8154_v32, %v927_v33 }
 0x341   : > { %11157 = vst [vmem:[#allocation93_spill] sm:$0xff] %v8550_v55  ;;  %v8560_v45 = vpop.f32.mrf.mxu1 }
 0x342   : > { %v1067_v13 = vmax.f32 %v928_v25, 0.0  ;;  %6976 = vmatmul.msk.f32.gmra.mxu0 %vm335_vm1, %v327_v39  ;;  %11158 = vst [vmem:[#allocation94_spill] sm:$0xff] %v8560_v45  ;;  %v328_v39 = vld [vmem:[%s7714_s27 + $0x338] sm:$0xff]  ;;  %v8949_v45 = vld [vmem:[#allocation2 + $0x168] sm:$0xff] }
 0x343   : > { %v8555_v9 = vld [vmem:[#allocation2 + $0x2a1] sm:$0xff] }
 0x344   : > { %1172 = vst.msk [vmem:[#allocation2 + $0x2b0] sm:$0xff] %vm1085_vm2, %v1067_v13  ;;  %7041 = vmatmul.msk.f32.gmra.mxu3 %vm1085_vm2, %v8555_v9  ;;  %7204 = vmatmul.msk.f32.gmra.mxu1 %vm1085_vm2, %v8557_v53 }
 0x345   : > { %7293 = vmatmul.msk.f32.gmra.mxu2 %vm1085_vm2, %v3462_v23  ;;  %v3463_v23 = vld [vmem:[#allocation2 + $0x149] sm:$0xff] }
 0x347   : > { %v930_v33 = vpop.f32.mrf.mxu0 }
 0x348   : > { %v8567_v25 = vpop.f32.mrf.mxu2  ;;  %v931_v55 = vadd.f32 %v8154_v32, %v930_v33 }
 0x349   : > { %11159 = vst [vmem:[#allocation95_spill] sm:$0xff] %v8567_v25  ;;  %v8582_v25 = vpop.f32.mrf.mxu1 }
 0x34a   : > { %v1068_v19 = vmax.f32 %v931_v55, 0.0  ;;  %6977 = vmatmul.msk.f32.gmra.mxu0 %vm335_vm1, %v328_v39  ;;  %11160 = vst [vmem:[#allocation96_spill] sm:$0xff] %v8582_v25  ;;  %v8872_v25 = vld [vmem:[#allocation2 + $0x140] sm:$0xff] }
 0x34b   : > { %v8572_v13 = vld [vmem:[#allocation2 + $0x2a9] sm:$0xff] }
 0x34c   : > { %1173 = vst.msk [vmem:[#allocation2 + $0x2b8] sm:$0xff] %vm1085_vm2, %v1068_v19  ;;  %7042 = vmatmul.msk.f32.gmra.mxu3 %vm1085_vm2, %v8572_v13  ;;  %7205 = vmatmul.msk.f32.gmra.mxu1 %vm1085_vm2, %v8574_v4 }
 0x34d   : > { %7294 = vmatmul.msk.f32.gmra.mxu2 %vm1085_vm2, %v3463_v23  ;;  %v3464_v23 = vld [vmem:[#allocation2 + $0x151] sm:$0xff] }
 0x34f   : > { %v933_v55 = vpop.f32.mrf.mxu0 }
 0x350   : > { %v8584_v33 = vpop.f32.mrf.mxu2  ;;  %v934_v39 = vadd.f32 %v8154_v32, %v933_v55 }
 0x351   : > { %11161 = vst [vmem:[#allocation97_spill] sm:$0xff] %v8584_v33 }
 0x352   : > { %v1069_v15 = vmax.f32 %v934_v39, 0.0  ;;  %6978 = vmatmul.msk.f32.vlgmr.msrb.gmra.mxu0 %vm1085_vm2, %v1266_v58  ;;  %v8601_v39 = vpop.f32.mrf.mxu1 }
 0x353   : > { %v8588_v19 = vld [vmem:[#allocation2 + $0x2b1] sm:$0xff]  ;;  %11163 = vst [vmem:[#allocation99_spill] sm:$0xff] %v8601_v39 }
 0x354   : > { %1174 = vst.msk [vmem:[#allocation2 + $0x2c0] sm:$0xff] %vm1085_vm2, %v1069_v15  ;;  %7043 = vmatmul.msk.f32.gmra.mxu3 %vm1085_vm2, %v8588_v19  ;;  %7206 = vmatmul.msk.f32.gmra.mxu1 %vm1085_vm2, %v8590_v27  ;;  %v8604_v15 = vld [vmem:[#allocation2 + $0xa8] sm:$0xff]  ;;  %v8853_v39 = vld [vmem:[#allocation2 + $0x130] sm:$0xff] }
 0x355   : > { %7295 = vmatmul.msk.f32.gmra.mxu2 %vm1085_vm2, %v3464_v23 }
 0x357   : > { %v936_v55 = vpop.f32.mrf.mxu0 }
 0x358   : > { %v8598_v33 = vpop.f32.mrf.mxu2  ;;  %v937_v58 = vadd.f32 %v8154_v32, %v936_v55 }
 0x359   : > { %11162 = vst [vmem:[#allocation98_spill] sm:$0xff] %v8598_v33 }
 0x35a   : > { %v1070_v59 = vmax.f32 %v937_v58, 0.0  ;;  %6979 = vmatmul.msk.f32.gmra.mxu0 %vm1085_vm2, %v1267_v35  ;;  %v1268_v58 = vld [vmem:[#allocation2 + $0x11] sm:$0xff] }
 0x35c   : > { %1175 = vst.msk [vmem:[#allocation2 + $0x2c8] sm:$0xff] %vm1085_vm2, %v1070_v59  ;;  %7207 = vmatmul.msk.f32.gmra.mxu1 %vm1085_vm2, %v8604_v15  ;;  %v8618_v59 = vld [vmem:[#allocation2 + $0xb0] sm:$0xff] }
 0x35d   : > { %7296 = vmatmul.msk.f32.gmra.mxu2 %vm1085_vm2, %v3465_v17  ;;  %v3466_v17 = vld [vmem:[#allocation2 + $0x169] sm:$0xff] }
 0x35f   : > { %v939_v23 = vpop.f32.mrf.mxu0 }
 0x360   : > { %v8610_v33 = vpop.f32.mrf.mxu2  ;;  %v940_v55 = vadd.f32 %v8154_v32, %v939_v23 }
 0x361   : > { %11164 = vst [vmem:[#allocation100_spill] sm:$0xff] %v8610_v33  ;;  %v8613_v6 = vpop.f32.mrf.mxu1 }
 0x362   : > { %11165 = vst [vmem:[#allocation101_spill] sm:$0xff] %v8613_v6  ;;  %v1071_v34 = vmax.f32 %v940_v55, 0.0  ;;  %6980 = vmatmul.msk.f32.gmra.mxu0 %vm1085_vm2, %v1268_v58  ;;  %v8834_v6 = vld [vmem:[#allocation2 + $0x128] sm:$0xff] }
 0x363   : > { %v8616_v35 = vld [vmem:[#allocation2 + $0x2c1] sm:$0xff] }
 0x364   : > { %1176 = vst.msk [vmem:[#allocation2 + $0x2d0] sm:$0xff] %vm1085_vm2, %v1071_v34  ;;  %7044 = vmatmul.msk.f32.gmra.mxu3 %vm1085_vm2, %v8616_v35  ;;  %7208 = vmatmul.msk.f32.gmra.mxu1 %vm1085_vm2, %v8618_v59 }
 0x365   : > { %7297 = vmatmul.msk.f32.gmra.mxu2 %vm1085_vm2, %v3466_v17  ;;  %v3467_v17 = vld [vmem:[#allocation2 + $0x171] sm:$0xff] }
 0x367   : > { %v942_v23 = vpop.f32.mrf.mxu0 }
 0x368   : > { %v8626_v33 = vpop.f32.mrf.mxu2  ;;  %v943_v55 = vadd.f32 %v8154_v32, %v942_v23 }
 0x369   : > { %11166 = vst [vmem:[#allocation102_spill] sm:$0xff] %v8626_v33  ;;  %v8629_v58 = vpop.f32.mrf.mxu1 }
 0x36a   : > { %11167 = vst [vmem:[#allocation103_spill] sm:$0xff] %v8629_v58  ;;  %v1072_v5 = vmax.f32 %v943_v55, 0.0  ;;  %6981 = vmatmul.msk.f32.gmra.mxu0 %vm1085_vm2, %v8216_v24  ;;  %v8814_v58 = vld [vmem:[#allocation2 + $0x120] sm:$0xff] }
 0x36b   : > { %v8633_v34 = vld [vmem:[#allocation2 + $0x2c9] sm:$0xff] }
 0x36c   : > { %1177 = vst.msk [vmem:[#allocation2 + $0x2d8] sm:$0xff] %vm1085_vm2, %v1072_v5  ;;  %7045 = vmatmul.msk.f32.gmra.mxu3 %vm1085_vm2, %v8633_v34  ;;  %7209 = vmatmul.msk.f32.gmra.mxu1 %vm1085_vm2, %v8635_v41 }
 0x36d   : > { %7298 = vmatmul.msk.f32.gmra.mxu2 %vm1085_vm2, %v3467_v17  ;;  %v3468_v17 = vld [vmem:[#allocation2 + $0x181] sm:$0xff] }
 0x36f   : > { %v945_v23 = vpop.f32.mrf.mxu0 }
 0x370   : > { %v8643_v55 = vpop.f32.mrf.mxu2  ;;  %v946_v24 = vadd.f32 %v8154_v32, %v945_v23 }
 0x371   : > { %11168 = vst [vmem:[#allocation104_spill] sm:$0xff] %v8643_v55  ;;  %v8646_v33 = vpop.f32.mrf.mxu1 }
 0x372   : > { %11169 = vst [vmem:[#allocation105_spill] sm:$0xff] %v8646_v33  ;;  %v1073_v63 = vmax.f32 %v946_v24, 0.0  ;;  %6982 = vmatmul.msk.f32.gmra.mxu0 %vm1085_vm2, %v8229_v48  ;;  %v8757_v33 = vld [vmem:[#allocation2 + $0x100] sm:$0xff] }
 0x373   : > { %v8650_v5 = vld [vmem:[#allocation2 + $0x2d1] sm:$0xff] }
 0x374   : > { %1178 = vst.msk [vmem:[#allocation2 + $0x2e0] sm:$0xff] %vm1085_vm2, %v1073_v63  ;;  %7046 = vmatmul.msk.f32.gmra.mxu3 %vm1085_vm2, %v8650_v5  ;;  %7210 = vmatmul.msk.f32.gmra.mxu1 %vm1085_vm2, %v8652_v2  ;;  %v8667_v63 = vld [vmem:[#allocation2 + $0xd0] sm:$0xff] }
 0x375   : > { %7299 = vmatmul.msk.f32.gmra.mxu2 %vm1085_vm2, %v3468_v17  ;;  %v2315_v17 = vld [vmem:[%s11065_s3 + $0x58] sm:$0xff] }
 0x376   : > { %2544 = vmatpush.msra.mxu3 %v2315_v17 }
 0x377   : > { %v948_v23 = vpop.f32.mrf.mxu0 }
 0x378   : > { %v949_v24 = vadd.f32 %v8154_v32, %v948_v23  ;;  %v8661_v55 = vpop.f32.mrf.mxu2 }
 0x379   : > { %11170 = vst [vmem:[#allocation106_spill] sm:$0xff] %v8661_v55  ;;  %v8663_v48 = vpop.f32.mrf.mxu1 }
 0x37a   : > { %11171 = vst [vmem:[#allocation107_spill] sm:$0xff] %v8663_v48  ;;  %v1074_v26 = vmax.f32 %v949_v24, 0.0  ;;  %6983 = vmatmul.msk.f32.gmra.mxu0 %vm1085_vm2, %v8242_v10  ;;  %v8685_v48 = vld [vmem:[#allocation2 + $0xe0] sm:$0xff] }
 0x37c   : > { %1179 = vst.msk [vmem:[#allocation2 + $0x2e8] sm:$0xff] %vm1085_vm2, %v1074_v26  ;;  %7211 = vmatmul.msk.f32.gmra.mxu1 %vm1085_vm2, %v8667_v63 }
 0x37d   : > { %7300 = vmatmul.msk.f32.gmra.mxu2 %vm1085_vm2, %v3469_v56  ;;  %v3470_v56 = vld [vmem:[#allocation2 + $0x191] sm:$0xff] }
 0x37f   : > { %v951_v23 = vpop.f32.mrf.mxu0 }
 0x380   : > { %v952_v24 = vadd.f32 %v8154_v32, %v951_v23  ;;  %v8677_v55 = vpop.f32.mrf.mxu2 }
 0x381   : > { %11172 = vst [vmem:[#allocation108_spill] sm:$0xff] %v8677_v55  ;;  %v8679_v10 = vpop.f32.mrf.mxu1 }
 0x382   : > { %11173 = vst [vmem:[#allocation109_spill] sm:$0xff] %v8679_v10  ;;  %v1075_v44 = vmax.f32 %v952_v24, 0.0  ;;  %6984 = vmatmul.msk.f32.gmra.mxu0 %vm1085_vm2, %v8254_v54  ;;  %v8696_v54 = vld [vmem:[%s11064_s2] ss:$0 sm:$0xff]  ;;  %v8707_v10 = vld [vmem:[#allocation2 + $0xe8] sm:$0xff] }
 0x383   : > { %v8683_v26 = vld [vmem:[#allocation2 + $0x2e1] sm:$0xff] }
 0x384   : > { %1180 = vst.msk [vmem:[#allocation2 + $0x2f0] sm:$0xff] %vm1085_vm2, %v1075_v44  ;;  %7047 = vmatmul.msk.f32.gmra.mxu3 %vm1085_vm2, %v8683_v26  ;;  %7212 = vmatmul.msk.f32.gmra.mxu1 %vm1085_vm2, %v8685_v48 }
 0x385   : > { %7301 = vmatmul.msk.f32.gmra.mxu2 %vm1085_vm2, %v3470_v56  ;;  %v4705_v56 = vld [vmem:[%s11065_s3 + $0xd8] sm:$0xff] }
 0x386   : > { %4934 = vmatpush.msra.mxu0 %v4705_v56  ;;  %v4702_v56 = vld [vmem:[%s11065_s3 + $0xc0] sm:$0xff] }
 0x387   : > { %v954_v32 = vpop.f32.mrf.mxu0 }
 0x388   : > { %v955_v17 = vadd.f32 %v8696_v54, %v954_v32  ;;  %v8699_v23 = vpop.f32.mrf.mxu2  ;;  %v3471_v32 = vld [vmem:[#allocation2 + $0x1a1] sm:$0xff] }
 0x389   : > { %11174 = vst [vmem:[#allocation110_spill] sm:$0xff] %v8699_v23  ;;  %v8701_v44 = vpop.f32.mrf.mxu1 }
 0x38a   : > { %11175 = vst [vmem:[#allocation111_spill] sm:$0xff] %v8701_v44  ;;  %v1076_v24 = vmax.f32 %v955_v17, 0.0  ;;  %6985 = vmatmul.msk.f32.gmra.mxu0 %vm1085_vm2, %v8267_v28  ;;  %v4704_v28 = vld [vmem:[%s11065_s3 + $0xd0] sm:$0xff]  ;;  %v8721_v17 = vpop.f32.mrf.mxu3 }
 0x38b   : > { %v8705_v55 = vld [vmem:[#allocation2 + $0x2e9] sm:$0xff]  ;;  %11176 = vst [vmem:[#allocation112_spill] sm:$0xff] %v8721_v17  ;;  %4935 = vmatpush.msra.mxu0 %v4704_v28 }
 0x38c   : > { %1181 = vst.msk [vmem:[#allocation2 + $0x2f8] sm:$0xff] %vm1085_vm2, %v1076_v24  ;;  %7048 = vmatmul.msk.f32.gmra.mxu3 %vm1085_vm2, %v8705_v55  ;;  %7213 = vmatmul.msk.f32.gmra.mxu1 %vm1085_vm2, %v8707_v10  ;;  %v4703_v24 = vld [vmem:[%s11065_s3 + $0xc8] sm:$0xff]  ;;  %v8795_v17 = vld [vmem:[#allocation2 + $0x110] sm:$0xff] }
 0x38d   : > { %7302 = vmatmul.msk.f32.gmra.mxu2 %vm1085_vm2, %v3471_v32  ;;  %4936 = vmatpush.msra.mxu0 %v4703_v24 }
 0x38f   : > { %v957_v23 = vpop.f32.mrf.mxu0  ;;  %4937 = vmatpush.msra.mxu0 %v4702_v56 }
 0x390   : > { %v958_v44 = vadd.f32 %v8696_v54, %v957_v23  ;;  %v8727_v49 = vpop.f32.mrf.mxu2  ;;  %v3472_v23 = vld [vmem:[#allocation2 + $0x1a9] sm:$0xff] }
 0x391   : > { %11177 = vst [vmem:[#allocation113_spill] sm:$0xff] %v8727_v49  ;;  %v8729_v14 = vpop.f32.mrf.mxu1 }
 0x392   : > { %11178 = vst [vmem:[#allocation114_spill] sm:$0xff] %v8729_v14  ;;  %v1077_v32 = vmax.f32 %v958_v44, 0.0  ;;  %6986 = vmatmul.msk.f32.gmra.mxu0 %vm1085_vm2, %v8276_v16  ;;  %v8746_v44 = vpop.f32.mrf.mxu3 }
 0x393   : > { %v8736_v28 = vld [vmem:[#allocation2 + $0x2f1] sm:$0xff]  ;;  %11179 = vst [vmem:[#allocation115_spill] sm:$0xff] %v8746_v44  ;;  %v8776_v44 = vld [vmem:[#allocation2 + $0x108] sm:$0xff] }
 0x394   : > { %1182 = vst.msk [vmem:[#allocation2 + $0x300] sm:$0xff] %vm1085_vm2, %v1077_v32  ;;  %7049 = vmatmul.msk.f32.gmra.mxu3 %vm1085_vm2, %v8736_v28  ;;  %7214 = vmatmul.msk.f32.gmra.mxu1 %vm1085_vm2, %v8738_v38  ;;  %v8755_v32 = vld [vmem:[#allocation2 + $0x1d0] sm:$0xff] }
 0x395   : > { %7303 = vmatmul.msk.f32.gmra.mxu2 %vm1085_vm2, %v3472_v23  ;;  %v3473_v23 = vld [vmem:[#allocation2 + $0x1b1] sm:$0xff] }
 0x397   : > { %v960_v24 = vpop.f32.mrf.mxu0 }
 0x398   : > { %v961_v16 = vadd.f32 %v8696_v54, %v960_v24  ;;  %v8749_v49 = vpop.f32.mrf.mxu2 }
 0x399   : > { %11180 = vst [vmem:[#allocation116_spill] sm:$0xff] %v8749_v49  ;;  %v8751_v14 = vpop.f32.mrf.mxu1 }
 0x39a   : > { %11181 = vst [vmem:[#allocation117_spill] sm:$0xff] %v8751_v14  ;;  %v1078_v56 = vmax.f32 %v961_v16, 0.0  ;;  %6987 = vmatmul.msk.f32.gmra.mxu0 %vm1085_vm2, %v8289_v36  ;;  %v8768_v36 = vpop.f32.mrf.mxu3 }
 0x39b   : > { %11183 = vst [vmem:[#allocation119_spill] sm:$0xff] %v8768_v36  ;;  %v8793_v36 = vld [vmem:[#allocation2 + $0x1e8] sm:$0xff] }
 0x39c   : > { %1183 = vst.msk [vmem:[#allocation2 + $0x308] sm:$0xff] %vm1085_vm2, %v1078_v56  ;;  %7094 = vmatmul.msk.f32.vlgmr.msrb.gmra.mxu3 %vm1085_vm2, %v8755_v32  ;;  %7215 = vmatmul.msk.f32.gmra.mxu1 %vm1085_vm2, %v8757_v33  ;;  %v8774_v56 = vld [vmem:[#allocation2 + $0x1e0] sm:$0xff] }
 0x39d   : > { %7304 = vmatmul.msk.f32.gmra.mxu2 %vm1085_vm2, %v3473_v23  ;;  %v3474_v23 = vld [vmem:[#allocation2 + $0x1c1] sm:$0xff] }
 0x39f   : > { %v963_v24 = vpop.f32.mrf.mxu0 }
 0x3a0   : > { %v964_v16 = vadd.f32 %v8696_v54, %v963_v24  ;;  %v8766_v49 = vpop.f32.mrf.mxu2 }
 0x3a1   : > { %11182 = vst [vmem:[#allocation118_spill] sm:$0xff] %v8766_v49  ;;  %v8770_v14 = vpop.f32.mrf.mxu1 }
 0x3a2   : > { %11184 = vst [vmem:[#allocation120_spill] sm:$0xff] %v8770_v14  ;;  %v1079_v29 = vmax.f32 %v964_v16, 0.0  ;;  %6988 = vmatmul.msk.f32.gmra.mxu0 %vm1085_vm2, %v8301_v0 }
 0x3a4   : > { %1184 = vst.msk [vmem:[#allocation2 + $0x310] sm:$0xff] %vm1085_vm2, %v1079_v29  ;;  %7095 = vmatmul.msk.f32.gmra.mxu3 %vm1085_vm2, %v8774_v56  ;;  %7216 = vmatmul.msk.f32.gmra.mxu1 %vm1085_vm2, %v8776_v44  ;;  %v8791_v29 = vpop.f32.mrf.mxu3 }
 0x3a5   : > { %7305 = vmatmul.msk.f32.gmra.mxu2 %vm1085_vm2, %v3474_v23  ;;  %11187 = vst [vmem:[#allocation123_spill] sm:$0xff] %v8791_v29  ;;  %v3475_v23 = vld [vmem:[#allocation2 + $0x1c9] sm:$0xff] }
 0x3a6   : > { %v8812_v29 = vld [vmem:[#allocation2 + $0x1f0] sm:$0xff] }
 0x3a7   : > { %v966_v24 = vpop.f32.mrf.mxu0 }
 0x3a8   : > { %v967_v16 = vadd.f32 %v8696_v54, %v966_v24  ;;  %v8785_v49 = vpop.f32.mrf.mxu2 }
 0x3a9   : > { %11185 = vst [vmem:[#allocation121_spill] sm:$0xff] %v8785_v49  ;;  %v8787_v0 = vpop.f32.mrf.mxu1 }
 0x3aa   : > { %11186 = vst [vmem:[#allocation122_spill] sm:$0xff] %v8787_v0  ;;  %v1080_v14 = vmax.f32 %v967_v16, 0.0  ;;  %6989 = vmatmul.msk.f32.gmra.mxu0 %vm1085_vm2, %v8314_v42 }
 0x3ac   : > { %1185 = vst.msk [vmem:[#allocation2 + $0x318] sm:$0xff] %vm1085_vm2, %v1080_v14  ;;  %7096 = vmatmul.msk.f32.gmra.mxu3 %vm1085_vm2, %v8793_v36  ;;  %7217 = vmatmul.msk.f32.gmra.mxu1 %vm1085_vm2, %v8795_v17  ;;  %v8810_v14 = vpop.f32.mrf.mxu3 }
 0x3ad   : > { %7306 = vmatmul.msk.f32.gmra.mxu2 %vm1085_vm2, %v3475_v23  ;;  %11190 = vst [vmem:[#allocation126_spill] sm:$0xff] %v8810_v14  ;;  %v3476_v23 = vld [vmem:[#allocation2 + $0x1d1] sm:$0xff]  ;;  %v8832_v14 = vld [vmem:[#allocation2 + $0x200] sm:$0xff] }
 0x3af   : > { %v969_v24 = vpop.f32.mrf.mxu0 }
 0x3b0   : > { %v970_v42 = vadd.f32 %v8696_v54, %v969_v24  ;;  %v8804_v16 = vpop.f32.mrf.mxu2  ;;  %v2314_v24 = vld [vmem:[%s11065_s3 + $0x50] sm:$0xff] }
 0x3b1   : > { %11188 = vst [vmem:[#allocation124_spill] sm:$0xff] %v8804_v16  ;;  %v8806_v49 = vpop.f32.mrf.mxu1  ;;  %2545 = vmatpush.msra.mxu3 %v2314_v24 }
 0x3b2   : > { %11189 = vst [vmem:[#allocation125_spill] sm:$0xff] %v8806_v49  ;;  %v1081_v0 = vmax.f32 %v970_v42, 0.0  ;;  %7410 = vmatmul.msk.f32.vlgmr.msra.gmra.mxu0 %vm1085_vm2, %v8448_v11 }
 0x3b4   : > { %1186 = vst.msk [vmem:[#allocation2 + $0x320] sm:$0xff] %vm1085_vm2, %v1081_v0  ;;  %7097 = vmatmul.msk.f32.gmra.mxu3 %vm1085_vm2, %v8812_v29  ;;  %7218 = vmatmul.msk.f32.gmra.mxu1 %vm1085_vm2, %v8814_v58  ;;  %v8841_v24 = vpop.f32.mrf.mxu3 }
 0x3b5   : > { %7307 = vmatmul.msk.f32.gmra.mxu2 %vm1085_vm2, %v3476_v23  ;;  %v3477_v23 = vld [vmem:[#allocation2 + $0x1e1] sm:$0xff]  ;;  %11193 = vst [vmem:[#allocation129_spill] sm:$0xff] %v8841_v24 }
 0x3b7   : > { %v972_v11 = vpop.f32.mrf.mxu0 }
 0x3b8   : > { %v973_v42 = vadd.f32 %v8696_v54, %v972_v11  ;;  %v8826_v16 = vpop.f32.mrf.mxu2 }
 0x3b9   : > { %11191 = vst [vmem:[#allocation127_spill] sm:$0xff] %v8826_v16  ;;  %v8828_v0 = vpop.f32.mrf.mxu1 }
 0x3ba   : > { %11192 = vst [vmem:[#allocation128_spill] sm:$0xff] %v8828_v0  ;;  %v1082_v49 = vmax.f32 %v973_v42, 0.0  ;;  %7411 = vmatmul.msk.f32.gmra.mxu0 %vm1085_vm2, %v8465_v47 }
 0x3bc   : > { %1187 = vst.msk [vmem:[#allocation2 + $0x328] sm:$0xff] %vm1085_vm2, %v1082_v49  ;;  %7098 = vmatmul.msk.f32.gmra.mxu3 %vm1085_vm2, %v8832_v14  ;;  %7219 = vmatmul.msk.f32.gmra.mxu1 %vm1085_vm2, %v8834_v6  ;;  %v8851_v49 = vld [vmem:[#allocation2 + $0x208] sm:$0xff] }
 0x3bd   : > { %7308 = vmatmul.msk.f32.gmra.mxu2 %vm1085_vm2, %v3477_v23  ;;  %v3478_v23 = vld [vmem:[#allocation2 + $0x1e9] sm:$0xff] }
 0x3bf   : > { %v975_v11 = vpop.f32.mrf.mxu0 }
 0x3c0   : > { %v976_v47 = vadd.f32 %v8696_v54, %v975_v11  ;;  %v8845_v42 = vpop.f32.mrf.mxu2  ;;  %v8861_v11 = vpop.f32.mrf.mxu3 }
 0x3c1   : > { %11194 = vst [vmem:[#allocation130_spill] sm:$0xff] %v8845_v42  ;;  %v8847_v16 = vpop.f32.mrf.mxu1 }
 0x3c2   : > { %11195 = vst [vmem:[#allocation131_spill] sm:$0xff] %v8847_v16  ;;  %v1083_v0 = vmax.f32 %v976_v47, 0.0  ;;  %7412 = vmatmul.msk.f32.gmra.mxu0 %vm1085_vm2, %v8480_v30 }
 0x3c3   : > { %11196 = vst [vmem:[#allocation132_spill] sm:$0xff] %v8861_v11  ;;  %v8930_v11 = vld [vmem:[#allocation2 + $0x160] sm:$0xff] }
 0x3c4   : > { %1188 = vst.msk [vmem:[#allocation2 + $0x330] sm:$0xff] %vm1085_vm2, %v1083_v0  ;;  %7099 = vmatmul.msk.f32.gmra.mxu3 %vm1085_vm2, %v8851_v49  ;;  %7220 = vmatmul.msk.f32.gmra.mxu1 %vm1085_vm2, %v8853_v39  ;;  %v8870_v0 = vld [vmem:[#allocation2 + $0x210] sm:$0xff] }
 0x3c5   : > { %7309 = vmatmul.msk.f32.gmra.mxu2 %vm1085_vm2, %v3478_v23 }
 0x3c7   : > { %v978_v47 = vpop.f32.mrf.mxu0 }
 0x3c8   : > { %v979_v30 = vadd.f32 %v8696_v54, %v978_v47  ;;  %v8864_v42 = vpop.f32.mrf.mxu2  ;;  %v3479_v54 = vld [vmem:[#allocation2 + $0x1f1] sm:$0xff]  ;;  %v8880_v23 = vpop.f32.mrf.mxu3 }
 0x3c9   : > { %11197 = vst [vmem:[#allocation133_spill] sm:$0xff] %v8864_v42  ;;  %v8866_v16 = vpop.f32.mrf.mxu1  ;;  %v8892_v42 = vld [vmem:[#allocation2 + $0x148] sm:$0xff] }
 0x3ca   : > { %11198 = vst [vmem:[#allocation134_spill] sm:$0xff] %v8866_v16  ;;  %v1084_v24 = vmax.f32 %v979_v30, 0.0  ;;  %7413 = vmatmul.msk.f32.gmra.mxu0 %vm1085_vm2, %v8495_v46 }
 0x3cb   : > { %11199 = vst [vmem:[#allocation135_spill] sm:$0xff] %v8880_v23  ;;  %v8911_v23 = vld [vmem:[#allocation2 + $0x150] sm:$0xff] }
 0x3cc   : > { %1189 = vst.msk [vmem:[#allocation2 + $0x338] sm:$0xff] %vm1085_vm2, %v1084_v24  ;;  %7100 = vmatmul.msk.f32.gmra.mxu3 %vm1085_vm2, %v8870_v0  ;;  %7221 = vmatmul.msk.f32.gmra.mxu1 %vm1085_vm2, %v8872_v25  ;;  %v8890_v24 = vld [vmem:[#allocation2 + $0x220] sm:$0xff] }
 0x3cd   : > { %7310 = vmatmul.msk.f32.gmra.mxu2 %vm1085_vm2, %v3479_v54  ;;  %v3480_v54 = vld [vmem:[#allocation2 + $0x201] sm:$0xff] }
 0x3cf   : > { %v8882_v47 = vpop.f32.mrf.mxu0 }
 0x3d0   : > { %11200 = vst [vmem:[#allocation136_spill] sm:$0xff] %v8882_v47  ;;  %v8884_v46 = vpop.f32.mrf.mxu2  ;;  %v8909_v47 = vld [vmem:[#allocation2 + $0x228] sm:$0xff] }
 0x3d1   : > { %11201 = vst [vmem:[#allocation137_spill] sm:$0xff] %v8884_v46  ;;  %v8886_v30 = vpop.f32.mrf.mxu1 }
 0x3d2   : > { %11202 = vst [vmem:[#allocation138_spill] sm:$0xff] %v8886_v30  ;;  %7414 = vmatmul.msk.f32.gmra.mxu0 %vm1085_vm2, %v8512_v1  ;;  %v8903_v30 = vpop.f32.mrf.mxu3 }
 0x3d3   : > { %11205 = vst [vmem:[#allocation141_spill] sm:$0xff] %v8903_v30  ;;  %v8928_v30 = vld [vmem:[#allocation2 + $0x230] sm:$0xff] }
 0x3d4   : > { %7101 = vmatmul.msk.f32.gmra.mxu3 %vm1085_vm2, %v8890_v24  ;;  %7222 = vmatmul.msk.f32.gmra.mxu1 %vm1085_vm2, %v8892_v42 }
 0x3d5   : > { %7311 = vmatmul.msk.f32.gmra.mxu2 %vm1085_vm2, %v3480_v54  ;;  %v3481_v54 = vld [vmem:[#allocation2 + $0x209] sm:$0xff] }
 0x3d7   : > { %v8899_v16 = vpop.f32.mrf.mxu0 }
 0x3d8   : > { %11203 = vst [vmem:[#allocation139_spill] sm:$0xff] %v8899_v16  ;;  %v8901_v46 = vpop.f32.mrf.mxu2 }
 0x3d9   : > { %11204 = vst [vmem:[#allocation140_spill] sm:$0xff] %v8901_v46  ;;  %v8905_v1 = vpop.f32.mrf.mxu1 }
 0x3da   : > { %11206 = vst [vmem:[#allocation142_spill] sm:$0xff] %v8905_v1  ;;  %7415 = vmatmul.msk.f32.gmra.mxu0 %vm1085_vm2, %v8529_v37  ;;  %v8926_v37 = vpop.f32.mrf.mxu3 }
 0x3db   : > { %11210 = vst [vmem:[#allocation146_spill] sm:$0xff] %v8926_v37  ;;  %v8947_v37 = vld [vmem:[#allocation2 + $0x240] sm:$0xff] }
 0x3dc   : > { %7102 = vmatmul.msk.f32.gmra.mxu3 %vm1085_vm2, %v8909_v47  ;;  %7223 = vmatmul.msk.f32.gmra.mxu1 %vm1085_vm2, %v8911_v23 }
 0x3dd   : > { %7312 = vmatmul.msk.f32.gmra.mxu2 %vm1085_vm2, %v3481_v54  ;;  %v3482_v54 = vld [vmem:[#allocation2 + $0x211] sm:$0xff] }
 0x3df   : > { %v8918_v46 = vpop.f32.mrf.mxu0 }
 0x3e0   : > { %11207 = vst [vmem:[#allocation143_spill] sm:$0xff] %v8918_v46  ;;  %v8920_v16 = vpop.f32.mrf.mxu2 }
 0x3e1   : > { %11208 = vst [vmem:[#allocation144_spill] sm:$0xff] %v8920_v16  ;;  %v8922_v1 = vpop.f32.mrf.mxu1 }
 0x3e2   : > { %11209 = vst [vmem:[#allocation145_spill] sm:$0xff] %v8922_v1  ;;  %7416 = vmatmul.msk.f32.gmra.mxu0 %vm1085_vm2, %v8542_v12 }
 0x3e4   : > { %7103 = vmatmul.msk.f32.gmra.mxu3 %vm1085_vm2, %v8928_v30  ;;  %7224 = vmatmul.msk.f32.gmra.mxu1 %vm1085_vm2, %v8930_v11 }
 0x3e5   : > { %7313 = vmatmul.msk.f32.gmra.mxu2 %vm1085_vm2, %v3482_v54  ;;  %v3483_v54 = vld [vmem:[#allocation2 + $0x221] sm:$0xff] }
 0x3e7   : > { %v8937_v16 = vpop.f32.mrf.mxu0  ;;  %v8945_v46 = vpop.f32.mrf.mxu3 }
 0x3e8   : > { %11211 = vst [vmem:[#allocation147_spill] sm:$0xff] %v8937_v16  ;;  %v8939_v1 = vpop.f32.mrf.mxu2 }
 0x3e9   : > { %11212 = vst [vmem:[#allocation148_spill] sm:$0xff] %v8939_v1  ;;  %v8941_v12 = vpop.f32.mrf.mxu1  ;;  %v2313_v1 = vld [vmem:[%s11065_s3 + $0x48] sm:$0xff] }
 0x3ea   : > { %11213 = vst [vmem:[#allocation149_spill] sm:$0xff] %v8941_v12  ;;  %7417 = vmatmul.msk.f32.gmra.mxu0 %vm1085_vm2, %v8557_v53  ;;  %2546 = vmatpush.msra.mxu3 %v2313_v1  ;;  %v3484_v1 = vld [vmem:[#allocation2 + $0x229] sm:$0xff] }
 0x3eb   : > { %11214 = vst [vmem:[#allocation150_spill] sm:$0xff] %v8945_v46  ;;  %v8967_v46 = vld [vmem:[#allocation2 + $0x248] sm:$0xff] }
 0x3ec   : > { %7104 = vmatmul.msk.f32.gmra.mxu3 %vm1085_vm2, %v8947_v37  ;;  %7225 = vmatmul.msk.f32.gmra.mxu1 %vm1085_vm2, %v8949_v45 }
 0x3ed   : > { %7314 = vmatmul.msk.f32.gmra.mxu2 %vm1085_vm2, %v3483_v54 }
 0x3ef   : > { %v8959_v53 = vpop.f32.mrf.mxu0  ;;  %v8975_v54 = vpop.f32.mrf.mxu3 }
 0x3f0   : > { %11215 = vst [vmem:[#allocation151_spill] sm:$0xff] %v8959_v53  ;;  %v8961_v12 = vpop.f32.mrf.mxu2  ;;  %v8986_v53 = vld [vmem:[#allocation2 + $0x250] sm:$0xff] }
 0x3f1   : > { %11216 = vst [vmem:[#allocation152_spill] sm:$0xff] %v8961_v12  ;;  %v8963_v16 = vpop.f32.mrf.mxu1 }
 0x3f2   : > { %11217 = vst [vmem:[#allocation153_spill] sm:$0xff] %v8963_v16  ;;  %7418 = vmatmul.msk.f32.gmra.mxu0 %vm1085_vm2, %v8574_v4 }
 0x3f3   : > { %11218 = vst [vmem:[#allocation154_spill] sm:$0xff] %v8975_v54  ;;  %v9005_v54 = vld [vmem:[#allocation2 + $0x260] sm:$0xff] }
 0x3f4   : > { %7105 = vmatmul.msk.f32.gmra.mxu3 %vm1085_vm2, %v8967_v46  ;;  %7226 = vmatmul.msk.f32.gmra.mxu1 %vm1085_vm2, %v8969_v3 }
 0x3f5   : > { %7315 = vmatmul.msk.f32.gmra.mxu2 %vm1085_vm2, %v3484_v1  ;;  %v3485_v1 = vld [vmem:[#allocation2 + $0x231] sm:$0xff] }
 0x3f7   : > { %v8978_v12 = vpop.f32.mrf.mxu0 }
 0x3f8   : > { %11219 = vst [vmem:[#allocation155_spill] sm:$0xff] %v8978_v12  ;;  %v8980_v16 = vpop.f32.mrf.mxu2  ;;  %v8995_v12 = vpop.f32.mrf.mxu3 }
 0x3f9   : > { %11220 = vst [vmem:[#allocation156_spill] sm:$0xff] %v8980_v16  ;;  %v8982_v4 = vpop.f32.mrf.mxu1 }
 0x3fa   : > { %11221 = vst [vmem:[#allocation157_spill] sm:$0xff] %v8982_v4  ;;  %7419 = vmatmul.msk.f32.gmra.mxu0 %vm1085_vm2, %v8590_v27 }
 0x3fb   : > { %11222 = vst [vmem:[#allocation158_spill] sm:$0xff] %v8995_v12  ;;  %v9024_v12 = vld [vmem:[#allocation2 + $0x268] sm:$0xff] }
 0x3fc   : > { %7106 = vmatmul.msk.f32.gmra.mxu3 %vm1085_vm2, %v8986_v53  ;;  %7227 = vmatmul.msk.f32.gmra.mxu1 %vm1085_vm2, %v8988_v52 }
 0x3fd   : > { %7316 = vmatmul.msk.f32.gmra.mxu2 %vm1085_vm2, %v3485_v1  ;;  %v3486_v1 = vld [vmem:[#allocation2 + $0x241] sm:$0xff] }
 0x3ff   : > { %v8997_v16 = vpop.f32.mrf.mxu0 }
 0x400   : > { %11223 = vst [vmem:[#allocation159_spill] sm:$0xff] %v8997_v16  ;;  %v8999_v4 = vpop.f32.mrf.mxu2 }
 0x401   : > { %11224 = vst [vmem:[#allocation160_spill] sm:$0xff] %v8999_v4  ;;  %v9001_v27 = vpop.f32.mrf.mxu1 }
 0x402   : > { %11225 = vst [vmem:[#allocation161_spill] sm:$0xff] %v9001_v27  ;;  %7420 = vmatmul.msk.f32.gmra.mxu0 %vm1085_vm2, %v8604_v15 }
 0x404   : > { %7107 = vmatmul.msk.f32.gmra.mxu3 %vm1085_vm2, %v9005_v54  ;;  %7228 = vmatmul.msk.f32.gmra.mxu1 %vm1085_vm2, %v9007_v21 }
 0x405   : > { %7317 = vmatmul.msk.f32.gmra.mxu2 %vm1085_vm2, %v3486_v1  ;;  %v3487_v1 = vld [vmem:[#allocation2 + $0x249] sm:$0xff] }
 0x407   : > { %v9014_v16 = vpop.f32.mrf.mxu0  ;;  %v9016_v4 = vpop.f32.mrf.mxu3 }
 0x408   : > { %11226 = vst [vmem:[#allocation162_spill] sm:$0xff] %v9014_v16  ;;  %v9018_v27 = vpop.f32.mrf.mxu2 }
 0x409   : > { %11227 = vst [vmem:[#allocation163_spill] sm:$0xff] %v9016_v4  ;;  %v9020_v15 = vpop.f32.mrf.mxu1  ;;  %v9043_v4 = vld [vmem:[#allocation2 + $0x270] sm:$0xff] }
 0x40a   : > { %11228 = vst [vmem:[#allocation164_spill] sm:$0xff] %v9018_v27  ;;  %7421 = vmatmul.msk.f32.gmra.mxu0 %vm1085_vm2, %v8618_v59 }
 0x40b   : > { %11229 = vst [vmem:[#allocation165_spill] sm:$0xff] %v9020_v15 }
 0x40c   : > { %7108 = vmatmul.msk.f32.gmra.mxu3 %vm1085_vm2, %v9024_v12  ;;  %7229 = vmatmul.msk.f32.gmra.mxu1 %vm1085_vm2, %v9026_v31 }
 0x40d   : > { %7318 = vmatmul.msk.f32.gmra.mxu2 %vm1085_vm2, %v3487_v1  ;;  %v3488_v1 = vld [vmem:[#allocation2 + $0x251] sm:$0xff] }
 0x40f   : > { %v9033_v16 = vpop.f32.mrf.mxu0  ;;  %v9035_v27 = vpop.f32.mrf.mxu3 }
 0x410   : > { %11230 = vst [vmem:[#allocation166_spill] sm:$0xff] %v9033_v16  ;;  %v9037_v15 = vpop.f32.mrf.mxu2 }
 0x411   : > { %11231 = vst [vmem:[#allocation167_spill] sm:$0xff] %v9035_v27  ;;  %v9039_v59 = vpop.f32.mrf.mxu1  ;;  %v9062_v27 = vld [vmem:[#allocation2 + $0x280] sm:$0xff] }
 0x412   : > { %11232 = vst [vmem:[#allocation168_spill] sm:$0xff] %v9037_v15  ;;  %7422 = vmatmul.msk.f32.gmra.mxu0 %vm1085_vm2, %v8635_v41 }
 0x413   : > { %11233 = vst [vmem:[#allocation169_spill] sm:$0xff] %v9039_v59 }
 0x414   : > { %7109 = vmatmul.msk.f32.gmra.mxu3 %vm1085_vm2, %v9043_v4  ;;  %7230 = vmatmul.msk.f32.gmra.mxu1 %vm1085_vm2, %v9045_v40 }
 0x415   : > { %7319 = vmatmul.msk.f32.gmra.mxu2 %vm1085_vm2, %v3488_v1 }
 0x417   : > { %v9052_v16 = vpop.f32.mrf.mxu0  ;;  %v9054_v15 = vpop.f32.mrf.mxu3 }
 0x418   : > { %11234 = vst [vmem:[#allocation170_spill] sm:$0xff] %v9052_v16  ;;  %v9056_v59 = vpop.f32.mrf.mxu2  ;;  %v9082_v16 = vld [vmem:[#allocation2 + $0x288] sm:$0xff] }
 0x419   : > { %11235 = vst [vmem:[#allocation171_spill] sm:$0xff] %v9054_v15  ;;  %v9058_v41 = vpop.f32.mrf.mxu1  ;;  %v9084_v15 = vld [vmem:[#allocation2 + $0x1b0] sm:$0xff] }
 0x41a   : > { %11236 = vst [vmem:[#allocation172_spill] sm:$0xff] %v9056_v59  ;;  %7423 = vmatmul.msk.f32.gmra.mxu0 %vm1085_vm2, %v8652_v2 }
 0x41b   : > { %11237 = vst [vmem:[#allocation173_spill] sm:$0xff] %v9058_v41 }
 0x41c   : > { %7110 = vmatmul.msk.f32.gmra.mxu3 %vm1085_vm2, %v9062_v27  ;;  %7231 = vmatmul.msk.f32.gmra.mxu1 %vm1085_vm2, %v9064_v60 }
 0x41d   : > { %7320 = vmatmul.msk.f32.gmra.mxu2 %vm1085_vm2, %v8432_v62  ;;  %v2312_v62 = vld [vmem:[%s11065_s3 + $0x40] sm:$0xff] }
 0x41e   : > { %2547 = vmatpush.msra.mxu3 %v2312_v62 }
 0x41f   : > { %v9072_v1 = vpop.f32.mrf.mxu0  ;;  %v9074_v59 = vpop.f32.mrf.mxu3 }
 0x420   : > { %11238 = vst [vmem:[#allocation174_spill] sm:$0xff] %v9072_v1  ;;  %v9076_v41 = vpop.f32.mrf.mxu2 }
 0x421   : > { %11239 = vst [vmem:[#allocation175_spill] sm:$0xff] %v9074_v59  ;;  %v9078_v2 = vpop.f32.mrf.mxu1  ;;  %v9105_v59 = vld [vmem:[#allocation2 + $0x290] sm:$0xff] }
 0x422   : > { %11240 = vst [vmem:[#allocation176_spill] sm:$0xff] %v9076_v41  ;;  %7424 = vmatmul.msk.f32.gmra.mxu0 %vm1085_vm2, %v8667_v63 }
 0x423   : > { %11241 = vst [vmem:[#allocation177_spill] sm:$0xff] %v9078_v2 }
 0x424   : > { %7111 = vmatmul.msk.f32.gmra.mxu3 %vm1085_vm2, %v9082_v16  ;;  %7232 = vmatmul.msk.f32.gmra.mxu1 %vm1085_vm2, %v9084_v15 }
 0x425   : > { %7321 = vmatmul.msk.f32.gmra.mxu2 %vm1085_vm2, %v8446_v50 }
 0x427   : > { %v9095_v41 = vpop.f32.mrf.mxu0  ;;  %v9097_v63 = vpop.f32.mrf.mxu3 }
 0x428   : > { %11242 = vst [vmem:[#allocation178_spill] sm:$0xff] %v9095_v41  ;;  %v9099_v2 = vpop.f32.mrf.mxu2  ;;  %v9127_v41 = vld [vmem:[#allocation2 + $0x1c8] sm:$0xff] }
 0x429   : > { %11243 = vst [vmem:[#allocation179_spill] sm:$0xff] %v9099_v2  ;;  %v9101_v1 = vpop.f32.mrf.mxu1 }
 0x42a   : > { %11244 = vst [vmem:[#allocation180_spill] sm:$0xff] %v9101_v1  ;;  %7425 = vmatmul.msk.f32.gmra.mxu0 %vm1085_vm2, %v8685_v48  ;;  %v9125_v1 = vld [vmem:[#allocation2 + $0x2a0] sm:$0xff] }
 0x42c   : > { %7112 = vmatmul.msk.f32.gmra.mxu3 %vm1085_vm2, %v9105_v59  ;;  %7233 = vmatmul.msk.f32.gmra.mxu1 %vm1085_vm2, %v9107_v8 }
 0x42d   : > { %7322 = vmatmul.msk.f32.gmra.mxu2 %vm1085_vm2, %v8463_v22 }
 0x42f   : > { %v9115_v50 = vpop.f32.mrf.mxu3  ;;  %v9117_v62 = vpop.f32.mrf.mxu0 }
 0x430   : > { %11245 = vst [vmem:[#allocation181_spill] sm:$0xff] %v9117_v62  ;;  %v9119_v2 = vpop.f32.mrf.mxu2  ;;  %v9145_v62 = vld [vmem:[#allocation2 + $0x2a8] sm:$0xff] }
 0x431   : > { %11246 = vst [vmem:[#allocation182_spill] sm:$0xff] %v9119_v2  ;;  %v9121_v48 = vpop.f32.mrf.mxu1 }
 0x432   : > { %11247 = vst [vmem:[#allocation183_spill] sm:$0xff] %v9121_v48  ;;  %7426 = vmatmul.msk.f32.gmra.mxu0 %vm1085_vm2, %v8707_v10 }
 0x434   : > { %7113 = vmatmul.msk.f32.gmra.mxu3 %vm1085_vm2, %v9125_v1  ;;  %7234 = vmatmul.msk.f32.gmra.mxu1 %vm1085_vm2, %v9127_v41 }
 0x435   : > { %7323 = vmatmul.msk.f32.gmra.mxu2 %vm1085_vm2, %v8493_v51 }
 0x437   : > { %v9135_v22 = vpop.f32.mrf.mxu3  ;;  %v9137_v2 = vpop.f32.mrf.mxu0 }
 0x438   : > { %11248 = vst [vmem:[#allocation184_spill] sm:$0xff] %v9137_v2  ;;  %v9139_v48 = vpop.f32.mrf.mxu2 }
 0x439   : > { %11249 = vst [vmem:[#allocation185_spill] sm:$0xff] %v9139_v48  ;;  %v9141_v10 = vpop.f32.mrf.mxu1 }
 0x43a   : > { %11250 = vst [vmem:[#allocation186_spill] sm:$0xff] %v9141_v10  ;;  %7427 = vmatmul.msk.f32.gmra.mxu0 %vm1085_vm2, %v8738_v38  ;;  %v9163_v38 = vld [vmem:[#allocation2 + $0x2b0] sm:$0xff] }
 0x43c   : > { %7114 = vmatmul.msk.f32.gmra.mxu3 %vm1085_vm2, %v9145_v62  ;;  %7235 = vmatmul.msk.f32.gmra.mxu1 %vm1085_vm2, %v8755_v32 }
 0x43d   : > { %7324 = vmatmul.msk.f32.gmra.mxu2 %vm1085_vm2, %v8510_v7 }
 0x43f   : > { %v9153_v51 = vpop.f32.mrf.mxu3  ;;  %v9155_v2 = vpop.f32.mrf.mxu0 }
 0x440   : > { %v9157_v48 = vpop.f32.mrf.mxu2 }
 0x441   : > { %11251 = vst [vmem:[#allocation187_spill] sm:$0xff] %v9157_v48  ;;  %v9159_v10 = vpop.f32.mrf.mxu1 }
 0x442   : > { %11252 = vst [vmem:[#allocation188_spill] sm:$0xff] %v9159_v10  ;;  %7428 = vmatmul.msk.f32.gmra.mxu0 %vm1085_vm2, %v8757_v33  ;;  %v9181_v33 = vld [vmem:[#allocation2 + $0x2c0] sm:$0xff] }
 0x444   : > { %7115 = vmatmul.msk.f32.gmra.mxu3 %vm1085_vm2, %v9163_v38  ;;  %7236 = vmatmul.msk.f32.gmra.mxu1 %vm1085_vm2, %v8774_v56 }
 0x445   : > { %7325 = vmatmul.msk.f32.gmra.mxu2 %vm1085_vm2, %v8527_v18 }
 0x447   : > { %v9171_v7 = vpop.f32.mrf.mxu3  ;;  %v9173_v32 = vpop.f32.mrf.mxu0 }
 0x448   : > { %v9175_v48 = vpop.f32.mrf.mxu2 }
 0x449   : > { %11253 = vst [vmem:[#allocation189_spill] sm:$0xff] %v9175_v48  ;;  %v9177_v10 = vpop.f32.mrf.mxu1 }
 0x44a   : > { %11254 = vst [vmem:[#allocation190_spill] sm:$0xff] %v9177_v10  ;;  %7429 = vmatmul.msk.f32.gmra.mxu0 %vm1085_vm2, %v8776_v44  ;;  %v9199_v44 = vld [vmem:[#allocation2 + $0x2c8] sm:$0xff] }
 0x44c   : > { %7116 = vmatmul.msk.f32.gmra.mxu3 %vm1085_vm2, %v9181_v33  ;;  %7237 = vmatmul.msk.f32.gmra.mxu1 %vm1085_vm2, %v8793_v36 }
 0x44d   : > { %7326 = vmatmul.msk.f32.gmra.mxu2 %vm1085_vm2, %v8555_v9 }
 0x44f   : > { %v9189_v18 = vpop.f32.mrf.mxu3  ;;  %v9191_v56 = vpop.f32.mrf.mxu0 }
 0x450   : > { %v9193_v48 = vpop.f32.mrf.mxu2 }
 0x451   : > { %11255 = vst [vmem:[#allocation191_spill] sm:$0xff] %v9193_v48  ;;  %v9195_v10 = vpop.f32.mrf.mxu1 }
 0x452   : > { %11256 = vst [vmem:[#allocation192_spill] sm:$0xff] %v9195_v10  ;;  %7430 = vmatmul.msk.f32.gmra.mxu0 %vm1085_vm2, %v8795_v17  ;;  %v9217_v17 = vld [vmem:[#allocation2 + $0x2d0] sm:$0xff] }
 0x454   : > { %7117 = vmatmul.msk.f32.gmra.mxu3 %vm1085_vm2, %v9199_v44  ;;  %7238 = vmatmul.msk.f32.gmra.mxu1 %vm1085_vm2, %v8812_v29 }
 0x455   : > { %7327 = vmatmul.msk.f32.gmra.mxu2 %vm1085_vm2, %v8572_v13  ;;  %v4107_v13 = vld [vmem:[%s11065_s3 + $0xb8] sm:$0xff] }
 0x456   : > { %4336 = vmatpush.msrb.mxu3 %v4107_v13 }
 0x457   : > { %v9207_v9 = vpop.f32.mrf.mxu3  ;;  %v9209_v36 = vpop.f32.mrf.mxu0 }
 0x458   : > { %v9211_v48 = vpop.f32.mrf.mxu2 }
 0x459   : > { %11257 = vst [vmem:[#allocation193_spill] sm:$0xff] %v9211_v48  ;;  %v9213_v10 = vpop.f32.mrf.mxu1 }
 0x45a   : > { %11258 = vst [vmem:[#allocation194_spill] sm:$0xff] %v9213_v10  ;;  %7431 = vmatmul.msk.f32.gmra.mxu0 %vm1085_vm2, %v8814_v58 }
 0x45c   : > { %7118 = vmatmul.msk.f32.gmra.mxu3 %vm1085_vm2, %v9217_v17  ;;  %7239 = vmatmul.msk.f32.gmra.mxu1 %vm1085_vm2, %v8832_v14  ;;  %v9241_v14 = vld [vmem:[#allocation2 + $0x2e0] sm:$0xff] }
 0x45d   : > { %7328 = vmatmul.msk.f32.gmra.mxu2 %vm1085_vm2, %v8588_v19  ;;  %v5899_v19 = vld [vmem:[%s11065_s3 + $0x118] sm:$0xff] }
 0x45e   : > { %6128 = vmatpush.msra.mxu2 %v5899_v19 }
 0x45f   : > { %v9228_v29 = vpop.f32.mrf.mxu3  ;;  %v9230_v48 = vpop.f32.mrf.mxu0 }
 0x460   : > { %11259 = vst [vmem:[#allocation195_spill] sm:$0xff] %v9230_v48  ;;  %v9232_v58 = vpop.f32.mrf.mxu2 }
 0x461   : > { %11260 = vst [vmem:[#allocation196_spill] sm:$0xff] %v9232_v58  ;;  %v9234_v10 = vpop.f32.mrf.mxu1 }
 0x462   : > { %11261 = vst [vmem:[#allocation197_spill] sm:$0xff] %v9234_v10  ;;  %7432 = vmatmul.msk.f32.gmra.mxu0 %vm1085_vm2, %v8834_v6  ;;  %v5302_v6 = vld [vmem:[%s11065_s3 + $0xf8] sm:$0xff] }
 0x463   : > { %5531 = vmatpush.msra.mxu1 %v5302_v6 }
 0x464   : > { %7119 = vmatmul.msk.f32.gmra.mxu3 %vm1085_vm2, %v9241_v14  ;;  %7240 = vmatmul.msk.f32.gmra.mxu1 %vm1085_vm2, %v8851_v49  ;;  %v9262_v49 = vld [vmem:[#allocation2 + $0x2e8] sm:$0xff] }
 0x465   : > { %7329 = vmatmul.msk.f32.gmra.mxu2 %vm1085_vm2, %v8616_v35 }
 0x467   : > { %v9252_v13 = vpop.f32.mrf.mxu3  ;;  %v9254_v58 = vpop.f32.mrf.mxu0 }
 0x468   : > { %11262 = vst [vmem:[#allocation198_spill] sm:$0xff] %v9254_v58  ;;  %v9256_v10 = vpop.f32.mrf.mxu2  ;;  %v5244_v58 = vld [vmem:[#allocation2 + $0xf1] sm:$0xff] }
 0x469   : > { %11263 = vst [vmem:[#allocation199_spill] sm:$0xff] %v9256_v10  ;;  %v9258_v19 = vpop.f32.mrf.mxu1 }
 0x46a   : > { %11264 = vst [vmem:[#allocation200_spill] sm:$0xff] %v9258_v19  ;;  %7433 = vmatmul.msk.f32.gmra.mxu0 %vm1085_vm2, %v8853_v39  ;;  %v9280_v39 = vld [vmem:[#allocation2 + $0x2f0] sm:$0xff] }
 0x46c   : > { %7120 = vmatmul.msk.f32.gmra.mxu3 %vm1085_vm2, %v9262_v49  ;;  %7241 = vmatmul.msk.f32.gmra.mxu1 %vm1085_vm2, %v8870_v0 }
 0x46d   : > { %7330 = vmatmul.msk.f32.gmra.mxu2 %vm1085_vm2, %v8633_v34 }
 0x46f   : > { %v9270_v35 = vpop.f32.mrf.mxu3  ;;  %v9274_v10 = vpop.f32.mrf.mxu0 }
 0x470   : > { %v9272_v6 = vpop.f32.mrf.mxu2  ;;  %11266 = vst [vmem:[#allocation202_spill] sm:$0xff] %v9274_v10 }
 0x471   : > { %11265 = vst [vmem:[#allocation201_spill] sm:$0xff] %v9272_v6  ;;  %v9276_v19 = vpop.f32.mrf.mxu1 }
 0x472   : > { %11267 = vst [vmem:[#allocation203_spill] sm:$0xff] %v9276_v19  ;;  %7434 = vmatmul.msk.f32.gmra.mxu0 %vm1085_vm2, %v8872_v25  ;;  %v2240_v25 = vld [vmem:[#allocation2 + $0x2] sm:$0xff] }
 0x474   : > { %7121 = vmatmul.msk.f32.gmra.mxu3 %vm1085_vm2, %v9280_v39  ;;  %7242 = vmatmul.msk.f32.gmra.mxu1 %vm1085_vm2, %v8890_v24 }
 0x475   : > { %7331 = vmatmul.msk.f32.gmra.mxu2 %vm1085_vm2, %v8650_v5 }
 0x477   : > { %v9288_v34 = vpop.f32.mrf.mxu3  ;;  %v9294_v19 = vpop.f32.mrf.mxu0 }
 0x478   : > { %v9290_v0 = vpop.f32.mrf.mxu2  ;;  %11270 = vst [vmem:[#allocation206_spill] sm:$0xff] %v9294_v19 }
 0x479   : > { %11268 = vst [vmem:[#allocation204_spill] sm:$0xff] %v9290_v0  ;;  %v9292_v6 = vpop.f32.mrf.mxu1 }
 0x47a   : > { %11269 = vst [vmem:[#allocation205_spill] sm:$0xff] %v9292_v6  ;;  %7435 = vmatmul.msk.f32.gmra.mxu0 %vm1085_vm2, %v8892_v42  ;;  %v2241_v6 = vld [vmem:[#allocation2 + $0xa] sm:$0xff] }
 0x47c   : > { %7122 = vmatmul.msk.f32.vlgmr.msra.gmra.mxu3 %vm1085_vm2, %v2240_v25  ;;  %7243 = vmatmul.msk.f32.gmra.mxu1 %vm1085_vm2, %v8909_v47  ;;  %v5898_v47 = vld [vmem:[%s11065_s3 + $0x110] sm:$0xff] }
 0x47d   : > { %7332 = vmatmul.msk.f32.gmra.mxu2 %vm1085_vm2, %v8683_v26 }
 0x47e   : > { %6129 = vmatpush.msra.mxu2 %v5898_v47 }
 0x47f   : > { %v9303_v5 = vpop.f32.mrf.mxu3  ;;  %v9311_v42 = vpop.f32.mrf.mxu0 }
 0x480   : > { %v9305_v24 = vpop.f32.mrf.mxu2  ;;  %11273 = vst [vmem:[#allocation209_spill] sm:$0xff] %v9311_v42  ;;  %v5232_v42 = vld [vmem:[#allocation2 + $0x71] sm:$0xff] }
 0x481   : > { %11271 = vst [vmem:[#allocation207_spill] sm:$0xff] %v9305_v24  ;;  %v9307_v0 = vpop.f32.mrf.mxu1 }
 0x482   : > { %11272 = vst [vmem:[#allocation208_spill] sm:$0xff] %v9307_v0  ;;  %7436 = vmatmul.msk.f32.gmra.mxu0 %vm1085_vm2, %v8911_v23 }
 0x484   : > { %7123 = vmatmul.msk.f32.gmra.mxu3 %vm1085_vm2, %v2241_v6  ;;  %7244 = vmatmul.msk.f32.gmra.mxu1 %vm1085_vm2, %v8928_v30  ;;  %v5897_v6 = vld [vmem:[%s11065_s3 + $0x108] sm:$0xff]  ;;  %v5896_v30 = vld [vmem:[%s11065_s3 + $0x100] sm:$0xff] }
 0x485   : > { %7333 = vmatmul.msk.f32.gmra.mxu2 %vm1085_vm2, %v8705_v55  ;;  %v2242_v55 = vld [vmem:[#allocation2 + $0x12] sm:$0xff] }
 0x486   : > { %6130 = vmatpush.msra.mxu2 %v5897_v6 }
 0x487   : > { %v9318_v26 = vpop.f32.mrf.mxu3  ;;  %v9340_v47 = vpop.f32.mrf.mxu0 }
 0x488   : > { %v9323_v25 = vpop.f32.mrf.mxu2  ;;  %11276 = vst [vmem:[#allocation212_spill] sm:$0xff] %v9340_v47  ;;  %6131 = vmatpush.msra.mxu2 %v5896_v30 }
 0x489   : > { %11274 = vst [vmem:[#allocation210_spill] sm:$0xff] %v9323_v25  ;;  %v9325_v23 = vpop.f32.mrf.mxu1  ;;  %v3504_v25 = vld [vmem:[#allocation2 + $0x301] sm:$0xff] }
 0x48a   : > { %11275 = vst [vmem:[#allocation211_spill] sm:$0xff] %v9325_v23  ;;  %7437 = vmatmul.msk.f32.gmra.mxu0 %vm1085_vm2, %v8930_v11 }
 0x48c   : > { %7124 = vmatmul.msk.f32.gmra.mxu3 %vm1085_vm2, %v2242_v55  ;;  %7245 = vmatmul.msk.f32.gmra.mxu1 %vm1085_vm2, %v8947_v37  ;;  %v2243_v55 = vld [vmem:[#allocation2 + $0x22] sm:$0xff] }
 0x48d   : > { %7334 = vmatmul.msk.f32.gmra.mxu2 %vm1085_vm2, %v8736_v28 }
 0x48f   : > { %v9342_v24 = vpop.f32.mrf.mxu3  ;;  %v9356_v37 = vpop.f32.mrf.mxu0 }
 0x490   : > { %v9344_v11 = vpop.f32.mrf.mxu2  ;;  %11279 = vst [vmem:[#allocation215_spill] sm:$0xff] %v9356_v37  ;;  %v5231_v37 = vld [vmem:[#allocation2 + $0x69] sm:$0xff] }
 0x491   : > { %11277 = vst [vmem:[#allocation213_spill] sm:$0xff] %v9344_v11  ;;  %v9346_v6 = vpop.f32.mrf.mxu1 }
 0x492   : > { %11278 = vst [vmem:[#allocation214_spill] sm:$0xff] %v9346_v6  ;;  %7438 = vmatmul.msk.f32.gmra.mxu0 %vm1085_vm2, %v8949_v45  ;;  %v3505_v45 = vld [vmem:[#allocation2 + $0x309] sm:$0xff] }
 0x493   : > { %v2244_v6 = vld [vmem:[#allocation2 + $0x2a] sm:$0xff] }
 0x494   : > { %7125 = vmatmul.msk.f32.gmra.mxu3 %vm1085_vm2, %v2243_v55  ;;  %7246 = vmatmul.msk.f32.gmra.mxu1 %vm1085_vm2, %v8967_v46 }
 0x495   : > { %7335 = vmatmul.msk.f32.gmra.mxu2 %vm1085_vm2, %v3504_v25 }
 0x497   : > { %v9354_v28 = vpop.f32.mrf.mxu3 }
 0x498   : > { %v9358_v30 = vpop.f32.mrf.mxu2 }
 0x499   : > { %11280 = vst [vmem:[#allocation216_spill] sm:$0xff] %v9358_v30  ;;  %v9360_v11 = vpop.f32.mrf.mxu1  ;;  %v9374_v30 = vpop.f32.mrf.mxu0 }
 0x49a   : > { %11281 = vst [vmem:[#allocation217_spill] sm:$0xff] %v9360_v11  ;;  %7439 = vmatmul.msk.f32.gmra.mxu0 %vm1085_vm2, %v8969_v3  ;;  %v3506_v3 = vld [vmem:[#allocation2 + $0x311] sm:$0xff] }
 0x49b   : > { %11284 = vst [vmem:[#allocation220_spill] sm:$0xff] %v9374_v30  ;;  %v2245_v11 = vld [vmem:[#allocation2 + $0x32] sm:$0xff] }
 0x49c   : > { %7126 = vmatmul.msk.f32.gmra.mxu3 %vm1085_vm2, %v2244_v6  ;;  %7247 = vmatmul.msk.f32.gmra.mxu1 %vm1085_vm2, %v8986_v53 }
 0x49d   : > { %7336 = vmatmul.msk.f32.gmra.mxu2 %vm1085_vm2, %v3505_v45 }
 0x49f   : > { %v9368_v46 = vpop.f32.mrf.mxu3 }
 0x4a0   : > { %v9370_v25 = vpop.f32.mrf.mxu2 }
 0x4a1   : > { %11282 = vst [vmem:[#allocation218_spill] sm:$0xff] %v9370_v25  ;;  %v9372_v55 = vpop.f32.mrf.mxu1  ;;  %v2246_v25 = vld [vmem:[#allocation2 + $0x42] sm:$0xff] }
 0x4a2   : > { %11283 = vst [vmem:[#allocation219_spill] sm:$0xff] %v9372_v55  ;;  %7440 = vmatmul.msk.f32.gmra.mxu0 %vm1085_vm2, %v8988_v52  ;;  %v9390_v52 = vpop.f32.mrf.mxu0 }
 0x4a3   : > { %11287 = vst [vmem:[#allocation223_spill] sm:$0xff] %v9390_v52 }
 0x4a4   : > { %7127 = vmatmul.msk.f32.gmra.mxu3 %vm1085_vm2, %v2245_v11  ;;  %7248 = vmatmul.msk.f32.gmra.mxu1 %vm1085_vm2, %v9005_v54 }
 0x4a5   : > { %7337 = vmatmul.msk.f32.gmra.mxu2 %vm1085_vm2, %v3506_v3 }
 0x4a7   : > { %v9382_v53 = vpop.f32.mrf.mxu3 }
 0x4a8   : > { %v9384_v6 = vpop.f32.mrf.mxu2 }
 0x4a9   : > { %11285 = vst [vmem:[#allocation221_spill] sm:$0xff] %v9384_v6  ;;  %v9386_v45 = vpop.f32.mrf.mxu1 }
 0x4aa   : > { %11286 = vst [vmem:[#allocation222_spill] sm:$0xff] %v9386_v45  ;;  %7441 = vmatmul.msk.f32.gmra.mxu0 %vm1085_vm2, %v9007_v21  ;;  %v2247_v21 = vld [vmem:[#allocation2 + $0x4a] sm:$0xff]  ;;  %v2255_v45 = vld [vmem:[#allocation2 + $0xa2] sm:$0xff] }
 0x4ac   : > { %7128 = vmatmul.msk.f32.gmra.mxu3 %vm1085_vm2, %v2246_v25  ;;  %7249 = vmatmul.msk.f32.gmra.mxu1 %vm1085_vm2, %v9024_v12  ;;  %v9408_v12 = vpop.f32.mrf.mxu0 }
 0x4ad   : > { %7554 = vmatmul.msk.f32.vlgmr.msra.gmra.mxu2 %vm1085_vm2, %v2246_v25  ;;  %11290 = vst [vmem:[#allocation226_spill] sm:$0xff] %v9408_v12  ;;  %v5230_v12 = vld [vmem:[#allocation2 + $0x61] sm:$0xff] }
 0x4af   : > { %v9396_v54 = vpop.f32.mrf.mxu3 }
 0x4b0   : > { %v9398_v11 = vpop.f32.mrf.mxu2 }
 0x4b1   : > { %11288 = vst [vmem:[#allocation224_spill] sm:$0xff] %v9398_v11  ;;  %v9400_v3 = vpop.f32.mrf.mxu1 }
 0x4b2   : > { %11289 = vst [vmem:[#allocation225_spill] sm:$0xff] %v9400_v3  ;;  %7442 = vmatmul.msk.f32.gmra.mxu0 %vm1085_vm2, %v9026_v31  ;;  %v2248_v31 = vld [vmem:[#allocation2 + $0x52] sm:$0xff] }
 0x4b4   : > { %7129 = vmatmul.msk.f32.gmra.mxu3 %vm1085_vm2, %v2247_v21  ;;  %7250 = vmatmul.msk.f32.gmra.mxu1 %vm1085_vm2, %v9043_v4 }
 0x4b5   : > { %7555 = vmatmul.msk.f32.gmra.mxu2 %vm1085_vm2, %v2247_v21  ;;  %v9424_v21 = vpop.f32.mrf.mxu0 }
 0x4b6   : > { %11293 = vst [vmem:[#allocation229_spill] sm:$0xff] %v9424_v21 }
 0x4b7   : > { %v9410_v25 = vpop.f32.mrf.mxu3 }
 0x4b8   : > { %v9412_v6 = vpop.f32.mrf.mxu2 }
 0x4b9   : > { %11291 = vst [vmem:[#allocation227_spill] sm:$0xff] %v9412_v6  ;;  %v9414_v11 = vpop.f32.mrf.mxu1 }
 0x4ba   : > { %11292 = vst [vmem:[#allocation228_spill] sm:$0xff] %v9414_v11  ;;  %7443 = vmatmul.msk.f32.gmra.mxu0 %vm1085_vm2, %v9045_v40  ;;  %v2249_v40 = vld [vmem:[#allocation2 + $0x62] sm:$0xff] }
 0x4bc   : > { %7130 = vmatmul.msk.f32.gmra.mxu3 %vm1085_vm2, %v2248_v31  ;;  %7251 = vmatmul.msk.f32.gmra.mxu1 %vm1085_vm2, %v9062_v27 }
 0x4bd   : > { %7556 = vmatmul.msk.f32.gmra.mxu2 %vm1085_vm2, %v2248_v31 }
 0x4bf   : > { %v9422_v4 = vpop.f32.mrf.mxu3 }
 0x4c0   : > { %v9426_v3 = vpop.f32.mrf.mxu2 }
 0x4c1   : > { %11294 = vst [vmem:[#allocation230_spill] sm:$0xff] %v9426_v3  ;;  %v9428_v6 = vpop.f32.mrf.mxu1  ;;  %v9442_v3 = vpop.f32.mrf.mxu0 }
 0x4c2   : > { %11295 = vst [vmem:[#allocation231_spill] sm:$0xff] %v9428_v6  ;;  %7444 = vmatmul.msk.f32.gmra.mxu0 %vm1085_vm2, %v9064_v60  ;;  %v2250_v60 = vld [vmem:[#allocation2 + $0x6a] sm:$0xff] }
 0x4c3   : > { %11298 = vst [vmem:[#allocation234_spill] sm:$0xff] %v9442_v3  ;;  %v4680_v3 = vld [vmem:[#allocation2 + $0x250] sm:$0xff] }
 0x4c4   : > { %7131 = vmatmul.msk.f32.gmra.mxu3 %vm1085_vm2, %v2249_v40  ;;  %7252 = vmatmul.msk.f32.gmra.mxu1 %vm1085_vm2, %v9082_v16 }
 0x4c5   : > { %7557 = vmatmul.msk.f32.gmra.mxu2 %vm1085_vm2, %v2249_v40 }
 0x4c7   : > { %v9436_v27 = vpop.f32.mrf.mxu3 }
 0x4c8   : > { %v9438_v31 = vpop.f32.mrf.mxu2 }
 0x4c9   : > { %11296 = vst [vmem:[#allocation232_spill] sm:$0xff] %v9438_v31  ;;  %v9440_v11 = vpop.f32.mrf.mxu1  ;;  %v9458_v6 = vpop.f32.mrf.mxu0 }
 0x4ca   : > { %11297 = vst [vmem:[#allocation233_spill] sm:$0xff] %v9440_v11  ;;  %7445 = vmatmul.msk.f32.gmra.mxu0 %vm1085_vm2, %v9084_v15  ;;  %v2251_v11 = vld [vmem:[#allocation2 + $0x72] sm:$0xff] }
 0x4cb   : > { %11301 = vst [vmem:[#allocation237_spill] sm:$0xff] %v9458_v6  ;;  %v5228_v6 = vld [vmem:[#allocation2 + $0x49] sm:$0xff] }
 0x4cc   : > { %7132 = vmatmul.msk.f32.gmra.mxu3 %vm1085_vm2, %v2250_v60  ;;  %7253 = vmatmul.msk.f32.gmra.mxu1 %vm1085_vm2, %v9105_v59 }
 0x4cd   : > { %7558 = vmatmul.msk.f32.gmra.mxu2 %vm1085_vm2, %v2250_v60 }
 0x4cf   : > { %v9450_v16 = vpop.f32.mrf.mxu3 }
 0x4d0   : > { %v9452_v40 = vpop.f32.mrf.mxu2 }
 0x4d1   : > { %11299 = vst [vmem:[#allocation235_spill] sm:$0xff] %v9452_v40  ;;  %v9454_v31 = vpop.f32.mrf.mxu1 }
 0x4d2   : > { %11300 = vst [vmem:[#allocation236_spill] sm:$0xff] %v9454_v31  ;;  %7446 = vmatmul.msk.f32.gmra.mxu0 %vm1085_vm2, %v9107_v8  ;;  %v2252_v8 = vld [vmem:[#allocation2 + $0x82] sm:$0xff]  ;;  %v4668_v31 = vld [vmem:[#allocation2 + $0x1d0] sm:$0xff] }
 0x4d4   : > { %7133 = vmatmul.msk.f32.gmra.mxu3 %vm1085_vm2, %v2251_v11  ;;  %7254 = vmatmul.msk.f32.gmra.mxu1 %vm1085_vm2, %v9125_v1  ;;  %v9476_v1 = vpop.f32.mrf.mxu0 }
 0x4d5   : > { %7559 = vmatmul.msk.f32.gmra.mxu2 %vm1085_vm2, %v2251_v11  ;;  %11304 = vst [vmem:[#allocation240_spill] sm:$0xff] %v9476_v1 }
 0x4d7   : > { %v9464_v15 = vpop.f32.mrf.mxu3 }
 0x4d8   : > { %v9466_v59 = vpop.f32.mrf.mxu2 }
 0x4d9   : > { %11302 = vst [vmem:[#allocation238_spill] sm:$0xff] %v9466_v59  ;;  %v9468_v60 = vpop.f32.mrf.mxu1 }
 0x4da   : > { %11303 = vst [vmem:[#allocation239_spill] sm:$0xff] %v9468_v60  ;;  %7447 = vmatmul.msk.f32.gmra.mxu0 %vm1085_vm2, %v9127_v41  ;;  %v2253_v41 = vld [vmem:[#allocation2 + $0x8a] sm:$0xff] }
 0x4dc   : > { %7134 = vmatmul.msk.f32.gmra.mxu3 %vm1085_vm2, %v2252_v8  ;;  %7255 = vmatmul.msk.f32.gmra.mxu1 %vm1085_vm2, %v9145_v62 }
 0x4dd   : > { %7560 = vmatmul.msk.f32.gmra.mxu2 %vm1085_vm2, %v2252_v8  ;;  %v9491_v8 = vpop.f32.mrf.mxu0 }
 0x4de   : > { %11307 = vst [vmem:[#allocation243_spill] sm:$0xff] %v9491_v8 }
 0x4df   : > { %v9478_v11 = vpop.f32.mrf.mxu3 }
 0x4e0   : > { %v9480_v40 = vpop.f32.mrf.mxu2 }
 0x4e1   : > { %11305 = vst [vmem:[#allocation241_spill] sm:$0xff] %v9480_v40  ;;  %v9482_v59 = vpop.f32.mrf.mxu1 }
 0x4e2   : > { %11306 = vst [vmem:[#allocation242_spill] sm:$0xff] %v9482_v59  ;;  %7448 = vmatmul.msk.f32.gmra.mxu0 %vm1085_vm2, %v4668_v31  ;;  %v4669_v59 = vld [vmem:[#allocation2 + $0x1e0] sm:$0xff]  ;;  %v2254_v31 = vld [vmem:[#allocation2 + $0x92] sm:$0xff] }
 0x4e4   : > { %7135 = vmatmul.msk.f32.gmra.mxu3 %vm1085_vm2, %v2253_v41  ;;  %7256 = vmatmul.msk.f32.gmra.mxu1 %vm1085_vm2, %v9163_v38  ;;  %v4106_v38 = vld [vmem:[%s11065_s3 + $0xb0] sm:$0xff] }
 0x4e5   : > { %7561 = vmatmul.msk.f32.gmra.mxu2 %vm1085_vm2, %v2253_v41  ;;  %4337 = vmatpush.msrb.mxu3 %v4106_v38  ;;  %v9511_v55 = vpop.f32.mrf.mxu0 }
 0x4e6   : > { %11312 = vst [vmem:[#allocation248_spill] sm:$0xff] %v9511_v55  ;;  %v2263_v55 = vld [vmem:[#allocation2 + $0xf2] sm:$0xff] }
 0x4e7   : > { %v9489_v62 = vpop.f32.mrf.mxu3 }
 0x4e8   : > { %v9493_v60 = vpop.f32.mrf.mxu2 }
 0x4e9   : > { %11308 = vst [vmem:[#allocation244_spill] sm:$0xff] %v9493_v60  ;;  %v9495_v40 = vpop.f32.mrf.mxu1 }
 0x4ea   : > { %11309 = vst [vmem:[#allocation245_spill] sm:$0xff] %v9495_v40  ;;  %7449 = vmatmul.msk.f32.gmra.mxu0 %vm1085_vm2, %v4669_v59  ;;  %v4670_v59 = vld [vmem:[#allocation2 + $0x1e8] sm:$0xff] }
 0x4ec   : > { %7136 = vmatmul.msk.f32.gmra.mxu3 %vm1085_vm2, %v2254_v31  ;;  %7257 = vmatmul.msk.f32.gmra.mxu1 %vm1085_vm2, %v9181_v33  ;;  %v5301_v33 = vld [vmem:[%s11065_s3 + $0xf0] sm:$0xff] }
 0x4ed   : > { %7562 = vmatmul.msk.f32.gmra.mxu2 %vm1085_vm2, %v2254_v31  ;;  %5532 = vmatpush.msra.mxu1 %v5301_v33  ;;  %v9528_v23 = vpop.f32.mrf.mxu0 }
 0x4ee   : > { %11315 = vst [vmem:[#allocation251_spill] sm:$0xff] %v9528_v23  ;;  %v2260_v23 = vld [vmem:[#allocation2 + $0xd2] sm:$0xff] }
 0x4ef   : > { %v9505_v41 = vpop.f32.mrf.mxu3 }
 0x4f0   : > { %v9507_v60 = vpop.f32.mrf.mxu2 }
 0x4f1   : > { %11310 = vst [vmem:[#allocation246_spill] sm:$0xff] %v9507_v60  ;;  %v9509_v40 = vpop.f32.mrf.mxu1 }
 0x4f2   : > { %11311 = vst [vmem:[#allocation247_spill] sm:$0xff] %v9509_v40  ;;  %7450 = vmatmul.msk.f32.gmra.mxu0 %vm1085_vm2, %v4670_v59  ;;  %v4671_v59 = vld [vmem:[#allocation2 + $0x1f0] sm:$0xff] }
 0x4f3   : > { %v2256_v40 = vld [vmem:[#allocation2 + $0xaa] sm:$0xff] }
 0x4f4   : > { %7137 = vmatmul.msk.f32.gmra.mxu3 %vm1085_vm2, %v2255_v45  ;;  %7258 = vmatmul.msk.f32.gmra.mxu1 %vm1085_vm2, %v9199_v44 }
 0x4f5   : > { %7563 = vmatmul.msk.f32.gmra.mxu2 %vm1085_vm2, %v2255_v45 }
 0x4f7   : > { %v9521_v31 = vpop.f32.mrf.mxu3 }
 0x4f8   : > { %v9523_v38 = vpop.f32.mrf.mxu2 }
 0x4f9   : > { %11313 = vst [vmem:[#allocation249_spill] sm:$0xff] %v9523_v38  ;;  %v9525_v60 = vpop.f32.mrf.mxu1  ;;  %v4672_v38 = vld [vmem:[#allocation2 + $0x200] sm:$0xff] }
 0x4fa   : > { %11314 = vst [vmem:[#allocation250_spill] sm:$0xff] %v9525_v60  ;;  %7451 = vmatmul.msk.f32.gmra.mxu0 %vm1085_vm2, %v4671_v59  ;;  %v2257_v59 = vld [vmem:[#allocation2 + $0xb2] sm:$0xff] }
 0x4fc   : > { %7138 = vmatmul.msk.f32.gmra.mxu3 %vm1085_vm2, %v2256_v40  ;;  %7259 = vmatmul.msk.f32.gmra.mxu1 %vm1085_vm2, %v9217_v17  ;;  %v9545_v17 = vpop.f32.mrf.mxu0 }
 0x4fd   : > { %7564 = vmatmul.msk.f32.gmra.mxu2 %vm1085_vm2, %v2256_v40  ;;  %11318 = vst [vmem:[#allocation254_spill] sm:$0xff] %v9545_v17 }
 0x4ff   : > { %v9534_v44 = vpop.f32.mrf.mxu3 }
 0x500   : > { %v9536_v45 = vpop.f32.mrf.mxu2 }
 0x501   : > { %11316 = vst [vmem:[#allocation252_spill] sm:$0xff] %v9536_v45  ;;  %v9538_v33 = vpop.f32.mrf.mxu1 }
 0x502   : > { %11317 = vst [vmem:[#allocation253_spill] sm:$0xff] %v9538_v33  ;;  %7452 = vmatmul.msk.f32.gmra.mxu0 %vm1085_vm2, %v4672_v38  ;;  %v4673_v33 = vld [vmem:[#allocation2 + $0x208] sm:$0xff] }
 0x503   : > { %v2258_v38 = vld [vmem:[#allocation2 + $0xc2] sm:$0xff] }
 0x504   : > { %7139 = vmatmul.msk.f32.gmra.mxu3 %vm1085_vm2, %v2257_v59  ;;  %7260 = vmatmul.msk.f32.gmra.mxu1 %vm1085_vm2, %v9241_v14 }
 0x505   : > { %7565 = vmatmul.msk.f32.gmra.mxu2 %vm1085_vm2, %v2257_v59  ;;  %v9560_v59 = vpop.f32.mrf.mxu0 }
 0x506   : > { %11321 = vst [vmem:[#allocation257_spill] sm:$0xff] %v9560_v59 }
 0x507   : > { %v9547_v40 = vpop.f32.mrf.mxu3 }
 0x508   : > { %v9549_v60 = vpop.f32.mrf.mxu2 }
 0x509   : > { %11319 = vst [vmem:[#allocation255_spill] sm:$0xff] %v9549_v60  ;;  %v9551_v45 = vpop.f32.mrf.mxu1 }
 0x50a   : > { %11320 = vst [vmem:[#allocation256_spill] sm:$0xff] %v9551_v45  ;;  %7453 = vmatmul.msk.f32.gmra.mxu0 %vm1085_vm2, %v4673_v33  ;;  %v4674_v45 = vld [vmem:[#allocation2 + $0x210] sm:$0xff]  ;;  %v5300_v33 = vld [vmem:[%s11065_s3 + $0xe8] sm:$0xff] }
 0x50b   : > { %5533 = vmatpush.msra.mxu1 %v5300_v33  ;;  %v2907_v33 = vld [vmem:[#allocation2 + $0x300] sm:$0xff] }
 0x50c   : > { %7140 = vmatmul.msk.f32.gmra.mxu3 %vm1085_vm2, %v2258_v38  ;;  %7261 = vmatmul.msk.f32.gmra.mxu1 %vm1085_vm2, %v9262_v49  ;;  %v5299_v49 = vld [vmem:[%s11065_s3 + $0xe0] sm:$0xff] }
 0x50d   : > { %7566 = vmatmul.msk.f32.gmra.mxu2 %vm1085_vm2, %v2258_v38  ;;  %v2259_v38 = vld [vmem:[#allocation2 + $0xca] sm:$0xff]  ;;  %5534 = vmatpush.msra.mxu1 %v5299_v49  ;;  %v9583_v17 = vpop.f32.mrf.mxu0 }
 0x50e   : > { %11326 = vst [vmem:[#allocation262_spill] sm:$0xff] %v9583_v17  ;;  %v2261_v17 = vld [vmem:[#allocation2 + $0xe2] sm:$0xff] }
 0x50f   : > { %v9558_v14 = vpop.f32.mrf.mxu3 }
 0x510   : > { %v9562_v0 = vpop.f32.mrf.mxu2 }
 0x511   : > { %11322 = vst [vmem:[#allocation258_spill] sm:$0xff] %v9562_v0  ;;  %v9564_v60 = vpop.f32.mrf.mxu1 }
 0x512   : > { %11323 = vst [vmem:[#allocation259_spill] sm:$0xff] %v9564_v60  ;;  %7454 = vmatmul.msk.f32.gmra.mxu0 %vm1085_vm2, %v4674_v45  ;;  %v4675_v45 = vld [vmem:[#allocation2 + $0x220] sm:$0xff] }
 0x514   : > { %7141 = vmatmul.msk.f32.gmra.mxu3 %vm1085_vm2, %v2259_v38  ;;  %7262 = vmatmul.msk.f32.gmra.mxu1 %vm1085_vm2, %v9280_v39 }
 0x515   : > { %7567 = vmatmul.msk.f32.gmra.mxu2 %vm1085_vm2, %v2259_v38  ;;  %v9596_v8 = vpop.f32.mrf.mxu0 }
 0x516   : > { %11329 = vst [vmem:[#allocation265_spill] sm:$0xff] %v9596_v8 }
 0x517   : > { %v9577_v0 = vpop.f32.mrf.mxu3 }
 0x518   : > { %v9579_v60 = vpop.f32.mrf.mxu2 }
 0x519   : > { %11324 = vst [vmem:[#allocation260_spill] sm:$0xff] %v9579_v60  ;;  %v9581_v59 = vpop.f32.mrf.mxu1  ;;  %v4676_v60 = vld [vmem:[#allocation2 + $0x228] sm:$0xff] }
 0x51a   : > { %11325 = vst [vmem:[#allocation261_spill] sm:$0xff] %v9581_v59  ;;  %7455 = vmatmul.msk.f32.gmra.mxu0 %vm1085_vm2, %v4675_v45  ;;  %v2908_v59 = vld [vmem:[#allocation2 + $0x308] sm:$0xff] }
 0x51c   : > { %7142 = vmatmul.msk.f32.gmra.mxu3 %vm1085_vm2, %v2260_v23  ;;  %7263 = vmatmul.msk.f32.gmra.mxu1 %vm1085_vm2, %v2907_v33 }
 0x51d   : > { %7568 = vmatmul.msk.f32.gmra.mxu2 %vm1085_vm2, %v2260_v23 }
 0x51f   : > { %v9589_v39 = vpop.f32.mrf.mxu3 }
 0x520   : > { %v9591_v49 = vpop.f32.mrf.mxu2 }
 0x521   : > { %11327 = vst [vmem:[#allocation263_spill] sm:$0xff] %v9591_v49  ;;  %v9593_v38 = vpop.f32.mrf.mxu1  ;;  %v4677_v49 = vld [vmem:[#allocation2 + $0x230] sm:$0xff] }
 0x522   : > { %11328 = vst [vmem:[#allocation264_spill] sm:$0xff] %v9593_v38  ;;  %7456 = vmatmul.msk.f32.gmra.mxu0 %vm1085_vm2, %v4676_v60  ;;  %v2909_v38 = vld [vmem:[#allocation2 + $0x310] sm:$0xff] }
 0x523   : > { %v2262_v60 = vld [vmem:[#allocation2 + $0xea] sm:$0xff] }
 0x524   : > { %7143 = vmatmul.msk.f32.gmra.mxu3 %vm1085_vm2, %v2261_v17  ;;  %7264 = vmatmul.msk.f32.gmra.mxu1 %vm1085_vm2, %v2908_v59  ;;  %v9611_v59 = vpop.f32.mrf.mxu0 }
 0x525   : > { %7569 = vmatmul.msk.f32.gmra.mxu2 %vm1085_vm2, %v2261_v17  ;;  %11332 = vst [vmem:[#allocation268_spill] sm:$0xff] %v9611_v59 }
 0x527   : > { %v9601_v23 = vpop.f32.mrf.mxu3 }
 0x528   : > { %v9603_v45 = vpop.f32.mrf.mxu2 }
 0x529   : > { %11330 = vst [vmem:[#allocation266_spill] sm:$0xff] %v9603_v45  ;;  %v9605_v33 = vpop.f32.mrf.mxu1 }
 0x52a   : > { %11331 = vst [vmem:[#allocation267_spill] sm:$0xff] %v9605_v33  ;;  %7457 = vmatmul.msk.f32.gmra.mxu0 %vm1085_vm2, %v4677_v49  ;;  %v4678_v33 = vld [vmem:[#allocation2 + $0x240] sm:$0xff] }
 0x52b   : > { %v5227_v49 = vld [vmem:[#allocation2 + $0x41] sm:$0xff] }
 0x52c   : > { %7144 = vmatmul.msk.f32.gmra.mxu3 %vm1085_vm2, %v2262_v60  ;;  %7265 = vmatmul.msk.f32.gmra.mxu1 %vm1085_vm2, %v2909_v38 }
 0x52d   : > { %7570 = vmatmul.msk.f32.gmra.mxu2 %vm1085_vm2, %v2262_v60  ;;  %v9625_v60 = vpop.f32.mrf.mxu0 }
 0x52e   : > { %11335 = vst [vmem:[#allocation271_spill] sm:$0xff] %v9625_v60 }
 0x52f   : > { %v9613_v17 = vpop.f32.mrf.mxu3 }
 0x530   : > { %v9615_v8 = vpop.f32.mrf.mxu2 }
 0x531   : > { %v9617_v45 = vpop.f32.mrf.mxu1 }
 0x532   : > { %11333 = vst [vmem:[#allocation269_spill] sm:$0xff] %v9617_v45  ;;  %7458 = vmatmul.msk.f32.gmra.mxu0 %vm1085_vm2, %v4678_v33  ;;  %v4679_v45 = vld [vmem:[#allocation2 + $0x248] sm:$0xff] }
 0x533   : > { %v2264_v33 = vld [vmem:[#allocation2 + $0x102] sm:$0xff] }
 0x534   : > { %7145 = vmatmul.msk.f32.gmra.mxu3 %vm1085_vm2, %v2263_v55  ;;  %7482 = vmatmul.msk.f32.vlgmr.msra.gmra.mxu1 %vm1085_vm2, %v5227_v49 }
 0x535   : > { %7571 = vmatmul.msk.f32.gmra.mxu2 %vm1085_vm2, %v2263_v55  ;;  %v9641_v21 = vpop.f32.mrf.mxu0 }
 0x536   : > { %11339 = vst [vmem:[#allocation275_spill] sm:$0xff] %v9641_v21  ;;  %v2266_v21 = vld [vmem:[#allocation2 + $0x112] sm:$0xff] }
 0x537   : > { %v9623_v38 = vpop.f32.mrf.mxu3 }
 0x538   : > { %11334 = vst [vmem:[#allocation270_spill] sm:$0xff] %v9623_v38  ;;  %v9627_v59 = vpop.f32.mrf.mxu2 }
 0x539   : > { %v9629_v1 = vpop.f32.mrf.mxu1 }
 0x53a   : > { %11336 = vst [vmem:[#allocation272_spill] sm:$0xff] %v9629_v1  ;;  %7459 = vmatmul.msk.f32.gmra.mxu0 %vm1085_vm2, %v4679_v45  ;;  %v2265_v45 = vld [vmem:[#allocation2 + $0x10a] sm:$0xff] }
 0x53b   : > { %v5229_v1 = vld [vmem:[#allocation2 + $0x51] sm:$0xff] }
 0x53c   : > { %7146 = vmatmul.msk.f32.gmra.mxu3 %vm1085_vm2, %v2264_v33  ;;  %7483 = vmatmul.msk.f32.gmra.mxu1 %vm1085_vm2, %v5228_v6 }
 0x53d   : > { %7572 = vmatmul.msk.f32.gmra.mxu2 %vm1085_vm2, %v2264_v33 }
 0x53f   : > { %v9635_v55 = vpop.f32.mrf.mxu3 }
 0x540   : > { %11337 = vst [vmem:[#allocation273_spill] sm:$0xff] %v9635_v55  ;;  %v9637_v49 = vpop.f32.mrf.mxu2 }
 0x541   : > { %v9639_v60 = vpop.f32.mrf.mxu1 }
 0x542   : > { %11338 = vst [vmem:[#allocation274_spill] sm:$0xff] %v9639_v60  ;;  %7460 = vmatmul.msk.f32.gmra.mxu0 %vm1085_vm2, %v4680_v3  ;;  %v4681_v60 = vld [vmem:[#allocation2 + $0x260] sm:$0xff]  ;;  %v9654_v3 = vpop.f32.mrf.mxu0 }
 0x543   : > { %11342 = vst [vmem:[#allocation278_spill] sm:$0xff] %v9654_v3 }
 0x544   : > { %7147 = vmatmul.msk.f32.gmra.mxu3 %vm1085_vm2, %v2265_v45  ;;  %7484 = vmatmul.msk.f32.gmra.mxu1 %vm1085_vm2, %v5229_v1 }
 0x545   : > { %7573 = vmatmul.msk.f32.gmra.mxu2 %vm1085_vm2, %v2265_v45 }
 0x547   : > { %v9647_v6 = vpop.f32.mrf.mxu3 }
 0x548   : > { %11340 = vst [vmem:[#allocation276_spill] sm:$0xff] %v9647_v6  ;;  %v9649_v33 = vpop.f32.mrf.mxu2 }
 0x549   : > { %v9651_v52 = vpop.f32.mrf.mxu1 }
 0x54a   : > { %11341 = vst [vmem:[#allocation277_spill] sm:$0xff] %v9651_v52  ;;  %7461 = vmatmul.msk.f32.gmra.mxu0 %vm1085_vm2, %v4681_v60  ;;  %v4682_v52 = vld [vmem:[#allocation2 + $0x268] sm:$0xff] }
 0x54b   : > { %v2267_v60 = vld [vmem:[#allocation2 + $0x122] sm:$0xff] }
 0x54c   : > { %7148 = vmatmul.msk.f32.gmra.mxu3 %vm1085_vm2, %v2266_v21  ;;  %7485 = vmatmul.msk.f32.gmra.mxu1 %vm1085_vm2, %v5230_v12  ;;  %v9669_v12 = vpop.f32.mrf.mxu0 }
 0x54d   : > { %7574 = vmatmul.msk.f32.gmra.mxu2 %vm1085_vm2, %v2266_v21  ;;  %11345 = vst [vmem:[#allocation281_spill] sm:$0xff] %v9669_v12 }
 0x54f   : > { %v9659_v1 = vpop.f32.mrf.mxu3 }
 0x550   : > { %11343 = vst [vmem:[#allocation279_spill] sm:$0xff] %v9659_v1  ;;  %v9661_v45 = vpop.f32.mrf.mxu2 }
 0x551   : > { %v9663_v30 = vpop.f32.mrf.mxu1 }
 0x552   : > { %11344 = vst [vmem:[#allocation280_spill] sm:$0xff] %v9663_v30  ;;  %7462 = vmatmul.msk.f32.gmra.mxu0 %vm1085_vm2, %v4682_v52  ;;  %v4683_v30 = vld [vmem:[#allocation2 + $0x270] sm:$0xff] }
 0x553   : > { %v2268_v52 = vld [vmem:[#allocation2 + $0x12a] sm:$0xff] }
 0x554   : > { %7149 = vmatmul.msk.f32.gmra.mxu3 %vm1085_vm2, %v2267_v60  ;;  %7486 = vmatmul.msk.f32.gmra.mxu1 %vm1085_vm2, %v5231_v37 }
 0x555   : > { %7575 = vmatmul.msk.f32.gmra.mxu2 %vm1085_vm2, %v2267_v60  ;;  %v9683_v60 = vpop.f32.mrf.mxu0 }
 0x556   : > { %11349 = vst [vmem:[#allocation285_spill] sm:$0xff] %v9683_v60 }
 0x557   : > { %v9671_v21 = vpop.f32.mrf.mxu3 }
 0x558   : > { %11346 = vst [vmem:[#allocation282_spill] sm:$0xff] %v9671_v21  ;;  %v9673_v3 = vpop.f32.mrf.mxu2  ;;  %v5233_v21 = vld [vmem:[#allocation2 + $0x81] sm:$0xff] }
 0x559   : > { %v9675_v47 = vpop.f32.mrf.mxu1 }
 0x55a   : > { %11347 = vst [vmem:[#allocation283_spill] sm:$0xff] %v9675_v47  ;;  %7463 = vmatmul.msk.f32.gmra.mxu0 %vm1085_vm2, %v4683_v30  ;;  %v4684_v47 = vld [vmem:[#allocation2 + $0x280] sm:$0xff]  ;;  %v2269_v30 = vld [vmem:[#allocation2 + $0x132] sm:$0xff] }
 0x55c   : > { %7150 = vmatmul.msk.f32.gmra.mxu3 %vm1085_vm2, %v2268_v52  ;;  %7487 = vmatmul.msk.f32.gmra.mxu1 %vm1085_vm2, %v5232_v42 }
 0x55d   : > { %7576 = vmatmul.msk.f32.gmra.mxu2 %vm1085_vm2, %v2268_v52  ;;  %v9699_v19 = vpop.f32.mrf.mxu0 }
 0x55e   : > { %11355 = vst [vmem:[#allocation291_spill] sm:$0xff] %v9699_v19  ;;  %v2271_v19 = vld [vmem:[#allocation2 + $0x14a] sm:$0xff] }
 0x55f   : > { %v9681_v37 = vpop.f32.mrf.mxu3 }
 0x560   : > { %11348 = vst [vmem:[#allocation284_spill] sm:$0xff] %v9681_v37  ;;  %v9685_v12 = vpop.f32.mrf.mxu2  ;;  %v4685_v37 = vld [vmem:[#allocation2 + $0x288] sm:$0xff] }
 0x561   : > { %11350 = vst [vmem:[#allocation286_spill] sm:$0xff] %v9685_v12  ;;  %v9687_v10 = vpop.f32.mrf.mxu1  ;;  %v5245_v12 = vld [vmem:[#allocation2 + $0x101] sm:$0xff] }
 0x562   : > { %11351 = vst [vmem:[#allocation287_spill] sm:$0xff] %v9687_v10  ;;  %7464 = vmatmul.msk.f32.gmra.mxu0 %vm1085_vm2, %v4684_v47  ;;  %v2270_v47 = vld [vmem:[#allocation2 + $0x142] sm:$0xff] }
 0x563   : > { %v5234_v10 = vld [vmem:[#allocation2 + $0x89] sm:$0xff] }
 0x564   : > { %7151 = vmatmul.msk.f32.gmra.mxu3 %vm1085_vm2, %v2269_v30  ;;  %7488 = vmatmul.msk.f32.gmra.mxu1 %vm1085_vm2, %v5233_v21 }
 0x565   : > { %7577 = vmatmul.msk.f32.gmra.mxu2 %vm1085_vm2, %v2269_v30 }
 0x567   : > { %v9693_v42 = vpop.f32.mrf.mxu3 }
 0x568   : > { %11352 = vst [vmem:[#allocation288_spill] sm:$0xff] %v9693_v42  ;;  %v9695_v52 = vpop.f32.mrf.mxu2 }
 0x569   : > { %11353 = vst [vmem:[#allocation289_spill] sm:$0xff] %v9695_v52  ;;  %v9697_v60 = vpop.f32.mrf.mxu1  ;;  %v5235_v52 = vld [vmem:[#allocation2 + $0x91] sm:$0xff] }
 0x56a   : > { %11354 = vst [vmem:[#allocation290_spill] sm:$0xff] %v9697_v60  ;;  %7465 = vmatmul.msk.f32.gmra.mxu0 %vm1085_vm2, %v4685_v37  ;;  %v4686_v60 = vld [vmem:[#allocation2 + $0x290] sm:$0xff]  ;;  %v9712_v37 = vpop.f32.mrf.mxu0 }
 0x56b   : > { %11359 = vst [vmem:[#allocation295_spill] sm:$0xff] %v9712_v37 }
 0x56c   : > { %7152 = vmatmul.msk.f32.gmra.mxu3 %vm1085_vm2, %v2270_v47  ;;  %7489 = vmatmul.msk.f32.gmra.mxu1 %vm1085_vm2, %v5234_v10 }
 0x56d   : > { %7578 = vmatmul.msk.f32.gmra.mxu2 %vm1085_vm2, %v2270_v47 }
 0x56f   : > { %v9705_v21 = vpop.f32.mrf.mxu3 }
 0x570   : > { %11356 = vst [vmem:[#allocation292_spill] sm:$0xff] %v9705_v21  ;;  %v9707_v30 = vpop.f32.mrf.mxu2 }
 0x571   : > { %11357 = vst [vmem:[#allocation293_spill] sm:$0xff] %v9707_v30  ;;  %v9709_v42 = vpop.f32.mrf.mxu1  ;;  %v5236_v30 = vld [vmem:[#allocation2 + $0xa1] sm:$0xff] }
 0x572   : > { %11358 = vst [vmem:[#allocation294_spill] sm:$0xff] %v9709_v42  ;;  %7466 = vmatmul.msk.f32.gmra.mxu0 %vm1085_vm2, %v4686_v60  ;;  %v4687_v42 = vld [vmem:[#allocation2 + $0x2a0] sm:$0xff]  ;;  %v2272_v60 = vld [vmem:[#allocation2 + $0x152] sm:$0xff] }
 0x574   : > { %7153 = vmatmul.msk.f32.gmra.mxu3 %vm1085_vm2, %v2271_v19  ;;  %7490 = vmatmul.msk.f32.gmra.mxu1 %vm1085_vm2, %v5235_v52  ;;  %v4105_v52 = vld [vmem:[%s11065_s3 + $0xa8] sm:$0xff] }
 0x575   : > { %7579 = vmatmul.msk.f32.gmra.mxu2 %vm1085_vm2, %v2271_v19  ;;  %4338 = vmatpush.msrb.mxu3 %v4105_v52  ;;  %v9730_v19 = vpop.f32.mrf.mxu0 }
 0x576   : > { %11363 = vst [vmem:[#allocation299_spill] sm:$0xff] %v9730_v19 }
 0x577   : > { %v9717_v10 = vpop.f32.mrf.mxu3 }
 0x578   : > { %11360 = vst [vmem:[#allocation296_spill] sm:$0xff] %v9717_v10  ;;  %v9719_v47 = vpop.f32.mrf.mxu2  ;;  %v4688_v10 = vld [vmem:[#allocation2 + $0x2a8] sm:$0xff] }
 0x579   : > { %11361 = vst [vmem:[#allocation297_spill] sm:$0xff] %v9719_v47  ;;  %v9721_v21 = vpop.f32.mrf.mxu1  ;;  %v2273_v47 = vld [vmem:[#allocation2 + $0x162] sm:$0xff] }
 0x57a   : > { %11362 = vst [vmem:[#allocation298_spill] sm:$0xff] %v9721_v21  ;;  %7467 = vmatmul.msk.f32.gmra.mxu0 %vm1085_vm2, %v4687_v42 }
 0x57c   : > { %7154 = vmatmul.msk.f32.gmra.mxu3 %vm1085_vm2, %v2272_v60  ;;  %7491 = vmatmul.msk.f32.gmra.mxu1 %vm1085_vm2, %v5236_v30  ;;  %v5237_v30 = vld [vmem:[#allocation2 + $0xa9] sm:$0xff] }
 0x57d   : > { %7580 = vmatmul.msk.f32.gmra.mxu2 %vm1085_vm2, %v2272_v60  ;;  %v9744_v52 = vpop.f32.mrf.mxu0 }
 0x57e   : > { %11368 = vst [vmem:[#allocation304_spill] sm:$0xff] %v9744_v52 }
 0x57f   : > { %v9732_v37 = vpop.f32.mrf.mxu3 }
 0x580   : > { %11364 = vst [vmem:[#allocation300_spill] sm:$0xff] %v9732_v37  ;;  %v9734_v21 = vpop.f32.mrf.mxu2 }
 0x581   : > { %11365 = vst [vmem:[#allocation301_spill] sm:$0xff] %v9734_v21  ;;  %v9736_v42 = vpop.f32.mrf.mxu1  ;;  %v5238_v21 = vld [vmem:[#allocation2 + $0xb1] sm:$0xff] }
 0x582   : > { %11366 = vst [vmem:[#allocation302_spill] sm:$0xff] %v9736_v42  ;;  %7468 = vmatmul.msk.f32.gmra.mxu0 %vm1085_vm2, %v4688_v10  ;;  %v4689_v42 = vld [vmem:[#allocation2 + $0x2b0] sm:$0xff] }
 0x583   : > { %v2274_v10 = vld [vmem:[#allocation2 + $0x16a] sm:$0xff] }
 0x584   : > { %7155 = vmatmul.msk.f32.gmra.mxu3 %vm1085_vm2, %v2273_v47  ;;  %7492 = vmatmul.msk.f32.gmra.mxu1 %vm1085_vm2, %v5237_v30 }
 0x585   : > { %7581 = vmatmul.msk.f32.gmra.mxu2 %vm1085_vm2, %v2273_v47 }
 0x587   : > { %v9742_v60 = vpop.f32.mrf.mxu3 }
 0x588   : > { %11367 = vst [vmem:[#allocation303_spill] sm:$0xff] %v9742_v60  ;;  %v9746_v19 = vpop.f32.mrf.mxu2  ;;  %v4690_v60 = vld [vmem:[#allocation2 + $0x2c0] sm:$0xff] }
 0x589   : > { %11369 = vst [vmem:[#allocation305_spill] sm:$0xff] %v9746_v19  ;;  %v9748_v37 = vpop.f32.mrf.mxu1  ;;  %v9760_v19 = vpop.f32.mrf.mxu0 }
 0x58a   : > { %11370 = vst [vmem:[#allocation306_spill] sm:$0xff] %v9748_v37  ;;  %7469 = vmatmul.msk.f32.gmra.mxu0 %vm1085_vm2, %v4689_v42  ;;  %v2275_v42 = vld [vmem:[#allocation2 + $0x172] sm:$0xff]  ;;  %v5239_v37 = vld [vmem:[#allocation2 + $0xc1] sm:$0xff] }
 0x58b   : > { %11374 = vst [vmem:[#allocation310_spill] sm:$0xff] %v9760_v19  ;;  %v2276_v19 = vld [vmem:[#allocation2 + $0x182] sm:$0xff] }
 0x58c   : > { %7156 = vmatmul.msk.f32.gmra.mxu3 %vm1085_vm2, %v2274_v10  ;;  %7493 = vmatmul.msk.f32.gmra.mxu1 %vm1085_vm2, %v5238_v21 }
 0x58d   : > { %7582 = vmatmul.msk.f32.gmra.mxu2 %vm1085_vm2, %v2274_v10 }
 0x58f   : > { %v9754_v47 = vpop.f32.mrf.mxu3 }
 0x590   : > { %11371 = vst [vmem:[#allocation307_spill] sm:$0xff] %v9754_v47  ;;  %v9756_v30 = vpop.f32.mrf.mxu2 }
 0x591   : > { %11372 = vst [vmem:[#allocation308_spill] sm:$0xff] %v9756_v30  ;;  %v9758_v52 = vpop.f32.mrf.mxu1  ;;  %v5240_v30 = vld [vmem:[#allocation2 + $0xc9] sm:$0xff] }
 0x592   : > { %11373 = vst [vmem:[#allocation309_spill] sm:$0xff] %v9758_v52  ;;  %7470 = vmatmul.msk.f32.gmra.mxu0 %vm1085_vm2, %v4690_v60  ;;  %v4691_v52 = vld [vmem:[#allocation2 + $0x2c8] sm:$0xff]  ;;  %v9773_v60 = vpop.f32.mrf.mxu0 }
 0x593   : > { %11378 = vst [vmem:[#allocation314_spill] sm:$0xff] %v9773_v60 }
 0x594   : > { %7157 = vmatmul.msk.f32.gmra.mxu3 %vm1085_vm2, %v2275_v42  ;;  %7494 = vmatmul.msk.f32.gmra.mxu1 %vm1085_vm2, %v5239_v37 }
 0x595   : > { %7583 = vmatmul.msk.f32.gmra.mxu2 %vm1085_vm2, %v2275_v42 }
 0x597   : > { %v9766_v21 = vpop.f32.mrf.mxu3 }
 0x598   : > { %11375 = vst [vmem:[#allocation311_spill] sm:$0xff] %v9766_v21  ;;  %v9768_v10 = vpop.f32.mrf.mxu2 }
 0x599   : > { %11376 = vst [vmem:[#allocation312_spill] sm:$0xff] %v9768_v10  ;;  %v9770_v47 = vpop.f32.mrf.mxu1  ;;  %v5241_v10 = vld [vmem:[#allocation2 + $0xd1] sm:$0xff] }
 0x59a   : > { %11377 = vst [vmem:[#allocation313_spill] sm:$0xff] %v9770_v47  ;;  %7471 = vmatmul.msk.f32.gmra.mxu0 %vm1085_vm2, %v4691_v52  ;;  %v4692_v47 = vld [vmem:[#allocation2 + $0x2d0] sm:$0xff] }
 0x59b   : > { %v2277_v52 = vld [vmem:[#allocation2 + $0x18a] sm:$0xff] }
 0x59c   : > { %7158 = vmatmul.msk.f32.gmra.mxu3 %vm1085_vm2, %v2276_v19  ;;  %7495 = vmatmul.msk.f32.gmra.mxu1 %vm1085_vm2, %v5240_v30  ;;  %v9788_v30 = vpop.f32.mrf.mxu0 }
 0x59d   : > { %7584 = vmatmul.msk.f32.gmra.mxu2 %vm1085_vm2, %v2276_v19  ;;  %11382 = vst [vmem:[#allocation318_spill] sm:$0xff] %v9788_v30 }
 0x59f   : > { %v9778_v37 = vpop.f32.mrf.mxu3 }
 0x5a0   : > { %11379 = vst [vmem:[#allocation315_spill] sm:$0xff] %v9778_v37  ;;  %v9780_v42 = vpop.f32.mrf.mxu2 }
 0x5a1   : > { %11380 = vst [vmem:[#allocation316_spill] sm:$0xff] %v9780_v42  ;;  %v9782_v21 = vpop.f32.mrf.mxu1  ;;  %v5242_v42 = vld [vmem:[#allocation2 + $0xe1] sm:$0xff] }
 0x5a2   : > { %11381 = vst [vmem:[#allocation317_spill] sm:$0xff] %v9782_v21  ;;  %7472 = vmatmul.msk.f32.gmra.mxu0 %vm1085_vm2, %v4692_v47  ;;  %v4693_v21 = vld [vmem:[#allocation2 + $0x2e0] sm:$0xff]  ;;  %v2278_v47 = vld [vmem:[#allocation2 + $0x192] sm:$0xff] }
 0x5a4   : > { %7159 = vmatmul.msk.f32.gmra.mxu3 %vm1085_vm2, %v2277_v52  ;;  %7496 = vmatmul.msk.f32.gmra.mxu1 %vm1085_vm2, %v5241_v10 }
 0x5a5   : > { %7585 = vmatmul.msk.f32.gmra.mxu2 %vm1085_vm2, %v2277_v52  ;;  %v9802_v52 = vpop.f32.mrf.mxu0 }
 0x5a6   : > { %11387 = vst [vmem:[#allocation323_spill] sm:$0xff] %v9802_v52 }
 0x5a7   : > { %v9790_v19 = vpop.f32.mrf.mxu3 }
 0x5a8   : > { %11383 = vst [vmem:[#allocation319_spill] sm:$0xff] %v9790_v19  ;;  %v9792_v60 = vpop.f32.mrf.mxu2 }
 0x5a9   : > { %11384 = vst [vmem:[#allocation320_spill] sm:$0xff] %v9792_v60  ;;  %v9794_v37 = vpop.f32.mrf.mxu1  ;;  %v5243_v60 = vld [vmem:[#allocation2 + $0xe9] sm:$0xff] }
 0x5aa   : > { %11385 = vst [vmem:[#allocation321_spill] sm:$0xff] %v9794_v37  ;;  %7473 = vmatmul.msk.f32.gmra.mxu0 %vm1085_vm2, %v4693_v21  ;;  %v4694_v37 = vld [vmem:[#allocation2 + $0x2e8] sm:$0xff] }
 0x5ab   : > { %v2279_v21 = vld [vmem:[#allocation2 + $0x1a2] sm:$0xff] }
 0x5ac   : > { %7160 = vmatmul.msk.f32.gmra.mxu3 %vm1085_vm2, %v2278_v47  ;;  %7497 = vmatmul.msk.f32.gmra.mxu1 %vm1085_vm2, %v5242_v42 }
 0x5ad   : > { %7586 = vmatmul.msk.f32.gmra.mxu2 %vm1085_vm2, %v2278_v47 }
 0x5af   : > { %v9800_v10 = vpop.f32.mrf.mxu3 }
 0x5b0   : > { %11386 = vst [vmem:[#allocation322_spill] sm:$0xff] %v9800_v10  ;;  %v9804_v30 = vpop.f32.mrf.mxu2  ;;  %v4695_v10 = vld [vmem:[#allocation2 + $0x2f0] sm:$0xff] }
 0x5b1   : > { %11388 = vst [vmem:[#allocation324_spill] sm:$0xff] %v9804_v30  ;;  %v9806_v19 = vpop.f32.mrf.mxu1  ;;  %v9818_v30 = vpop.f32.mrf.mxu0 }
 0x5b2   : > { %7474 = vmatmul.msk.f32.gmra.mxu0 %vm1085_vm2, %v4694_v37  ;;  %11391 = vst [vmem:[#allocation327_spill] sm:$0xff] %v9818_v30  ;;  %v2280_v37 = vld [vmem:[#allocation2 + $0x1aa] sm:$0xff] }
 0x5b4   : > { %7161 = vmatmul.msk.f32.gmra.mxu3 %vm1085_vm2, %v2279_v21  ;;  %7498 = vmatmul.msk.f32.gmra.mxu1 %vm1085_vm2, %v5243_v60 }
 0x5b5   : > { %7587 = vmatmul.msk.f32.gmra.mxu2 %vm1085_vm2, %v2279_v21 }
 0x5b7   : > { %v9812_v42 = vpop.f32.mrf.mxu3 }
 0x5b8   : > { %11389 = vst [vmem:[#allocation325_spill] sm:$0xff] %v9812_v42  ;;  %v9814_v47 = vpop.f32.mrf.mxu2 }
 0x5b9   : > { %11390 = vst [vmem:[#allocation326_spill] sm:$0xff] %v9814_v47  ;;  %v9816_v52 = vpop.f32.mrf.mxu1  ;;  %v2281_v47 = vld [vmem:[#allocation2 + $0x1b2] sm:$0xff] }
 0x5ba   : > { %7475 = vmatmul.msk.f32.gmra.mxu0 %vm1085_vm2, %v4695_v10 }
 0x5bc   : > { %7162 = vmatmul.msk.f32.gmra.mxu3 %vm1085_vm2, %v2280_v37  ;;  %7499 = vmatmul.msk.f32.gmra.mxu1 %vm1085_vm2, %v5244_v58  ;;  %v2282_v58 = vld [vmem:[#allocation2 + $0x1c2] sm:$0xff] }
 0x5bd   : > { %7588 = vmatmul.msk.f32.gmra.mxu2 %vm1085_vm2, %v2280_v37  ;;  %v5246_v37 = vld [vmem:[#allocation2 + $0x109] sm:$0xff] }
 0x5bf   : > { %v9824_v60 = vpop.f32.mrf.mxu3 }
 0x5c0   : > { %11392 = vst [vmem:[#allocation328_spill] sm:$0xff] %v9824_v60  ;;  %v9828_v42 = vpop.f32.mrf.mxu2 }
 0x5c1   : > { %v9826_v21 = vpop.f32.mrf.mxu1  ;;  %11393 = vst [vmem:[#allocation329_spill] sm:$0xff] %v9828_v42 }
 0x5c4   : > { %7163 = vmatmul.msk.f32.gmra.mxu3 %vm1085_vm2, %v2281_v47  ;;  %7500 = vmatmul.msk.f32.gmra.mxu1 %vm1085_vm2, %v5245_v12  ;;  %v2283_v12 = vld [vmem:[#allocation2 + $0x1ca] sm:$0xff] }
 0x5c5   : > { %7589 = vmatmul.msk.f32.gmra.mxu2 %vm1085_vm2, %v2281_v47  ;;  %v5247_v47 = vld [vmem:[#allocation2 + $0x111] sm:$0xff] }
 0x5c7   : > { %v9833_v10 = vpop.f32.mrf.mxu3 }
 0x5c8   : > { %11394 = vst [vmem:[#allocation330_spill] sm:$0xff] %v9833_v10  ;;  %v9839_v60 = vpop.f32.mrf.mxu2 }
 0x5c9   : > { %v9835_v30 = vpop.f32.mrf.mxu1  ;;  %11395 = vst [vmem:[#allocation331_spill] sm:$0xff] %v9839_v60  ;;  %v2284_v60 = vld [vmem:[#allocation2 + $0x1d2] sm:$0xff] }
 0x5cc   : > { %7164 = vmatmul.msk.f32.gmra.mxu3 %vm1085_vm2, %v2282_v58  ;;  %7501 = vmatmul.msk.f32.gmra.mxu1 %vm1085_vm2, %v5246_v37 }
 0x5cd   : > { %7590 = vmatmul.msk.f32.gmra.mxu2 %vm1085_vm2, %v2282_v58  ;;  %v5248_v58 = vld [vmem:[#allocation2 + $0x121] sm:$0xff] }
 0x5cf   : > { %v9842_v42 = vpop.f32.mrf.mxu3 }
 0x5d0   : > { %11396 = vst [vmem:[#allocation332_spill] sm:$0xff] %v9842_v42  ;;  %v9849_v10 = vpop.f32.mrf.mxu2 }
 0x5d1   : > { %v9844_v1 = vpop.f32.mrf.mxu1  ;;  %11397 = vst [vmem:[#allocation333_spill] sm:$0xff] %v9849_v10  ;;  %v5249_v10 = vld [vmem:[#allocation2 + $0x129] sm:$0xff] }
 0x5d4   : > { %7165 = vmatmul.msk.f32.gmra.mxu3 %vm1085_vm2, %v2283_v12  ;;  %7502 = vmatmul.msk.f32.gmra.mxu1 %vm1085_vm2, %v5247_v47 }
 0x5d5   : > { %7591 = vmatmul.msk.f32.gmra.mxu2 %vm1085_vm2, %v2283_v12  ;;  %v2285_v12 = vld [vmem:[#allocation2 + $0x1e2] sm:$0xff] }
 0x5d7   : > { %v9851_v55 = vpop.f32.mrf.mxu3 }
 0x5d8   : > { %11398 = vst [vmem:[#allocation334_spill] sm:$0xff] %v9851_v55  ;;  %v9860_v48 = vpop.f32.mrf.mxu2 }
 0x5d9   : > { %v9853_v37 = vpop.f32.mrf.mxu1  ;;  %11400 = vst [vmem:[#allocation336_spill] sm:$0xff] %v9860_v48 }
 0x5dc   : > { %7166 = vmatmul.msk.f32.gmra.mxu3 %vm1085_vm2, %v2284_v60  ;;  %7503 = vmatmul.msk.f32.gmra.mxu1 %vm1085_vm2, %v5248_v58 }
 0x5dd   : > { %7592 = vmatmul.msk.f32.gmra.mxu2 %vm1085_vm2, %v2284_v60  ;;  %v2286_v60 = vld [vmem:[#allocation2 + $0x1ea] sm:$0xff] }
 0x5df   : > { %v9858_v42 = vpop.f32.mrf.mxu3 }
 0x5e0   : > { %11399 = vst [vmem:[#allocation335_spill] sm:$0xff] %v9858_v42  ;;  %v9871_v58 = vpop.f32.mrf.mxu2  ;;  %v5250_v42 = vld [vmem:[#allocation2 + $0x131] sm:$0xff] }
 0x5e1   : > { %v9862_v47 = vpop.f32.mrf.mxu1  ;;  %11404 = vst [vmem:[#allocation340_spill] sm:$0xff] %v9871_v58 }
 0x5e2   : > { %11401 = vst [vmem:[#allocation337_spill] sm:$0xff] %v9862_v47 }
 0x5e4   : > { %7167 = vmatmul.msk.f32.gmra.mxu3 %vm1085_vm2, %v2285_v12  ;;  %7504 = vmatmul.msk.f32.gmra.mxu1 %vm1085_vm2, %v5249_v10  ;;  %v2287_v10 = vld [vmem:[#allocation2 + $0x1f2] sm:$0xff] }
 0x5e5   : > { %7593 = vmatmul.msk.f32.gmra.mxu2 %vm1085_vm2, %v2285_v12  ;;  %v5251_v12 = vld [vmem:[#allocation2 + $0x141] sm:$0xff] }
 0x5e7   : > { %v9867_v55 = vpop.f32.mrf.mxu3 }
 0x5e8   : > { %11402 = vst [vmem:[#allocation338_spill] sm:$0xff] %v9867_v55  ;;  %v9882_v55 = vpop.f32.mrf.mxu2 }
 0x5e9   : > { %v9869_v6 = vpop.f32.mrf.mxu1  ;;  %11407 = vst [vmem:[#allocation343_spill] sm:$0xff] %v9882_v55  ;;  %v2289_v55 = vld [vmem:[#allocation2 + $0x20a] sm:$0xff] }
 0x5ea   : > { %11403 = vst [vmem:[#allocation339_spill] sm:$0xff] %v9869_v6 }
 0x5ec   : > { %7168 = vmatmul.msk.f32.gmra.mxu3 %vm1085_vm2, %v2286_v60  ;;  %7505 = vmatmul.msk.f32.gmra.mxu1 %vm1085_vm2, %v5250_v42  ;;  %v2288_v42 = vld [vmem:[#allocation2 + $0x202] sm:$0xff] }
 0x5ed   : > { %7594 = vmatmul.msk.f32.gmra.mxu2 %vm1085_vm2, %v2286_v60  ;;  %v5252_v60 = vld [vmem:[#allocation2 + $0x149] sm:$0xff] }
 0x5ef   : > { %v9876_v48 = vpop.f32.mrf.mxu3 }
 0x5f0   : > { %11405 = vst [vmem:[#allocation341_spill] sm:$0xff] %v9876_v48  ;;  %v9892_v48 = vpop.f32.mrf.mxu2 }
 0x5f1   : > { %v9878_v47 = vpop.f32.mrf.mxu1  ;;  %11410 = vst [vmem:[#allocation346_spill] sm:$0xff] %v9892_v48  ;;  %v5254_v48 = vld [vmem:[#allocation2 + $0x161] sm:$0xff] }
 0x5f2   : > { %11406 = vst [vmem:[#allocation342_spill] sm:$0xff] %v9878_v47 }
 0x5f4   : > { %7169 = vmatmul.msk.f32.gmra.mxu3 %vm1085_vm2, %v2287_v10  ;;  %7506 = vmatmul.msk.f32.gmra.mxu1 %vm1085_vm2, %v5251_v12 }
 0x5f5   : > { %7595 = vmatmul.msk.f32.gmra.mxu2 %vm1085_vm2, %v2287_v10  ;;  %v5253_v10 = vld [vmem:[#allocation2 + $0x151] sm:$0xff] }
 0x5f7   : > { %v9885_v58 = vpop.f32.mrf.mxu3 }
 0x5f8   : > { %11408 = vst [vmem:[#allocation344_spill] sm:$0xff] %v9885_v58 }
 0x5f9   : > { %v9887_v6 = vpop.f32.mrf.mxu1 }
 0x5fa   : > { %11409 = vst [vmem:[#allocation345_spill] sm:$0xff] %v9887_v6  ;;  %v9903_v6 = vpop.f32.mrf.mxu2 }
 0x5fb   : > { %11414 = vst [vmem:[#allocation350_spill] sm:$0xff] %v9903_v6  ;;  %v2291_v6 = vld [vmem:[#allocation2 + $0x222] sm:$0xff] }
 0x5fc   : > { %7170 = vmatmul.msk.f32.gmra.mxu3 %vm1085_vm2, %v2288_v42  ;;  %7507 = vmatmul.msk.f32.gmra.mxu1 %vm1085_vm2, %v5252_v60 }
 0x5fd   : > { %7596 = vmatmul.msk.f32.gmra.mxu2 %vm1085_vm2, %v2288_v42  ;;  %v2290_v42 = vld [vmem:[#allocation2 + $0x212] sm:$0xff] }
 0x5ff   : > { %v9894_v47 = vpop.f32.mrf.mxu3 }
 0x600   : > { %11411 = vst [vmem:[#allocation347_spill] sm:$0xff] %v9894_v47  ;;  %v4104_v47 = vld [vmem:[%s11065_s3 + $0xa0] sm:$0xff] }
 0x601   : > { %v9896_v12 = vpop.f32.mrf.mxu1  ;;  %4339 = vmatpush.msrb.mxu3 %v4104_v47  ;;  %v5256_v47 = vld [vmem:[#allocation2 + $0x171] sm:$0xff] }
 0x602   : > { %11412 = vst [vmem:[#allocation348_spill] sm:$0xff] %v9896_v12 }
 0x604   : > { %7171 = vmatmul.msk.f32.gmra.mxu3 %vm1085_vm2, %v2289_v55  ;;  %7508 = vmatmul.msk.f32.gmra.mxu1 %vm1085_vm2, %v5253_v10 }
 0x605   : > { %7597 = vmatmul.msk.f32.gmra.mxu2 %vm1085_vm2, %v2289_v55 }
 0x607   : > { %v9901_v58 = vpop.f32.mrf.mxu3 }
 0x608   : > { %11413 = vst [vmem:[#allocation349_spill] sm:$0xff] %v9901_v58  ;;  %v9917_v58 = vpop.f32.mrf.mxu2 }
 0x609   : > { %v9905_v60 = vpop.f32.mrf.mxu1  ;;  %11418 = vst [vmem:[#allocation354_spill] sm:$0xff] %v9917_v58 }
 0x60a   : > { %11415 = vst [vmem:[#allocation351_spill] sm:$0xff] %v9905_v60  ;;  %v5255_v60 = vld [vmem:[#allocation2 + $0x169] sm:$0xff] }
 0x60c   : > { %7172 = vmatmul.msk.f32.gmra.mxu3 %vm1085_vm2, %v2290_v42  ;;  %7509 = vmatmul.msk.f32.gmra.mxu1 %vm1085_vm2, %v5254_v48 }
 0x60d   : > { %7598 = vmatmul.msk.f32.gmra.mxu2 %vm1085_vm2, %v2290_v42  ;;  %v2292_v42 = vld [vmem:[#allocation2 + $0x22a] sm:$0xff] }
 0x60f   : > { %v9913_v55 = vpop.f32.mrf.mxu3 }
 0x610   : > { %11416 = vst [vmem:[#allocation352_spill] sm:$0xff] %v9913_v55  ;;  %v9928_v55 = vpop.f32.mrf.mxu2 }
 0x611   : > { %v9915_v10 = vpop.f32.mrf.mxu1  ;;  %11421 = vst [vmem:[#allocation357_spill] sm:$0xff] %v9928_v55  ;;  %v5258_v55 = vld [vmem:[#allocation2 + $0x189] sm:$0xff] }
 0x612   : > { %11417 = vst [vmem:[#allocation353_spill] sm:$0xff] %v9915_v10 }
 0x614   : > { %7173 = vmatmul.msk.f32.gmra.mxu3 %vm1085_vm2, %v2291_v6  ;;  %7510 = vmatmul.msk.f32.gmra.mxu1 %vm1085_vm2, %v5255_v60  ;;  %v2293_v60 = vld [vmem:[#allocation2 + $0x232] sm:$0xff] }
 0x615   : > { %7599 = vmatmul.msk.f32.gmra.mxu2 %vm1085_vm2, %v2291_v6  ;;  %v5257_v6 = vld [vmem:[#allocation2 + $0x181] sm:$0xff] }
 0x617   : > { %v9922_v48 = vpop.f32.mrf.mxu3 }
 0x618   : > { %11419 = vst [vmem:[#allocation355_spill] sm:$0xff] %v9922_v48  ;;  %v9938_v48 = vpop.f32.mrf.mxu2 }
 0x619   : > { %v9924_v12 = vpop.f32.mrf.mxu1  ;;  %11424 = vst [vmem:[#allocation360_spill] sm:$0xff] %v9938_v48 }
 0x61a   : > { %11420 = vst [vmem:[#allocation356_spill] sm:$0xff] %v9924_v12 }
 0x61c   : > { %7174 = vmatmul.msk.f32.gmra.mxu3 %vm1085_vm2, %v2292_v42  ;;  %7511 = vmatmul.msk.f32.gmra.mxu1 %vm1085_vm2, %v5256_v47  ;;  %v2294_v47 = vld [vmem:[#allocation2 + $0x242] sm:$0xff] }
 0x61d   : > { %7600 = vmatmul.msk.f32.gmra.mxu2 %vm1085_vm2, %v2292_v42 }
 0x61f   : > { %v9931_v58 = vpop.f32.mrf.mxu3 }
 0x620   : > { %11422 = vst [vmem:[#allocation358_spill] sm:$0xff] %v9931_v58  ;;  %v9949_v58 = vpop.f32.mrf.mxu2 }
 0x621   : > { %v9933_v10 = vpop.f32.mrf.mxu1  ;;  %11428 = vst [vmem:[#allocation364_spill] sm:$0xff] %v9949_v58 }
 0x622   : > { %11423 = vst [vmem:[#allocation359_spill] sm:$0xff] %v9933_v10 }
 0x624   : > { %7175 = vmatmul.msk.f32.gmra.mxu3 %vm1085_vm2, %v2293_v60  ;;  %7512 = vmatmul.msk.f32.gmra.mxu1 %vm1085_vm2, %v5257_v6  ;;  %v2295_v6 = vld [vmem:[#allocation2 + $0x24a] sm:$0xff] }
 0x625   : > { %7601 = vmatmul.msk.f32.gmra.mxu2 %vm1085_vm2, %v2293_v60  ;;  %v5259_v60 = vld [vmem:[#allocation2 + $0x191] sm:$0xff] }
 0x627   : > { %v9940_v12 = vpop.f32.mrf.mxu3 }
 0x628   : > { %11425 = vst [vmem:[#allocation361_spill] sm:$0xff] %v9940_v12  ;;  %v9958_v10 = vpop.f32.mrf.mxu2 }
 0x629   : > { %v9942_v38 = vpop.f32.mrf.mxu1  ;;  %11431 = vst [vmem:[#allocation367_spill] sm:$0xff] %v9958_v10 }
 0x62a   : > { %11426 = vst [vmem:[#allocation362_spill] sm:$0xff] %v9942_v38 }
 0x62c   : > { %7176 = vmatmul.msk.f32.gmra.mxu3 %vm1085_vm2, %v2294_v47  ;;  %7513 = vmatmul.msk.f32.gmra.mxu1 %vm1085_vm2, %v5258_v55  ;;  %v2296_v55 = vld [vmem:[#allocation2 + $0x252] sm:$0xff] }
 0x62d   : > { %7602 = vmatmul.msk.f32.gmra.mxu2 %vm1085_vm2, %v2294_v47  ;;  %v5260_v47 = vld [vmem:[#allocation2 + $0x1a1] sm:$0xff] }
 0x62f   : > { %v9947_v42 = vpop.f32.mrf.mxu3 }
 0x630   : > { %11427 = vst [vmem:[#allocation363_spill] sm:$0xff] %v9947_v42 }
 0x631   : > { %v9954_v12 = vpop.f32.mrf.mxu1 }
 0x632   : > { %11429 = vst [vmem:[#allocation365_spill] sm:$0xff] %v9954_v12 }
 0x634   : > { %7177 = vmatmul.msk.f32.gmra.mxu3 %vm1085_vm2, %v2295_v6  ;;  %7514 = vmatmul.msk.f32.gmra.mxu1 %vm1085_vm2, %v5259_v60  ;;  %v2297_v60 = vld [vmem:[#allocation2 + $0x262] sm:$0xff] }
 0x635   : > { %7603 = vmatmul.msk.f32.gmra.mxu2 %vm1085_vm2, %v2295_v6  ;;  %v5261_v6 = vld [vmem:[#allocation2 + $0x1a9] sm:$0xff] }
 0x637   : > { %v9956_v48 = vpop.f32.mrf.mxu3 }
 0x638   : > { %11430 = vst [vmem:[#allocation366_spill] sm:$0xff] %v9956_v48  ;;  %v9969_v48 = vpop.f32.mrf.mxu2 }
 0x639   : > { %v9965_v58 = vpop.f32.mrf.mxu1  ;;  %11434 = vst [vmem:[#allocation370_spill] sm:$0xff] %v9969_v48 }
 0x63a   : > { %11433 = vst [vmem:[#allocation369_spill] sm:$0xff] %v9965_v58 }
 0x63c   : > { %7178 = vmatmul.msk.f32.gmra.mxu3 %vm1085_vm2, %v2296_v55  ;;  %7515 = vmatmul.msk.f32.gmra.mxu1 %vm1085_vm2, %v5260_v47  ;;  %v2298_v47 = vld [vmem:[#allocation2 + $0x26a] sm:$0xff] }
 0x63d   : > { %7604 = vmatmul.msk.f32.gmra.mxu2 %vm1085_vm2, %v2296_v55  ;;  %v5262_v55 = vld [vmem:[#allocation2 + $0x1b1] sm:$0xff] }
 0x63f   : > { %v9963_v42 = vpop.f32.mrf.mxu3 }
 0x640   : > { %11432 = vst [vmem:[#allocation368_spill] sm:$0xff] %v9963_v42  ;;  %v2151_v42 = vadd.f32 %v8388_v61, %v8409_v20 }
 0x641   : > { %v9974_v12 = vpop.f32.mrf.mxu1 }
 0x644   : > { %7179 = vmatmul.msk.f32.gmra.mxu3 %vm1085_vm2, %v2297_v60  ;;  %7516 = vmatmul.msk.f32.gmra.mxu1 %vm1085_vm2, %v5261_v6  ;;  %v9981_v6 = vpop.f32.mrf.mxu2 }
 0x645   : > { %7605 = vmatmul.msk.f32.gmra.mxu2 %vm1085_vm2, %v2297_v60  ;;  %11436 = vst [vmem:[#allocation372_spill] sm:$0xff] %v9981_v6  ;;  %v2299_v60 = vld [vmem:[#allocation2 + $0x272] sm:$0xff] }
 0x647   : > { %v9972_v10 = vpop.f32.mrf.mxu3 }
 0x648   : > { %11435 = vst [vmem:[#allocation371_spill] sm:$0xff] %v9972_v10  ;;  %v5263_v10 = vld [vmem:[#allocation2 + $0x1c1] sm:$0xff] }
 0x649   : > { %v9985_v38 = vpop.f32.mrf.mxu1 }
 0x64a   : > { %11438 = vst [vmem:[#allocation374_spill] sm:$0xff] %v9985_v38 }
 0x64c   : > { %7180 = vmatmul.msk.f32.gmra.mxu3 %vm1085_vm2, %v2298_v47  ;;  %7517 = vmatmul.msk.f32.gmra.mxu1 %vm1085_vm2, %v5262_v55  ;;  %v9994_v61 = vpop.f32.mrf.mxu2 }
 0x64d   : > { %7606 = vmatmul.msk.f32.gmra.mxu2 %vm1085_vm2, %v2298_v47  ;;  %v2154_v47 = vadd.f32 %v8396_v43, %v8421_v57 }
 0x64f   : > { %v2675_v48 = vpop.f32.mrf.mxu3 }
 0x650   : > { %v9983_v58 = vadd.f32 %v2675_v48, %v2151_v42  ;;  %v2300_v48 = vld [vmem:[#allocation2 + $0x282] sm:$0xff] }
 0x651   : > { %v5264_v42 = vld [vmem:[#allocation2 + $0x1c9] sm:$0xff] }
 0x652   : > { %11437 = vst [vmem:[#allocation373_spill] sm:$0xff] %v9983_v58  ;;  %v11440_v58 = vld [vmem:[#allocation79_spill] sm:$0xff] }
 0x654   : > { %7181 = vmatmul.msk.f32.gmra.mxu3 %vm1085_vm2, %v2299_v60  ;;  %7518 = vmatmul.msk.f32.gmra.mxu1 %vm1085_vm2, %v5263_v10  ;;  %v11441_v10 = vld [vmem:[#allocation175_spill] sm:$0xff]  ;;  %v10005_v57 = vpop.f32.mrf.mxu2 }
 0x655   : > { %7607 = vmatmul.msk.f32.gmra.mxu2 %vm1085_vm2, %v2299_v60  ;;  %v2157_v6 = vadd.f32 %v11441_v10, %v11440_v58  ;;  %v10001_v60 = vpop.f32.mrf.mxu1  ;;  %11443 = vst [vmem:[#allocation175_spill] sm:$0xff] %v10005_v57 }
 0x657   : > { %v2678_v55 = vpop.f32.mrf.mxu3 }
 0x658   : > { %v9992_v20 = vadd.f32 %v2678_v55, %v2154_v47  ;;  %v2301_v47 = vld [vmem:[#allocation2 + $0x28a] sm:$0xff] }
 0x659   : > { %v5265_v55 = vld [vmem:[#allocation2 + $0x1d1] sm:$0xff] }
 0x65a   : > { %11439 = vst [vmem:[#allocation375_spill] sm:$0xff] %v9992_v20 }
 0x65c   : > { %7182 = vmatmul.msk.f32.gmra.mxu3 %vm1085_vm2, %v2300_v48  ;;  %7519 = vmatmul.msk.f32.gmra.mxu1 %vm1085_vm2, %v5264_v42  ;;  %v11444_v42 = vld [vmem:[#allocation81_spill] sm:$0xff] }
 0x65d   : > { %7608 = vmatmul.msk.f32.gmra.mxu2 %vm1085_vm2, %v2300_v48  ;;  %v2160_v48 = vadd.f32 %v9097_v63, %v11444_v42  ;;  %v10012_v58 = vpop.f32.mrf.mxu1 }
 0x65f   : > { %v2681_v38 = vpop.f32.mrf.mxu3 }
 0x660   : > { %v10003_v43 = vadd.f32 %v2681_v38, %v2157_v6  ;;  %v2302_v38 = vld [vmem:[#allocation2 + $0x292] sm:$0xff]  ;;  %v5266_v6 = vld [vmem:[#allocation2 + $0x1e1] sm:$0xff] }
 0x662   : > { %11442 = vst [vmem:[#allocation79_spill] sm:$0xff] %v10003_v43  ;;  %v10018_v43 = vpop.f32.mrf.mxu2 }
 0x663   : > { %11446 = vst [vmem:[#allocation376_spill] sm:$0xff] %v10018_v43 }
 0x664   : > { %7183 = vmatmul.msk.f32.gmra.mxu3 %vm1085_vm2, %v2301_v47  ;;  %7520 = vmatmul.msk.f32.gmra.mxu1 %vm1085_vm2, %v5265_v55  ;;  %v11447_v55 = vld [vmem:[#allocation83_spill] sm:$0xff] }
 0x665   : > { %7609 = vmatmul.msk.f32.gmra.mxu2 %vm1085_vm2, %v2301_v47  ;;  %v2163_v47 = vadd.f32 %v9115_v50, %v11447_v55  ;;  %v10025_v42 = vpop.f32.mrf.mxu1  ;;  %v5268_v55 = vld [vmem:[#allocation2 + $0x1f1] sm:$0xff] }
 0x667   : > { %v2684_v20 = vpop.f32.mrf.mxu3 }
 0x668   : > { %v10014_v10 = vadd.f32 %v2684_v20, %v2160_v48  ;;  %v2303_v20 = vld [vmem:[#allocation2 + $0x2a2] sm:$0xff] }
 0x669   : > { %v5267_v48 = vld [vmem:[#allocation2 + $0x1e9] sm:$0xff] }
 0x66a   : > { %11445 = vst [vmem:[#allocation81_spill] sm:$0xff] %v10014_v10 }
 0x66c   : > { %7184 = vmatmul.msk.f32.gmra.mxu3 %vm1085_vm2, %v2302_v38  ;;  %7521 = vmatmul.msk.f32.gmra.mxu1 %vm1085_vm2, %v5266_v6  ;;  %v11449_v6 = vld [vmem:[#allocation86_spill] sm:$0xff] }
 0x66d   : > { %7610 = vmatmul.msk.f32.gmra.mxu2 %vm1085_vm2, %v2302_v38  ;;  %v2166_v10 = vadd.f32 %v9135_v22, %v11449_v6  ;;  %v10032_v38 = vpop.f32.mrf.mxu2 }
 0x66e   : > { %11450 = vst [vmem:[#allocation86_spill] sm:$0xff] %v10032_v38  ;;  %v5269_v38 = vld [vmem:[#allocation2 + $0x201] sm:$0xff] }
 0x66f   : > { %v2687_v57 = vpop.f32.mrf.mxu3 }
 0x670   : > { %v10023_v63 = vadd.f32 %v2687_v57, %v2163_v47  ;;  %v2304_v57 = vld [vmem:[#allocation2 + $0x2aa] sm:$0xff]  ;;  %v10036_v47 = vpop.f32.mrf.mxu1 }
 0x672   : > { %11448 = vst [vmem:[#allocation83_spill] sm:$0xff] %v10023_v63  ;;  %v10043_v63 = vpop.f32.mrf.mxu0 }
 0x674   : > { %7185 = vmatmul.msk.f32.gmra.mxu3 %vm1085_vm2, %v2303_v20  ;;  %7522 = vmatmul.msk.f32.gmra.mxu1 %vm1085_vm2, %v5267_v48  ;;  %v11452_v48 = vld [vmem:[#allocation88_spill] sm:$0xff] }
 0x675   : > { %7611 = vmatmul.msk.f32.gmra.mxu2 %vm1085_vm2, %v2303_v20  ;;  %v2169_v20 = vadd.f32 %v9153_v51, %v11452_v48  ;;  %11453 = vst [vmem:[#allocation88_spill] sm:$0xff] %v10043_v63 }
 0x677   : > { %v2690_v43 = vpop.f32.mrf.mxu3 }
 0x678   : > { %v10034_v50 = vadd.f32 %v2690_v43, %v2166_v10  ;;  %v10047_v43 = vpop.f32.mrf.mxu2  ;;  %v4696_v10 = vld [vmem:[#allocation2 + $0x300] sm:$0xff] }
 0x679   : > { %11455 = vst [vmem:[#allocation379_spill] sm:$0xff] %v10047_v43  ;;  %7476 = vmatmul.msk.f32.gmra.mxu0 %vm1085_vm2, %v4696_v10  ;;  %v2306_v10 = vld [vmem:[#allocation2 + $0x2c2] sm:$0xff] }
 0x67a   : > { %11451 = vst [vmem:[#allocation377_spill] sm:$0xff] %v10034_v50  ;;  %v2305_v50 = vld [vmem:[#allocation2 + $0x2b2] sm:$0xff]  ;;  %v5270_v43 = vld [vmem:[#allocation2 + $0x209] sm:$0xff] }
 0x67c   : > { %7186 = vmatmul.msk.f32.gmra.mxu3 %vm1085_vm2, %v2304_v57  ;;  %7523 = vmatmul.msk.f32.gmra.mxu1 %vm1085_vm2, %v5268_v55  ;;  %v10055_v55 = vpop.f32.mrf.mxu1 }
 0x67d   : > { %7612 = vmatmul.msk.f32.gmra.mxu2 %vm1085_vm2, %v2304_v57  ;;  %v11456_v57 = vld [vmem:[#allocation90_spill] sm:$0xff] }
 0x67e   : > { %v2172_v51 = vadd.f32 %v9171_v7, %v11456_v57  ;;  %v11460_v7 = vld [vmem:[#allocation92_spill] sm:$0xff] }
 0x67f   : > { %v2693_v22 = vpop.f32.mrf.mxu3 }
 0x680   : > { %v10045_v6 = vadd.f32 %v2693_v22, %v2169_v20  ;;  %v10059_v22 = vpop.f32.mrf.mxu0  ;;  %v10061_v63 = vpop.f32.mrf.mxu2 }
 0x681   : > { %11458 = vst [vmem:[#allocation380_spill] sm:$0xff] %v10059_v22  ;;  %v2307_v22 = vld [vmem:[#allocation2 + $0x2ca] sm:$0xff] }
 0x682   : > { %11454 = vst [vmem:[#allocation378_spill] sm:$0xff] %v10045_v6  ;;  %v4697_v6 = vld [vmem:[#allocation2 + $0x308] sm:$0xff] }
 0x683   : > { %11459 = vst [vmem:[#allocation381_spill] sm:$0xff] %v10061_v63  ;;  %7477 = vmatmul.msk.f32.gmra.mxu0 %vm1085_vm2, %v4697_v6  ;;  %v5271_v63 = vld [vmem:[#allocation2 + $0x211] sm:$0xff] }
 0x684   : > { %7187 = vmatmul.msk.f32.gmra.mxu3 %vm1085_vm2, %v2305_v50  ;;  %7524 = vmatmul.msk.f32.gmra.mxu1 %vm1085_vm2, %v5269_v38  ;;  %v2175_v38 = vadd.f32 %v9189_v18, %v11460_v7  ;;  %v10069_v57 = vpop.f32.mrf.mxu1  ;;  %v11464_v18 = vld [vmem:[#allocation94_spill] sm:$0xff] }
 0x685   : > { %7613 = vmatmul.msk.f32.gmra.mxu2 %vm1085_vm2, %v2305_v50 }
 0x687   : > { %v2696_v48 = vpop.f32.mrf.mxu3 }
 0x688   : > { %v10057_v20 = vadd.f32 %v2696_v48, %v2172_v51  ;;  %v4698_v48 = vld [vmem:[#allocation2 + $0x310] sm:$0xff]  ;;  %v10078_v6 = vpop.f32.mrf.mxu2 }
 0x689   : > { %11463 = vst [vmem:[#allocation383_spill] sm:$0xff] %v10078_v6 }
 0x68a   : > { %11457 = vst [vmem:[#allocation90_spill] sm:$0xff] %v10057_v20  ;;  %v10073_v20 = vpop.f32.mrf.mxu0 }
 0x68b   : > { %11462 = vst [vmem:[#allocation382_spill] sm:$0xff] %v10073_v20  ;;  %7478 = vmatmul.msk.f32.gmra.mxu0 %vm1085_vm2, %v4698_v48 }
 0x68c   : > { %7188 = vmatmul.msk.f32.gmra.mxu3 %vm1085_vm2, %v2306_v10  ;;  %7525 = vmatmul.msk.f32.gmra.mxu1 %vm1085_vm2, %v5270_v43  ;;  %v2178_v43 = vadd.f32 %v9207_v9, %v11464_v18  ;;  %v2309_v18 = vld [vmem:[#allocation2 + $0x2e2] sm:$0xff] }
 0x68d   : > { %7614 = vmatmul.msk.f32.gmra.mxu2 %vm1085_vm2, %v2306_v10 }
 0x68f   : > { %v2699_v50 = vpop.f32.mrf.mxu3 }
 0x690   : > { %v10071_v51 = vadd.f32 %v2699_v50, %v2175_v38  ;;  %v10085_v38 = vpop.f32.mrf.mxu1  ;;  %v2308_v50 = vld [vmem:[#allocation2 + $0x2d2] sm:$0xff] }
 0x692   : > { %11461 = vst [vmem:[#allocation92_spill] sm:$0xff] %v10071_v51  ;;  %v5272_v51 = vld [vmem:[#allocation2 + $0x221] sm:$0xff] }
 0x694   : > { %7189 = vmatmul.msk.f32.gmra.mxu3 %vm1085_vm2, %v2307_v22  ;;  %7526 = vmatmul.msk.f32.gmra.mxu1 %vm1085_vm2, %v5271_v63  ;;  %v11466_v63 = vld [vmem:[#allocation96_spill] sm:$0xff] }
 0x695   : > { %7615 = vmatmul.msk.f32.gmra.mxu2 %vm1085_vm2, %v2307_v22  ;;  %v2181_v48 = vadd.f32 %v9228_v29, %v11466_v63  ;;  %v10092_v22 = vpop.f32.mrf.mxu2 }
 0x696   : > { %11467 = vst [vmem:[#allocation96_spill] sm:$0xff] %v10092_v22 }
 0x697   : > { %v2702_v10 = vpop.f32.mrf.mxu3 }
 0x698   : > { %v10083_v7 = vadd.f32 %v2702_v10, %v2178_v43  ;;  %v5273_v43 = vld [vmem:[#allocation2 + $0x229] sm:$0xff]  ;;  %v10096_v10 = vpop.f32.mrf.mxu1 }
 0x69a   : > { %11465 = vst [vmem:[#allocation94_spill] sm:$0xff] %v10083_v7 }
 0x69c   : > { %7190 = vmatmul.msk.f32.gmra.mxu3 %vm1085_vm2, %v2308_v50  ;;  %7527 = vmatmul.msk.f32.gmra.mxu1 %vm1085_vm2, %v5272_v51  ;;  %v11469_v51 = vld [vmem:[#allocation99_spill] sm:$0xff] }
 0x69d   : > { %7616 = vmatmul.msk.f32.gmra.mxu2 %vm1085_vm2, %v2308_v50  ;;  %v2184_v50 = vadd.f32 %v9252_v13, %v11469_v51  ;;  %v10105_v63 = vpop.f32.mrf.mxu2 }
 0x69e   : > { %11471 = vst [vmem:[#allocation385_spill] sm:$0xff] %v10105_v63 }
 0x69f   : > { %v2705_v20 = vpop.f32.mrf.mxu3 }
 0x6a0   : > { %v10094_v9 = vadd.f32 %v2705_v20, %v2181_v48  ;;  %v10107_v20 = vpop.f32.mrf.mxu0  ;;  %v2310_v48 = vld [vmem:[#allocation2 + $0x2ea] sm:$0xff]  ;;  %v10114_v13 = vpop.f32.mrf.mxu1 }
 0x6a1   : > { %11472 = vst [vmem:[#allocation386_spill] sm:$0xff] %v10107_v20  ;;  %v5275_v20 = vld [vmem:[#allocation2 + $0x241] sm:$0xff] }
 0x6a2   : > { %11468 = vst [vmem:[#allocation384_spill] sm:$0xff] %v10094_v9  ;;  %v5274_v9 = vld [vmem:[#allocation2 + $0x231] sm:$0xff] }
 0x6a4   : > { %7191 = vmatmul.msk.f32.gmra.mxu3 %vm1085_vm2, %v2309_v18  ;;  %7528 = vmatmul.msk.f32.gmra.mxu1 %vm1085_vm2, %v5273_v43  ;;  %v4699_v43 = vld [vmem:[#allocation2 + $0x320] sm:$0xff] }
 0x6a5   : > { %7617 = vmatmul.msk.f32.gmra.mxu2 %vm1085_vm2, %v2309_v18  ;;  %v11473_v18 = vld [vmem:[#allocation101_spill] sm:$0xff]  ;;  %7479 = vmatmul.msk.f32.gmra.mxu0 %vm1085_vm2, %v4699_v43 }
 0x6a6   : > { %v2187_v22 = vadd.f32 %v9270_v35, %v11473_v18  ;;  %v4700_v35 = vld [vmem:[#allocation2 + $0x328] sm:$0xff] }
 0x6a7   : > { %v2708_v7 = vpop.f32.mrf.mxu3 }
 0x6a8   : > { %v10103_v29 = vadd.f32 %v2708_v7, %v2184_v50  ;;  %v10119_v50 = vpop.f32.mrf.mxu2  ;;  %v10121_v63 = vpop.f32.mrf.mxu0 }
 0x6a9   : > { %11475 = vst [vmem:[#allocation387_spill] sm:$0xff] %v10119_v50  ;;  %v10129_v43 = vpop.f32.mrf.mxu1  ;;  %v5283_v50 = vld [vmem:[#allocation2 + $0x291] sm:$0xff] }
 0x6aa   : > { %11470 = vst [vmem:[#allocation99_spill] sm:$0xff] %v10103_v29  ;;  %v2311_v29 = vld [vmem:[#allocation2 + $0x2f2] sm:$0xff] }
 0x6ab   : > { %11476 = vst [vmem:[#allocation388_spill] sm:$0xff] %v10121_v63 }
 0x6ac   : > { %7192 = vmatmul.msk.f32.gmra.mxu3 %vm1085_vm2, %v2310_v48  ;;  %7529 = vmatmul.msk.f32.gmra.mxu1 %vm1085_vm2, %v5274_v9  ;;  %v11477_v9 = vld [vmem:[#allocation103_spill] sm:$0xff] }
 0x6ad   : > { %7618 = vmatmul.msk.f32.gmra.mxu2 %vm1085_vm2, %v2310_v48  ;;  %v2190_v48 = vadd.f32 %v9288_v34, %v11477_v9  ;;  %7480 = vmatmul.msk.f32.gmra.mxu0 %vm1085_vm2, %v4700_v35  ;;  %v11480_v34 = vld [vmem:[#allocation112_spill] sm:$0xff] }
 0x6ae   : > { %v2193_v35 = vadd.f32 %v9303_v5, %v11480_v34 }
 0x6af   : > { %v2711_v7 = vpop.f32.mrf.mxu3 }
 0x6b0   : > { %v10117_v51 = vadd.f32 %v2711_v7, %v2187_v22  ;;  %v4032_v7 = vld [vmem:[#allocation2 + $0x22] sm:$0xff]  ;;  %v10135_v63 = vpop.f32.mrf.mxu2  ;;  %v10140_v9 = vpop.f32.mrf.mxu0 }
 0x6b1   : > { %11479 = vst [vmem:[#allocation389_spill] sm:$0xff] %v10135_v63  ;;  %v11483_v63 = vld [vmem:[#allocation115_spill] sm:$0xff] }
 0x6b2   : > { %11474 = vst [vmem:[#allocation101_spill] sm:$0xff] %v10117_v51  ;;  %v5276_v51 = vld [vmem:[#allocation2 + $0x249] sm:$0xff]  ;;  %v2196_v5 = vadd.f32 %v9318_v26, %v11483_v63 }
 0x6b3   : > { %11481 = vst [vmem:[#allocation112_spill] sm:$0xff] %v10140_v9 }
 0x6b4   : > { %7193 = vmatmul.msk.f32.gmra.mxu3 %vm1085_vm2, %v2311_v29  ;;  %7530 = vmatmul.msk.f32.gmra.mxu1 %vm1085_vm2, %v5275_v20  ;;  %v5890_v20 = vld [vmem:[#allocation2 + $0x302] sm:$0xff] }
 0x6b5   : > { %7619 = vmatmul.msk.f32.gmra.mxu2 %vm1085_vm2, %v2311_v29  ;;  %v4701_v29 = vld [vmem:[#allocation2 + $0x330] sm:$0xff] }
 0x6b6   : > { %7481 = vmatmul.msk.f32.gmra.mxu0 %vm1085_vm2, %v4701_v29 }
 0x6b7   : > { %v2714_v22 = vpop.f32.mrf.mxu3 }
 0x6b8   : > { %v10131_v18 = vadd.f32 %v2714_v22, %v2190_v48  ;;  %v10152_v34 = vpop.f32.mrf.mxu2 }
 0x6b9   : > { %11484 = vst [vmem:[#allocation115_spill] sm:$0xff] %v10152_v34 }
 0x6ba   : > { %11478 = vst [vmem:[#allocation103_spill] sm:$0xff] %v10131_v18  ;;  %v10145_v18 = vpop.f32.mrf.mxu1 }
 0x6bc   : > { %7338 = vmatmul.msk.f32.vlgmr.msrb.gmra.mxu3 %vm1085_vm2, %v4032_v7  ;;  %7531 = vmatmul.msk.f32.gmra.mxu1 %vm1085_vm2, %v5276_v51  ;;  %v4033_v7 = vld [vmem:[#allocation2 + $0x2a] sm:$0xff] }
 0x6bd   : > { %7620 = vmatmul.msk.f32.gmra.mxu2 %vm1085_vm2, %v5890_v20  ;;  %v5277_v51 = vld [vmem:[#allocation2 + $0x251] sm:$0xff] }
 0x6be   : > { %v5891_v20 = vld [vmem:[#allocation2 + $0x30a] sm:$0xff] }
 0x6bf   : > { %v2717_v48 = vpop.f32.mrf.mxu3 }
 0x6c0   : > { %v10143_v22 = vadd.f32 %v2717_v48, %v2193_v35  ;;  %v4034_v35 = vld [vmem:[#allocation2 + $0x32] sm:$0xff]  ;;  %v5278_v48 = vld [vmem:[#allocation2 + $0x261] sm:$0xff]  ;;  %v10165_v34 = vpop.f32.mrf.mxu2 }
 0x6c1   : > { %11488 = vst [vmem:[#allocation392_spill] sm:$0xff] %v10165_v34 }
 0x6c2   : > { %11482 = vst [vmem:[#allocation390_spill] sm:$0xff] %v10143_v22  ;;  %v10156_v22 = vpop.f32.mrf.mxu1 }
 0x6c4   : > { %7339 = vmatmul.msk.f32.gmra.mxu3 %vm1085_vm2, %v4033_v7  ;;  %7532 = vmatmul.msk.f32.gmra.mxu1 %vm1085_vm2, %v5277_v51  ;;  %v5892_v7 = vld [vmem:[#allocation2 + $0x312] sm:$0xff] }
 0x6c5   : > { %7621 = vmatmul.msk.f32.gmra.mxu2 %vm1085_vm2, %v5891_v20  ;;  %v11486_v51 = vld [vmem:[#allocation119_spill] sm:$0xff] }
 0x6c6   : > { %v2199_v20 = vadd.f32 %v9342_v24, %v11486_v51 }
 0x6c7   : > { %v2720_v29 = vpop.f32.mrf.mxu3 }
 0x6c8   : > { %v10154_v9 = vadd.f32 %v2720_v29, %v2196_v5  ;;  %v4035_v5 = vld [vmem:[#allocation2 + $0x42] sm:$0xff] }
 0x6c9   : > { %v5279_v29 = vld [vmem:[#allocation2 + $0x269] sm:$0xff] }
 0x6ca   : > { %11485 = vst [vmem:[#allocation391_spill] sm:$0xff] %v10154_v9  ;;  %v10172_v9 = vpop.f32.mrf.mxu1 }
 0x6cc   : > { %7340 = vmatmul.msk.f32.gmra.mxu3 %vm1085_vm2, %v4034_v35  ;;  %7533 = vmatmul.msk.f32.gmra.mxu1 %vm1085_vm2, %v5278_v48  ;;  %v5893_v35 = vld [vmem:[#allocation2 + $0x322] sm:$0xff]  ;;  %v11489_v48 = vld [vmem:[#allocation123_spill] sm:$0xff] }
 0x6cd   : > { %7622 = vmatmul.msk.f32.gmra.mxu2 %vm1085_vm2, %v5892_v7  ;;  %v2202_v7 = vadd.f32 %v9354_v28, %v11489_v48 }
 0x6cf   : > { %v2723_v26 = vpop.f32.mrf.mxu3 }
 0x6d0   : > { %v10163_v63 = vadd.f32 %v2723_v26, %v2199_v20  ;;  %v10176_v20 = vpop.f32.mrf.mxu2  ;;  %v4036_v26 = vld [vmem:[#allocation2 + $0x4a] sm:$0xff] }
 0x6d1   : > { %11491 = vst [vmem:[#allocation393_spill] sm:$0xff] %v10176_v20 }
 0x6d2   : > { %11487 = vst [vmem:[#allocation119_spill] sm:$0xff] %v10163_v63  ;;  %v5280_v63 = vld [vmem:[#allocation2 + $0x271] sm:$0xff]  ;;  %v10183_v48 = vpop.f32.mrf.mxu1 }
 0x6d4   : > { %7341 = vmatmul.msk.f32.gmra.mxu3 %vm1085_vm2, %v4035_v5  ;;  %7534 = vmatmul.msk.f32.gmra.mxu1 %vm1085_vm2, %v5279_v29  ;;  %v5894_v5 = vld [vmem:[#allocation2 + $0x32a] sm:$0xff] }
 0x6d5   : > { %7623 = vmatmul.msk.f32.gmra.mxu2 %vm1085_vm2, %v5893_v35  ;;  %v11492_v29 = vld [vmem:[#allocation126_spill] sm:$0xff] }
 0x6d6   : > { %v2205_v35 = vadd.f32 %v9368_v46, %v11492_v29 }
 0x6d7   : > { %v2726_v24 = vpop.f32.mrf.mxu3 }
 0x6d8   : > { %v10174_v51 = vadd.f32 %v2726_v24, %v2202_v7  ;;  %v4037_v7 = vld [vmem:[#allocation2 + $0x52] sm:$0xff]  ;;  %v5281_v24 = vld [vmem:[#allocation2 + $0x281] sm:$0xff] }
 0x6da   : > { %11490 = vst [vmem:[#allocation123_spill] sm:$0xff] %v10174_v51  ;;  %v10189_v51 = vpop.f32.mrf.mxu2  ;;  %v10196_v20 = vpop.f32.mrf.mxu1 }
 0x6db   : > { %11494 = vst [vmem:[#allocation394_spill] sm:$0xff] %v10189_v51 }
 0x6dc   : > { %7342 = vmatmul.msk.f32.gmra.mxu3 %vm1085_vm2, %v4036_v26  ;;  %7535 = vmatmul.msk.f32.gmra.mxu1 %vm1085_vm2, %v5280_v63  ;;  %v5895_v26 = vld [vmem:[#allocation2 + $0x332] sm:$0xff]  ;;  %v11495_v63 = vld [vmem:[#allocation129_spill] sm:$0xff] }
 0x6dd   : > { %7624 = vmatmul.msk.f32.gmra.mxu2 %vm1085_vm2, %v5894_v5  ;;  %v2208_v5 = vadd.f32 %v9382_v53, %v11495_v63  ;;  %v11499_v63 = vld [vmem:[#allocation135_spill] sm:$0xff] }
 0x6df   : > { %v2729_v28 = vpop.f32.mrf.mxu3 }
 0x6e0   : > { %v10185_v34 = vadd.f32 %v2729_v28, %v2205_v35  ;;  %v4038_v35 = vld [vmem:[#allocation2 + $0x62] sm:$0xff] }
 0x6e1   : > { %v5282_v28 = vld [vmem:[#allocation2 + $0x289] sm:$0xff] }
 0x6e2   : > { %11493 = vst [vmem:[#allocation126_spill] sm:$0xff] %v10185_v34  ;;  %v10204_v53 = vpop.f32.mrf.mxu1 }
 0x6e4   : > { %7343 = vmatmul.msk.f32.gmra.mxu3 %vm1085_vm2, %v4037_v7  ;;  %7536 = vmatmul.msk.f32.gmra.mxu1 %vm1085_vm2, %v5281_v24  ;;  %v11497_v7 = vld [vmem:[#allocation132_spill] sm:$0xff] }
 0x6e5   : > { %7625 = vmatmul.msk.f32.gmra.mxu2 %vm1085_vm2, %v5895_v26  ;;  %v2211_v24 = vadd.f32 %v9396_v54, %v11497_v7  ;;  %v4039_v26 = vld [vmem:[#allocation2 + $0x6a] sm:$0xff] }
 0x6e6   : > { %v11501_v54 = vld [vmem:[#allocation141_spill] sm:$0xff] }
 0x6e7   : > { %v2732_v46 = vpop.f32.mrf.mxu3 }
 0x6e8   : > { %v10194_v29 = vadd.f32 %v2732_v46, %v2208_v5  ;;  %v2214_v5 = vadd.f32 %v9410_v25, %v11499_v63  ;;  %v11503_v25 = vld [vmem:[#allocation146_spill] sm:$0xff] }
 0x6e9   : > { %v2220_v63 = vadd.f32 %v9436_v27, %v11503_v25  ;;  %v4043_v27 = vld [vmem:[#allocation2 + $0x92] sm:$0xff]  ;;  %v5287_v25 = vld [vmem:[#allocation2 + $0x2c1] sm:$0xff] }
 0x6ea   : > { %11496 = vst [vmem:[#allocation129_spill] sm:$0xff] %v10194_v29  ;;  %v5284_v29 = vld [vmem:[#allocation2 + $0x2a1] sm:$0xff]  ;;  %v10216_v7 = vpop.f32.mrf.mxu1 }
 0x6ec   : > { %7344 = vmatmul.msk.f32.gmra.mxu3 %vm1085_vm2, %v4038_v35  ;;  %7537 = vmatmul.msk.f32.gmra.mxu1 %vm1085_vm2, %v5282_v28  ;;  %v4040_v28 = vld [vmem:[#allocation2 + $0x72] sm:$0xff] }
 0x6ef   : > { %v2735_v34 = vpop.f32.mrf.mxu3 }
 0x6f0   : > { %v10202_v51 = vadd.f32 %v2735_v34, %v2211_v24  ;;  %v2217_v34 = vadd.f32 %v9422_v4, %v11501_v54  ;;  %v4042_v4 = vld [vmem:[#allocation2 + $0x8a] sm:$0xff] }
 0x6f1   : > { %v11506_v54 = vld [vmem:[#allocation150_spill] sm:$0xff] }
 0x6f2   : > { %11498 = vst [vmem:[#allocation132_spill] sm:$0xff] %v10202_v51  ;;  %v5285_v51 = vld [vmem:[#allocation2 + $0x2a9] sm:$0xff] }
 0x6f4   : > { %7345 = vmatmul.msk.f32.gmra.mxu3 %vm1085_vm2, %v4039_v26  ;;  %7538 = vmatmul.msk.f32.gmra.mxu1 %vm1085_vm2, %v5283_v50  ;;  %v4041_v50 = vld [vmem:[#allocation2 + $0x82] sm:$0xff] }
 0x6f7   : > { %v2738_v46 = vpop.f32.mrf.mxu3 }
 0x6f8   : > { %v10210_v35 = vadd.f32 %v2738_v46, %v2214_v5  ;;  %v10224_v46 = vpop.f32.mrf.mxu1 }
 0x6f9   : > { %11504 = vst [vmem:[#allocation146_spill] sm:$0xff] %v10224_v46  ;;  %v11537_v46 = vld [vmem:[#allocation8_spill] sm:$0xff] }
 0x6fa   : > { %11500 = vst [vmem:[#allocation135_spill] sm:$0xff] %v10210_v35  ;;  %v11528_v35 = vld [vmem:[#allocation76_spill] sm:$0xff] }
 0x6fc   : > { %7346 = vmatmul.msk.f32.gmra.mxu3 %vm1085_vm2, %v4040_v28  ;;  %7539 = vmatmul.msk.f32.gmra.mxu1 %vm1085_vm2, %v5284_v29  ;;  %v5286_v28 = vld [vmem:[#allocation2 + $0x2b1] sm:$0xff] }
 0x6ff   : > { %v2741_v24 = vpop.f32.mrf.mxu3 }
 0x700   : > { %v10218_v26 = vadd.f32 %v2741_v24, %v2217_v34  ;;  %v2223_v34 = vadd.f32 %v9450_v16, %v11506_v54  ;;  %v11511_v54 = vld [vmem:[#allocation158_spill] sm:$0xff] }
 0x702   : > { %11502 = vst [vmem:[#allocation141_spill] sm:$0xff] %v10218_v26  ;;  %v5288_v26 = vld [vmem:[#allocation2 + $0x2c9] sm:$0xff] }
 0x704   : > { %7347 = vmatmul.msk.f32.gmra.mxu3 %vm1085_vm2, %v4041_v50  ;;  %7540 = vmatmul.msk.f32.gmra.mxu1 %vm1085_vm2, %v5285_v51  ;;  %v10234_v51 = vpop.f32.mrf.mxu1 }
 0x705   : > { %11508 = vst [vmem:[#allocation396_spill] sm:$0xff] %v10234_v51 }
 0x707   : > { %v2744_v5 = vpop.f32.mrf.mxu3 }
 0x708   : > { %v10226_v29 = vadd.f32 %v2744_v5, %v2220_v63  ;;  %v11509_v63 = vld [vmem:[#allocation154_spill] sm:$0xff] }
 0x709   : > { %v2226_v5 = vadd.f32 %v9464_v15, %v11509_v63  ;;  %v11513_v15 = vld [vmem:[#allocation163_spill] sm:$0xff] }
 0x70a   : > { %11505 = vst [vmem:[#allocation395_spill] sm:$0xff] %v10226_v29  ;;  %v2232_v63 = vadd.f32 %v9489_v62, %v11513_v15  ;;  %v4047_v62 = vld [vmem:[#allocation2 + $0xc2] sm:$0xff]  ;;  %v11519_v15 = vld [vmem:[#allocation171_spill] sm:$0xff] }
 0x70c   : > { %7348 = vmatmul.msk.f32.gmra.mxu3 %vm1085_vm2, %v4042_v4  ;;  %7541 = vmatmul.msk.f32.gmra.mxu1 %vm1085_vm2, %v5286_v28  ;;  %v4044_v28 = vld [vmem:[#allocation2 + $0xa2] sm:$0xff]  ;;  %v10242_v16 = vpop.f32.mrf.mxu1 }
 0x70f   : > { %v2747_v24 = vpop.f32.mrf.mxu3 }
 0x710   : > { %v10232_v50 = vadd.f32 %v2747_v24, %v2223_v34  ;;  %v2229_v34 = vadd.f32 %v9478_v11, %v11511_v54  ;;  %v11516_v11 = vld [vmem:[#allocation167_spill] sm:$0xff] }
 0x711   : > { %v2235_v54 = vadd.f32 %v9505_v41, %v11516_v11  ;;  %v4048_v41 = vld [vmem:[#allocation2 + $0xca] sm:$0xff] }
 0x712   : > { %11507 = vst [vmem:[#allocation150_spill] sm:$0xff] %v10232_v50  ;;  %v5289_v50 = vld [vmem:[#allocation2 + $0x2d1] sm:$0xff] }
 0x713   : > { %v5292_v11 = vld [vmem:[#allocation2 + $0x2f1] sm:$0xff] }
 0x714   : > { %7349 = vmatmul.msk.f32.gmra.mxu3 %vm1085_vm2, %v4043_v27  ;;  %7542 = vmatmul.msk.f32.gmra.mxu1 %vm1085_vm2, %v5287_v25  ;;  %v4045_v25 = vld [vmem:[#allocation2 + $0xaa] sm:$0xff] }
 0x717   : > { %v2750_v4 = vpop.f32.mrf.mxu3 }
 0x718   : > { %v10240_v29 = vadd.f32 %v2750_v4, %v2226_v5  ;;  %v10254_v5 = vpop.f32.mrf.mxu1 }
 0x719   : > { %11514 = vst [vmem:[#allocation163_spill] sm:$0xff] %v10254_v5  ;;  %v11534_v5 = vld [vmem:[#allocation6_spill] sm:$0xff] }
 0x71a   : > { %11510 = vst [vmem:[#allocation154_spill] sm:$0xff] %v10240_v29  ;;  %v5290_v29 = vld [vmem:[#allocation2 + $0x2e1] sm:$0xff] }
 0x71c   : > { %7350 = vmatmul.msk.f32.gmra.mxu3 %vm1085_vm2, %v4044_v28  ;;  %7543 = vmatmul.msk.f32.gmra.mxu1 %vm1085_vm2, %v5288_v26  ;;  %v4046_v26 = vld [vmem:[#allocation2 + $0xb2] sm:$0xff] }
 0x71f   : > { %v2753_v24 = vpop.f32.mrf.mxu3 }
 0x720   : > { %v10248_v27 = vadd.f32 %v2753_v24, %v2229_v34  ;;  %v10262_v24 = vpop.f32.mrf.mxu1 }
 0x721   : > { %11517 = vst [vmem:[#allocation167_spill] sm:$0xff] %v10262_v24  ;;  %v4050_v24 = vld [vmem:[#allocation2 + $0xe2] sm:$0xff] }
 0x722   : > { %11512 = vst [vmem:[#allocation158_spill] sm:$0xff] %v10248_v27  ;;  %v4049_v27 = vld [vmem:[#allocation2 + $0xd2] sm:$0xff] }
 0x724   : > { %7351 = vmatmul.msk.f32.gmra.mxu3 %vm1085_vm2, %v4045_v25  ;;  %7544 = vmatmul.msk.f32.gmra.mxu1 %vm1085_vm2, %v5289_v50  ;;  %v5291_v25 = vld [vmem:[#allocation2 + $0x2e9] sm:$0xff] }
 0x727   : > { %v2756_v4 = vpop.f32.mrf.mxu3 }
 0x728   : > { %v10256_v28 = vadd.f32 %v2756_v4, %v2232_v63  ;;  %v2238_v63 = vadd.f32 %v9521_v31, %v11519_v15  ;;  %v11525_v15 = vld [vmem:[#allocation105_spill] sm:$0xff] }
 0x72a   : > { %11515 = vst [vmem:[#allocation397_spill] sm:$0xff] %v10256_v28  ;;  %v5293_v28 = vld [vmem:[#allocation2 + $0x301] sm:$0xff] }
 0x72c   : > { %7352 = vmatmul.msk.f32.gmra.mxu3 %vm1085_vm2, %v4046_v26  ;;  %7545 = vmatmul.msk.f32.gmra.mxu1 %vm1085_vm2, %v5290_v29  ;;  %v10272_v29 = vpop.f32.mrf.mxu1 }
 0x72d   : > { %11521 = vst [vmem:[#allocation399_spill] sm:$0xff] %v10272_v29 }
 0x72f   : > { %v2759_v34 = vpop.f32.mrf.mxu3 }
 0x730   : > { %v10264_v50 = vadd.f32 %v2759_v34, %v2235_v54  ;;  %v11522_v34 = vld [vmem:[#allocation136_spill] sm:$0xff] }
 0x732   : > { %11518 = vst [vmem:[#allocation398_spill] sm:$0xff] %v10264_v50  ;;  %v11523_v50 = vld [vmem:[#allocation4_spill] sm:$0xff] }
 0x734   : > { %7353 = vmatmul.msk.f32.gmra.mxu3 %vm1085_vm2, %v4047_v62  ;;  %7546 = vmatmul.msk.f32.gmra.mxu1 %vm1085_vm2, %v5291_v25  ;;  %v2025_v62 = vadd.f32 %v11523_v50, %v11522_v34  ;;  %v10279_v31 = vpop.f32.mrf.mxu1  ;;  %v5294_v50 = vld [vmem:[#allocation2 + $0x309] sm:$0xff]  ;;  %v11529_v34 = vld [vmem:[#allocation147_spill] sm:$0xff] }
 0x735   : > { %11524 = vst [vmem:[#allocation136_spill] sm:$0xff] %v10279_v31  ;;  %v11533_v31 = vld [vmem:[#allocation143_spill] sm:$0xff] }
 0x736   : > { %v2765_v25 = vadd.f32 %v9534_v44, %v2025_v62  ;;  %v11530_v44 = vld [vmem:[#allocation7_spill] sm:$0xff]  ;;  %v2031_v6 = vadd.f32 %v11534_v5, %v11533_v31  ;;  %v11539_v31 = vld [vmem:[#allocation80_spill] sm:$0xff] }
 0x737   : > { %v2762_v4 = vpop.f32.mrf.mxu3  ;;  %v2034_v62 = vadd.f32 %v11530_v44, %v11529_v34  ;;  %v11535_v34 = vld [vmem:[#allocation111_spill] sm:$0xff] }
 0x738   : > { %v10270_v26 = vadd.f32 %v2762_v4, %v2238_v63  ;;  %v3363_v63 = vadd.f32 %v11525_v15, %v2765_v25 }
 0x73a   : > { %11520 = vst [vmem:[#allocation171_spill] sm:$0xff] %v10270_v26  ;;  %v11527_v26 = vld [vmem:[#allocation5_spill] sm:$0xff]  ;;  %v3960_v29 = vadd.f32 %v11528_v35, %v3363_v63 }
 0x73b   : > { %v11532_v35 = vld [vmem:[#allocation181_spill] sm:$0xff] }
 0x73c   : > { %7354 = vmatmul.msk.f32.gmra.mxu3 %vm1085_vm2, %v4048_v41  ;;  %7547 = vmatmul.msk.f32.gmra.mxu1 %vm1085_vm2, %v5292_v11  ;;  %v11526_v41 = vld [vmem:[#allocation139_spill] sm:$0xff]  ;;  %v10293_v25 = vpop.f32.mrf.mxu1 }
 0x73d   : > { %v2028_v11 = vadd.f32 %v11527_v26, %v11526_v41  ;;  %v11531_v26 = vld [vmem:[#allocation107_spill] sm:$0xff] }
 0x73f   : > { %v4341_v54 = vpop.f32.mrf.mxu3  ;;  %v2766_v51 = vadd.f32 %v9547_v40, %v2028_v11  ;;  %v4051_v40 = vld [vmem:[#allocation2 + $0xea] sm:$0xff] }
 0x740   : > { %v5295_v11 = vld [vmem:[#allocation2 + $0x311] sm:$0xff] }
 0x741   : > { %v3364_v41 = vadd.f32 %v11531_v26, %v2766_v51  ;;  %v11540_v26 = vld [vmem:[#allocation109_spill] sm:$0xff] }
 0x744   : > { %7355 = vmatmul.msk.f32.gmra.mxu3 %vm1085_vm2, %v4049_v27  ;;  %7548 = vmatmul.msk.f32.gmra.mxu1 %vm1085_vm2, %v5293_v28  ;;  %v4557_v27 = vadd.f32 %v4341_v54, %v3960_v29  ;;  %v2768_v28 = vadd.f32 %v9577_v0, %v2034_v62  ;;  %v2767_v29 = vadd.f32 %v9558_v14, %v2031_v6  ;;  %v11538_v0 = vld [vmem:[#allocation77_spill] sm:$0xff]  ;;  %v10316_v6 = vld [vmem:[%s11066_s4] ss:$0 sm:$0xff] }
 0x745   : > { %v3961_v54 = vadd.f32 %v11538_v0, %v3364_v41  ;;  %v11541_v41 = vld [vmem:[#allocation114_spill] sm:$0xff] }
 0x746   : > { %v5155_v63 = vadd.f32 %v11532_v35, %v4557_v27  ;;  %v3366_v44 = vadd.f32 %v11535_v34, %v2768_v28  ;;  %v3365_v35 = vadd.f32 %v11540_v26, %v2767_v29  ;;  %v10310_v34 = vpop.f32.mrf.mxu1  ;;  %v11545_v29 = vld [vmem:[#allocation78_spill] sm:$0xff] }
 0x747   : > { %v4344_v4 = vpop.f32.mrf.mxu3 }
 0x748   : > { %v5752_v51 = vadd.f32 %v9806_v19, %v5155_v63  ;;  %v4558_v5 = vadd.f32 %v4344_v4, %v3961_v54  ;;  %v3963_v27 = vadd.f32 %v11539_v31, %v3366_v44  ;;  %v11542_v63 = vld [vmem:[#allocation184_spill] sm:$0xff]  ;;  %v11543_v44 = vld [vmem:[#allocation155_spill] sm:$0xff]  ;;  %v3962_v0 = vadd.f32 %v11545_v29, %v3365_v35  ;;  %v11546_v31 = vld [vmem:[#allocation82_spill] sm:$0xff] }
 0x74a   : > { %v6349_v14 = vadd.f32 %v9615_v8, %v5752_v51 }
 0x74c   : > { %7356 = vmatmul.msk.f32.gmra.mxu3 %vm1085_vm2, %v4050_v24  ;;  %7549 = vmatmul.msk.f32.gmra.mxu1 %vm1085_vm2, %v5294_v50  ;;  %v11536_v24 = vld [vmem:[#allocation151_spill] sm:$0xff]  ;;  %v6425_v51 = vadd.f32 %v10316_v6, %v6349_v14 }
 0x74d   : > { %v2037_v50 = vadd.f32 %v11537_v46, %v11536_v24  ;;  %v4052_v24 = vld [vmem:[#allocation2 + $0xf2] sm:$0xff] }
 0x74f   : > { %v4347_v15 = vpop.f32.mrf.mxu3  ;;  %v2769_v62 = vadd.f32 %v9589_v39, %v2037_v50  ;;  %v5156_v39 = vadd.f32 %v11542_v63, %v4558_v5  ;;  %v5296_v50 = vld [vmem:[#allocation2 + $0x321] sm:$0xff]  ;;  %v10334_v63 = vpop.f32.mrf.mxu1 }
 0x751   : > { %v3367_v19 = vadd.f32 %v11541_v41, %v2769_v62  ;;  %v5753_v62 = vadd.f32 %v9816_v52, %v5156_v39  ;;  %v6497_v41 = vmax.f32 %v6425_v51, 0.0  ;;  %v5298_v51 = vld [vmem:[#allocation2 + $0x331] sm:$0xff] }
 0x754   : > { %7357 = vmatmul.msk.f32.gmra.mxu3 %vm1085_vm2, %v4051_v40  ;;  %7550 = vmatmul.msk.f32.gmra.mxu1 %vm1085_vm2, %v5295_v11  ;;  %v11544_v40 = vld [vmem:[#allocation9_spill] sm:$0xff] }
 0x755   : > { %v2040_v11 = vadd.f32 %v11544_v40, %v11543_v44 }
 0x757   : > { %v4350_v28 = vpop.f32.mrf.mxu3  ;;  %v2770_v54 = vadd.f32 %v9601_v23, %v2040_v11  ;;  %v6350_v23 = vadd.f32 %v9627_v59, %v5753_v62  ;;  %v11548_v59 = vld [vmem:[#allocation84_spill] sm:$0xff] }
 0x758   : > { %v4560_v46 = vadd.f32 %v4350_v28, %v3963_v27  ;;  %v3964_v27 = vadd.f32 %v11546_v31, %v3367_v19  ;;  %v11549_v31 = vld [vmem:[#allocation159_spill] sm:$0xff] }
 0x759   : > { %v6426_v44 = vadd.f32 %v10316_v6, %v6350_v23 }
 0x75a   : > { %v5158_v4 = vadd.f32 %v9173_v32, %v4560_v46  ;;  %v4559_v32 = vadd.f32 %v4347_v15, %v3962_v0  ;;  %v5297_v15 = vld [vmem:[#allocation2 + $0x329] sm:$0xff] }
 0x75b   : > { %v6498_v29 = vmax.f32 %v6426_v44, 0.0 }
 0x75c   : > { %v5755_v8 = vadd.f32 %v9835_v30, %v5158_v4  ;;  %7358 = vmatmul.msk.f32.gmra.mxu3 %vm1085_vm2, %v4052_v24  ;;  %7551 = vmatmul.msk.f32.gmra.mxu1 %vm1085_vm2, %v5296_v50  ;;  %v11547_v30 = vld [vmem:[#allocation117_spill] sm:$0xff]  ;;  %v5157_v14 = vadd.f32 %v9155_v2, %v4559_v32 }
 0x75d   : > { %v3368_v46 = vadd.f32 %v11547_v30, %v2770_v54  ;;  %v4054_v54 = vld [vmem:[#allocation2 + $0x10a] sm:$0xff]  ;;  %v4055_v30 = vld [vmem:[#allocation2 + $0x112] sm:$0xff] }
 0x75e   : > { %v6352_v5 = vadd.f32 %v9649_v33, %v5755_v8  ;;  %v4053_v33 = vld [vmem:[#allocation2 + $0x102] sm:$0xff]  ;;  %v5754_v40 = vadd.f32 %v9826_v21, %v5157_v14  ;;  %v10350_v21 = vpop.f32.mrf.mxu1 }
 0x75f   : > { %v4353_v28 = vpop.f32.mrf.mxu3 }
 0x760   : > { %v6428_v26 = vadd.f32 %v10316_v6, %v6352_v5  ;;  %v4561_v35 = vadd.f32 %v4353_v28, %v3964_v27  ;;  %v11550_v27 = vld [vmem:[#allocation10_spill] sm:$0xff] }
 0x761   : > { %v2043_v28 = vadd.f32 %v11550_v27, %v11549_v31  ;;  %v11561_v31 = vld [vmem:[#allocation166_spill] sm:$0xff]  ;;  %v11562_v27 = vld [vmem:[#allocation12_spill] sm:$0xff] }
 0x762   : > { %v6500_v4 = vmax.f32 %v6428_v26, 0.0  ;;  %v5159_v52 = vadd.f32 %v9191_v56, %v4561_v35  ;;  %v3965_v56 = vadd.f32 %v11548_v59, %v3368_v46  ;;  %v11556_v59 = vld [vmem:[#allocation13_spill] sm:$0xff] }
 0x764   : > { %v6569_v19 = vmax.f32 %v6497_v41, %v6500_v4  ;;  %v5756_v39 = vadd.f32 %v9844_v1, %v5159_v52  ;;  %7359 = vmatmul.msk.f32.gmra.mxu3 %vm1085_vm2, %v4053_v33  ;;  %7552 = vmatmul.msk.f32.gmra.mxu1 %vm1085_vm2, %v5297_v15  ;;  %v6351_v1 = vadd.f32 %v9637_v49, %v5754_v40  ;;  %v11552_v33 = vld [vmem:[#allocation162_spill] sm:$0xff]  ;;  %v11553_v15 = vld [vmem:[#allocation11_spill] sm:$0xff]  ;;  %v4056_v40 = vld [vmem:[#allocation2 + $0x122] sm:$0xff] }
 0x766   : > { %6606 = vst.msk [vmem:[#allocation3] sm:$0xff] %vm6605_vm3, %v6569_v19  ;;  %v6353_v2 = vadd.f32 %v9661_v45, %v5756_v39  ;;  %v6427_v32 = vadd.f32 %v10316_v6, %v6351_v1  ;;  %v2046_v19 = vadd.f32 %v11553_v15, %v11552_v33  ;;  %v11554_v39 = vld [vmem:[#allocation85_spill] sm:$0xff]  ;;  %v11569_v33 = vld [vmem:[#allocation279_spill] sm:$0xff] }
 0x767   : > { %v4356_v11 = vpop.f32.mrf.mxu3 }
 0x768   : > { %v6429_v24 = vadd.f32 %v10316_v6, %v6353_v2  ;;  %v4562_v50 = vadd.f32 %v4356_v11, %v3965_v56  ;;  %v6499_v26 = vmax.f32 %v6427_v32, 0.0  ;;  %v11555_v2 = vld [vmem:[#allocation170_spill] sm:$0xff] }
 0x769   : > { %v2052_v56 = vadd.f32 %v11556_v59, %v11555_v2  ;;  %v11557_v11 = vld [vmem:[#allocation270_spill] sm:$0xff]  ;;  %v11571_v2 = vld [vmem:[#allocation125_spill] sm:$0xff] }
 0x76a   : > { %v6501_v0 = vmax.f32 %v6429_v24, 0.0  ;;  %v5160_v8 = vadd.f32 %v9209_v36, %v4562_v50  ;;  %v2772_v24 = vadd.f32 %v11557_v11, %v2046_v19  ;;  %v11572_v11 = vld [vmem:[#allocation286_spill] sm:$0xff] }
 0x76c   : > { %v6570_v62 = vmax.f32 %v6498_v29, %v6501_v0  ;;  %v5757_v45 = vadd.f32 %v9853_v37, %v5160_v8  ;;  %7360 = vmatmul.msk.f32.gmra.mxu3 %vm1085_vm2, %v4054_v54  ;;  %7553 = vmatmul.msk.f32.gmra.mxu1 %vm1085_vm2, %v5298_v51  ;;  %v2771_v37 = vadd.f32 %v9613_v17, %v2043_v28  ;;  %v11558_v0 = vld [vmem:[#allocation276_spill] sm:$0xff] }
 0x76d   : > { %v2774_v8 = vadd.f32 %v11558_v0, %v2052_v56  ;;  %v2049_v28 = vadd.f32 %v11562_v27, %v11561_v31  ;;  %v11579_v31 = vld [vmem:[#allocation345_spill] sm:$0xff] }
 0x76e   : > { %6607 = vst.msk [vmem:[#allocation3 + $0x8] sm:$0xff] %vm6605_vm3, %v6570_v62  ;;  %v6354_v49 = vadd.f32 %v9673_v3, %v5757_v45  ;;  %v11551_v3 = vld [vmem:[#allocation120_spill] sm:$0xff]  ;;  %v11559_v62 = vld [vmem:[#allocation122_spill] sm:$0xff] }
 0x76f   : > { %v4359_v5 = vpop.f32.mrf.mxu3  ;;  %v3369_v4 = vadd.f32 %v11551_v3, %v2771_v37  ;;  %v3370_v45 = vadd.f32 %v11559_v62, %v2772_v24  ;;  %v4057_v37 = vld [vmem:[#allocation2 + $0x12a] sm:$0xff] }
 0x770   : > { %v6430_v36 = vadd.f32 %v10316_v6, %v6354_v49  ;;  %v11560_v49 = vld [vmem:[#allocation195_spill] sm:$0xff]  ;;  %v11576_v62 = vld [vmem:[#allocation178_spill] sm:$0xff] }
 0x771   : > { %v3966_v44 = vadd.f32 %v11554_v39, %v3369_v4  ;;  %v11568_v4 = vld [vmem:[#allocation337_spill] sm:$0xff]  ;;  %v11570_v39 = vld [vmem:[#allocation91_spill] sm:$0xff] }
 0x772   : > { %v6502_v35 = vmax.f32 %v6430_v36, 0.0 }
 0x773   : > { %v4563_v1 = vadd.f32 %v4359_v5, %v3966_v44  ;;  %v11565_v5 = vld [vmem:[#allocation14_spill] sm:$0xff] }
 0x774   : > { %v6571_v46 = vmax.f32 %v6499_v26, %v6502_v35  ;;  %7361 = vmatmul.msk.f32.gmra.mxu3 %vm1085_vm2, %v4055_v30  ;;  %v11563_v26 = vld [vmem:[#allocation128_spill] sm:$0xff]  ;;  %v11564_v30 = vld [vmem:[#allocation174_spill] sm:$0xff] }
 0x775   : > { %v6642_v41 = vld [vmem:[#allocation3] ss:$2 sm:$0xff]  ;;  %v6690_v23 = vld [vmem:[#allocation3 + $0x1] ss:$2 sm:$0xff]  ;;  %v5161_v36 = vadd.f32 %v11560_v49, %v4563_v1  ;;  %v3372_v35 = vadd.f32 %v11563_v26, %v2774_v8  ;;  %v11574_v1 = vld [vmem:[#allocation198_spill] sm:$0xff] }
 0x776   : > { %v6737_v14 = vmax.f32 %v6642_v41, %v6690_v23  ;;  %6608 = vst.msk [vmem:[#allocation3 + $0x10] sm:$0xff] %vm6605_vm3, %v6571_v46  ;;  %v2055_v46 = vadd.f32 %v11565_v5, %v11564_v30  ;;  %v11566_v41 = vld [vmem:[#allocation273_spill] sm:$0xff]  ;;  %v11575_v8 = vld [vmem:[#allocation206_spill] sm:$0xff] }
 0x777   : > { %v4362_v17 = vpop.f32.mrf.mxu3  ;;  %v2773_v23 = vadd.f32 %v11566_v41, %v2049_v28  ;;  %v3969_v44 = vadd.f32 %v11570_v39, %v3372_v35  ;;  %v4058_v49 = vld [vmem:[#allocation2 + $0x132] sm:$0xff]  ;;  %v11585_v39 = vld [vmem:[#allocation289_spill] sm:$0xff] }
 0x778   : > { %v6761_v52 = vpack.c.bf16 %v6737_v14, %v6737_v14  ;;  %v11567_v14 = vld [vmem:[#allocation87_spill] sm:$0xff]  ;;  %v2775_v15 = vadd.f32 %v11569_v33, %v2055_v46  ;;  %v11580_v28 = vld [vmem:[#allocation282_spill] sm:$0xff]  ;;  %v11582_v46 = vld [vmem:[#allocation297_spill] sm:$0xff] }
 0x779   : > { %v3967_v3 = vadd.f32 %v11567_v14, %v3370_v45  ;;  %v3371_v59 = vadd.f32 %v11571_v2, %v2773_v23  ;;  %v11577_v45 = vld [vmem:[#allocation15_spill] sm:$0xff]  ;;  %v11583_v23 = vld [vmem:[#allocation93_spill] sm:$0xff]  ;;  %v11584_v33 = vld [vmem:[#allocation134_spill] sm:$0xff] }
 0x77a   : > { %6786 = vst.msk [vmem:[%s10369_s17] sm:$0xf] %vm6785_vm4, %v6761_v52  ;;  %v5758_v52 = vadd.f32 %v11568_v4, %v5161_v36  ;;  %v11578_v36 = vld [vmem:[#allocation89_spill] sm:$0xff] }
 0x77b   : > { %v4564_v19 = vadd.f32 %v4362_v17, %v3967_v3  ;;  %v3968_v17 = vadd.f32 %v11578_v36, %v3371_v59 }
 0x77c   : > { %7362 = vmatmul.msk.f32.gmra.mxu3 %vm1085_vm2, %v4056_v40  ;;  %v6355_v24 = vadd.f32 %v11572_v11, %v5758_v52 }
 0x77d   : > { %v6644_v50 = vld [vmem:[#allocation3 + $0x10] ss:$2 sm:$0xf]  ;;  %v6692_v29 = vld [vmem:[#allocation3 + $0x11] ss:$2 sm:$0xf]  ;;  %v5162_v0 = vadd.f32 %v11574_v1, %v4564_v19 }
 0x77e   : > { %v6738_v54 = vmax.f32 %v6644_v50, %v6692_v29  ;;  %v11573_v50 = vld [vmem:[#allocation131_spill] sm:$0xff]  ;;  %v6431_v35 = vadd.f32 %v10316_v6, %v6355_v24  ;;  %v4059_v24 = vld [vmem:[#allocation2 + $0x142] sm:$0xff] }
 0x77f   : > { %v4365_v51 = vpop.f32.mrf.mxu3  ;;  %v3373_v29 = vadd.f32 %v11573_v50, %v2775_v15  ;;  %v11588_v50 = vld [vmem:[#allocation348_spill] sm:$0xff] }
 0x780   : > { %v6762_v32 = vpack.c.bf16 %v6738_v54, %v6738_v54  ;;  %v4565_v5 = vadd.f32 %v4365_v51, %v3968_v17  ;;  %v6503_v19 = vmax.f32 %v6431_v35, 0.0  ;;  %v11593_v35 = vld [vmem:[#allocation212_spill] sm:$0xff] }
 0x781   : > { %v3970_v14 = vadd.f32 %v11583_v23, %v3373_v29 }
 0x782   : > { %6788 = vst.msk [vmem:[%s10369_s17 + $0x4] sm:$0x3] %vm6787_vm5, %v6762_v32  ;;  %v2058_v32 = vadd.f32 %v11577_v45, %v11576_v62  ;;  %v11591_v45 = vld [vmem:[#allocation95_spill] sm:$0xff] }
 0x784   : > { %7363 = vmatmul.msk.f32.gmra.mxu3 %vm1085_vm2, %v4057_v37  ;;  %v2776_v26 = vadd.f32 %v11580_v28, %v2058_v32  ;;  %v11581_v37 = vld [vmem:[#allocation339_spill] sm:$0xff] }
 0x785   : > { %v5759_v30 = vadd.f32 %v11581_v37, %v5162_v0  ;;  %v11589_v0 = vld [vmem:[#allocation342_spill] sm:$0xff] }
 0x786   : > { %v3374_v15 = vadd.f32 %v11584_v33, %v2776_v26  ;;  %v11596_v33 = vld [vmem:[#allocation18_spill] sm:$0xff] }
 0x787   : > { %v4368_v40 = vpop.f32.mrf.mxu3 }
 0x788   : > { %v4566_v56 = vadd.f32 %v4368_v40, %v3969_v44  ;;  %v6356_v44 = vadd.f32 %v11585_v39, %v5759_v30  ;;  %v11586_v40 = vld [vmem:[#allocation202_spill] sm:$0xff]  ;;  %v3971_v32 = vadd.f32 %v11591_v45, %v3374_v15  ;;  %v11597_v15 = vld [vmem:[#allocation16_spill] sm:$0xff]  ;;  %v11602_v45 = vld [vmem:[#allocation97_spill] sm:$0xff] }
 0x789   : > { %v5163_v2 = vadd.f32 %v11586_v40, %v4565_v5  ;;  %v4060_v30 = vld [vmem:[#allocation2 + $0x14a] sm:$0xff]  ;;  %v11598_v40 = vld [vmem:[#allocation284_spill] sm:$0xff] }
 0x78a   : > { %v5164_v54 = vadd.f32 %v11575_v8, %v4566_v56  ;;  %v11587_v56 = vld [vmem:[#allocation209_spill] sm:$0xff]  ;;  %v6432_v29 = vadd.f32 %v10316_v6, %v6356_v44 }
 0x78b   : > { %v5760_v8 = vadd.f32 %v11589_v0, %v5163_v2 }
 0x78c   : > { %v5761_v27 = vadd.f32 %v11579_v31, %v5164_v54  ;;  %7364 = vmatmul.msk.f32.gmra.mxu3 %vm1085_vm2, %v4058_v49  ;;  %v11590_v54 = vld [vmem:[#allocation301_spill] sm:$0xff]  ;;  %v6504_v31 = vmax.f32 %v6432_v29, 0.0 }
 0x78e   : > { %v6358_v41 = vadd.f32 %v11582_v46, %v5761_v27  ;;  %v11592_v27 = vld [vmem:[#allocation293_spill] sm:$0xff]  ;;  %v11594_v46 = vld [vmem:[#allocation351_spill] sm:$0xff] }
 0x78f   : > { %v4371_v3 = vpop.f32.mrf.mxu3  ;;  %v6357_v28 = vadd.f32 %v11592_v27, %v5760_v8  ;;  %v11600_v8 = vld [vmem:[#allocation20_spill] sm:$0xff] }
 0x790   : > { %v6434_v4 = vadd.f32 %v10316_v6, %v6358_v41  ;;  %v4567_v52 = vadd.f32 %v4371_v3, %v3970_v14  ;;  %v11595_v14 = vld [vmem:[#allocation305_spill] sm:$0xff]  ;;  %v11605_v27 = vld [vmem:[#allocation288_spill] sm:$0xff] }
 0x791   : > { %v6433_v23 = vadd.f32 %v10316_v6, %v6357_v28 }
 0x792   : > { %v6506_v59 = vmax.f32 %v6434_v4, 0.0  ;;  %v5165_v11 = vadd.f32 %v11587_v56, %v4567_v52 }
 0x793   : > { %v6505_v39 = vmax.f32 %v6433_v23, 0.0  ;;  %v11607_v23 = vld [vmem:[#allocation142_spill] sm:$0xff] }
 0x794   : > { %v6572_v51 = vmax.f32 %v6503_v19, %v6506_v59  ;;  %v5762_v1 = vadd.f32 %v11588_v50, %v5165_v11  ;;  %7365 = vmatmul.msk.f32.gmra.mxu3 %vm1085_vm2, %v4059_v24  ;;  %v2061_v19 = vadd.f32 %v11597_v15, %v11596_v33  ;;  %v4061_v59 = vld [vmem:[#allocation2 + $0x152] sm:$0xff] }
 0x795   : > { %v11599_v50 = vld [vmem:[#allocation138_spill] sm:$0xff] }
 0x796   : > { %6609 = vst.msk [vmem:[#allocation3 + $0x18] sm:$0xff] %vm6605_vm3, %v6572_v51  ;;  %v6359_v62 = vadd.f32 %v11590_v54, %v5762_v1  ;;  %v2777_v2 = vadd.f32 %v11598_v40, %v2061_v19  ;;  %v11601_v54 = vld [vmem:[#allocation17_spill] sm:$0xff]  ;;  %v11609_v15 = vld [vmem:[#allocation22_spill] sm:$0xff]  ;;  %v11610_v19 = vld [vmem:[#allocation19_spill] sm:$0xff] }
 0x797   : > { %v4374_v49 = vpop.f32.mrf.mxu3 }
 0x798   : > { %v6435_v36 = vadd.f32 %v10316_v6, %v6359_v62  ;;  %v4568_v17 = vadd.f32 %v4374_v49, %v3971_v32  ;;  %v3375_v1 = vadd.f32 %v11599_v50, %v2777_v2  ;;  %v2064_v62 = vadd.f32 %v11601_v54, %v11600_v8  ;;  %v4062_v49 = vld [vmem:[#allocation2 + $0x162] sm:$0xff]  ;;  %v4063_v2 = vld [vmem:[#allocation2 + $0x16a] sm:$0xff] }
 0x799   : > { %v11617_v8 = vld [vmem:[#allocation300_spill] sm:$0xff] }
 0x79a   : > { %v6507_v26 = vmax.f32 %v6435_v36, 0.0  ;;  %v5166_v37 = vadd.f32 %v11593_v35, %v4568_v17  ;;  %v3972_v32 = vadd.f32 %v11602_v45, %v3375_v1  ;;  %v11603_v36 = vld [vmem:[#allocation24_spill] sm:$0xff]  ;;  %v11604_v17 = vld [vmem:[#allocation21_spill] sm:$0xff]  ;;  %v2778_v28 = vadd.f32 %v11605_v27, %v2064_v62  ;;  %v11618_v45 = vld [vmem:[#allocation102_spill] sm:$0xff] }
 0x79b   : > { %v11616_v1 = vld [vmem:[#allocation353_spill] sm:$0xff]  ;;  %v11620_v27 = vld [vmem:[#allocation308_spill] sm:$0xff] }
 0x79c   : > { %v6573_v5 = vmax.f32 %v6504_v31, %v6507_v26  ;;  %v5763_v41 = vadd.f32 %v11594_v46, %v5166_v37  ;;  %7366 = vmatmul.msk.f32.gmra.mxu3 %vm1085_vm2, %v4060_v30  ;;  %v2070_v31 = vadd.f32 %v11604_v17, %v11603_v36  ;;  %v11606_v30 = vld [vmem:[#allocation296_spill] sm:$0xff]  ;;  %v11619_v36 = vld [vmem:[#allocation145_spill] sm:$0xff] }
 0x79e   : > { %6610 = vst.msk [vmem:[#allocation3 + $0x20] sm:$0xff] %vm6605_vm3, %v6573_v5  ;;  %v6360_v3 = vadd.f32 %v11595_v14, %v5763_v41  ;;  %v2780_v5 = vadd.f32 %v11606_v30, %v2070_v31  ;;  %v3376_v14 = vadd.f32 %v11607_v23, %v2778_v28  ;;  %v11624_v23 = vld [vmem:[#allocation28_spill] sm:$0xff] }
 0x79f   : > { %v4377_v4 = vpop.f32.mrf.mxu3 }
 0x7a0   : > { %v6436_v52 = vadd.f32 %v10316_v6, %v6360_v3  ;;  %v4569_v37 = vadd.f32 %v4377_v4, %v3972_v32 }
 0x7a2   : > { %v6508_v44 = vmax.f32 %v6436_v52, 0.0  ;;  %v11608_v52 = vld [vmem:[#allocation215_spill] sm:$0xff] }
 0x7a3   : > { %v5167_v33 = vadd.f32 %v11608_v52, %v4569_v37  ;;  %v11622_v37 = vld [vmem:[#allocation220_spill] sm:$0xff]  ;;  %v4064_v52 = vld [vmem:[#allocation2 + $0x172] sm:$0xff] }
 0x7a4   : > { %v6574_v56 = vmax.f32 %v6505_v39, %v6508_v44  ;;  %7367 = vmatmul.msk.f32.gmra.mxu3 %vm1085_vm2, %v4061_v59  ;;  %v2067_v39 = vadd.f32 %v11610_v19, %v11609_v15  ;;  %v11611_v44 = vld [vmem:[#allocation149_spill] sm:$0xff]  ;;  %v11612_v59 = vld [vmem:[#allocation26_spill] sm:$0xff] }
 0x7a5   : > { %v6646_v11 = vld [vmem:[#allocation3 + $0x18] ss:$2 sm:$0xff]  ;;  %v6694_v24 = vld [vmem:[#allocation3 + $0x19] ss:$2 sm:$0xff]  ;;  %v3378_v40 = vadd.f32 %v11611_v44, %v2780_v5  ;;  %v11623_v5 = vld [vmem:[#allocation226_spill] sm:$0xff] }
 0x7a6   : > { %v6739_v51 = vmax.f32 %v6646_v11, %v6694_v24  ;;  %6611 = vst.msk [vmem:[#allocation3 + $0x28] sm:$0xff] %vm6605_vm3, %v6574_v56  ;;  %v11613_v56 = vld [vmem:[#allocation23_spill] sm:$0xff]  ;;  %v11614_v11 = vld [vmem:[#allocation292_spill] sm:$0xff]  ;;  %v11627_v15 = vld [vmem:[#allocation362_spill] sm:$0xff] }
 0x7a7   : > { %v4380_v29 = vpop.f32.mrf.mxu3  ;;  %v2073_v4 = vadd.f32 %v11613_v56, %v11612_v59  ;;  %v2779_v24 = vadd.f32 %v11614_v11, %v2067_v39  ;;  %v3975_v32 = vadd.f32 %v11618_v45, %v3378_v40  ;;  %v11628_v39 = vld [vmem:[#allocation303_spill] sm:$0xff]  ;;  %v11633_v45 = vld [vmem:[#allocation312_spill] sm:$0xff] }
 0x7a8   : > { %v6763_v0 = vpack.c.bf16 %v6739_v51, %v6739_v51  ;;  %v11615_v51 = vld [vmem:[#allocation98_spill] sm:$0xff] }
 0x7a9   : > { %v3973_v50 = vadd.f32 %v11615_v51, %v3376_v14  ;;  %v2781_v54 = vadd.f32 %v11617_v8, %v2073_v4  ;;  %v3377_v17 = vadd.f32 %v11619_v36, %v2779_v24  ;;  %v11625_v14 = vld [vmem:[#allocation25_spill] sm:$0xff]  ;;  %v11630_v4 = vld [vmem:[#allocation320_spill] sm:$0xff] }
 0x7aa   : > { %6789 = vst.msk [vmem:[%s10369_s17 + $0x8] sm:$0xf] %vm6785_vm4, %v6763_v0  ;;  %v5764_v0 = vadd.f32 %v11616_v1, %v5167_v33  ;;  %v11626_v33 = vld [vmem:[#allocation100_spill] sm:$0xff]  ;;  %v11632_v8 = vld [vmem:[#allocation157_spill] sm:$0xff] }
 0x7ab   : > { %v4570_v62 = vadd.f32 %v4380_v29, %v3973_v50  ;;  %v3974_v29 = vadd.f32 %v11626_v33, %v3377_v17  ;;  %v11631_v24 = vld [vmem:[#allocation104_spill] sm:$0xff] }
 0x7ac   : > { %7368 = vmatmul.msk.f32.gmra.mxu3 %vm1085_vm2, %v4062_v49  ;;  %v6361_v28 = vadd.f32 %v11620_v27, %v5764_v0 }
 0x7ad   : > { %v6648_v26 = vld [vmem:[#allocation3 + $0x28] ss:$2 sm:$0xf]  ;;  %v6696_v35 = vld [vmem:[#allocation3 + $0x29] ss:$2 sm:$0xf]  ;;  %v5168_v30 = vadd.f32 %v11622_v37, %v4570_v62 }
 0x7ae   : > { %v6740_v46 = vmax.f32 %v6648_v26, %v6696_v35  ;;  %v11621_v26 = vld [vmem:[#allocation153_spill] sm:$0xff]  ;;  %v6437_v40 = vadd.f32 %v10316_v6, %v6361_v28 }
 0x7af   : > { %v4383_v41 = vpop.f32.mrf.mxu3  ;;  %v3379_v35 = vadd.f32 %v11621_v26, %v2781_v54  ;;  %v4065_v28 = vld [vmem:[#allocation2 + $0x182] sm:$0xff] }
 0x7b0   : > { %v6764_v3 = vpack.c.bf16 %v6740_v46, %v6740_v46  ;;  %v4571_v56 = vadd.f32 %v4383_v41, %v3974_v29  ;;  %v6509_v62 = vmax.f32 %v6437_v40, 0.0  ;;  %v11636_v26 = vld [vmem:[#allocation365_spill] sm:$0xff]  ;;  %v11641_v40 = vld [vmem:[#allocation234_spill] sm:$0xff] }
 0x7b1   : > { %v3976_v51 = vadd.f32 %v11631_v24, %v3379_v35 }
 0x7b2   : > { %6790 = vst.msk [vmem:[%s10369_s17 + $0xc] sm:$0x3] %vm6787_vm5, %v6764_v3  ;;  %v2076_v3 = vadd.f32 %v11625_v14, %v11624_v23  ;;  %v11639_v14 = vld [vmem:[#allocation106_spill] sm:$0xff] }
 0x7b4   : > { %7369 = vmatmul.msk.f32.gmra.mxu3 %vm1085_vm2, %v4063_v2  ;;  %v2782_v44 = vadd.f32 %v11628_v39, %v2076_v3  ;;  %v11629_v2 = vld [vmem:[#allocation356_spill] sm:$0xff] }
 0x7b5   : > { %v5765_v59 = vadd.f32 %v11629_v2, %v5168_v30  ;;  %v11637_v30 = vld [vmem:[#allocation359_spill] sm:$0xff] }
 0x7b6   : > { %v3380_v54 = vadd.f32 %v11632_v8, %v2782_v44  ;;  %v11644_v8 = vld [vmem:[#allocation30_spill] sm:$0xff] }
 0x7b7   : > { %v4386_v49 = vpop.f32.mrf.mxu3 }
 0x7b8   : > { %v4572_v31 = vadd.f32 %v4386_v49, %v3975_v32  ;;  %v6362_v32 = vadd.f32 %v11633_v45, %v5765_v59  ;;  %v11634_v49 = vld [vmem:[#allocation223_spill] sm:$0xff]  ;;  %v3977_v3 = vadd.f32 %v11639_v14, %v3380_v54  ;;  %v4066_v59 = vld [vmem:[#allocation2 + $0x18a] sm:$0xff]  ;;  %v11650_v14 = vld [vmem:[#allocation108_spill] sm:$0xff] }
 0x7b9   : > { %v5169_v36 = vadd.f32 %v11634_v49, %v4571_v56  ;;  %v11645_v54 = vld [vmem:[#allocation27_spill] sm:$0xff] }
 0x7ba   : > { %v5170_v46 = vadd.f32 %v11623_v5, %v4572_v31  ;;  %v11635_v31 = vld [vmem:[#allocation229_spill] sm:$0xff]  ;;  %v6438_v35 = vadd.f32 %v10316_v6, %v6362_v32  ;;  %v11646_v49 = vld [vmem:[#allocation307_spill] sm:$0xff] }
 0x7bb   : > { %v5766_v5 = vadd.f32 %v11637_v30, %v5169_v36 }
 0x7bc   : > { %v5767_v19 = vadd.f32 %v11627_v15, %v5170_v46  ;;  %7370 = vmatmul.msk.f32.gmra.mxu3 %vm1085_vm2, %v4064_v52  ;;  %v11638_v46 = vld [vmem:[#allocation324_spill] sm:$0xff]  ;;  %v6510_v15 = vmax.f32 %v6438_v35, 0.0 }
 0x7be   : > { %v6364_v11 = vadd.f32 %v11630_v4, %v5767_v19  ;;  %v11640_v19 = vld [vmem:[#allocation316_spill] sm:$0xff]  ;;  %v11642_v4 = vld [vmem:[#allocation369_spill] sm:$0xff] }
 0x7bf   : > { %v4389_v50 = vpop.f32.mrf.mxu3  ;;  %v6363_v39 = vadd.f32 %v11640_v19, %v5766_v5  ;;  %v11648_v5 = vld [vmem:[#allocation32_spill] sm:$0xff]  ;;  %v11653_v19 = vld [vmem:[#allocation311_spill] sm:$0xff] }
 0x7c0   : > { %v6440_v1 = vadd.f32 %v10316_v6, %v6364_v11  ;;  %v4573_v0 = vadd.f32 %v4389_v50, %v3976_v51  ;;  %v11643_v51 = vld [vmem:[#allocation326_spill] sm:$0xff] }
 0x7c1   : > { %v6439_v24 = vadd.f32 %v10316_v6, %v6363_v39 }
 0x7c2   : > { %v6512_v17 = vmax.f32 %v6440_v1, 0.0  ;;  %v5171_v27 = vadd.f32 %v11635_v31, %v4573_v0 }
 0x7c3   : > { %v6511_v45 = vmax.f32 %v6439_v24, 0.0  ;;  %v11655_v24 = vld [vmem:[#allocation165_spill] sm:$0xff] }
 0x7c4   : > { %v6575_v41 = vmax.f32 %v6509_v62, %v6512_v17  ;;  %v5768_v37 = vadd.f32 %v11636_v26, %v5171_v27  ;;  %7371 = vmatmul.msk.f32.gmra.mxu3 %vm1085_vm2, %v4065_v28  ;;  %v2079_v62 = vadd.f32 %v11645_v54, %v11644_v8  ;;  %v4067_v17 = vld [vmem:[#allocation2 + $0x192] sm:$0xff]  ;;  %v11647_v26 = vld [vmem:[#allocation161_spill] sm:$0xff] }
 0x7c5   : > { %v11657_v54 = vld [vmem:[#allocation34_spill] sm:$0xff] }
 0x7c6   : > { %6612 = vst.msk [vmem:[#allocation3 + $0x30] sm:$0xff] %vm6605_vm3, %v6575_v41  ;;  %v6365_v23 = vadd.f32 %v11638_v46, %v5768_v37  ;;  %v2783_v36 = vadd.f32 %v11646_v49, %v2079_v62  ;;  %v11649_v46 = vld [vmem:[#allocation29_spill] sm:$0xff]  ;;  %v11658_v62 = vld [vmem:[#allocation31_spill] sm:$0xff] }
 0x7c7   : > { %v4392_v52 = vpop.f32.mrf.mxu3 }
 0x7c8   : > { %v6441_v33 = vadd.f32 %v10316_v6, %v6365_v23  ;;  %v4574_v29 = vadd.f32 %v4392_v52, %v3977_v3  ;;  %v3381_v37 = vadd.f32 %v11647_v26, %v2783_v36  ;;  %v2082_v23 = vadd.f32 %v11649_v46, %v11648_v5  ;;  %v4068_v52 = vld [vmem:[#allocation2 + $0x1a2] sm:$0xff]  ;;  %v4069_v36 = vld [vmem:[#allocation2 + $0x1aa] sm:$0xff] }
 0x7ca   : > { %v6513_v44 = vmax.f32 %v6441_v33, 0.0  ;;  %v5172_v2 = vadd.f32 %v11641_v40, %v4574_v29  ;;  %v3978_v3 = vadd.f32 %v11650_v14, %v3381_v37  ;;  %v11651_v33 = vld [vmem:[#allocation36_spill] sm:$0xff]  ;;  %v11652_v29 = vld [vmem:[#allocation33_spill] sm:$0xff]  ;;  %v2784_v39 = vadd.f32 %v11653_v19, %v2082_v23 }
 0x7cb   : > { %v11665_v23 = vld [vmem:[#allocation116_spill] sm:$0xff] }
 0x7cc   : > { %v6576_v56 = vmax.f32 %v6510_v15, %v6513_v44  ;;  %v5769_v11 = vadd.f32 %v11642_v4, %v5172_v2  ;;  %7372 = vmatmul.msk.f32.gmra.mxu3 %vm1085_vm2, %v4066_v59  ;;  %v2088_v15 = vadd.f32 %v11652_v29, %v11651_v33  ;;  %v11654_v59 = vld [vmem:[#allocation319_spill] sm:$0xff] }
 0x7ce   : > { %6613 = vst.msk [vmem:[#allocation3 + $0x38] sm:$0xff] %vm6605_vm3, %v6576_v56  ;;  %v6366_v50 = vadd.f32 %v11643_v51, %v5769_v11  ;;  %v2786_v56 = vadd.f32 %v11654_v59, %v2088_v15  ;;  %v3382_v51 = vadd.f32 %v11655_v24, %v2784_v39  ;;  %v11667_v15 = vld [vmem:[#allocation329_spill] sm:$0xff]  ;;  %v11670_v59 = vld [vmem:[#allocation248_spill] sm:$0xff] }
 0x7cf   : > { %v4395_v1 = vpop.f32.mrf.mxu3  ;;  %v11668_v39 = vld [vmem:[#allocation177_spill] sm:$0xff] }
 0x7d0   : > { %v6442_v0 = vadd.f32 %v10316_v6, %v6366_v50  ;;  %v4575_v2 = vadd.f32 %v4395_v1, %v3978_v3  ;;  %v11672_v24 = vld [vmem:[#allocation37_spill] sm:$0xff] }
 0x7d2   : > { %v6514_v32 = vmax.f32 %v6442_v0, 0.0  ;;  %v11656_v0 = vld [vmem:[#allocation237_spill] sm:$0xff] }
 0x7d3   : > { %v5173_v8 = vadd.f32 %v11656_v0, %v4575_v2 }
 0x7d4   : > { %v6577_v31 = vmax.f32 %v6511_v45, %v6514_v32  ;;  %7373 = vmatmul.msk.f32.gmra.mxu3 %vm1085_vm2, %v4067_v17  ;;  %v2085_v45 = vadd.f32 %v11658_v62, %v11657_v54  ;;  %v11659_v32 = vld [vmem:[#allocation173_spill] sm:$0xff]  ;;  %v11660_v17 = vld [vmem:[#allocation38_spill] sm:$0xff] }
 0x7d5   : > { %v6650_v27 = vld [vmem:[#allocation3 + $0x30] ss:$2 sm:$0xff]  ;;  %v6698_v28 = vld [vmem:[#allocation3 + $0x31] ss:$2 sm:$0xff]  ;;  %v3384_v49 = vadd.f32 %v11659_v32, %v2786_v56  ;;  %v5770_v37 = vadd.f32 %v9974_v12, %v5173_v8  ;;  %v11674_v8 = vld [vmem:[#allocation325_spill] sm:$0xff] }
 0x7d6   : > { %v6741_v41 = vmax.f32 %v6650_v27, %v6698_v28  ;;  %6614 = vst.msk [vmem:[#allocation3 + $0x40] sm:$0xff] %vm6605_vm3, %v6577_v31  ;;  %v11661_v31 = vld [vmem:[#allocation35_spill] sm:$0xff] }
 0x7d7   : > { %v4398_v35 = vpop.f32.mrf.mxu3  ;;  %v2091_v1 = vadd.f32 %v11661_v31, %v11660_v17  ;;  %v11662_v27 = vld [vmem:[#allocation315_spill] sm:$0xff]  ;;  %v3981_v14 = vadd.f32 %v11665_v23, %v3384_v49  ;;  %v6367_v19 = vadd.f32 %v11667_v15, %v5770_v37  ;;  %v11677_v31 = vld [vmem:[#allocation118_spill] sm:$0xff] }
 0x7d8   : > { %v6765_v30 = vpack.c.bf16 %v6741_v41, %v6741_v41  ;;  %v2785_v28 = vadd.f32 %v11662_v27, %v2085_v45  ;;  %v11663_v41 = vld [vmem:[#allocation110_spill] sm:$0xff] }
 0x7d9   : > { %v3979_v26 = vadd.f32 %v11663_v41, %v3382_v51  ;;  %v4070_v51 = vld [vmem:[#allocation2 + $0x1b2] sm:$0xff]  ;;  %v6443_v62 = vadd.f32 %v10316_v6, %v6367_v19 }
 0x7da   : > { %6791 = vst.msk [vmem:[%s10369_s17 + $0x10] sm:$0xf] %vm6785_vm4, %v6765_v30  ;;  %v11664_v30 = vld [vmem:[#allocation322_spill] sm:$0xff] }
 0x7db   : > { %v2787_v5 = vadd.f32 %v11664_v30, %v2091_v1  ;;  %v4576_v46 = vadd.f32 %v4398_v35, %v3979_v26  ;;  %v11675_v45 = vld [vmem:[#allocation374_spill] sm:$0xff]  ;;  %v11678_v26 = vld [vmem:[#allocation180_spill] sm:$0xff]  ;;  %v11679_v30 = vld [vmem:[#allocation331_spill] sm:$0xff] }
 0x7dc   : > { %7374 = vmatmul.msk.f32.gmra.mxu3 %vm1085_vm2, %v4068_v52  ;;  %v11666_v52 = vld [vmem:[#allocation169_spill] sm:$0xff] }
 0x7dd   : > { %v6652_v44 = vld [vmem:[#allocation3 + $0x40] ss:$2 sm:$0xf]  ;;  %v6700_v40 = vld [vmem:[#allocation3 + $0x41] ss:$2 sm:$0xf]  ;;  %v3383_v33 = vadd.f32 %v11666_v52, %v2785_v28 }
 0x7de   : > { %v6742_v4 = vmax.f32 %v6652_v44, %v6700_v40  ;;  %v3385_v44 = vadd.f32 %v11668_v39, %v2787_v5  ;;  %v11669_v40 = vld [vmem:[#allocation240_spill] sm:$0xff] }
 0x7df   : > { %v4401_v11 = vpop.f32.mrf.mxu3  ;;  %v5174_v2 = vadd.f32 %v11669_v40, %v4576_v46  ;;  %v11680_v46 = vld [vmem:[#allocation243_spill] sm:$0xff]  ;;  %v11682_v39 = vld [vmem:[#allocation340_spill] sm:$0xff]  ;;  %v11683_v40 = vld [vmem:[#allocation121_spill] sm:$0xff] }
 0x7e0   : > { %v6766_v50 = vpack.c.bf16 %v6742_v4, %v6742_v4  ;;  %v11671_v4 = vld [vmem:[#allocation40_spill] sm:$0xff]  ;;  %v3982_v1 = vadd.f32 %v11677_v31, %v3385_v44 }
 0x7e1   : > { %v2094_v12 = vadd.f32 %v11672_v24, %v11671_v4  ;;  %v5771_v32 = vadd.f32 %v11675_v45, %v5174_v2 }
 0x7e2   : > { %6792 = vst.msk [vmem:[%s10369_s17 + $0x14] sm:$0x3] %vm6787_vm5, %v6766_v50  ;;  %v11673_v50 = vld [vmem:[#allocation113_spill] sm:$0xff] }
 0x7e3   : > { %v3980_v35 = vadd.f32 %v11673_v50, %v3383_v33  ;;  %v2788_v54 = vadd.f32 %v11674_v8, %v2094_v12  ;;  %v6368_v5 = vadd.f32 %v11679_v30, %v5771_v32  ;;  %v4071_v33 = vld [vmem:[#allocation2 + $0x1c2] sm:$0xff]  ;;  %v11685_v50 = vld [vmem:[#allocation254_spill] sm:$0xff] }
 0x7e4   : > { %7375 = vmatmul.msk.f32.gmra.mxu3 %vm1085_vm2, %v4069_v36  ;;  %v11676_v36 = vld [vmem:[#allocation336_spill] sm:$0xff]  ;;  %v11684_v12 = vld [vmem:[#allocation333_spill] sm:$0xff] }
 0x7e5   : > { %v4577_v49 = vadd.f32 %v4401_v11, %v3980_v35  ;;  %v3386_v37 = vadd.f32 %v11678_v26, %v2788_v54  ;;  %v6444_v15 = vadd.f32 %v10316_v6, %v6368_v5  ;;  %v11690_v5 = vld [vmem:[#allocation183_spill] sm:$0xff] }
 0x7e7   : > { %v4404_v3 = vpop.f32.mrf.mxu3  ;;  %v5175_v23 = vadd.f32 %v11680_v46, %v4577_v49  ;;  %v3983_v2 = vadd.f32 %v11683_v40, %v3386_v37  ;;  %v6516_v24 = vmax.f32 %v6444_v15, 0.0  ;;  %v4074_v15 = vld [vmem:[#allocation2 + $0x1e2] sm:$0xff]  ;;  %v11696_v40 = vld [vmem:[#allocation330_spill] sm:$0xff] }
 0x7e8   : > { %v4578_v29 = vadd.f32 %v4404_v3, %v3981_v14  ;;  %v11681_v3 = vld [vmem:[#allocation251_spill] sm:$0xff] }
 0x7e9   : > { %v5772_v19 = vadd.f32 %v10001_v60, %v5175_v23 }
 0x7ea   : > { %v5176_v56 = vadd.f32 %v11670_v59, %v4578_v29 }
 0x7ec   : > { %v5773_v0 = vadd.f32 %v10012_v58, %v5176_v56  ;;  %7376 = vmatmul.msk.f32.gmra.mxu3 %vm1085_vm2, %v4070_v51  ;;  %v6515_v58 = vmax.f32 %v6443_v62, 0.0  ;;  %v6369_v51 = vadd.f32 %v11684_v12, %v5772_v19  ;;  %v11686_v62 = vld [vmem:[#allocation343_spill] sm:$0xff]  ;;  %v11694_v19 = vld [vmem:[#allocation48_spill] sm:$0xff] }
 0x7ee   : > { %v6370_v17 = vadd.f32 %v11676_v36, %v5773_v0  ;;  %v4072_v0 = vld [vmem:[#allocation2 + $0x1ca] sm:$0xff]  ;;  %v6445_v54 = vadd.f32 %v10316_v6, %v6369_v51 }
 0x7ef   : > { %v4407_v27 = vpop.f32.mrf.mxu3  ;;  %v11687_v36 = vld [vmem:[#allocation42_spill] sm:$0xff] }
 0x7f0   : > { %v6446_v28 = vadd.f32 %v10316_v6, %v6370_v17  ;;  %v4579_v41 = vadd.f32 %v4407_v27, %v3982_v1  ;;  %v11688_v17 = vld [vmem:[#allocation39_spill] sm:$0xff]  ;;  %v6517_v1 = vmax.f32 %v6445_v54, 0.0  ;;  %v11700_v54 = vld [vmem:[#allocation46_spill] sm:$0xff] }
 0x7f1   : > { %v2097_v31 = vadd.f32 %v11688_v17, %v11687_v36  ;;  %v4075_v17 = vld [vmem:[#allocation2 + $0x1ea] sm:$0xff] }
 0x7f2   : > { %v6518_v14 = vmax.f32 %v6446_v28, 0.0  ;;  %v5177_v52 = vadd.f32 %v11681_v3, %v4579_v41  ;;  %v11689_v28 = vld [vmem:[#allocation328_spill] sm:$0xff] }
 0x7f3   : > { %v2789_v41 = vadd.f32 %v11689_v28, %v2097_v31  ;;  %v11691_v3 = vld [vmem:[#allocation44_spill] sm:$0xff]  ;;  %v11703_v31 = vld [vmem:[#allocation50_spill] sm:$0xff] }
 0x7f4   : > { %v6578_v11 = vmax.f32 %v6515_v58, %v6518_v14  ;;  %v5774_v29 = vadd.f32 %v10025_v42, %v5177_v52  ;;  %7377 = vmatmul.msk.f32.gmra.mxu3 %vm1085_vm2, %v4071_v33  ;;  %v11692_v52 = vld [vmem:[#allocation41_spill] sm:$0xff] }
 0x7f5   : > { %v3387_v46 = vadd.f32 %v11690_v5, %v2789_v41  ;;  %v2100_v33 = vadd.f32 %v11692_v52, %v11691_v3  ;;  %v11706_v41 = vld [vmem:[#allocation127_spill] sm:$0xff]  ;;  %v11708_v5 = vld [vmem:[#allocation133_spill] sm:$0xff]  ;;  %v11709_v3 = vld [vmem:[#allocation188_spill] sm:$0xff] }
 0x7f6   : > { %6615 = vst.msk [vmem:[#allocation3 + $0x48] sm:$0xff] %vm6605_vm3, %v6578_v11  ;;  %v6371_v44 = vadd.f32 %v11682_v39, %v5774_v29  ;;  %v11693_v11 = vld [vmem:[#allocation124_spill] sm:$0xff]  ;;  %v11695_v39 = vld [vmem:[#allocation45_spill] sm:$0xff] }
 0x7f7   : > { %v4410_v59 = vpop.f32.mrf.mxu3  ;;  %v3984_v29 = vadd.f32 %v11693_v11, %v3387_v46  ;;  %v11710_v11 = vld [vmem:[#allocation346_spill] sm:$0xff] }
 0x7f8   : > { %v6447_v56 = vadd.f32 %v10316_v6, %v6371_v44  ;;  %v4580_v4 = vadd.f32 %v4410_v59, %v3983_v2  ;;  %v2106_v44 = vadd.f32 %v11695_v39, %v11694_v19  ;;  %v2790_v2 = vadd.f32 %v11696_v40, %v2100_v33  ;;  %v11712_v39 = vld [vmem:[#allocation262_spill] sm:$0xff]  ;;  %v11713_v40 = vld [vmem:[#allocation268_spill] sm:$0xff] }
 0x7fa   : > { %v6519_v42 = vmax.f32 %v6447_v56, 0.0  ;;  %v5178_v35 = vadd.f32 %v11685_v50, %v4580_v4  ;;  %v11698_v50 = vld [vmem:[#allocation186_spill] sm:$0xff] }
 0x7fc   : > { %v6579_v8 = vmax.f32 %v6516_v24, %v6519_v42  ;;  %v5775_v60 = vadd.f32 %v10036_v47, %v5178_v35  ;;  %7378 = vmatmul.msk.f32.gmra.mxu3 %vm1085_vm2, %v4072_v0  ;;  %v4073_v47 = vld [vmem:[#allocation2 + $0x1d2] sm:$0xff]  ;;  %v3388_v35 = vadd.f32 %v11698_v50, %v2790_v2 }
 0x7fd   : > { %v11697_v24 = vld [vmem:[#allocation334_spill] sm:$0xff] }
 0x7fe   : > { %6616 = vst.msk [vmem:[#allocation3 + $0x50] sm:$0xff] %vm6605_vm3, %v6579_v8  ;;  %v6372_v45 = vadd.f32 %v11686_v62, %v5775_v60  ;;  %v2792_v12 = vadd.f32 %v11697_v24, %v2106_v44  ;;  %v11699_v8 = vld [vmem:[#allocation257_spill] sm:$0xff]  ;;  %v11701_v62 = vld [vmem:[#allocation43_spill] sm:$0xff]  ;;  %v11716_v24 = vld [vmem:[#allocation130_spill] sm:$0xff] }
 0x7ff   : > { %v4413_v32 = vpop.f32.mrf.mxu3 }
 0x800   : > { %v6448_v49 = vadd.f32 %v10316_v6, %v6372_v45  ;;  %v4581_v4 = vadd.f32 %v4413_v32, %v3984_v29  ;;  %v2103_v45 = vadd.f32 %v11701_v62, %v11700_v54  ;;  %v11719_v62 = vld [vmem:[#allocation137_spill] sm:$0xff] }
 0x802   : > { %v6520_v27 = vmax.f32 %v6448_v49, 0.0  ;;  %v5179_v60 = vadd.f32 %v11699_v8, %v4581_v4  ;;  %v11702_v49 = vld [vmem:[#allocation190_spill] sm:$0xff] }
 0x803   : > { %v3390_v36 = vadd.f32 %v11702_v49, %v2792_v12  ;;  %v4076_v4 = vld [vmem:[#allocation2 + $0x1f2] sm:$0xff] }
 0x804   : > { %v6580_v26 = vmax.f32 %v6517_v1, %v6520_v27  ;;  %7379 = vmatmul.msk.f32.gmra.mxu3 %vm1085_vm2, %v4073_v47  ;;  %v11704_v1 = vld [vmem:[#allocation47_spill] sm:$0xff]  ;;  %v11705_v27 = vld [vmem:[#allocation332_spill] sm:$0xff]  ;;  %v3985_v47 = vadd.f32 %v11706_v41, %v3388_v35 }
 0x805   : > { %v6654_v37 = vld [vmem:[#allocation3 + $0x48] ss:$2 sm:$0xff]  ;;  %v6702_v58 = vld [vmem:[#allocation3 + $0x49] ss:$2 sm:$0xff]  ;;  %v2109_v32 = vadd.f32 %v11704_v1, %v11703_v31  ;;  %v2791_v28 = vadd.f32 %v11705_v27, %v2103_v45  ;;  %v3987_v46 = vadd.f32 %v11708_v5, %v3390_v36 }
 0x806   : > { %v6743_v30 = vmax.f32 %v6654_v37, %v6702_v58  ;;  %6617 = vst.msk [vmem:[#allocation3 + $0x58] sm:$0xff] %vm6605_vm3, %v6580_v26  ;;  %v5776_v26 = vadd.f32 %v10055_v55, %v5179_v60  ;;  %v11707_v37 = vld [vmem:[#allocation335_spill] sm:$0xff]  ;;  %v11718_v60 = vld [vmem:[#allocation357_spill] sm:$0xff]  ;;  %v11720_v31 = vld [vmem:[#allocation194_spill] sm:$0xff] }
 0x807   : > { %v4416_v23 = vpop.f32.mrf.mxu3  ;;  %v2793_v58 = vadd.f32 %v11707_v37, %v2109_v32  ;;  %v3389_v52 = vadd.f32 %v11709_v3, %v2791_v28  ;;  %v11721_v32 = vld [vmem:[#allocation350_spill] sm:$0xff]  ;;  %v11722_v28 = vld [vmem:[#allocation265_spill] sm:$0xff]  ;;  %v11725_v3 = vld [vmem:[#allocation140_spill] sm:$0xff] }
 0x808   : > { %v6767_v14 = vpack.c.bf16 %v6743_v30, %v6743_v30  ;;  %v4582_v30 = vadd.f32 %v4416_v23, %v3985_v47  ;;  %v6373_v29 = vadd.f32 %v11710_v11, %v5776_v26  ;;  %v11723_v26 = vld [vmem:[#allocation271_spill] sm:$0xff] }
 0x809   : > { %v3986_v23 = vadd.f32 %v11716_v24, %v3389_v52 }
 0x80a   : > { %6793 = vst.msk [vmem:[%s10369_s17 + $0x18] sm:$0xf] %vm6785_vm4, %v6767_v14  ;;  %v5180_v44 = vadd.f32 %v11712_v39, %v4582_v30  ;;  %v6449_v35 = vadd.f32 %v10316_v6, %v6373_v29 }
 0x80c   : > { %7380 = vmatmul.msk.f32.gmra.mxu3 %vm1085_vm2, %v4074_v15  ;;  %v11711_v15 = vld [vmem:[#allocation192_spill] sm:$0xff] }
 0x80d   : > { %v6656_v59 = vld [vmem:[#allocation3 + $0x58] ss:$2 sm:$0xf]  ;;  %v6704_v56 = vld [vmem:[#allocation3 + $0x59] ss:$2 sm:$0xf]  ;;  %v3391_v19 = vadd.f32 %v11711_v15, %v2793_v58 }
 0x80e   : > { %v6744_v51 = vmax.f32 %v6656_v59, %v6704_v56  ;;  %v11714_v59 = vld [vmem:[#allocation52_spill] sm:$0xff]  ;;  %v11715_v56 = vld [vmem:[#allocation49_spill] sm:$0xff] }
 0x80f   : > { %v4419_v42 = vpop.f32.mrf.mxu3  ;;  %v2112_v55 = vadd.f32 %v11715_v56, %v11714_v59  ;;  %v3988_v45 = vadd.f32 %v11719_v62, %v3391_v19  ;;  %v11726_v19 = vld [vmem:[#allocation354_spill] sm:$0xff] }
 0x810   : > { %v6768_v0 = vpack.c.bf16 %v6744_v51, %v6744_v51  ;;  %v11717_v51 = vld [vmem:[#allocation338_spill] sm:$0xff]  ;;  %v4583_v8 = vadd.f32 %v4419_v42, %v3986_v23 }
 0x811   : > { %v2794_v50 = vadd.f32 %v11717_v51, %v2112_v55  ;;  %v11728_v55 = vld [vmem:[#allocation364_spill] sm:$0xff]  ;;  %v11730_v51 = vld [vmem:[#allocation51_spill] sm:$0xff] }
 0x812   : > { %6794 = vst.msk [vmem:[%s10369_s17 + $0x1c] sm:$0x3] %vm6787_vm5, %v6768_v0  ;;  %v5777_v0 = vadd.f32 %v10069_v57, %v5180_v44  ;;  %v5181_v41 = vadd.f32 %v11722_v28, %v4583_v8  ;;  %v4077_v57 = vld [vmem:[#allocation2 + $0x202] sm:$0xff]  ;;  %v11727_v44 = vld [vmem:[#allocation275_spill] sm:$0xff] }
 0x813   : > { %v3392_v1 = vadd.f32 %v11720_v31, %v2794_v50  ;;  %v11731_v8 = vld [vmem:[#allocation341_spill] sm:$0xff]  ;;  %v11735_v28 = vld [vmem:[#allocation144_spill] sm:$0xff] }
 0x814   : > { %7381 = vmatmul.msk.f32.gmra.mxu3 %vm1085_vm2, %v4075_v17  ;;  %v6374_v27 = vadd.f32 %v11721_v32, %v5777_v0  ;;  %v5778_v5 = vadd.f32 %v10085_v38, %v5181_v41  ;;  %v11734_v32 = vld [vmem:[#allocation53_spill] sm:$0xff] }
 0x815   : > { %v3989_v52 = vadd.f32 %v11725_v3, %v3392_v1 }
 0x816   : > { %v6450_v30 = vadd.f32 %v10316_v6, %v6374_v27  ;;  %v6375_v39 = vadd.f32 %v11726_v19, %v5778_v5  ;;  %v11741_v19 = vld [vmem:[#allocation278_spill] sm:$0xff] }
 0x817   : > { %v4422_v14 = vpop.f32.mrf.mxu3 }
 0x818   : > { %v4584_v33 = vadd.f32 %v4422_v14, %v3987_v46  ;;  %v11724_v46 = vld [vmem:[#allocation360_spill] sm:$0xff]  ;;  %v6522_v15 = vmax.f32 %v6450_v30, 0.0  ;;  %v6451_v56 = vadd.f32 %v10316_v6, %v6375_v39 }
 0x81a   : > { %v5182_v2 = vadd.f32 %v11713_v40, %v4584_v33 }
 0x81c   : > { %v5779_v12 = vadd.f32 %v10096_v10, %v5182_v2  ;;  %7382 = vmatmul.msk.f32.gmra.mxu3 %vm1085_vm2, %v4076_v4  ;;  %v6521_v10 = vmax.f32 %v6449_v35, 0.0  ;;  %v4078_v2 = vld [vmem:[#allocation2 + $0x20a] sm:$0xff]  ;;  %v6523_v35 = vmax.f32 %v6451_v56, 0.0 }
 0x81d   : > { %v11745_v56 = vld [vmem:[#allocation62_spill] sm:$0xff] }
 0x81e   : > { %v6376_v54 = vadd.f32 %v11718_v60, %v5779_v12  ;;  %v11729_v12 = vld [vmem:[#allocation54_spill] sm:$0xff] }
 0x81f   : > { %v4425_v49 = vpop.f32.mrf.mxu3  ;;  %v2115_v50 = vadd.f32 %v11730_v51, %v11729_v12  ;;  %v11748_v12 = vld [vmem:[#allocation148_spill] sm:$0xff] }
 0x820   : > { %v6452_v36 = vadd.f32 %v10316_v6, %v6376_v54  ;;  %v4585_v17 = vadd.f32 %v4425_v49, %v3988_v45 }
 0x821   : > { %v2795_v60 = vadd.f32 %v11731_v8, %v2115_v50 }
 0x822   : > { %v6524_v47 = vmax.f32 %v6452_v36, 0.0  ;;  %v5183_v37 = vadd.f32 %v11723_v26, %v4585_v17  ;;  %v11732_v36 = vld [vmem:[#allocation197_spill] sm:$0xff]  ;;  %v11736_v26 = vld [vmem:[#allocation60_spill] sm:$0xff] }
 0x823   : > { %v3393_v17 = vadd.f32 %v11732_v36, %v2795_v60  ;;  %v11750_v60 = vld [vmem:[#allocation156_spill] sm:$0xff]  ;;  %v11752_v36 = vld [vmem:[#allocation367_spill] sm:$0xff] }
 0x824   : > { %v6581_v42 = vmax.f32 %v6521_v10, %v6524_v47  ;;  %v5780_v58 = vadd.f32 %v10114_v13, %v5183_v37  ;;  %7383 = vmatmul.msk.f32.gmra.mxu3 %vm1085_vm2, %v4077_v57  ;;  %v11733_v10 = vld [vmem:[#allocation56_spill] sm:$0xff]  ;;  %v11737_v37 = vld [vmem:[#allocation57_spill] sm:$0xff] }
 0x825   : > { %v2118_v27 = vadd.f32 %v11734_v32, %v11733_v10  ;;  %v3990_v41 = vadd.f32 %v11735_v28, %v3393_v17  ;;  %v4080_v47 = vld [vmem:[#allocation2 + $0x222] sm:$0xff]  ;;  %v2124_v57 = vadd.f32 %v11737_v37, %v11736_v26  ;;  %v11755_v28 = vld [vmem:[#allocation291_spill] sm:$0xff] }
 0x826   : > { %6618 = vst.msk [vmem:[#allocation3 + $0x60] sm:$0xff] %vm6605_vm3, %v6581_v42  ;;  %v6377_v14 = vadd.f32 %v11724_v46, %v5780_v58  ;;  %v11738_v42 = vld [vmem:[#allocation344_spill] sm:$0xff]  ;;  %v11754_v32 = vld [vmem:[#allocation281_spill] sm:$0xff]  ;;  %v4082_v37 = vld [vmem:[#allocation2 + $0x232] sm:$0xff] }
 0x827   : > { %v4428_v33 = vpop.f32.mrf.mxu3  ;;  %v2796_v58 = vadd.f32 %v11738_v42, %v2118_v27  ;;  %v11757_v26 = vld [vmem:[#allocation61_spill] sm:$0xff] }
 0x828   : > { %v6453_v11 = vadd.f32 %v10316_v6, %v6377_v14  ;;  %v4586_v29 = vadd.f32 %v4428_v33, %v3989_v52  ;;  %v11739_v14 = vld [vmem:[#allocation349_spill] sm:$0xff] }
 0x829   : > { %v2798_v3 = vadd.f32 %v11739_v14, %v2124_v57  ;;  %v11758_v57 = vld [vmem:[#allocation152_spill] sm:$0xff] }
 0x82a   : > { %v6525_v13 = vmax.f32 %v6453_v11, 0.0  ;;  %v5184_v40 = vadd.f32 %v11727_v44, %v4586_v29  ;;  %v11740_v11 = vld [vmem:[#allocation200_spill] sm:$0xff]  ;;  %v11743_v44 = vld [vmem:[#allocation55_spill] sm:$0xff] }
 0x82b   : > { %v3394_v29 = vadd.f32 %v11740_v11, %v2796_v58  ;;  %v11759_v58 = vld [vmem:[#allocation355_spill] sm:$0xff] }
 0x82c   : > { %v6582_v59 = vmax.f32 %v6522_v15, %v6525_v13  ;;  %v5781_v38 = vadd.f32 %v10129_v43, %v5184_v40  ;;  %7384 = vmatmul.msk.f32.gmra.mxu3 %vm1085_vm2, %v4078_v2  ;;  %v4079_v43 = vld [vmem:[#allocation2 + $0x212] sm:$0xff]  ;;  %v11744_v2 = vld [vmem:[#allocation205_spill] sm:$0xff] }
 0x82d   : > { %v11742_v13 = vld [vmem:[#allocation58_spill] sm:$0xff]  ;;  %v3991_v51 = vadd.f32 %v11748_v12, %v3394_v29 }
 0x82e   : > { %6619 = vst.msk [vmem:[#allocation3 + $0x68] sm:$0xff] %vm6605_vm3, %v6582_v59  ;;  %v6378_v4 = vadd.f32 %v11728_v55, %v5781_v38  ;;  %v2121_v40 = vadd.f32 %v11743_v44, %v11742_v13  ;;  %v3396_v59 = vadd.f32 %v11744_v2, %v2798_v3  ;;  %v4081_v38 = vld [vmem:[#allocation2 + $0x22a] sm:$0xff]  ;;  %v11746_v55 = vld [vmem:[#allocation59_spill] sm:$0xff] }
 0x82f   : > { %v4431_v24 = vpop.f32.mrf.mxu3  ;;  %v11762_v44 = vld [vmem:[#allocation370_spill] sm:$0xff]  ;;  %v11763_v2 = vld [vmem:[#allocation285_spill] sm:$0xff] }
 0x830   : > { %v6454_v23 = vadd.f32 %v10316_v6, %v6378_v4  ;;  %v4587_v46 = vadd.f32 %v4431_v24, %v3990_v41  ;;  %v2127_v4 = vadd.f32 %v11746_v55, %v11745_v56  ;;  %v11747_v24 = vld [vmem:[#allocation347_spill] sm:$0xff] }
 0x831   : > { %v11764_v56 = vld [vmem:[#allocation295_spill] sm:$0xff] }
 0x832   : > { %v6526_v0 = vmax.f32 %v6454_v23, 0.0  ;;  %v5185_v39 = vadd.f32 %v11741_v19, %v4587_v46  ;;  %v2797_v23 = vadd.f32 %v11747_v24, %v2121_v40 }
 0x834   : > { %v6583_v54 = vmax.f32 %v6523_v35, %v6526_v0  ;;  %7385 = vmatmul.msk.f32.gmra.mxu3 %vm1085_vm2, %v4079_v43  ;;  %v5782_v50 = vadd.f32 %v10145_v18, %v5185_v39  ;;  %v11749_v35 = vld [vmem:[#allocation352_spill] sm:$0xff]  ;;  %v3993_v43 = vadd.f32 %v11750_v60, %v3396_v59  ;;  %v11761_v39 = vld [vmem:[#allocation211_spill] sm:$0xff] }
 0x835   : > { %v6658_v62 = vld [vmem:[#allocation3 + $0x60] ss:$2 sm:$0xff]  ;;  %v6706_v45 = vld [vmem:[#allocation3 + $0x61] ss:$2 sm:$0xff]  ;;  %v2799_v0 = vadd.f32 %v11749_v35, %v2127_v4 }
 0x836   : > { %v6745_v49 = vmax.f32 %v6658_v62, %v6706_v45  ;;  %6620 = vst.msk [vmem:[#allocation3 + $0x70] sm:$0xff] %vm6605_vm3, %v6583_v54  ;;  %v11751_v62 = vld [vmem:[#allocation203_spill] sm:$0xff]  ;;  %v6379_v17 = vadd.f32 %v11752_v36, %v5782_v50 }
 0x837   : > { %v4434_v31 = vpop.f32.mrf.mxu3  ;;  %v3395_v45 = vadd.f32 %v11751_v62, %v2797_v23  ;;  %v11765_v23 = vld [vmem:[#allocation175_spill] sm:$0xff] }
 0x838   : > { %v6769_v1 = vpack.c.bf16 %v6745_v49, %v6745_v49  ;;  %v4588_v8 = vadd.f32 %v4434_v31, %v3991_v51  ;;  %v11766_v51 = vld [vmem:[#allocation164_spill] sm:$0xff] }
 0x839   : > { %v3992_v31 = vadd.f32 %v11758_v57, %v3395_v45  ;;  %v4084_v45 = vld [vmem:[#allocation2 + $0x24a] sm:$0xff] }
 0x83a   : > { %6795 = vst.msk [vmem:[%s10369_s17 + $0x20] sm:$0xf] %vm6785_vm4, %v6769_v1  ;;  %v11753_v1 = vld [vmem:[#allocation208_spill] sm:$0xff]  ;;  %v5186_v27 = vadd.f32 %v11754_v32, %v4588_v8 }
 0x83b   : > { %v3397_v10 = vadd.f32 %v11753_v1, %v2799_v0  ;;  %v10694_v0 = vld [vmem:[%s11066_s4] ss:$0 sm:$0xff] }
 0x83c   : > { %7386 = vmatmul.msk.f32.gmra.mxu3 %vm1085_vm2, %v4080_v47  ;;  %v11756_v47 = vld [vmem:[#allocation64_spill] sm:$0xff]  ;;  %v5783_v46 = vadd.f32 %v10156_v22, %v5186_v27 }
 0x83d   : > { %v6660_v30 = vld [vmem:[#allocation3 + $0x70] ss:$2 sm:$0xf]  ;;  %v6708_v5 = vld [vmem:[#allocation3 + $0x71] ss:$2 sm:$0xf]  ;;  %v2130_v18 = vadd.f32 %v11757_v26, %v11756_v47 }
 0x83e   : > { %v6746_v52 = vmax.f32 %v6660_v30, %v6708_v5  ;;  %v6455_v5 = vadd.f32 %v10316_v6, %v6379_v17  ;;  %v6380_v40 = vadd.f32 %v11762_v44, %v5783_v46  ;;  %v4083_v22 = vld [vmem:[#allocation2 + $0x242] sm:$0xff] }
 0x83f   : > { %v4437_v33 = vpop.f32.mrf.mxu3  ;;  %v2800_v30 = vadd.f32 %v11759_v58, %v2130_v18  ;;  %v11769_v1 = vld [vmem:[#allocation376_spill] sm:$0xff] }
 0x840   : > { %v6770_v15 = vpack.c.bf16 %v6746_v52, %v6746_v52  ;;  %v4589_v14 = vadd.f32 %v4437_v33, %v3992_v31  ;;  %v11760_v52 = vld [vmem:[#allocation160_spill] sm:$0xff]  ;;  %v6456_v4 = vadd.f32 %v10316_v6, %v6380_v40  ;;  %v11779_v40 = vld [vmem:[#allocation361_spill] sm:$0xff] }
 0x841   : > { %v3994_v11 = vadd.f32 %v11760_v52, %v3397_v10  ;;  %v3398_v13 = vadd.f32 %v11761_v39, %v2800_v30  ;;  %v11774_v52 = vld [vmem:[#allocation68_spill] sm:$0xff] }
 0x842   : > { %6796 = vst.msk [vmem:[%s10369_s17 + $0x24] sm:$0x3] %vm6787_vm5, %v6770_v15  ;;  %v5187_v59 = vadd.f32 %v11763_v2, %v4589_v14  ;;  %v6528_v60 = vmax.f32 %v6456_v4, 0.0  ;;  %v4086_v39 = vld [vmem:[#allocation2 + $0x262] sm:$0xff] }
 0x843   : > { %v3995_v50 = vadd.f32 %v11766_v51, %v3398_v13  ;;  %v11777_v13 = vld [vmem:[#allocation72_spill] sm:$0xff]  ;;  %v11781_v4 = vld [vmem:[#allocation217_spill] sm:$0xff] }
 0x844   : > { %7387 = vmatmul.msk.f32.gmra.mxu3 %vm1085_vm2, %v4081_v38  ;;  %v5784_v24 = vadd.f32 %v10172_v9, %v5187_v59  ;;  %v11768_v9 = vld [vmem:[#allocation299_spill] sm:$0xff] }
 0x847   : > { %v4440_v54 = vpop.f32.mrf.mxu3 }
 0x848   : > { %v4590_v49 = vadd.f32 %v4440_v54, %v3993_v43  ;;  %v11767_v43 = vld [vmem:[#allocation372_spill] sm:$0xff] }
 0x84a   : > { %v5188_v41 = vadd.f32 %v11755_v28, %v4590_v49  ;;  %v11770_v28 = vld [vmem:[#allocation66_spill] sm:$0xff] }
 0x84c   : > { %v5785_v42 = vadd.f32 %v10183_v48, %v5188_v41  ;;  %7388 = vmatmul.msk.f32.gmra.mxu3 %vm1085_vm2, %v4082_v37  ;;  %v6527_v48 = vmax.f32 %v6455_v5, 0.0  ;;  %v11771_v41 = vld [vmem:[#allocation63_spill] sm:$0xff]  ;;  %v11772_v37 = vld [vmem:[#allocation358_spill] sm:$0xff] }
 0x84d   : > { %v2133_v47 = vadd.f32 %v11771_v41, %v11770_v28  ;;  %v11773_v5 = vld [vmem:[#allocation214_spill] sm:$0xff] }
 0x84e   : > { %v6382_v3 = vadd.f32 %v9994_v61, %v5785_v42 }
 0x84f   : > { %v4443_v29 = vpop.f32.mrf.mxu3  ;;  %v2801_v57 = vadd.f32 %v11772_v37, %v2133_v47  ;;  %v11792_v47 = vld [vmem:[#allocation219_spill] sm:$0xff]  ;;  %v11793_v37 = vld [vmem:[#allocation86_spill] sm:$0xff] }
 0x850   : > { %v6458_v15 = vadd.f32 %v10316_v6, %v6382_v3  ;;  %v4591_v19 = vadd.f32 %v4443_v29, %v3994_v11  ;;  %v6381_v6 = vadd.f32 %v11767_v43, %v5784_v24  ;;  %v11775_v11 = vld [vmem:[#allocation65_spill] sm:$0xff] }
 0x851   : > { %v3399_v46 = vadd.f32 %v11773_v5, %v2801_v57  ;;  %v2136_v29 = vadd.f32 %v11775_v11, %v11774_v52  ;;  %v4087_v43 = vld [vmem:[#allocation2 + $0x26a] sm:$0xff]  ;;  %v4088_v52 = vld [vmem:[#allocation2 + $0x272] sm:$0xff]  ;;  %v11799_v11 = vld [vmem:[#allocation176_spill] sm:$0xff] }
 0x852   : > { %v6530_v38 = vmax.f32 %v6458_v15, 0.0  ;;  %v5189_v55 = vadd.f32 %v11764_v56, %v4591_v19  ;;  %v6457_v17 = vadd.f32 %v10694_v0, %v6381_v6  ;;  %v11776_v15 = vld [vmem:[#allocation168_spill] sm:$0xff]  ;;  %v11786_v6 = vld [vmem:[#allocation74_spill] sm:$0xff] }
 0x853   : > { %v3996_v19 = vadd.f32 %v11776_v15, %v3399_v46  ;;  %v2802_v2 = vadd.f32 %v11779_v40, %v2136_v29  ;;  %v11797_v46 = vld [vmem:[#allocation75_spill] sm:$0xff] }
 0x854   : > { %v6584_v33 = vmax.f32 %v6527_v48, %v6530_v38  ;;  %v5786_v61 = vadd.f32 %v10196_v20, %v5189_v55  ;;  %7389 = vmatmul.msk.f32.gmra.mxu3 %vm1085_vm2, %v4083_v22  ;;  %v6529_v26 = vmax.f32 %v6457_v17, 0.0  ;;  %v11778_v48 = vld [vmem:[#allocation69_spill] sm:$0xff]  ;;  %v11780_v55 = vld [vmem:[#allocation366_spill] sm:$0xff]  ;;  %v11800_v15 = vld [vmem:[#allocation371_spill] sm:$0xff] }
 0x855   : > { %v2142_v44 = vadd.f32 %v11778_v48, %v11777_v13  ;;  %v3400_v24 = vadd.f32 %v11781_v4, %v2802_v2  ;;  %v11801_v13 = vld [vmem:[#allocation146_spill] sm:$0xff]  ;;  %v11802_v40 = vld [vmem:[#allocation383_spill] sm:$0xff] }
 0x856   : > { %6621 = vst.msk [vmem:[#allocation3 + $0x78] sm:$0xff] %vm6605_vm3, %v6584_v33  ;;  %v6383_v12 = vadd.f32 %v11765_v23, %v5786_v61 }
 0x857   : > { %v4446_v35 = vpop.f32.mrf.mxu3  ;;  %v2804_v22 = vadd.f32 %v11780_v55, %v2142_v44 }
 0x858   : > { %v6459_v20 = vadd.f32 %v10694_v0, %v6383_v12  ;;  %v4592_v8 = vadd.f32 %v4446_v35, %v3995_v50  ;;  %v11782_v12 = vld [vmem:[#allocation304_spill] sm:$0xff]  ;;  %v11783_v50 = vld [vmem:[#allocation70_spill] sm:$0xff]  ;;  %v11784_v35 = vld [vmem:[#allocation67_spill] sm:$0xff] }
 0x85a   : > { %v6531_v54 = vmax.f32 %v6459_v20, 0.0  ;;  %v5190_v62 = vadd.f32 %v11768_v9, %v4592_v8  ;;  %v2139_v20 = vadd.f32 %v11784_v35, %v11783_v50  ;;  %v11785_v8 = vld [vmem:[#allocation222_spill] sm:$0xff]  ;;  %v11807_v35 = vld [vmem:[#allocation323_spill] sm:$0xff] }
 0x85c   : > { %v6585_v49 = vmax.f32 %v6528_v60, %v6531_v54  ;;  %v5787_v36 = vadd.f32 %v10204_v53, %v5190_v62  ;;  %7390 = vmatmul.msk.f32.gmra.mxu3 %vm1085_vm2, %v4084_v45  ;;  %v4085_v53 = vld [vmem:[#allocation2 + $0x252] sm:$0xff]  ;;  %v3402_v60 = vadd.f32 %v11785_v8, %v2804_v22  ;;  %v4089_v8 = vld [vmem:[#allocation2 + $0x282] sm:$0xff] }
 0x85d   : > { %v11787_v54 = vld [vmem:[#allocation71_spill] sm:$0xff] }
 0x85e   : > { %6622 = vst.msk [vmem:[#allocation3 + $0x80] sm:$0xff] %vm6605_vm3, %v6585_v49  ;;  %v6384_v10 = vadd.f32 %v11769_v1, %v5787_v36  ;;  %v2145_v9 = vadd.f32 %v11787_v54, %v11786_v6  ;;  %v11788_v62 = vld [vmem:[#allocation363_spill] sm:$0xff]  ;;  %v11789_v49 = vld [vmem:[#allocation172_spill] sm:$0xff] }
 0x85f   : > { %v4449_v32 = vpop.f32.mrf.mxu3  ;;  %v2803_v45 = vadd.f32 %v11788_v62, %v2139_v20  ;;  %v3997_v36 = vadd.f32 %v11789_v49, %v3400_v24  ;;  %v11790_v1 = vld [vmem:[#allocation368_spill] sm:$0xff]  ;;  %v11805_v24 = vld [vmem:[#allocation379_spill] sm:$0xff]  ;;  %v11811_v49 = vld [vmem:[#allocation185_spill] sm:$0xff] }
 0x860   : > { %v6460_v27 = vadd.f32 %v10694_v0, %v6384_v10  ;;  %v4593_v56 = vadd.f32 %v4449_v32, %v3996_v19  ;;  %v2805_v10 = vadd.f32 %v11790_v1, %v2145_v9  ;;  %v11809_v54 = vld [vmem:[#allocation396_spill] sm:$0xff] }
 0x861   : > { %v11810_v62 = vld [vmem:[#allocation96_spill] sm:$0xff] }
 0x862   : > { %v6532_v18 = vmax.f32 %v6460_v27, 0.0  ;;  %v5191_v51 = vadd.f32 %v11782_v12, %v4593_v56  ;;  %v11791_v27 = vld [vmem:[#allocation179_spill] sm:$0xff]  ;;  %v11806_v12 = vld [vmem:[#allocation314_spill] sm:$0xff] }
 0x863   : > { %v3999_v28 = vadd.f32 %v11791_v27, %v3402_v60  ;;  %v11808_v60 = vld [vmem:[#allocation163_spill] sm:$0xff]  ;;  %v11812_v27 = vld [vmem:[#allocation381_spill] sm:$0xff] }
 0x864   : > { %v6586_v31 = vmax.f32 %v6529_v26, %v6532_v18  ;;  %7391 = vmatmul.msk.f32.gmra.mxu3 %vm1085_vm2, %v4085_v53  ;;  %v5788_v17 = vadd.f32 %v10216_v7, %v5191_v51  ;;  %v3401_v26 = vadd.f32 %v11792_v47, %v2803_v45  ;;  %v11794_v53 = vld [vmem:[#allocation225_spill] sm:$0xff]  ;;  %v11813_v47 = vld [vmem:[#allocation327_spill] sm:$0xff] }
 0x865   : > { %v6662_v42 = vld [vmem:[#allocation3 + $0x78] ss:$2 sm:$0xff]  ;;  %v6710_v58 = vld [vmem:[#allocation3 + $0x79] ss:$2 sm:$0xff] }
 0x866   : > { %v6747_v30 = vmax.f32 %v6662_v42, %v6710_v58  ;;  %6623 = vst.msk [vmem:[#allocation3 + $0x88] sm:$0xff] %vm6605_vm3, %v6586_v31  ;;  %v6385_v57 = vadd.f32 %v11793_v37, %v5788_v17  ;;  %v3403_v31 = vadd.f32 %v11794_v53, %v2805_v10  ;;  %v11795_v42 = vld [vmem:[#allocation310_spill] sm:$0xff] }
 0x867   : > { %v4452_v14 = vpop.f32.mrf.mxu3 }
 0x868   : > { %v6771_v3 = vpack.c.bf16 %v6747_v30, %v6747_v30  ;;  %v4594_v32 = vadd.f32 %v4452_v14, %v3997_v36  ;;  %v11796_v30 = vld [vmem:[#allocation318_spill] sm:$0xff]  ;;  %v3998_v14 = vadd.f32 %v11799_v11, %v3401_v26  ;;  %v10773_v11 = vpop.f32.mrf.mxu1 }
 0x86a   : > { %6797 = vst.msk [vmem:[%s10369_s17 + $0x28] sm:$0xf] %vm6785_vm4, %v6771_v3  ;;  %v5192_v58 = vadd.f32 %v11795_v42, %v4594_v32  ;;  %v11798_v3 = vld [vmem:[#allocation73_spill] sm:$0xff] }
 0x86b   : > { %v2148_v7 = vadd.f32 %v11798_v3, %v11797_v46  ;;  %v11815_v42 = vld [vmem:[#allocation385_spill] sm:$0xff] }
 0x86c   : > { %7392 = vmatmul.msk.f32.gmra.mxu3 %vm1085_vm2, %v4086_v39  ;;  %v6461_v39 = vadd.f32 %v10694_v0, %v6385_v57  ;;  %v5789_v48 = vadd.f32 %v11801_v13, %v5192_v58  ;;  %v11814_v57 = vld [vmem:[#allocation167_spill] sm:$0xff] }
 0x86d   : > { %v6664_v59 = vld [vmem:[#allocation3 + $0x88] ss:$2 sm:$0xf]  ;;  %v6712_v38 = vld [vmem:[#allocation3 + $0x89] ss:$2 sm:$0xf]  ;;  %v2806_v19 = vadd.f32 %v11800_v15, %v2148_v7  ;;  %v10775_v15 = vpop.f32.mrf.mxu0 }
 0x86e   : > { %v6748_v33 = vmax.f32 %v6664_v59, %v6712_v38  ;;  %v11803_v59 = vld [vmem:[#allocation182_spill] sm:$0xff]  ;;  %v11817_v13 = vld [vmem:[#allocation231_spill] sm:$0xff] }
 0x86f   : > { %v4455_v61 = vpop.f32.mrf.mxu3  ;;  %v4000_v38 = vadd.f32 %v11803_v59, %v3403_v31  ;;  %v4091_v7 = vld [vmem:[#allocation2 + $0x292] sm:$0xff] }
 0x870   : > { %v6772_v23 = vpack.c.bf16 %v6748_v33, %v6748_v33  ;;  %v4595_v44 = vadd.f32 %v4455_v61, %v3998_v14  ;;  %v11804_v33 = vld [vmem:[#allocation228_spill] sm:$0xff]  ;;  %v11818_v59 = vld [vmem:[#allocation187_spill] sm:$0xff] }
 0x871   : > { %v3404_v4 = vadd.f32 %v11804_v33, %v2806_v19 }
 0x872   : > { %6798 = vst.msk [vmem:[%s10369_s17 + $0x2c] sm:$0x3] %vm6787_vm5, %v6772_v23  ;;  %v6386_v23 = vadd.f32 %v11805_v24, %v5789_v48  ;;  %v5193_v51 = vadd.f32 %v11806_v12, %v4595_v44  ;;  %v10780_v44 = vpop.f32.mrf.mxu2  ;;  %v11819_v12 = vld [vmem:[#allocation375_spill] sm:$0xff] }
 0x873   : > { %v4001_v36 = vadd.f32 %v11811_v49, %v3404_v4 }
 0x874   : > { %7393 = vmatmul.msk.f32.gmra.mxu3 %vm1085_vm2, %v4087_v43  ;;  %v6462_v6 = vadd.f32 %v10694_v0, %v6386_v23  ;;  %v5790_v9 = vadd.f32 %v11809_v54, %v5193_v51  ;;  %v11820_v51 = vld [vmem:[#allocation233_spill] sm:$0xff] }
 0x875   : > { %v10788_v23 = vpop.f32.mrf.mxu0  ;;  %v4093_v54 = vld [vmem:[#allocation2 + $0x2aa] sm:$0xff] }
 0x876   : > { %v6534_v32 = vmax.f32 %v6462_v6, 0.0 }
 0x877   : > { %v4458_v41 = vpop.f32.mrf.mxu3 }
 0x878   : > { %v4596_v18 = vadd.f32 %v4458_v41, %v3999_v28  ;;  %v6387_v28 = vadd.f32 %v11812_v27, %v5790_v9  ;;  %v11824_v9 = vld [vmem:[#allocation189_spill] sm:$0xff]  ;;  %v11828_v27 = vld [vmem:[#allocation236_spill] sm:$0xff] }
 0x87a   : > { %v5194_v5 = vadd.f32 %v11796_v30, %v4596_v18  ;;  %v4090_v18 = vld [vmem:[#allocation2 + $0x28a] sm:$0xff]  ;;  %v6463_v31 = vadd.f32 %v10694_v0, %v6387_v28 }
 0x87c   : > { %v5791_v29 = vadd.f32 %v10242_v16, %v5194_v5  ;;  %7394 = vmatmul.msk.f32.gmra.mxu3 %vm1085_vm2, %v4088_v52  ;;  %v6533_v16 = vmax.f32 %v6461_v39, 0.0  ;;  %v6535_v46 = vmax.f32 %v6463_v31, 0.0  ;;  %v11816_v39 = vld [vmem:[#allocation373_spill] sm:$0xff] }
 0x87d   : > { %v3405_v48 = vadd.f32 %v11817_v13, %v11816_v39 }
 0x87e   : > { %v6388_v2 = vadd.f32 %v11802_v40, %v5791_v29 }
 0x87f   : > { %v4461_v56 = vpop.f32.mrf.mxu3 }
 0x880   : > { %v6464_v55 = vadd.f32 %v10694_v0, %v6388_v2  ;;  %v4597_v22 = vadd.f32 %v4461_v56, %v4000_v38  ;;  %v4002_v38 = vadd.f32 %v11818_v59, %v3405_v48  ;;  %v4092_v56 = vld [vmem:[#allocation2 + $0x2a2] sm:$0xff] }
 0x881   : > { %v11836_v48 = vld [vmem:[#allocation392_spill] sm:$0xff] }
 0x882   : > { %v6536_v50 = vmax.f32 %v6464_v55, 0.0  ;;  %v5195_v20 = vadd.f32 %v11807_v35, %v4597_v22 }
 0x884   : > { %v6587_v61 = vmax.f32 %v6533_v16, %v6536_v50  ;;  %v5792_v43 = vadd.f32 %v11808_v60, %v5195_v20  ;;  %7395 = vmatmul.msk.f32.gmra.mxu3 %vm1085_vm2, %v4089_v8  ;;  %v10786_v16 = vpop.f32.mrf.mxu1  ;;  %v3406_v50 = vadd.f32 %v11820_v51, %v11819_v12  ;;  %v10792_v20 = vpop.f32.mrf.mxu2  ;;  %v11821_v8 = vld [vmem:[#allocation88_spill] sm:$0xff]  ;;  %v11822_v60 = vld [vmem:[#allocation81_spill] sm:$0xff] }
 0x886   : > { %6624 = vst.msk [vmem:[#allocation3 + $0x90] sm:$0xff] %vm6605_vm3, %v6587_v61  ;;  %v6389_v45 = vadd.f32 %v11810_v62, %v5792_v43  ;;  %v11823_v43 = vld [vmem:[#allocation239_spill] sm:$0xff]  ;;  %v4003_v62 = vadd.f32 %v11824_v9, %v3406_v50  ;;  %v11841_v50 = vld [vmem:[#allocation382_spill] sm:$0xff] }
 0x887   : > { %v4464_v17 = vpop.f32.mrf.mxu3  ;;  %v3408_v6 = vadd.f32 %v11823_v43, %v11822_v60  ;;  %v4095_v43 = vld [vmem:[#allocation2 + $0x2c2] sm:$0xff] }
 0x888   : > { %v6465_v1 = vadd.f32 %v10694_v0, %v6389_v45  ;;  %v4598_v10 = vadd.f32 %v4464_v17, %v4001_v36  ;;  %v11825_v45 = vld [vmem:[#allocation399_spill] sm:$0xff]  ;;  %v11826_v17 = vld [vmem:[#allocation193_spill] sm:$0xff] }
 0x88a   : > { %v6537_v41 = vmax.f32 %v6465_v1, 0.0  ;;  %v5196_v26 = vadd.f32 %v11813_v47, %v4598_v10  ;;  %v4005_v1 = vadd.f32 %v11826_v17, %v3408_v6 }
 0x88c   : > { %v6588_v37 = vmax.f32 %v6534_v32, %v6537_v41  ;;  %v5793_v53 = vadd.f32 %v11814_v57, %v5196_v26  ;;  %7396 = vmatmul.msk.f32.gmra.mxu3 %vm1085_vm2, %v4090_v18  ;;  %v11827_v32 = vld [vmem:[#allocation79_spill] sm:$0xff]  ;;  %v10805_v47 = vpop.f32.mrf.mxu1 }
 0x88d   : > { %v3407_v28 = vadd.f32 %v11828_v27, %v11827_v32  ;;  %v11829_v26 = vld [vmem:[#allocation387_spill] sm:$0xff] }
 0x88e   : > { %6625 = vst.msk [vmem:[#allocation3 + $0x98] sm:$0xff] %vm6605_vm3, %v6588_v37  ;;  %v6390_v58 = vadd.f32 %v11815_v42, %v5793_v53  ;;  %v10808_v37 = vpop.f32.mrf.mxu0  ;;  %v11830_v57 = vld [vmem:[#allocation83_spill] sm:$0xff]  ;;  %v11831_v53 = vld [vmem:[#allocation242_spill] sm:$0xff]  ;;  %v11832_v42 = vld [vmem:[#allocation380_spill] sm:$0xff] }
 0x88f   : > { %v4467_v30 = vpop.f32.mrf.mxu3  ;;  %v3409_v31 = vadd.f32 %v11831_v53, %v11830_v57  ;;  %v11846_v57 = vld [vmem:[#allocation112_spill] sm:$0xff] }
 0x890   : > { %v6466_v5 = vadd.f32 %v10694_v0, %v6390_v58  ;;  %v4599_v33 = vadd.f32 %v4467_v30, %v4002_v38  ;;  %v11833_v30 = vld [vmem:[#allocation386_spill] sm:$0xff] }
 0x892   : > { %v6538_v3 = vmax.f32 %v6466_v5, 0.0  ;;  %v5197_v61 = vadd.f32 %v11821_v8, %v4599_v33  ;;  %v11839_v33 = vld [vmem:[#allocation245_spill] sm:$0xff] }
 0x894   : > { %v6589_v52 = vmax.f32 %v6535_v46, %v6538_v3  ;;  %7397 = vmatmul.msk.f32.gmra.mxu3 %vm1085_vm2, %v4091_v7  ;;  %v5794_v49 = vadd.f32 %v11825_v45, %v5197_v61  ;;  %v10814_v46 = vpop.f32.mrf.mxu2  ;;  %v4094_v3 = vld [vmem:[#allocation2 + $0x2b2] sm:$0xff]  ;;  %v11842_v61 = vld [vmem:[#allocation388_spill] sm:$0xff] }
 0x895   : > { %v6666_v14 = vld [vmem:[#allocation3 + $0x90] ss:$2 sm:$0xff]  ;;  %v6714_v29 = vld [vmem:[#allocation3 + $0x91] ss:$2 sm:$0xff] }
 0x896   : > { %v6749_v19 = vmax.f32 %v6666_v14, %v6714_v29  ;;  %6626 = vst.msk [vmem:[#allocation3 + $0xa0] sm:$0xff] %vm6605_vm3, %v6589_v52  ;;  %v6391_v18 = vadd.f32 %v11829_v26, %v5794_v49  ;;  %v11834_v7 = vld [vmem:[#allocation191_spill] sm:$0xff]  ;;  %v10831_v6 = vpop.f32.mrf.mxu0 }
 0x897   : > { %v4470_v40 = vpop.f32.mrf.mxu3  ;;  %v4004_v52 = vadd.f32 %v11834_v7, %v3407_v28 }
 0x898   : > { %v6773_v2 = vpack.c.bf16 %v6749_v19, %v6749_v19  ;;  %v4600_v36 = vadd.f32 %v4470_v40, %v4003_v62  ;;  %v6467_v29 = vadd.f32 %v10694_v0, %v6391_v18  ;;  %v11835_v19 = vld [vmem:[#allocation136_spill] sm:$0xff] }
 0x89a   : > { %6799 = vst.msk [vmem:[%s10369_s17 + $0x30] sm:$0xf] %vm6785_vm4, %v6773_v2  ;;  %v5198_v58 = vadd.f32 %v11832_v42, %v4600_v36  ;;  %v11837_v2 = vld [vmem:[#allocation196_spill] sm:$0xff]  ;;  %v6539_v12 = vmax.f32 %v6467_v29, 0.0  ;;  %v11843_v36 = vld [vmem:[#allocation393_spill] sm:$0xff] }
 0x89b   : > { %v4006_v59 = vadd.f32 %v11837_v2, %v3409_v31  ;;  %v4096_v31 = vld [vmem:[#allocation2 + $0x2ca] sm:$0xff] }
 0x89c   : > { %7398 = vmatmul.msk.f32.gmra.mxu3 %vm1085_vm2, %v4092_v56  ;;  %v5795_v39 = vadd.f32 %v11835_v19, %v5198_v58  ;;  %v10835_v62 = vpop.f32.mrf.mxu2 }
 0x89d   : > { %v6668_v55 = vld [vmem:[#allocation3 + $0xa0] ss:$2 sm:$0xf]  ;;  %v6716_v22 = vld [vmem:[#allocation3 + $0xa1] ss:$2 sm:$0xf] }
 0x89e   : > { %v6750_v4 = vmax.f32 %v6668_v55, %v6716_v22  ;;  %v11838_v22 = vld [vmem:[#allocation377_spill] sm:$0xff] }
 0x89f   : > { %v4473_v24 = vpop.f32.mrf.mxu3 }
 0x8a0   : > { %v6774_v35 = vpack.c.bf16 %v6750_v4, %v6750_v4  ;;  %v4601_v13 = vadd.f32 %v4473_v24, %v4004_v52  ;;  %v3410_v4 = vadd.f32 %v11839_v33, %v11838_v22  ;;  %v10829_v24 = vpop.f32.mrf.mxu1 }
 0x8a2   : > { %6800 = vst.msk [vmem:[%s10369_s17 + $0x34] sm:$0x3] %vm6787_vm5, %v6774_v35  ;;  %v5199_v35 = vadd.f32 %v11841_v50, %v4601_v13  ;;  %v4098_v50 = vld [vmem:[#allocation2 + $0x2e2] sm:$0xff] }
 0x8a4   : > { %7399 = vmatmul.msk.f32.gmra.mxu3 %vm1085_vm2, %v4093_v54  ;;  %v5796_v49 = vadd.f32 %v10293_v25, %v5199_v35  ;;  %v10854_v52 = vpop.f32.mrf.mxu2 }
 0x8a7   : > { %v4476_v10 = vpop.f32.mrf.mxu3 }
 0x8a8   : > { %v4602_v41 = vadd.f32 %v4476_v10, %v4005_v1  ;;  %v11844_v1 = vld [vmem:[#allocation199_spill] sm:$0xff]  ;;  %v10847_v58 = vpop.f32.mrf.mxu1 }
 0x8a9   : > { %v4007_v10 = vadd.f32 %v11844_v1, %v3410_v4 }
 0x8aa   : > { %v5200_v5 = vadd.f32 %v11833_v30, %v4602_v41  ;;  %v10849_v30 = vpop.f32.mrf.mxu0 }
 0x8ac   : > { %v5797_v14 = vadd.f32 %v10310_v34, %v5200_v5  ;;  %7400 = vmatmul.msk.f32.gmra.mxu3 %vm1085_vm2, %v4094_v3  ;;  %v11840_v34 = vld [vmem:[#allocation389_spill] sm:$0xff]  ;;  %v11847_v3 = vld [vmem:[#allocation394_spill] sm:$0xff] }
 0x8ad   : > { %v6392_v51 = vadd.f32 %v11840_v34, %v5795_v39  ;;  %v4097_v39 = vld [vmem:[#allocation2 + $0x2d2] sm:$0xff]  ;;  %v11850_v34 = vld [vmem:[#allocation201_spill] sm:$0xff] }
 0x8ae   : > { %v6394_v40 = vadd.f32 %v11836_v48, %v5797_v14 }
 0x8af   : > { %v4479_v38 = vpop.f32.mrf.mxu3  ;;  %v6468_v45 = vadd.f32 %v10694_v0, %v6392_v51 }
 0x8b0   : > { %v6470_v56 = vadd.f32 %v10694_v0, %v6394_v40  ;;  %v4603_v55 = vadd.f32 %v4479_v38, %v4006_v59  ;;  %v11848_v59 = vld [vmem:[#allocation378_spill] sm:$0xff]  ;;  %v11849_v38 = vld [vmem:[#allocation247_spill] sm:$0xff] }
 0x8b1   : > { %v6540_v41 = vmax.f32 %v6468_v45, 0.0 }
 0x8b2   : > { %v6542_v8 = vmax.f32 %v6470_v56, 0.0  ;;  %v5201_v60 = vadd.f32 %v11842_v61, %v4603_v55  ;;  %v3411_v56 = vadd.f32 %v11849_v38, %v11848_v59  ;;  %v10861_v55 = vpop.f32.mrf.mxu1  ;;  %v10863_v33 = vpop.f32.mrf.mxu0 }
 0x8b4   : > { %v6590_v54 = vmax.f32 %v6539_v12, %v6542_v8  ;;  %v5798_v9 = vadd.f32 %v10334_v63, %v5201_v60  ;;  %7401 = vmatmul.msk.f32.gmra.mxu3 %vm1085_vm2, %v4095_v43  ;;  %v11845_v63 = vld [vmem:[#allocation115_spill] sm:$0xff]  ;;  %v10865_v12 = vpop.f32.mrf.mxu2  ;;  %v4008_v51 = vadd.f32 %v11850_v34, %v3411_v56 }
 0x8b5   : > { %v6393_v26 = vadd.f32 %v11845_v63, %v5796_v49  ;;  %v11855_v63 = vld [vmem:[#allocation204_spill] sm:$0xff] }
 0x8b6   : > { %6627 = vst.msk [vmem:[#allocation3 + $0xa8] sm:$0xff] %vm6605_vm3, %v6590_v54  ;;  %v6395_v17 = vadd.f32 %v11843_v36, %v5798_v9  ;;  %v11851_v54 = vld [vmem:[#allocation90_spill] sm:$0xff] }
 0x8b7   : > { %v4482_v32 = vpop.f32.mrf.mxu3  ;;  %v6469_v5 = vadd.f32 %v10694_v0, %v6393_v26  ;;  %v11852_v9 = vld [vmem:[#allocation250_spill] sm:$0xff] }
 0x8b8   : > { %v6471_v27 = vadd.f32 %v10694_v0, %v6395_v17  ;;  %v4604_v28 = vadd.f32 %v4482_v32, %v4007_v10  ;;  %v3412_v45 = vadd.f32 %v11852_v9, %v11851_v54  ;;  %v11853_v10 = vld [vmem:[#allocation94_spill] sm:$0xff]  ;;  %v11854_v32 = vld [vmem:[#allocation256_spill] sm:$0xff] }
 0x8b9   : > { %v6541_v19 = vmax.f32 %v6469_v5, 0.0 }
 0x8ba   : > { %v6543_v18 = vmax.f32 %v6471_v27, 0.0  ;;  %v5202_v53 = vadd.f32 %v11846_v57, %v4604_v28  ;;  %v10873_v36 = vpop.f32.mrf.mxu1  ;;  %v10876_v1 = vpop.f32.mrf.mxu0  ;;  %v3414_v27 = vadd.f32 %v11854_v32, %v11853_v10  ;;  %v4009_v26 = vadd.f32 %v11855_v63, %v3412_v45 }
 0x8bc   : > { %v6591_v42 = vmax.f32 %v6540_v41, %v6543_v18  ;;  %v5799_v25 = vadd.f32 %v10350_v21, %v5202_v53  ;;  %7402 = vmatmul.msk.f32.gmra.mxu3 %vm1085_vm2, %v4096_v31  ;;  %v10882_v28 = vpop.f32.mrf.mxu2  ;;  %v4099_v41 = vld [vmem:[#allocation2 + $0x2ea] sm:$0xff] }
 0x8bd   : > { %v11856_v53 = vld [vmem:[#allocation210_spill] sm:$0xff] }
 0x8be   : > { %6628 = vst.msk [vmem:[#allocation3 + $0xb0] sm:$0xff] %vm6605_vm3, %v6591_v42  ;;  %v6396_v7 = vadd.f32 %v11847_v3, %v5799_v25  ;;  %v4011_v31 = vadd.f32 %v11856_v53, %v3414_v27  ;;  %v11857_v42 = vld [vmem:[#allocation92_spill] sm:$0xff]  ;;  %v11858_v25 = vld [vmem:[#allocation253_spill] sm:$0xff] }
 0x8bf   : > { %v4485_v14 = vpop.f32.mrf.mxu3  ;;  %v3413_v5 = vadd.f32 %v11858_v25, %v11857_v42 }
 0x8c0   : > { %v6472_v29 = vadd.f32 %v10694_v0, %v6396_v7  ;;  %v4605_v61 = vadd.f32 %v4485_v14, %v4008_v51  ;;  %v11859_v14 = vld [vmem:[#allocation384_spill] sm:$0xff] }
 0x8c2   : > { %v6544_v21 = vmax.f32 %v6472_v29, 0.0  ;;  %v5203_v17 = vadd.f32 %v10775_v15, %v4605_v61  ;;  %v11860_v29 = vld [vmem:[#allocation259_spill] sm:$0xff] }
 0x8c4   : > { %v6592_v13 = vmax.f32 %v6541_v19, %v6544_v21  ;;  %7403 = vmatmul.msk.f32.gmra.mxu3 %vm1085_vm2, %v4097_v39  ;;  %v5800_v18 = vadd.f32 %v10773_v11, %v5203_v17  ;;  %v3415_v19 = vadd.f32 %v11860_v29, %v11859_v14  ;;  %v4100_v11 = vld [vmem:[#allocation2 + $0x2f2] sm:$0xff]  ;;  %v10902_v38 = vpop.f32.mrf.mxu2 }
 0x8c5   : > { %v6670_v48 = vld [vmem:[#allocation3 + $0xa8] ss:$2 sm:$0xff]  ;;  %v6718_v40 = vld [vmem:[#allocation3 + $0xa9] ss:$2 sm:$0xff] }
 0x8c6   : > { %v6751_v2 = vmax.f32 %v6670_v48, %v6718_v40  ;;  %6629 = vst.msk [vmem:[#allocation3 + $0xb8] sm:$0xff] %vm6605_vm3, %v6592_v13  ;;  %v6397_v7 = vadd.f32 %v10780_v44, %v5800_v18  ;;  %v10895_v13 = vpop.f32.mrf.mxu1  ;;  %v10897_v48 = vpop.f32.mrf.mxu0  ;;  %v11861_v40 = vld [vmem:[#allocation207_spill] sm:$0xff] }
 0x8c7   : > { %v4488_v22 = vpop.f32.mrf.mxu3  ;;  %v4103_v29 = vld [vmem:[#allocation2 + $0x312] sm:$0xff] }
 0x8c8   : > { %v6775_v4 = vpack.c.bf16 %v6751_v2, %v6751_v2  ;;  %v4606_v57 = vadd.f32 %v4488_v22, %v4009_v26  ;;  %v4010_v2 = vadd.f32 %v11861_v40, %v3413_v5  ;;  %v6473_v44 = vadd.f32 %v10694_v0, %v6397_v7  ;;  %v11862_v22 = vld [vmem:[#allocation213_spill] sm:$0xff] }
 0x8ca   : > { %6801 = vst.msk [vmem:[%s10369_s17 + $0x38] sm:$0xf] %vm6785_vm4, %v6775_v4  ;;  %v5204_v21 = vadd.f32 %v10788_v23, %v4606_v57  ;;  %v4012_v4 = vadd.f32 %v11862_v22, %v3415_v19  ;;  %v6545_v61 = vmax.f32 %v6473_v44, 0.0 }
 0x8cc   : > { %7404 = vmatmul.msk.f32.gmra.mxu3 %vm1085_vm2, %v4098_v50  ;;  %v5801_v56 = vadd.f32 %v10786_v16, %v5204_v21  ;;  %v10925_v27 = vpop.f32.mrf.mxu2 }
 0x8cd   : > { %v6672_v35 = vld [vmem:[#allocation3 + $0xb8] ss:$2 sm:$0xf]  ;;  %v6720_v8 = vld [vmem:[#allocation3 + $0xb9] ss:$2 sm:$0xf] }
 0x8ce   : > { %v6752_v60 = vmax.f32 %v6672_v35, %v6720_v8  ;;  %v11863_v35 = vld [vmem:[#allocation99_spill] sm:$0xff]  ;;  %v11864_v8 = vld [vmem:[#allocation261_spill] sm:$0xff]  ;;  %v10918_v17 = vpop.f32.mrf.mxu0 }
 0x8cf   : > { %v4491_v43 = vpop.f32.mrf.mxu3 }
 0x8d0   : > { %v6776_v49 = vpack.c.bf16 %v6752_v60, %v6752_v60  ;;  %v4607_v23 = vadd.f32 %v4491_v43, %v4010_v2  ;;  %v6398_v60 = vadd.f32 %v10792_v20, %v5801_v56  ;;  %v4101_v43 = vld [vmem:[#allocation2 + $0x302] sm:$0xff] }
 0x8d2   : > { %6802 = vst.msk [vmem:[%s10369_s17 + $0x3c] sm:$0x3] %vm6787_vm5, %v6776_v49  ;;  %v5205_v54 = vadd.f32 %v10808_v37, %v4607_v23  ;;  %v10916_v49 = vpop.f32.mrf.mxu1  ;;  %v6474_v10 = vadd.f32 %v10694_v0, %v6398_v60  ;;  %v11865_v37 = vld [vmem:[#allocation216_spill] sm:$0xff] }
 0x8d4   : > { %7405 = vmatmul.msk.f32.gmra.mxu3 %vm1085_vm2, %v4099_v41  ;;  %v5802_v32 = vadd.f32 %v10805_v47, %v5205_v54  ;;  %v6546_v26 = vmax.f32 %v6474_v10, 0.0  ;;  %v6304_v7 = vpop.f32.mrf.mxu2  ;;  %v11873_v10 = vld [vmem:[#allocation221_spill] sm:$0xff] }
 0x8d6   : > { %v6399_v18 = vadd.f32 %v10814_v46, %v5802_v32 }
 0x8d7   : > { %v4494_v15 = vpop.f32.mrf.mxu3 }
 0x8d8   : > { %v4608_v3 = vadd.f32 %v4494_v15, %v4011_v31  ;;  %v4102_v31 = vld [vmem:[#allocation2 + $0x30a] sm:$0xff] }
 0x8da   : > { %v5206_v39 = vadd.f32 %v10831_v6, %v4608_v3  ;;  %v5707_v25 = vpop.f32.mrf.mxu1  ;;  %v5110_v3 = vpop.f32.mrf.mxu0 }
 0x8dc   : > { %v5803_v59 = vadd.f32 %v10829_v24, %v5206_v39  ;;  %7406 = vmatmul.msk.f32.gmra.mxu3 %vm1085_vm2, %v4100_v11  ;;  %v3416_v24 = vadd.f32 %v11864_v8, %v11863_v35  ;;  %v11866_v11 = vld [vmem:[#allocation101_spill] sm:$0xff]  ;;  %v6307_v23 = vpop.f32.mrf.mxu2  ;;  %v11869_v8 = vld [vmem:[#allocation103_spill] sm:$0xff] }
 0x8de   : > { %v6400_v6 = vadd.f32 %v10835_v62, %v5803_v59 }
 0x8df   : > { %v4497_v34 = vpop.f32.mrf.mxu3 }
 0x8e0   : > { %v6476_v51 = vadd.f32 %v10694_v0, %v6400_v6  ;;  %v4609_v50 = vadd.f32 %v4497_v34, %v4012_v4  ;;  %v11868_v6 = vld [vmem:[#allocation218_spill] sm:$0xff] }
 0x8e2   : > { %v6548_v9 = vmax.f32 %v6476_v51, 0.0  ;;  %v5207_v16 = vadd.f32 %v10849_v30, %v4609_v50  ;;  %v4013_v30 = vadd.f32 %v11865_v37, %v3416_v24  ;;  %v5710_v44 = vpop.f32.mrf.mxu1  ;;  %v5113_v56 = vpop.f32.mrf.mxu0  ;;  %v11870_v24 = vld [vmem:[#allocation267_spill] sm:$0xff] }
 0x8e4   : > { %v6593_v45 = vmax.f32 %v6545_v61, %v6548_v9  ;;  %v5804_v62 = vadd.f32 %v10847_v58, %v5207_v16  ;;  %7407 = vmatmul.msk.f32.gmra.mxu3 %vm1085_vm2, %v4101_v43  ;;  %v3418_v61 = vadd.f32 %v11870_v24, %v11869_v8  ;;  %v11871_v9 = vld [vmem:[#allocation391_spill] sm:$0xff]  ;;  %v11872_v16 = vld [vmem:[#allocation272_spill] sm:$0xff] }
 0x8e5   : > { %v3420_v43 = vadd.f32 %v11872_v16, %v11871_v9  ;;  %v11883_v8 = vld [vmem:[#allocation232_spill] sm:$0xff] }
 0x8e6   : > { %6630 = vst.msk [vmem:[#allocation3 + $0xc0] sm:$0xff] %vm6605_vm3, %v6593_v45  ;;  %v6401_v20 = vadd.f32 %v10854_v52, %v5804_v62  ;;  %v6475_v52 = vadd.f32 %v10694_v0, %v6399_v18  ;;  %v4015_v32 = vadd.f32 %v11873_v10, %v3418_v61  ;;  %v11876_v18 = vld [vmem:[#allocation269_spill] sm:$0xff] }
 0x8e7   : > { %v4500_v41 = vpop.f32.mrf.mxu3 }
 0x8e8   : > { %v6477_v58 = vadd.f32 %v10694_v0, %v6401_v20  ;;  %v4610_v63 = vadd.f32 %v4500_v41, %v4013_v30  ;;  %v6310_v20 = vpop.f32.mrf.mxu2  ;;  %v11874_v41 = vld [vmem:[#allocation227_spill] sm:$0xff] }
 0x8ea   : > { %v6549_v57 = vmax.f32 %v6477_v58, 0.0  ;;  %v5208_v53 = vadd.f32 %v10863_v33, %v4610_v63  ;;  %v6547_v33 = vmax.f32 %v6475_v52, 0.0  ;;  %v5713_v45 = vpop.f32.mrf.mxu1  ;;  %v5116_v62 = vpop.f32.mrf.mxu0  ;;  %v4017_v58 = vadd.f32 %v11874_v41, %v3420_v43 }
 0x8ec   : > { %v6594_v47 = vmax.f32 %v6546_v26, %v6549_v57  ;;  %v5805_v15 = vadd.f32 %v10861_v55, %v5208_v53  ;;  %7408 = vmatmul.msk.f32.gmra.mxu3 %vm1085_vm2, %v4102_v31  ;;  %v11875_v26 = vld [vmem:[#allocation390_spill] sm:$0xff]  ;;  %v11877_v31 = vld [vmem:[#allocation119_spill] sm:$0xff] }
 0x8ed   : > { %v3419_v57 = vadd.f32 %v11876_v18, %v11875_v26 }
 0x8ee   : > { %6631 = vst.msk [vmem:[#allocation3 + $0xc8] sm:$0xff] %vm6605_vm3, %v6594_v47  ;;  %v6402_v42 = vadd.f32 %v10865_v12, %v5805_v15  ;;  %v11867_v12 = vld [vmem:[#allocation264_spill] sm:$0xff]  ;;  %v11878_v47 = vld [vmem:[#allocation274_spill] sm:$0xff] }
 0x8ef   : > { %v4503_v5 = vpop.f32.mrf.mxu3  ;;  %v3417_v40 = vadd.f32 %v11867_v12, %v11866_v11  ;;  %v3421_v15 = vadd.f32 %v11878_v47, %v11877_v31 }
 0x8f0   : > { %v6478_v46 = vadd.f32 %v10694_v0, %v6402_v42  ;;  %v10967_v11 = vpop.f32.mrf.mxu2 }
 0x8f1   : > { %v4014_v22 = vadd.f32 %v11868_v6, %v3417_v40  ;;  %v11881_v40 = vld [vmem:[#allocation123_spill] sm:$0xff] }
 0x8f2   : > { %v6550_v14 = vmax.f32 %v6478_v46, 0.0 }
 0x8f3   : > { %v4611_v51 = vadd.f32 %v4503_v5, %v4014_v22  ;;  %v11879_v5 = vld [vmem:[#allocation224_spill] sm:$0xff] }
 0x8f4   : > { %v6595_v19 = vmax.f32 %v6547_v33, %v6550_v14  ;;  %7409 = vmatmul.msk.f32.gmra.mxu3 %vm1085_vm2, %v4103_v29  ;;  %v4016_v46 = vadd.f32 %v11879_v5, %v3419_v57  ;;  %v10963_v29 = vpop.f32.mrf.mxu0 }
 0x8f5   : > { %v6674_v55 = vld [vmem:[#allocation3 + $0xc0] ss:$2 sm:$0xff]  ;;  %v6722_v21 = vld [vmem:[#allocation3 + $0xc1] ss:$2 sm:$0xff]  ;;  %v5209_v54 = vadd.f32 %v10876_v1, %v4611_v51 }
 0x8f6   : > { %v6753_v39 = vmax.f32 %v6674_v55, %v6722_v21  ;;  %6632 = vst.msk [vmem:[#allocation3 + $0xd0] sm:$0xff] %vm6605_vm3, %v6595_v19 }
 0x8f7   : > { %v4506_v2 = vpop.f32.mrf.mxu3  ;;  %v5806_v37 = vadd.f32 %v10873_v36, %v5209_v54  ;;  %v10960_v36 = vpop.f32.mrf.mxu1 }
 0x8f8   : > { %v6777_v59 = vpack.c.bf16 %v6753_v39, %v6753_v39  ;;  %v4612_v30 = vadd.f32 %v4506_v2, %v4015_v32 }
 0x8f9   : > { %v6403_v53 = vadd.f32 %v10882_v28, %v5806_v37  ;;  %v11880_v28 = vld [vmem:[#allocation230_spill] sm:$0xff] }
 0x8fa   : > { %6803 = vst.msk [vmem:[%s10369_s17 + $0x40] sm:$0xf] %vm6785_vm4, %v6777_v59  ;;  %v5210_v52 = vadd.f32 %v10897_v48, %v4612_v30  ;;  %v4018_v39 = vadd.f32 %v11880_v28, %v3421_v15  ;;  %v11887_v28 = vld [vmem:[#allocation129_spill] sm:$0xff] }
 0x8fb   : > { %v6479_v14 = vadd.f32 %v10694_v0, %v6403_v53  ;;  %v11885_v53 = vld [vmem:[#allocation280_spill] sm:$0xff] }
 0x8fc   : > { %v5807_v19 = vadd.f32 %v10895_v13, %v5210_v52  ;;  %v5122_v54 = vpop.f32.mrf.mxu0  ;;  %v11886_v52 = vld [vmem:[#allocation235_spill] sm:$0xff] }
 0x8fd   : > { %v6676_v4 = vld [vmem:[#allocation3 + $0xd0] ss:$2 sm:$0xf]  ;;  %v6724_v34 = vld [vmem:[#allocation3 + $0xd1] ss:$2 sm:$0xf] }
 0x8fe   : > { %v6754_v50 = vmax.f32 %v6676_v4, %v6724_v34  ;;  %v6551_v59 = vmax.f32 %v6479_v14, 0.0  ;;  %v6404_v6 = vadd.f32 %v10902_v38, %v5807_v19 }
 0x8ff   : > { %v4509_v35 = vpop.f32.mrf.mxu3  ;;  %v5719_v61 = vpop.f32.mrf.mxu1 }
 0x900   : > { %v6778_v60 = vpack.c.bf16 %v6754_v50, %v6754_v50  ;;  %v4613_v55 = vadd.f32 %v4509_v35, %v4016_v46  ;;  %v6480_v51 = vadd.f32 %v10694_v0, %v6404_v6 }
 0x902   : > { %6804 = vst.msk [vmem:[%s10369_s17 + $0x44] sm:$0x3] %vm6787_vm5, %v6778_v60  ;;  %v5211_v22 = vadd.f32 %v10918_v17, %v4613_v55  ;;  %v10979_v17 = vpop.f32.mrf.mxu2 }
 0x904   : > { %v5808_v50 = vadd.f32 %v10916_v49, %v5211_v22 }
 0x907   : > { %v4512_v63 = vpop.f32.mrf.mxu3  ;;  %v10985_v41 = vpop.f32.mrf.mxu1 }
 0x908   : > { %v4614_v1 = vadd.f32 %v4512_v63, %v4017_v58  ;;  %v5125_v58 = vpop.f32.mrf.mxu0 }
 0x90a   : > { %v5212_v42 = vadd.f32 %v5110_v3, %v4614_v1  ;;  %v10987_v18 = vpop.f32.mrf.mxu2  ;;  %v11884_v1 = vld [vmem:[#allocation126_spill] sm:$0xff] }
 0x90c   : > { %v5809_v33 = vadd.f32 %v5707_v25, %v5212_v42  ;;  %v11882_v25 = vld [vmem:[#allocation277_spill] sm:$0xff] }
 0x90d   : > { %v3422_v2 = vadd.f32 %v11882_v25, %v11881_v40  ;;  %v11889_v40 = vld [vmem:[#allocation135_spill] sm:$0xff]  ;;  %v11890_v25 = vld [vmem:[#allocation290_spill] sm:$0xff] }
 0x90e   : > { %v6406_v21 = vadd.f32 %v6304_v7, %v5809_v33 }
 0x90f   : > { %v4515_v12 = vpop.f32.mrf.mxu3  ;;  %v4019_v24 = vadd.f32 %v11883_v8, %v3422_v2  ;;  %v5725_v15 = vpop.f32.mrf.mxu1  ;;  %v3426_v2 = vadd.f32 %v11890_v25, %v11889_v40  ;;  %v11893_v8 = vld [vmem:[#allocation132_spill] sm:$0xff] }
 0x910   : > { %v6482_v48 = vadd.f32 %v10694_v0, %v6406_v21  ;;  %v4615_v3 = vadd.f32 %v4515_v12, %v4018_v39  ;;  %v5128_v5 = vpop.f32.mrf.mxu0  ;;  %v11888_v39 = vld [vmem:[#allocation283_spill] sm:$0xff] }
 0x911   : > { %v3424_v12 = vadd.f32 %v11888_v39, %v11887_v28 }
 0x912   : > { %v6554_v4 = vmax.f32 %v6482_v48, 0.0  ;;  %v5213_v13 = vadd.f32 %v5113_v56, %v4615_v3  ;;  %v6552_v56 = vmax.f32 %v6480_v51, 0.0  ;;  %v6322_v46 = vpop.f32.mrf.mxu2 }
 0x914   : > { %v6596_v34 = vmax.f32 %v6551_v59, %v6554_v4  ;;  %v5810_v7 = vadd.f32 %v5710_v44, %v5213_v13  ;;  %v6405_v44 = vadd.f32 %v10925_v27, %v5808_v50  ;;  %v11891_v59 = vld [vmem:[#allocation238_spill] sm:$0xff] }
 0x915   : > { %v4021_v6 = vadd.f32 %v11891_v59, %v3424_v12 }
 0x916   : > { %6633 = vst.msk [vmem:[#allocation3 + $0xd8] sm:$0xff] %vm6605_vm3, %v6596_v34  ;;  %v6407_v35 = vadd.f32 %v6307_v23, %v5810_v7  ;;  %v6481_v32 = vadd.f32 %v10694_v0, %v6405_v44  ;;  %v11892_v7 = vld [vmem:[#allocation244_spill] sm:$0xff] }
 0x917   : > { %v4518_v60 = vpop.f32.mrf.mxu3  ;;  %v5728_v22 = vpop.f32.mrf.mxu1  ;;  %v4023_v51 = vadd.f32 %v11892_v7, %v3426_v2 }
 0x918   : > { %v6483_v38 = vadd.f32 %v10694_v0, %v6407_v35  ;;  %v4616_v9 = vadd.f32 %v4518_v60, %v4019_v24  ;;  %v6553_v63 = vmax.f32 %v6481_v32, 0.0  ;;  %v5131_v13 = vpop.f32.mrf.mxu0  ;;  %v11894_v24 = vld [vmem:[#allocation287_spill] sm:$0xff] }
 0x919   : > { %v3425_v60 = vadd.f32 %v11894_v24, %v11893_v8 }
 0x91a   : > { %v6555_v16 = vmax.f32 %v6483_v38, 0.0  ;;  %v5214_v43 = vadd.f32 %v5116_v62, %v4616_v9  ;;  %v6325_v50 = vpop.f32.mrf.mxu2  ;;  %v11895_v9 = vld [vmem:[#allocation141_spill] sm:$0xff] }
 0x91c   : > { %v6597_v10 = vmax.f32 %v6552_v56, %v6555_v16  ;;  %v5811_v49 = vadd.f32 %v5713_v45, %v5214_v43  ;;  %v11896_v56 = vld [vmem:[#allocation294_spill] sm:$0xff] }
 0x91d   : > { %v3427_v44 = vadd.f32 %v11896_v56, %v11895_v9 }
 0x91e   : > { %6634 = vst.msk [vmem:[#allocation3 + $0xe0] sm:$0xff] %vm6605_vm3, %v6597_v10  ;;  %v6408_v23 = vadd.f32 %v6310_v20, %v5811_v49  ;;  %v3423_v20 = vadd.f32 %v11885_v53, %v11884_v1  ;;  %v11897_v10 = vld [vmem:[#allocation241_spill] sm:$0xff]  ;;  %v11899_v1 = vld [vmem:[#allocation395_spill] sm:$0xff]  ;;  %v11900_v53 = vld [vmem:[#allocation298_spill] sm:$0xff] }
 0x91f   : > { %v4521_v37 = vpop.f32.mrf.mxu3  ;;  %v4022_v49 = vadd.f32 %v11897_v10, %v3425_v60  ;;  %v11902_v60 = vld [vmem:[#allocation150_spill] sm:$0xff] }
 0x920   : > { %v6484_v30 = vadd.f32 %v10694_v0, %v6408_v23  ;;  %v4020_v42 = vadd.f32 %v11886_v52, %v3423_v20 }
 0x922   : > { %v6556_v26 = vmax.f32 %v6484_v30, 0.0  ;;  %v4617_v19 = vadd.f32 %v4521_v37, %v4020_v42  ;;  %v6328_v20 = vpop.f32.mrf.mxu2 }
 0x924   : > { %v6598_v27 = vmax.f32 %v6553_v63, %v6556_v26  ;;  %v5215_v3 = vadd.f32 %v10963_v29, %v4617_v19  ;;  %v11898_v63 = vld [vmem:[#allocation246_spill] sm:$0xff]  ;;  %v11901_v19 = vld [vmem:[#allocation249_spill] sm:$0xff] }
 0x925   : > { %v6678_v62 = vld [vmem:[#allocation3 + $0xd8] ss:$2 sm:$0xff]  ;;  %v6726_v57 = vld [vmem:[#allocation3 + $0xd9] ss:$2 sm:$0xff]  ;;  %v4024_v26 = vadd.f32 %v11898_v63, %v3427_v44  ;;  %v11906_v63 = vld [vmem:[#allocation306_spill] sm:$0xff] }
 0x926   : > { %v6755_v45 = vmax.f32 %v6678_v62, %v6726_v57  ;;  %6635 = vst.msk [vmem:[#allocation3 + $0xe8] sm:$0xff] %vm6605_vm3, %v6598_v27  ;;  %v5812_v4 = vadd.f32 %v10960_v36, %v5215_v3  ;;  %v5731_v27 = vpop.f32.mrf.mxu1 }
 0x927   : > { %v4524_v31 = vpop.f32.mrf.mxu3 }
 0x928   : > { %v6779_v47 = vpack.c.bf16 %v6755_v45, %v6755_v45  ;;  %v4618_v34 = vadd.f32 %v4524_v31, %v4021_v6  ;;  %v6409_v38 = vadd.f32 %v10967_v11, %v5812_v4  ;;  %v5134_v45 = vpop.f32.mrf.mxu0 }
 0x92a   : > { %6805 = vst.msk [vmem:[%s10369_s17 + $0x48] sm:$0xf] %vm6785_vm4, %v6779_v47  ;;  %v5216_v16 = vadd.f32 %v5122_v54, %v4618_v34  ;;  %v6485_v32 = vadd.f32 %v10694_v0, %v6409_v38  ;;  %v3428_v54 = vadd.f32 %v11900_v53, %v11899_v1  ;;  %v6331_v25 = vpop.f32.mrf.mxu2  ;;  %v11909_v1 = vld [vmem:[#allocation255_spill] sm:$0xff] }
 0x92c   : > { %v5813_v23 = vadd.f32 %v5719_v61, %v5216_v16  ;;  %v6557_v31 = vmax.f32 %v6485_v32, 0.0 }
 0x92d   : > { %v6680_v33 = vld [vmem:[#allocation3 + $0xe8] ss:$2 sm:$0xf]  ;;  %v6728_v14 = vld [vmem:[#allocation3 + $0xe9] ss:$2 sm:$0xf] }
 0x92e   : > { %v6756_v55 = vmax.f32 %v6680_v33, %v6728_v14  ;;  %v6410_v47 = vadd.f32 %v10979_v17, %v5813_v23  ;;  %v5734_v17 = vpop.f32.mrf.mxu1 }
 0x92f   : > { %v4527_v21 = vpop.f32.mrf.mxu3 }
 0x930   : > { %v6780_v48 = vpack.c.bf16 %v6756_v55, %v6756_v55  ;;  %v4619_v37 = vadd.f32 %v4527_v21, %v4022_v49  ;;  %v4025_v55 = vadd.f32 %v11901_v19, %v3428_v54  ;;  %v5137_v12 = vpop.f32.mrf.mxu0 }
 0x932   : > { %6806 = vst.msk [vmem:[%s10369_s17 + $0x4c] sm:$0x3] %vm6787_vm5, %v6780_v48 }
 0x937   : > { %v4530_v35 = vpop.f32.mrf.mxu3 }
 0x938   : > { %v4620_v29 = vadd.f32 %v4530_v35, %v4023_v51  ;;  %v5140_v7 = vpop.f32.mrf.mxu0  ;;  %v5737_v51 = vpop.f32.mrf.mxu1 }
 0x93a   : > { %v5218_v43 = vadd.f32 %v5128_v5, %v4620_v29  ;;  %v11903_v29 = vld [vmem:[#allocation302_spill] sm:$0xff] }
 0x93b   : > { %v3429_v38 = vadd.f32 %v11903_v29, %v11902_v60 }
 0x93c   : > { %v5815_v36 = vadd.f32 %v5725_v15, %v5218_v43  ;;  %v5217_v15 = vadd.f32 %v5125_v58, %v4619_v37 }
 0x93e   : > { %v6412_v30 = vadd.f32 %v6322_v46, %v5815_v36  ;;  %v6486_v46 = vadd.f32 %v10694_v0, %v6410_v47  ;;  %v5814_v33 = vadd.f32 %v10985_v41, %v5217_v15  ;;  %v11910_v47 = vld [vmem:[#allocation260_spill] sm:$0xff] }
 0x93f   : > { %v4533_v62 = vpop.f32.mrf.mxu3 }
 0x940   : > { %v6488_v57 = vadd.f32 %v10694_v0, %v6412_v30  ;;  %v4621_v11 = vadd.f32 %v4533_v62, %v4024_v26  ;;  %v6558_v58 = vmax.f32 %v6486_v46, 0.0  ;;  %v6411_v48 = vadd.f32 %v10987_v18, %v5814_v33  ;;  %v6334_v18 = vpop.f32.mrf.mxu2  ;;  %v5143_v16 = vpop.f32.mrf.mxu0  ;;  %v11905_v30 = vld [vmem:[#allocation154_spill] sm:$0xff] }
 0x941   : > { %v5740_v43 = vpop.f32.mrf.mxu1  ;;  %v3430_v26 = vadd.f32 %v11906_v63, %v11905_v30 }
 0x942   : > { %v6560_v52 = vmax.f32 %v6488_v57, 0.0  ;;  %v5219_v61 = vadd.f32 %v5131_v13, %v4621_v11  ;;  %v6487_v41 = vadd.f32 %v10694_v0, %v6411_v48  ;;  %v11907_v57 = vld [vmem:[#allocation397_spill] sm:$0xff] }
 0x943   : > { %v11908_v11 = vld [vmem:[#allocation313_spill] sm:$0xff]  ;;  %v4027_v53 = vadd.f32 %v11909_v1, %v3430_v26 }
 0x944   : > { %v6599_v42 = vmax.f32 %v6557_v31, %v6560_v52  ;;  %v5816_v5 = vadd.f32 %v5728_v22, %v5219_v61  ;;  %v6559_v13 = vmax.f32 %v6487_v41, 0.0 }
 0x946   : > { %6636 = vst.msk [vmem:[#allocation3 + $0xf0] sm:$0xff] %vm6605_vm3, %v6599_v42  ;;  %v6413_v14 = vadd.f32 %v6325_v50, %v5816_v5  ;;  %v11911_v42 = vld [vmem:[#allocation158_spill] sm:$0xff]  ;;  %v11912_v5 = vld [vmem:[#allocation309_spill] sm:$0xff] }
 0x947   : > { %v4536_v21 = vpop.f32.mrf.mxu3  ;;  %v3431_v46 = vadd.f32 %v11912_v5, %v11911_v42 }
 0x948   : > { %v6489_v28 = vadd.f32 %v10694_v0, %v6413_v14  ;;  %v4622_v39 = vadd.f32 %v4536_v21, %v4025_v55  ;;  %v6337_v23 = vpop.f32.mrf.mxu2  ;;  %v5146_v54 = vpop.f32.mrf.mxu0  ;;  %v11913_v55 = vld [vmem:[#allocation398_spill] sm:$0xff]  ;;  %v11914_v21 = vld [vmem:[#allocation317_spill] sm:$0xff] }
 0x949   : > { %v5743_v52 = vpop.f32.mrf.mxu1 }
 0x94a   : > { %v6561_v3 = vmax.f32 %v6489_v28, 0.0  ;;  %v5220_v40 = vadd.f32 %v5134_v45, %v4622_v39  ;;  %v3432_v45 = vadd.f32 %v11908_v11, %v11907_v57  ;;  %v3433_v28 = vadd.f32 %v11914_v21, %v11913_v55 }
 0x94c   : > { %v6600_v2 = vmax.f32 %v6558_v58, %v6561_v3  ;;  %v5817_v59 = vadd.f32 %v5731_v27, %v5220_v40  ;;  %v4029_v15 = vadd.f32 %v11910_v47, %v3432_v45  ;;  %v11915_v58 = vld [vmem:[#allocation258_spill] sm:$0xff] }
 0x94d   : > { %v4028_v48 = vadd.f32 %v11915_v58, %v3431_v46 }
 0x94e   : > { %6637 = vst.msk [vmem:[#allocation3 + $0xf8] sm:$0xff] %vm6605_vm3, %v6600_v2  ;;  %v6414_v6 = vadd.f32 %v6328_v20, %v5817_v59 }
 0x94f   : > { %v4539_v22 = vpop.f32.mrf.mxu3 }
 0x950   : > { %v6490_v4 = vadd.f32 %v10694_v0, %v6414_v6  ;;  %v11904_v0 = vld [vmem:[#allocation252_spill] sm:$0xff]  ;;  %v6340_v14 = vpop.f32.mrf.mxu2  ;;  %v11916_v6 = vld [vmem:[#allocation263_spill] sm:$0xff] }
 0x951   : > { %v4026_v44 = vadd.f32 %v11904_v0, %v3429_v38 }
 0x952   : > { %v6562_v34 = vmax.f32 %v6490_v4, 0.0  ;;  %v5149_v4 = vpop.f32.mrf.mxu0 }
 0x953   : > { %v4623_v36 = vadd.f32 %v4539_v22, %v4026_v44  ;;  %v4030_v22 = vadd.f32 %v11916_v6, %v3433_v28 }
 0x954   : > { %v6601_v50 = vmax.f32 %v6559_v13, %v6562_v34 }
 0x955   : > { %v6682_v35 = vld [vmem:[#allocation3 + $0xf0] ss:$2 sm:$0xff]  ;;  %v6730_v8 = vld [vmem:[#allocation3 + $0xf1] ss:$2 sm:$0xff]  ;;  %v5221_v62 = vadd.f32 %v5137_v12, %v4623_v36 }
 0x956   : > { %v6757_v24 = vmax.f32 %v6682_v35, %v6730_v8  ;;  %6638 = vst.msk [vmem:[#allocation3 + $0x100] sm:$0xff] %vm6605_vm3, %v6601_v50  ;;  %v11917_v50 = vld [vmem:[#allocation171_spill] sm:$0xff]  ;;  %v5746_v8 = vpop.f32.mrf.mxu1  ;;  %v11919_v36 = vld [vmem:[#allocation266_spill] sm:$0xff] }
 0x957   : > { %v4542_v9 = vpop.f32.mrf.mxu3  ;;  %v5818_v20 = vadd.f32 %v5734_v17, %v5221_v62  ;;  %v7655_v17 = vld [vmem:[%s11066_s4] ss:$0 sm:$0xff] }
 0x958   : > { %v6781_v56 = vpack.c.bf16 %v6757_v24, %v6757_v24  ;;  %v4624_v31 = vadd.f32 %v4542_v9, %v4027_v53 }
 0x959   : > { %v6415_v19 = vadd.f32 %v6331_v25, %v5818_v20 }
 0x95a   : > { %6807 = vst.msk [vmem:[%s10369_s17 + $0x50] sm:$0xf] %vm6785_vm4, %v6781_v56  ;;  %v5222_v39 = vadd.f32 %v5140_v7, %v4624_v31  ;;  %v11918_v7 = vld [vmem:[#allocation321_spill] sm:$0xff]  ;;  %v6343_v56 = vpop.f32.mrf.mxu2  ;;  %v5152_v26 = vpop.f32.mrf.mxu0 }
 0x95b   : > { %v6491_v40 = vadd.f32 %v7655_v17, %v6415_v19  ;;  %v3434_v35 = vadd.f32 %v11918_v7, %v11917_v50 }
 0x95c   : > { %v5819_v2 = vadd.f32 %v5737_v51, %v5222_v39 }
 0x95d   : > { %v6684_v10 = vld [vmem:[#allocation3 + $0x100] ss:$2 sm:$0xf]  ;;  %v6732_v49 = vld [vmem:[#allocation3 + $0x101] ss:$2 sm:$0xf] }
 0x95e   : > { %v6758_v32 = vmax.f32 %v6684_v10, %v6732_v49  ;;  %v6563_v24 = vmax.f32 %v6491_v40, 0.0  ;;  %v6416_v60 = vadd.f32 %v6334_v18, %v5819_v2  ;;  %v5749_v57 = vpop.f32.mrf.mxu1 }
 0x95f   : > { %v4545_v37 = vpop.f32.mrf.mxu3 }
 0x960   : > { %v6782_v27 = vpack.c.bf16 %v6758_v32, %v6758_v32  ;;  %v4625_v59 = vadd.f32 %v4545_v37, %v4028_v48  ;;  %v6492_v44 = vadd.f32 %v7655_v17, %v6416_v60  ;;  %v4031_v32 = vadd.f32 %v11919_v36, %v3434_v35 }
 0x962   : > { %6808 = vst.msk [vmem:[%s10369_s17 + $0x54] sm:$0x3] %vm6787_vm5, %v6782_v27  ;;  %v5223_v29 = vadd.f32 %v5143_v16, %v4625_v59  ;;  %v6564_v27 = vmax.f32 %v6492_v44, 0.0  ;;  %v6346_v1 = vpop.f32.mrf.mxu2 }
 0x964   : > { %v5820_v10 = vadd.f32 %v5740_v43, %v5223_v29 }
 0x966   : > { %v6417_v62 = vadd.f32 %v6337_v23, %v5820_v10 }
 0x967   : > { %v4548_v61 = vpop.f32.mrf.mxu3 }
 0x968   : > { %v4626_v33 = vadd.f32 %v4548_v61, %v4029_v15  ;;  %v6493_v53 = vadd.f32 %v7655_v17, %v6417_v62 }
 0x96a   : > { %v5224_v12 = vadd.f32 %v5146_v54, %v4626_v33  ;;  %v6565_v20 = vmax.f32 %v6493_v53, 0.0 }
 0x96c   : > { %v5821_v3 = vadd.f32 %v5743_v52, %v5224_v12 }
 0x96e   : > { %v6418_v41 = vadd.f32 %v6340_v14, %v5821_v3 }
 0x96f   : > { %v4551_v25 = vpop.f32.mrf.mxu3 }
 0x970   : > { %v6494_v13 = vadd.f32 %v7655_v17, %v6418_v41  ;;  %v4627_v34 = vadd.f32 %v4551_v25, %v4030_v22 }
 0x972   : > { %v6566_v38 = vmax.f32 %v6494_v13, 0.0  ;;  %v5225_v9 = vadd.f32 %v5149_v4, %v4627_v34 }
 0x974   : > { %v6602_v0 = vmax.f32 %v6563_v24, %v6566_v38  ;;  %v5822_v51 = vadd.f32 %v5746_v8, %v5225_v9 }
 0x976   : > { %6639 = vst.msk [vmem:[#allocation3 + $0x108] sm:$0xff] %vm6605_vm3, %v6602_v0  ;;  %v6419_v49 = vadd.f32 %v6343_v56, %v5822_v51 }
 0x977   : > { %v4554_v37 = vpop.f32.mrf.mxu3 }
 0x978   : > { %v6495_v30 = vadd.f32 %v7655_v17, %v6419_v49  ;;  %v4628_v63 = vadd.f32 %v4554_v37, %v4031_v32 }
 0x97a   : > { %v6567_v18 = vmax.f32 %v6495_v30, 0.0  ;;  %v5226_v16 = vadd.f32 %v5152_v26, %v4628_v63 }
 0x97c   : > { %v6603_v11 = vmax.f32 %v6564_v27, %v6567_v18  ;;  %v5823_v45 = vadd.f32 %v5749_v57, %v5226_v16 }
 0x97e   : > { %6640 = vst.msk [vmem:[#allocation3 + $0x110] sm:$0xff] %vm6605_vm3, %v6603_v11  ;;  %v6420_v43 = vadd.f32 %v6346_v1, %v5823_v45 }
 0x980   : > { %v6496_v54 = vadd.f32 %v7655_v17, %v6420_v43 }
 0x982   : > { %v6568_v31 = vmax.f32 %v6496_v54, 0.0 }
 0x984   : > { %v6604_v47 = vmax.f32 %v6565_v20, %v6568_v31 }
 0x985   : > { %v6686_v15 = vld [vmem:[#allocation3 + $0x108] ss:$2 sm:$0xff]  ;;  %v6734_v52 = vld [vmem:[#allocation3 + $0x109] ss:$2 sm:$0xff] }
 0x986   : > { %v6759_v61 = vmax.f32 %v6686_v15, %v6734_v52  ;;  %6641 = vst.msk [vmem:[#allocation3 + $0x118] sm:$0xff] %vm6605_vm3, %v6604_v47 }
 0x988   : > { %v6783_v23 = vpack.c.bf16 %v6759_v61, %v6759_v61 }
 0x98a   : > { %6809 = vst.msk [vmem:[%s10369_s17 + $0x58] sm:$0xf] %vm6785_vm4, %v6783_v23 }
 0x98d   : > { %v6688_v42 = vld [vmem:[#allocation3 + $0x118] ss:$2 sm:$0xf]  ;;  %v6736_v5 = vld [vmem:[#allocation3 + $0x119] ss:$2 sm:$0xf] }
 0x98e   : > { %v6760_v46 = vmax.f32 %v6688_v42, %v6736_v5 }
 0x990   : > { %v6784_v33 = vpack.c.bf16 %v6760_v46, %v6760_v46 }
 0x992   : > { %6810 = vst.msk [vmem:[%s10369_s17 + $0x5c] sm:$0x3] %vm6787_vm5, %v6784_v33 }
 0x993 PF: > { %s15_s18 = sadd.s32 1, %s7662_s18  }
 0x994   : > { %p12_p4 = scmp.ge.s32.totalorder %s15_s18, 4  }
 0x996   :  { %14 = sbr.rel (!%p12_p4) target bundleno = 1 (0x1), region = 119 }

</bundles_post_ra>
